<compile_context>
chip_gen: v5e
topology: v5e:2x2
jax: 0.10.0
libtpu: 0.0.40
codegen_flags: <defaults>
</compile_context>

<pallas_src>
import jax
import jax.numpy as jnp
from jax.experimental import pallas as pl
from jax.experimental.pallas import tpu as pltpu

NEG_SLOPE = 0.01   # torch.nn.LeakyReLU default
IN_DIM = 6
IN_PAD = 8         # feature dim padded 6 -> 8 (zero-filled), layout friendly
OUT_DIM = 384


def _leaky_relu(x):
    return jnp.where(x > 0, x, NEG_SLOPE * x)


def _round_up(n, m):
    return ((n + m - 1) // m) * m


def regressor_kernel(x_ref,
                     w1_ref, b1_ref,
                     w2_ref, b2_ref,
                     w3_ref, b3_ref,
                     w4_ref, b4_ref,
                     o_ref):
    """One (TM, 8) batch tile through the 4-layer MLP; f32 accumulation."""
    h = x_ref[...]  # already bf16 (wrapper fuses pad + cast)

    # Layer 1: Linear(8 [pad of 6] -> l1) + LeakyReLU (Dropout = identity, eval)
    # NOTE: K=8 under-fills the MXU; it is ~0.3% of the FLOPs so the simple MXU
    # path is kept (a VPU broadcast-FMA variant is possible but not worth it).
    h = jnp.dot(h, w1_ref[...], preferred_element_type=jnp.float32) + b1_ref[...]
    h = _leaky_relu(h)
    # TODO(synk): train-mode Dropout(p=pd) omitted (eval-mode identity); add a
    # pltpu.prng_seed / pltpu.prng_random_bits mask for train-mode parity.

    # Layer 2: Linear(l1 -> l2) + LeakyReLU (Dropout = identity, eval)
    h = jnp.dot(h.astype(jnp.bfloat16), w2_ref[...],
                preferred_element_type=jnp.float32) + b2_ref[...]
    h = _leaky_relu(h)

    # Layer 3: Linear(l2 -> l3) + LeakyReLU
    h = jnp.dot(h.astype(jnp.bfloat16), w3_ref[...],
                preferred_element_type=jnp.float32) + b3_ref[...]
    h = _leaky_relu(h)

    # Layer 4: Linear(l3 -> 384)
    out = jnp.dot(h.astype(jnp.bfloat16), w4_ref[...],
                  preferred_element_type=jnp.float32) + b4_ref[...]

    o_ref[...] = out.astype(o_ref.dtype)


def init_params(key, l1=128, l2=256, l3=512, in_dim=IN_DIM, out_dim=OUT_DIM,
                dtype=jnp.float32):
    """Init mimicking torch.nn.Linear default (uniform +/- 1/sqrt(fan_in)).

    Weights are stored transposed relative to PyTorch: shape (in, out).
    Biases are stored as (1, out) so they stay 2-D inside the kernel.
    """
    dims = [(in_dim, l1), (l1, l2), (l2, l3), (l3, out_dim)]
    params = []
    for (fan_in, fan_out) in dims:
        key, kw, kb = jax.random.split(key, 3)
        bound = 1.0 / jnp.sqrt(float(fan_in))
        w = jax.random.uniform(kw, (fan_in, fan_out), dtype, -bound, bound)
        b = jax.random.uniform(kb, (1, fan_out), dtype, -bound, bound)
        params.append((w, b))
    return params


def prepare_params(params):
    """One-time conversion for the kernel: pad W1 rows 6->8 (zero rows are
    exact), cast weights to bf16 and biases to f32. Call this once, outside
    the per-forward path, so no HBM casts happen per invocation."""
    flat = []
    for li, (w, b) in enumerate(params):
        fan_in, fan_out = w.shape
        if li == 0 and fan_in != IN_PAD:
            w = jnp.zeros((IN_PAD, fan_out), w.dtype).at[:fan_in, :].set(w)
        flat.append(jnp.asarray(w, jnp.bfloat16))
        flat.append(jnp.asarray(b, jnp.float32).reshape(1, fan_out))
    return tuple(flat)


def _choose_tiling(B, block_m):
    """Pick (tm, n_tiles, Bp) s.t. tail padding is small and, for B > 16, the
    grid has >= 2 steps so the 'parallel' batch axis can use both v7x TCs."""
    min_tiles = 2 if B > 16 else 1
    n_tiles = max(min_tiles, pl.cdiv(B, block_m))
    tm = _round_up(pl.cdiv(B, n_tiles), 16)   # bf16-friendly sublane multiple
    Bp = tm * n_tiles
    return tm, n_tiles, Bp


def regressor_forward(x, flat_params, *, block_m=512, out_dtype=jnp.float32):
    """x: (B, 6) float; flat_params from prepare_params(). Returns (B, 384)."""
    B, in_dim = x.shape
    assert in_dim == IN_DIM, in_dim
    tm, n_tiles, Bp = _choose_tiling(B, block_m)

    # Single fused pad + cast copy: (B, 6) f32 -> (Bp, 8) bf16.
    xp = jnp.zeros((Bp, IN_PAD), jnp.bfloat16).at[:B, :IN_DIM].set(
        x.astype(jnp.bfloat16))

    dims = [flat_params[2 * i].shape for i in range(4)]   # (fan_in, fan_out)
    out_itemsize = jnp.dtype(out_dtype).itemsize

    # Advisory cost estimate for XLA scheduling around the custom call.
    flops = 2 * Bp * sum(fi * fo for fi, fo in dims)
    w_bytes = sum(fi * fo * 2 + fo * 4 for fi, fo in dims)   # bf16 W + f32 b
    bytes_accessed = Bp * IN_PAD * 2 + w_bytes + Bp * OUT_DIM * out_itemsize
    cost = pl.CostEstimate(flops=flops, transcendentals=0,
                           bytes_accessed=bytes_accessed)

    # Per-grid-step VMEM footprint estimate; only override the scoped-VMEM
    # limit when big tiles (block_m >= 1024) would exceed v5e's 16 MiB default.
    vmem_est = (2 * tm * IN_PAD * 2                      # x tile, double-buffered
                + 2 * tm * OUT_DIM * out_itemsize        # out tile, double-buffered
                + w_bytes                                # resident weights/biases
                + tm * (128 + 256 + 512 + 384) * 4)      # f32 intermediates
    vmem_limit = int(vmem_est * 1.5) if vmem_est > 12 * 1024 * 1024 else None

    def _run(single_buffer_weights):
        in_specs = [pl.BlockSpec((tm, IN_PAD), lambda i: (i, 0))]
        for li in range(4):
            w = flat_params[2 * li]
            b = flat_params[2 * li + 1]
            kw = {}
            if single_buffer_weights:
                # Constant index_map -> weights stay VMEM-resident; double
                # buffering them is pure waste.
                kw["pipeline_mode"] = pl.Buffered(1)
            in_specs.append(pl.BlockSpec(w.shape, lambda i: (0, 0), **kw))
            in_specs.append(pl.BlockSpec(b.shape, lambda i: (0, 0), **kw))

        cp_kwargs = dict(dimension_semantics=("parallel",))
        if vmem_limit is not None:
            cp_kwargs["vmem_limit_bytes"] = vmem_limit

        return pl.pallas_call(
            regressor_kernel,
            out_shape=jax.ShapeDtypeStruct((Bp, OUT_DIM), out_dtype),
            grid=(n_tiles,),
            in_specs=in_specs,
            out_specs=pl.BlockSpec((tm, OUT_DIM), lambda i: (i, 0)),
            compiler_params=pltpu.CompilerParams(**cp_kwargs),
            cost_estimate=cost,
        )(xp, *flat_params)

    try:
        out = _run(single_buffer_weights=True)
    except Exception:
        # pipeline_mode=pl.Buffered(1) not accepted by this JAX build; fall
        # back to default double-buffering of the (small) resident weights.
        out = _run(single_buffer_weights=False)

    return out if Bp == B else out[:B]


def regressor_reference(x, params):
    """Pure-JAX reference using the same bf16-in / f32-accumulate recipe."""
    h = x.astype(jnp.float32)
    for i, (w, b) in enumerate(params):
        h = jnp.dot(h.astype(jnp.bfloat16), w.astype(jnp.bfloat16),
                    preferred_element_type=jnp.float32) + b.astype(jnp.float32)
        if i < 3:
            h = _leaky_relu(h)
    return h


if __name__ == "__main__":
    key = jax.random.PRNGKey(0)
    key, kx = jax.random.split(key)

    B = 300  # exercises tiling: n_tiles=2, tm=160, Bp=320 (small tail padding)
    x = jax.random.normal(kx, (B, IN_DIM), dtype=jnp.float32)

    params = init_params(key)
    flat_params = prepare_params(params)   # one-time pad + bf16/f32 cast

    out = regressor_forward(x, flat_params)
    out = jax.block_until_ready(out)

    ref = regressor_reference(x, params)
    assert out.shape == (B, OUT_DIM), out.shape
    assert jnp.allclose(out, ref, atol=2e-2, rtol=2e-2), "mismatch vs reference"

    print("KERNEL_OK")
</pallas_src>

<mosaic_0001>
module attributes {stable_mosaic.version = 11 : i64} {
  func.func @regressor_kernel(%arg0: i32, %arg1: memref<160x8xbf16, #tpu.memory_space<vmem>>, %arg2: memref<8x128xbf16, #tpu.memory_space<vmem>>, %arg3: memref<1x128xf32, #tpu.memory_space<vmem>>, %arg4: memref<128x256xbf16, #tpu.memory_space<vmem>>, %arg5: memref<1x256xf32, #tpu.memory_space<vmem>>, %arg6: memref<256x512xbf16, #tpu.memory_space<vmem>>, %arg7: memref<1x512xf32, #tpu.memory_space<vmem>>, %arg8: memref<512x384xbf16, #tpu.memory_space<vmem>>, %arg9: memref<1x384xf32, #tpu.memory_space<vmem>>, %arg10: memref<160x384xf32, #tpu.memory_space<vmem>>) attributes {dimension_semantics = [#tpu.dimension_semantics<parallel>], iteration_bounds = array<i64: 2>, scalar_prefetch = 0 : i64, scratch_operands = 0 : i64, tpu.core_type = #tpu.core_type<tc>, window_params = [{transform_indices = @transform_0, window_bounds = array<i64: 160, 8>}, {pipeline_mode = #tpu.pipeline_mode<synchronous>, transform_indices = @transform_1, window_bounds = array<i64: 8, 128>}, {pipeline_mode = #tpu.pipeline_mode<synchronous>, transform_indices = @transform_2, window_bounds = array<i64: 1, 128>}, {pipeline_mode = #tpu.pipeline_mode<synchronous>, transform_indices = @transform_3, window_bounds = array<i64: 128, 256>}, {pipeline_mode = #tpu.pipeline_mode<synchronous>, transform_indices = @transform_4, window_bounds = array<i64: 1, 256>}, {pipeline_mode = #tpu.pipeline_mode<synchronous>, transform_indices = @transform_5, window_bounds = array<i64: 256, 512>}, {pipeline_mode = #tpu.pipeline_mode<synchronous>, transform_indices = @transform_6, window_bounds = array<i64: 1, 512>}, {pipeline_mode = #tpu.pipeline_mode<synchronous>, transform_indices = @transform_7, window_bounds = array<i64: 512, 384>}, {pipeline_mode = #tpu.pipeline_mode<synchronous>, transform_indices = @transform_8, window_bounds = array<i64: 1, 384>}, {transform_indices = @transform_9, window_bounds = array<i64: 160, 384>}]} {
    %c0 = arith.constant 0 : index
    %c0_0 = arith.constant 0 : index
    %0 = vector.load %arg1[%c0, %c0_0] : memref<160x8xbf16, #tpu.memory_space<vmem>>, vector<160x8xbf16>
    %c0_1 = arith.constant 0 : index
    %c0_2 = arith.constant 0 : index
    %1 = vector.load %arg2[%c0_1, %c0_2] : memref<8x128xbf16, #tpu.memory_space<vmem>>, vector<8x128xbf16>
    %cst = arith.constant dense<0.000000e+00> : vector<160x128xf32>
    %2 = tpu.matmul %0, %1, %cst {dimension_numbers = #tpu.dot_dimension_numbers<[1], [0], [0], [1], [0, 0, 1, 1], [], []>} : vector<160x8xbf16>, vector<8x128xbf16>, vector<160x128xf32> -> vector<160x128xf32>
    %c0_3 = arith.constant 0 : index
    %c0_4 = arith.constant 0 : index
    %3 = vector.load %arg3[%c0_3, %c0_4] : memref<1x128xf32, #tpu.memory_space<vmem>>, vector<1x128xf32>
    %4 = vector.broadcast %3 : vector<1x128xf32> to vector<160x128xf32>
    %5 = arith.addf %2, %4 : vector<160x128xf32>
    %cst_5 = arith.constant 0.000000e+00 : f32
    %6 = vector.broadcast %cst_5 : f32 to vector<160x128xf32>
    %7 = arith.cmpf ogt, %5, %6 : vector<160x128xf32>
    %cst_6 = arith.constant 0.00999999977 : f32
    %8 = vector.broadcast %cst_6 : f32 to vector<160x128xf32>
    %9 = arith.mulf %8, %5 : vector<160x128xf32>
    %10 = arith.select %7, %5, %9 : vector<160x128xi1>, vector<160x128xf32>
    %11 = arith.truncf %10 : vector<160x128xf32> to vector<160x128xbf16>
    %c0_7 = arith.constant 0 : index
    %c0_8 = arith.constant 0 : index
    %12 = vector.load %arg4[%c0_7, %c0_8] : memref<128x256xbf16, #tpu.memory_space<vmem>>, vector<128x256xbf16>
    %cst_9 = arith.constant dense<0.000000e+00> : vector<160x256xf32>
    %13 = tpu.matmul %11, %12, %cst_9 {dimension_numbers = #tpu.dot_dimension_numbers<[1], [0], [0], [1], [0, 0, 1, 1], [], []>} : vector<160x128xbf16>, vector<128x256xbf16>, vector<160x256xf32> -> vector<160x256xf32>
    %c0_10 = arith.constant 0 : index
    %c0_11 = arith.constant 0 : index
    %14 = vector.load %arg5[%c0_10, %c0_11] : memref<1x256xf32, #tpu.memory_space<vmem>>, vector<1x256xf32>
    %15 = vector.broadcast %14 : vector<1x256xf32> to vector<160x256xf32>
    %16 = arith.addf %13, %15 : vector<160x256xf32>
    %cst_12 = arith.constant 0.000000e+00 : f32
    %17 = vector.broadcast %cst_12 : f32 to vector<160x256xf32>
    %18 = arith.cmpf ogt, %16, %17 : vector<160x256xf32>
    %cst_13 = arith.constant 0.00999999977 : f32
    %19 = vector.broadcast %cst_13 : f32 to vector<160x256xf32>
    %20 = arith.mulf %19, %16 : vector<160x256xf32>
    %21 = arith.select %18, %16, %20 : vector<160x256xi1>, vector<160x256xf32>
    %22 = arith.truncf %21 : vector<160x256xf32> to vector<160x256xbf16>
    %c0_14 = arith.constant 0 : index
    %c0_15 = arith.constant 0 : index
    %23 = vector.load %arg6[%c0_14, %c0_15] : memref<256x512xbf16, #tpu.memory_space<vmem>>, vector<256x512xbf16>
    %cst_16 = arith.constant dense<0.000000e+00> : vector<160x512xf32>
    %24 = tpu.matmul %22, %23, %cst_16 {dimension_numbers = #tpu.dot_dimension_numbers<[1], [0], [0], [1], [0, 0, 1, 1], [], []>} : vector<160x256xbf16>, vector<256x512xbf16>, vector<160x512xf32> -> vector<160x512xf32>
    %c0_17 = arith.constant 0 : index
    %c0_18 = arith.constant 0 : index
    %25 = vector.load %arg7[%c0_17, %c0_18] : memref<1x512xf32, #tpu.memory_space<vmem>>, vector<1x512xf32>
    %26 = vector.broadcast %25 : vector<1x512xf32> to vector<160x512xf32>
    %27 = arith.addf %24, %26 : vector<160x512xf32>
    %cst_19 = arith.constant 0.000000e+00 : f32
    %28 = vector.broadcast %cst_19 : f32 to vector<160x512xf32>
    %29 = arith.cmpf ogt, %27, %28 : vector<160x512xf32>
    %cst_20 = arith.constant 0.00999999977 : f32
    %30 = vector.broadcast %cst_20 : f32 to vector<160x512xf32>
    %31 = arith.mulf %30, %27 : vector<160x512xf32>
    %32 = arith.select %29, %27, %31 : vector<160x512xi1>, vector<160x512xf32>
    %33 = arith.truncf %32 : vector<160x512xf32> to vector<160x512xbf16>
    %c0_21 = arith.constant 0 : index
    %c0_22 = arith.constant 0 : index
    %34 = vector.load %arg8[%c0_21, %c0_22] : memref<512x384xbf16, #tpu.memory_space<vmem>>, vector<512x384xbf16>
    %cst_23 = arith.constant dense<0.000000e+00> : vector<160x384xf32>
    %35 = tpu.matmul %33, %34, %cst_23 {dimension_numbers = #tpu.dot_dimension_numbers<[1], [0], [0], [1], [0, 0, 1, 1], [], []>} : vector<160x512xbf16>, vector<512x384xbf16>, vector<160x384xf32> -> vector<160x384xf32>
    %c0_24 = arith.constant 0 : index
    %c0_25 = arith.constant 0 : index
    %36 = vector.load %arg9[%c0_24, %c0_25] : memref<1x384xf32, #tpu.memory_space<vmem>>, vector<1x384xf32>
    %37 = vector.broadcast %36 : vector<1x384xf32> to vector<160x384xf32>
    %38 = arith.addf %35, %37 : vector<160x384xf32>
    %c0_26 = arith.constant 0 : index
    %c0_27 = arith.constant 0 : index
    %39 = vector.load %arg10[%c0_26, %c0_27] : memref<160x384xf32, #tpu.memory_space<vmem>>, vector<160x384xf32>
    tpu.vector_store %arg10[%c0_26, %c0_27], %38 {strides = array<i32>} : memref<160x384xf32, #tpu.memory_space<vmem>>, vector<160x384xf32>,
    return
  }
  func.func @transform_0(%arg0: i32) -> (i32, i32) {
    %c0_i32 = arith.constant 0 : i32
    %c0_i32_0 = arith.constant 0 : i32
    return %arg0, %c0_i32 : i32, i32
  }
  func.func @transform_1(%arg0: i32) -> (i32, i32) {
    %c0_i32 = arith.constant 0 : i32
    %c0_i32_0 = arith.constant 0 : i32
    %c0_i32_1 = arith.constant 0 : i32
    return %c0_i32, %c0_i32_0 : i32, i32
  }
  func.func @transform_2(%arg0: i32) -> (i32, i32) {
    %c0_i32 = arith.constant 0 : i32
    %c0_i32_0 = arith.constant 0 : i32
    %c0_i32_1 = arith.constant 0 : i32
    return %c0_i32, %c0_i32_0 : i32, i32
  }
  func.func @transform_3(%arg0: i32) -> (i32, i32) {
    %c0_i32 = arith.constant 0 : i32
    %c0_i32_0 = arith.constant 0 : i32
    %c0_i32_1 = arith.constant 0 : i32
    return %c0_i32, %c0_i32_0 : i32, i32
  }
  func.func @transform_4(%arg0: i32) -> (i32, i32) {
    %c0_i32 = arith.constant 0 : i32
    %c0_i32_0 = arith.constant 0 : i32
    %c0_i32_1 = arith.constant 0 : i32
    return %c0_i32, %c0_i32_0 : i32, i32
  }
  func.func @transform_5(%arg0: i32) -> (i32, i32) {
    %c0_i32 = arith.constant 0 : i32
    %c0_i32_0 = arith.constant 0 : i32
    %c0_i32_1 = arith.constant 0 : i32
    return %c0_i32, %c0_i32_0 : i32, i32
  }
  func.func @transform_6(%arg0: i32) -> (i32, i32) {
    %c0_i32 = arith.constant 0 : i32
    %c0_i32_0 = arith.constant 0 : i32
    %c0_i32_1 = arith.constant 0 : i32
    return %c0_i32, %c0_i32_0 : i32, i32
  }
  func.func @transform_7(%arg0: i32) -> (i32, i32) {
    %c0_i32 = arith.constant 0 : i32
    %c0_i32_0 = arith.constant 0 : i32
    %c0_i32_1 = arith.constant 0 : i32
    return %c0_i32, %c0_i32_0 : i32, i32
  }
  func.func @transform_8(%arg0: i32) -> (i32, i32) {
    %c0_i32 = arith.constant 0 : i32
    %c0_i32_0 = arith.constant 0 : i32
    %c0_i32_1 = arith.constant 0 : i32
    return %c0_i32, %c0_i32_0 : i32, i32
  }
  func.func @transform_9(%arg0: i32) -> (i32, i32) {
    %c0_i32 = arith.constant 0 : i32
    %c0_i32_0 = arith.constant 0 : i32
    return %arg0, %c0_i32 : i32, i32
  }
}

module attributes {stable_mosaic.version = 11 : i64} {
  func.func @regressor_kernel(%arg0: i32, %arg1: memref<160x8xbf16, #tpu.memory_space<vmem>>, %arg2: memref<8x128xbf16, #tpu.memory_space<vmem>>, %arg3: memref<1x128xf32, #tpu.memory_space<vmem>>, %arg4: memref<128x256xbf16, #tpu.memory_space<vmem>>, %arg5: memref<1x256xf32, #tpu.memory_space<vmem>>, %arg6: memref<256x512xbf16, #tpu.memory_space<vmem>>, %arg7: memref<1x512xf32, #tpu.memory_space<vmem>>, %arg8: memref<512x384xbf16, #tpu.memory_space<vmem>>, %arg9: memref<1x384xf32, #tpu.memory_space<vmem>>, %arg10: memref<160x384xf32, #tpu.memory_space<vmem>>) attributes {dimension_semantics = [#tpu.dimension_semantics<parallel>], iteration_bounds = array<i64: 2>, scalar_prefetch = 0 : i64, scratch_operands = 0 : i64, tpu.core_type = #tpu.core_type<tc>, window_params = [{transform_indices = @transform_0, window_bounds = array<i64: 160, 8>}, {pipeline_mode = #tpu.pipeline_mode<synchronous>, transform_indices = @transform_1, window_bounds = array<i64: 8, 128>}, {pipeline_mode = #tpu.pipeline_mode<synchronous>, transform_indices = @transform_2, window_bounds = array<i64: 1, 128>}, {pipeline_mode = #tpu.pipeline_mode<synchronous>, transform_indices = @transform_3, window_bounds = array<i64: 128, 256>}, {pipeline_mode = #tpu.pipeline_mode<synchronous>, transform_indices = @transform_4, window_bounds = array<i64: 1, 256>}, {pipeline_mode = #tpu.pipeline_mode<synchronous>, transform_indices = @transform_5, window_bounds = array<i64: 256, 512>}, {pipeline_mode = #tpu.pipeline_mode<synchronous>, transform_indices = @transform_6, window_bounds = array<i64: 1, 512>}, {pipeline_mode = #tpu.pipeline_mode<synchronous>, transform_indices = @transform_7, window_bounds = array<i64: 512, 384>}, {pipeline_mode = #tpu.pipeline_mode<synchronous>, transform_indices = @transform_8, window_bounds = array<i64: 1, 384>}, {transform_indices = @transform_9, window_bounds = array<i64: 160, 384>}]} {
    %c0 = arith.constant 0 : index
    %c0_0 = arith.constant 0 : index
    %0 = vector.load %arg1[%c0, %c0_0] : memref<160x8xbf16, #tpu.memory_space<vmem>>, vector<160x8xbf16>
    %c0_1 = arith.constant 0 : index
    %c0_2 = arith.constant 0 : index
    %1 = vector.load %arg2[%c0_1, %c0_2] : memref<8x128xbf16, #tpu.memory_space<vmem>>, vector<8x128xbf16>
    %cst = arith.constant dense<0.000000e+00> : vector<160x128xf32>
    %2 = tpu.matmul %0, %1, %cst {dimension_numbers = #tpu.dot_dimension_numbers<[1], [0], [0], [1], [0, 0, 1, 1], [], []>} : vector<160x8xbf16>, vector<8x128xbf16>, vector<160x128xf32> -> vector<160x128xf32>
    %c0_3 = arith.constant 0 : index
    %c0_4 = arith.constant 0 : index
    %3 = vector.load %arg3[%c0_3, %c0_4] : memref<1x128xf32, #tpu.memory_space<vmem>>, vector<1x128xf32>
    %4 = vector.broadcast %3 : vector<1x128xf32> to vector<160x128xf32>
    %5 = arith.addf %2, %4 : vector<160x128xf32>
    %cst_5 = arith.constant 0.000000e+00 : f32
    %6 = vector.broadcast %cst_5 : f32 to vector<160x128xf32>
    %7 = arith.cmpf ogt, %5, %6 : vector<160x128xf32>
    %cst_6 = arith.constant 0.00999999977 : f32
    %8 = vector.broadcast %cst_6 : f32 to vector<160x128xf32>
    %9 = arith.mulf %8, %5 : vector<160x128xf32>
    %10 = arith.select %7, %5, %9 : vector<160x128xi1>, vector<160x128xf32>
    %11 = arith.truncf %10 : vector<160x128xf32> to vector<160x128xbf16>
    %c0_7 = arith.constant 0 : index
    %c0_8 = arith.constant 0 : index
    %12 = vector.load %arg4[%c0_7, %c0_8] : memref<128x256xbf16, #tpu.memory_space<vmem>>, vector<128x256xbf16>
    %cst_9 = arith.constant dense<0.000000e+00> : vector<160x256xf32>
    %13 = tpu.matmul %11, %12, %cst_9 {dimension_numbers = #tpu.dot_dimension_numbers<[1], [0], [0], [1], [0, 0, 1, 1], [], []>} : vector<160x128xbf16>, vector<128x256xbf16>, vector<160x256xf32> -> vector<160x256xf32>
    %c0_10 = arith.constant 0 : index
    %c0_11 = arith.constant 0 : index
    %14 = vector.load %arg5[%c0_10, %c0_11] : memref<1x256xf32, #tpu.memory_space<vmem>>, vector<1x256xf32>
    %15 = vector.broadcast %14 : vector<1x256xf32> to vector<160x256xf32>
    %16 = arith.addf %13, %15 : vector<160x256xf32>
    %cst_12 = arith.constant 0.000000e+00 : f32
    %17 = vector.broadcast %cst_12 : f32 to vector<160x256xf32>
    %18 = arith.cmpf ogt, %16, %17 : vector<160x256xf32>
    %cst_13 = arith.constant 0.00999999977 : f32
    %19 = vector.broadcast %cst_13 : f32 to vector<160x256xf32>
    %20 = arith.mulf %19, %16 : vector<160x256xf32>
    %21 = arith.select %18, %16, %20 : vector<160x256xi1>, vector<160x256xf32>
    %22 = arith.truncf %21 : vector<160x256xf32> to vector<160x256xbf16>
    %c0_14 = arith.constant 0 : index
    %c0_15 = arith.constant 0 : index
    %23 = vector.load %arg6[%c0_14, %c0_15] : memref<256x512xbf16, #tpu.memory_space<vmem>>, vector<256x512xbf16>
    %cst_16 = arith.constant dense<0.000000e+00> : vector<160x512xf32>
    %24 = tpu.matmul %22, %23, %cst_16 {dimension_numbers = #tpu.dot_dimension_numbers<[1], [0], [0], [1], [0, 0, 1, 1], [], []>} : vector<160x256xbf16>, vector<256x512xbf16>, vector<160x512xf32> -> vector<160x512xf32>
    %c0_17 = arith.constant 0 : index
    %c0_18 = arith.constant 0 : index
    %25 = vector.load %arg7[%c0_17, %c0_18] : memref<1x512xf32, #tpu.memory_space<vmem>>, vector<1x512xf32>
    %26 = vector.broadcast %25 : vector<1x512xf32> to vector<160x512xf32>
    %27 = arith.addf %24, %26 : vector<160x512xf32>
    %cst_19 = arith.constant 0.000000e+00 : f32
    %28 = vector.broadcast %cst_19 : f32 to vector<160x512xf32>
    %29 = arith.cmpf ogt, %27, %28 : vector<160x512xf32>
    %cst_20 = arith.constant 0.00999999977 : f32
    %30 = vector.broadcast %cst_20 : f32 to vector<160x512xf32>
    %31 = arith.mulf %30, %27 : vector<160x512xf32>
    %32 = arith.select %29, %27, %31 : vector<160x512xi1>, vector<160x512xf32>
    %33 = arith.truncf %32 : vector<160x512xf32> to vector<160x512xbf16>
    %c0_21 = arith.constant 0 : index
    %c0_22 = arith.constant 0 : index
    %34 = vector.load %arg8[%c0_21, %c0_22] : memref<512x384xbf16, #tpu.memory_space<vmem>>, vector<512x384xbf16>
    %cst_23 = arith.constant dense<0.000000e+00> : vector<160x384xf32>
    %35 = tpu.matmul %33, %34, %cst_23 {dimension_numbers = #tpu.dot_dimension_numbers<[1], [0], [0], [1], [0, 0, 1, 1], [], []>} : vector<160x512xbf16>, vector<512x384xbf16>, vector<160x384xf32> -> vector<160x384xf32>
    %c0_24 = arith.constant 0 : index
    %c0_25 = arith.constant 0 : index
    %36 = vector.load %arg9[%c0_24, %c0_25] : memref<1x384xf32, #tpu.memory_space<vmem>>, vector<1x384xf32>
    %37 = vector.broadcast %36 : vector<1x384xf32> to vector<160x384xf32>
    %38 = arith.addf %35, %37 : vector<160x384xf32>
    %c0_26 = arith.constant 0 : index
    %c0_27 = arith.constant 0 : index
    %39 = vector.load %arg10[%c0_26, %c0_27] : memref<160x384xf32, #tpu.memory_space<vmem>>, vector<160x384xf32>
    tpu.vector_store %arg10[%c0_26, %c0_27], %38 {strides = array<i32>} : memref<160x384xf32, #tpu.memory_space<vmem>>, vector<160x384xf32>,
    return
  }
  func.func @transform_0(%arg0: i32) -> (i32, i32) {
    %c0_i32 = arith.constant 0 : i32
    %c0_i32_0 = arith.constant 0 : i32
    return %arg0, %c0_i32 : i32, i32
  }
  func.func @transform_1(%arg0: i32) -> (i32, i32) {
    %c0_i32 = arith.constant 0 : i32
    %c0_i32_0 = arith.constant 0 : i32
    %c0_i32_1 = arith.constant 0 : i32
    return %c0_i32, %c0_i32_0 : i32, i32
  }
  func.func @transform_2(%arg0: i32) -> (i32, i32) {
    %c0_i32 = arith.constant 0 : i32
    %c0_i32_0 = arith.constant 0 : i32
    %c0_i32_1 = arith.constant 0 : i32
    return %c0_i32, %c0_i32_0 : i32, i32
  }
  func.func @transform_3(%arg0: i32) -> (i32, i32) {
    %c0_i32 = arith.constant 0 : i32
    %c0_i32_0 = arith.constant 0 : i32
    %c0_i32_1 = arith.constant 0 : i32
    return %c0_i32, %c0_i32_0 : i32, i32
  }
  func.func @transform_4(%arg0: i32) -> (i32, i32) {
    %c0_i32 = arith.constant 0 : i32
    %c0_i32_0 = arith.constant 0 : i32
    %c0_i32_1 = arith.constant 0 : i32
    return %c0_i32, %c0_i32_0 : i32, i32
  }
  func.func @transform_5(%arg0: i32) -> (i32, i32) {
    %c0_i32 = arith.constant 0 : i32
    %c0_i32_0 = arith.constant 0 : i32
    %c0_i32_1 = arith.constant 0 : i32
    return %c0_i32, %c0_i32_0 : i32, i32
  }
  func.func @transform_6(%arg0: i32) -> (i32, i32) {
    %c0_i32 = arith.constant 0 : i32
    %c0_i32_0 = arith.constant 0 : i32
    %c0_i32_1 = arith.constant 0 : i32
    return %c0_i32, %c0_i32_0 : i32, i32
  }
  func.func @transform_7(%arg0: i32) -> (i32, i32) {
    %c0_i32 = arith.constant 0 : i32
    %c0_i32_0 = arith.constant 0 : i32
    %c0_i32_1 = arith.constant 0 : i32
    return %c0_i32, %c0_i32_0 : i32, i32
  }
  func.func @transform_8(%arg0: i32) -> (i32, i32) {
    %c0_i32 = arith.constant 0 : i32
    %c0_i32_0 = arith.constant 0 : i32
    %c0_i32_1 = arith.constant 0 : i32
    return %c0_i32, %c0_i32_0 : i32, i32
  }
  func.func @transform_9(%arg0: i32) -> (i32, i32) {
    %c0_i32 = arith.constant 0 : i32
    %c0_i32_0 = arith.constant 0 : i32
    return %arg0, %c0_i32 : i32, i32
  }
}

</mosaic_0001>

<bundles_post_ra>
// kernel: tpu_custom_call.1
= control target key start
LH: loop header
LB: loop body
LE: loop exit
PB: predicated region body
PF: predicated region fallthrough
CT: control target
= control target key end

     0   :  { %s5883_s0 = inlined_call_operand.vmem [shape: bf16[320,8], index: 0, kind: input, shape index: {}]   ;;  %s5884_s1 = inlined_call_operand.vmem [shape: bf16[8,128], index: 1, kind: input, shape index: {}]   ;;  %s5885_s2 = inlined_call_operand.vmem [shape: f32[1,128], index: 2, kind: input, shape index: {}]   ;;  %s5886_s3 = inlined_call_operand.vmem [shape: bf16[128,256], index: 3, kind: input, shape index: {}]   ;;  %s5887_s4 = inlined_call_operand.vmem [shape: f32[1,256], index: 4, kind: input, shape index: {}]   ;;  %s5888_s5 = inlined_call_operand.hbm [shape: bf16[256,512], index: 5, kind: input, shape index: {}]   ;;  %s5889_s6 = inlined_call_operand.vmem [shape: f32[1,512], index: 6, kind: input, shape index: {}]   ;;  %s5890_s7 = inlined_call_operand.hbm [shape: bf16[512,384], index: 7, kind: input, shape index: {}]   ;;  %s5891_s8 = inlined_call_operand.vmem [shape: f32[1,384], index: 8, kind: input, shape index: {}]   ;;  %s5892_s9 = inlined_call_operand.hbm [shape: f32[320,384], index: 9, kind: output, shape index: {}]  }
   0x1   :  { %5903 = sst [smem:[#allocation16_spill]] %s5888_s5 }
   0x2   :  { %14 = vsyncpa [#allocation3], 0 }
   0x3   :  { %15 = vsyncpa [#allocation6], 0 }
   0x4   :  { %16 = vsyncpa [#allocation4], 0 }
   0x5   :  { %18 = vsyncpa [#allocation4 + $0x1], 0  ;;  %s4861_s30 = smov 0   ;;  %s4863_s10 = smov 0  }
   0x6   :  { %s4865_s11 = smov 0   ;;  %s4867_s12 = smov 0  }
   0x7 LB: > { %s4882_s13 = sadd.s32 4294967295, %s4801_s12   ;;  %s3631_s14 = sadd.s32 4294967294, %s4801_s12   ;;  %s4801_s12 = sphi %s4867_s12, %s5921_s12   ;;  %s4797_s11 = sphi %s4865_s11, %s5920_s11   ;;  %s4793_s10 = sphi %s4863_s10, %s5919_s10   ;;  %s4789_s30 = sphi %s4861_s30, %s5918_s30  }
   0x8   : > { %s4886_s15 = sadd.s32 1, %s4801_s12   ;;  %s225_s16 = sadd.s32 1, %s4797_s11 }
   0x9   : > { %s222_s17 = ssub.s32 %s4801_s12, %s4886_s15  ;;  %p235_p0 = scmp.ne.s32.totalorder %s4797_s11, %s4793_s10 }
   0xa   : > { %p223_p1 = scmp.eq.s32.totalorder %s222_s17, 0  ;;  %p236_p2 = scmp.eq.s32.totalorder %s4882_s13, 1 }
   0xb   : > { %p241_p3 = scmp.ne.s32.totalorder %s4793_s10, %s4789_s30  ;;  %p242_p4 = scmp.eq.s32.totalorder %s3631_s14, 1 }
   0xc   : > { %s4897_s18 = scalar_select %p223_p1, %s4797_s11, %s225_s16  }
   0xd   : > { %p4899_p5 = por %p236_p2, %p235_p0  ;;  %p4903_p6 = por %p242_p4, %p241_p3 }
   0xe   : > { %p3632_p7 = scmp.ge.s32.totalorder %s4801_s12, 1  ;;  %p249_p8 = scmp.lt.s32.totalorder %s4801_s12, 3 }
   0xf   : > { %p4622_p9 = scmp.eq.s32.totalorder %s4882_s13, 0  ;;  %s5907_s5 = sld [smem:[#allocation16_spill]] }
  0x10   : > { %p4910_p10 = pnand %p3632_p7, %p249_p8  ;;  %s4803_s25 = smov [#allocation2]  }
  0x11   : > { %s274_s26 = sshll.u32 %s4803_s25, 4  ;;  %s289_s29 = sshll.u32 %s5890_s7, 4  ;;  %s275_s26 = int_to_ptr.vmem [resolvable:$true] %s274_s26  ;;  %s290_s29 = int_to_ptr.hbm [resolvable:$true] %s289_s29 }
  0x12   : > { %p4611_p11 = pneg %p4910_p10  ;;  %s4804_s14 = smov 256  }
  0x13   : > { %s4805_s16 = smov 16   ;;  %s4806_s17 = smov [#allocation5]  }
  0x14   : > { %p4612_p12 = pnand %p4622_p9, %p4611_p11  ;;  %s291_s22 = sshll.u32 %s4806_s17, 4  ;;  %s292_s22 = int_to_ptr.vmem [resolvable:$true] %s291_s22 }
  0x15   : > { %s272_s24 = sshll.u32 %s5907_s5, 4  ;;  %s4807_s23 = smov 192   ;;  %s273_s24 = int_to_ptr.hbm [resolvable:$true] %s272_s24 }
  0x16   : > { %4614 = dma.hbm_to_vmem [thread:$0]  (!%p4612_p12), %s273_s24, 8192, %s275_s26, [#allocation3], %s4804_s14, %s4804_s14, %s4805_s16  }
  0x17   : > { %s4808_s5 = smov 12   ;;  %319 = sbr.rel (%p4910_p10) target bundleno = 1283 (0x503), region = 56 }
  0x18   : > { %4617 = dma.hbm_to_vmem [thread:$0]  (!%p4612_p12), %s290_s29, 12288, %s292_s22, [#allocation6], %s4807_s23, %s4807_s23, %s4808_s5  }
  0x1c   : > { %4776 = dma.done.wait (%p4622_p9), [#allocation3], 8192  }
  0x1d   : > { %4778 = vsyncadd (%p4622_p9), [#allocation3], 4294959104 }
  0x1e   : > { %4780 = dma.done.wait (%p4622_p9), [#allocation6], 12288  }
  0x1f   : > { %4782 = vsyncadd (%p4622_p9), [#allocation6], 4294955008  ;;  %s361_s24 = smul.u32 20, %s4882_s13  ;;  %vm475_vm0 = vcmask 1043456   ;;  %v389_v0 = vld [vmem:[%s5884_s1] sm:$0xf] }
  0x20   : > { %v477_v1 = vsel %vm475_vm0, %v389_v0, 0  ;;  %vm444_vm1 = vcmask 64512   ;;  %v3748_v7 = vld [vmem:[%s5886_s3 + $0x70] sm:$0xf]  ;;  %v4422_v8 = vld [vmem:[%s5886_s3 + $0x74] sm:$0xf0] }
  0x21   : > { %p362_p13 = scmp.lt.s32.totalorder %s361_s24, 39  ;;  %486 = vmatpush.bf16.msra.mxu0 %v477_v1  ;;  %v3749_v9 = vor.u32 %v4422_v8, %v3748_v7  ;;  %v3740_v11 = vld [vmem:[%s5886_s3 + $0x60] sm:$0xf]  ;;  %v4420_v12 = vld [vmem:[%s5886_s3 + $0x64] sm:$0xf0]  ;;  %s358_s14 = sand.u32 1, %s4793_s10  }
  0x22   : > { %v3741_v13 = vor.u32 %v4420_v12, %v3740_v11  ;;  %v3732_v14 = vld [vmem:[%s5886_s3 + $0x50] sm:$0xf]  ;;  %v4418_v15 = vld [vmem:[%s5886_s3 + $0x54] sm:$0xf0]  ;;  %v3724_v17 = vld [vmem:[%s5886_s3 + $0x40] sm:$0xf] }
  0x23   : > { %s5923_s24 = smov (!%p362_p13, %s361_s24), 39  ;;  %710 = vmatpush.bf16.msra.mxu1 %v3749_v9  ;;  %4583 = vmatpush.bf16.msra.mxu3 %v3749_v9  ;;  %v3733_v16 = vor.u32 %v4418_v15, %v3732_v14  ;;  %v4416_v18 = vld [vmem:[%s5886_s3 + $0x44] sm:$0xf0]  ;;  %v3716_v20 = vld [vmem:[%s5886_s3 + $0x30] sm:$0xf]  ;;  %s4599_s16 = smul.u32 480, %s358_s14 }
  0x24   : > { %s3639_s5 = sshll.u32 %s5923_s24, 2  ;;  %v3725_v19 = vor.u32 %v4416_v18, %v3724_v17  ;;  %v4414_v21 = vld [vmem:[%s5886_s3 + $0x34] sm:$0xf0]  ;;  %v3708_v24 = vld [vmem:[%s5886_s3 + $0x20] sm:$0xf]  ;;  %s4751_s23 = scalar_lea.hbm %s5892_s9, 960 }
  0x25   : > { %s4941_s28 = scalar_lea.vmem %s5883_s0, %s3639_s5  ;;  %v3717_v23 = vor.u32 %v4414_v21, %v3716_v20  ;;  %v4412_v25 = vld [vmem:[%s5886_s3 + $0x24] sm:$0xf0]  ;;  %v3700_v27 = vld [vmem:[%s5886_s3 + $0x10] sm:$0xf]  ;;  %v4410_v28 = vld [vmem:[%s5886_s3 + $0x14] sm:$0xf0] }
  0x26   : > { %v4397_v2 = vld [vmem:[%s4941_s28] sm:$0xff]  ;;  %v4398_v3 = vld [vmem:[%s4941_s28 + $0x8] sm:$0xff]  ;;  %v4399_v4 = vld [vmem:[%s4941_s28 + $0x10] sm:$0xff]  ;;  %v3709_v26 = vor.u32 %v4412_v25, %v3708_v24  ;;  %v3701_v29 = vor.u32 %v4410_v28, %v3700_v27  ;;  %s5634_s17 = scalar_lea.vmem [#allocation7], %s4599_s16 }
  0x27   : > { %3680 = vmatmul.msk.bf16.vlgmr.msra.gmra.mxu0 %vm444_vm1, %v4397_v2  ;;  %v4400_v5 = vld [vmem:[%s4941_s28 + $0x18] sm:$0xff]  ;;  %v4401_v6 = vld [vmem:[%s4941_s28 + $0x20] sm:$0xff]  ;;  %v4402_v10 = vld [vmem:[%s4941_s28 + $0x28] sm:$0xff]  ;;  %711 = vmatpush.bf16.msra.mxu1 %v3741_v13  ;;  %s3544_s25 = sshll.u32 %s5634_s17, 4  ;;  %s3545_s25 = int_to_ptr.vmem [resolvable:$true] %s3544_s25 }
  0x28   : > { %4584 = vmatpush.bf16.msra.mxu3 %v3741_v13  ;;  %v4403_v22 = vld [vmem:[%s4941_s28 + $0x30] sm:$0xff]  ;;  %v3692_v30 = vld [vmem:[%s5886_s3] sm:$0xf]  ;;  %v4408_v31 = vld [vmem:[%s5886_s3 + $0x4] sm:$0xf0] }
  0x29   : > { %v3693_v32 = vor.u32 %v4408_v31, %v3692_v30  ;;  %v4421_v33 = vld [vmem:[%s5886_s3 + $0x74] sm:$0xf]  ;;  %v3750_v34 = vld [vmem:[%s5886_s3 + $0x78] sm:$0xf0]  ;;  %v4419_v37 = vld [vmem:[%s5886_s3 + $0x64] sm:$0xf] }
  0x2a   : > { %v4404_v35 = vld [vmem:[%s4941_s28 + $0x38] sm:$0xff]  ;;  %v3753_v36 = vor.u32 %v4421_v33, %v3750_v34  ;;  %v3742_v38 = vld [vmem:[%s5886_s3 + $0x68] sm:$0xf0]  ;;  %v4417_v40 = vld [vmem:[%s5886_s3 + $0x54] sm:$0xf] }
  0x2b   : > { %712 = vmatpush.bf16.msra.mxu1 %v3733_v16  ;;  %v3745_v39 = vor.u32 %v4419_v37, %v3742_v38  ;;  %v3734_v41 = vld [vmem:[%s5886_s3 + $0x58] sm:$0xf0]  ;;  %v4415_v43 = vld [vmem:[%s5886_s3 + $0x44] sm:$0xf]  ;;  %v3726_v44 = vld [vmem:[%s5886_s3 + $0x48] sm:$0xf0] }
  0x2c   : > { %4585 = vmatpush.bf16.msra.mxu3 %v3733_v16  ;;  %4591 = vmatpush.bf16.msra.mxu2 %v3753_v36  ;;  %v3737_v42 = vor.u32 %v4417_v40, %v3734_v41  ;;  %v3729_v45 = vor.u32 %v4415_v43, %v3726_v44  ;;  %v3996_v46 = vld [vmem:[#allocation2 + $0x1e0] sm:$0xf]  ;;  %v4485_v47 = vld [vmem:[#allocation2 + $0x1ec] sm:$0xf0]  ;;  %v4413_v49 = vld [vmem:[%s5886_s3 + $0x34] sm:$0xf] }
  0x2d   : > { %v3997_v48 = vor.u32 %v4485_v47, %v3996_v46  ;;  %v3718_v50 = vld [vmem:[%s5886_s3 + $0x38] sm:$0xf0]  ;;  %v4405_v51 = vld [vmem:[%s4941_s28 + $0x40] sm:$0xff]  ;;  %v3710_v56 = vld [vmem:[%s5886_s3 + $0x28] sm:$0xf0] }
  0x2e   : > { %v3721_v52 = vor.u32 %v4413_v49, %v3718_v50  ;;  %v5041_v54 = vld [vmem:[%s5885_s2] ss:$0 sm:$0xff]  ;;  %v4411_v55 = vld [vmem:[%s5886_s3 + $0x24] sm:$0xf]  ;;  %v4409_v59 = vld [vmem:[%s5886_s3 + $0x14] sm:$0xf] }
  0x2f   : > { %713 = vmatpush.bf16.msra.mxu1 %v3725_v19  ;;  %1421 = vmatpush.bf16.msrb.mxu0 %v3997_v48  ;;  %v3713_v57 = vor.u32 %v4411_v55, %v3710_v56  ;;  %v3702_v60 = vld [vmem:[%s5886_s3 + $0x18] sm:$0xf0]  ;;  %v4407_v1 = vld [vmem:[%s5886_s3 + $0x4] sm:$0xf]  ;;  %v3694_v2 = vld [vmem:[%s5886_s3 + $0x8] sm:$0xf0] }
  0x30   : > { %4586 = vmatpush.bf16.msra.mxu3 %v3725_v19  ;;  %4592 = vmatpush.bf16.msra.mxu2 %v3745_v39  ;;  %v3705_v61 = vor.u32 %v4409_v59, %v3702_v60  ;;  %v4406_v8 = vld [vmem:[%s4941_s28 + $0x48] sm:$0xff]  ;;  %v4481_v11 = vld [vmem:[#allocation2 + $0x1cc] sm:$0xf0]  ;;  %v3868_v12 = vld [vmem:[#allocation2 + $0xe0] sm:$0xf]  ;;  %s4626_s28 = smul.u32 480, %s4882_s13 }
  0x31   : > { %v4453_v13 = vld [vmem:[#allocation2 + $0xec] sm:$0xf0]  ;;  %v4483_v21 = vld [vmem:[#allocation2 + $0x1e4] sm:$0xf]  ;;  %v3852_v28 = vld [vmem:[#allocation2 + $0xc0] sm:$0xf] }
  0x32   : > { %v3869_v16 = vor.u32 %v4453_v13, %v3868_v12  ;;  %v3964_v30 = vld [vmem:[#allocation2 + $0x1a0] sm:$0xf]  ;;  %v4477_v31 = vld [vmem:[#allocation2 + $0x1ac] sm:$0xf0]  ;;  %v3982_v40 = vld [vmem:[#allocation2 + $0x1d0] sm:$0xf0]  ;;  %s3543_s21 = scalar_lea.hbm %s5892_s9, %s4626_s28 }
  0x33   : > { %714 = vmatpush.bf16.msra.mxu1 %v3717_v23  ;;  %v3965_v34 = vor.u32 %v4477_v31, %v3964_v30  ;;  %v3836_v46 = vld [vmem:[#allocation2 + $0xa0] sm:$0xf]  ;;  %v4445_v47 = vld [vmem:[#allocation2 + $0xac] sm:$0xf0]  ;;  %v3870_v30 = vld [vmem:[#allocation2 + $0xf0] sm:$0xf0] }
  0x34   : > { %4587 = vmatpush.bf16.msra.mxu3 %v3717_v23  ;;  %4593 = vmatpush.bf16.msra.mxu2 %v3737_v42  ;;  %v3837_v49 = vor.u32 %v4445_v47, %v3836_v46  ;;  %v3948_v55 = vld [vmem:[#allocation2 + $0x180] sm:$0xf]  ;;  %v4473_v56 = vld [vmem:[#allocation2 + $0x18c] sm:$0xf0]  ;;  %s3546_s26 = sshll.u32 %s3543_s21, 4  ;;  %s3531_s13 = scalar_lea.sflag [#allocation4], %s358_s14  ;;  %s3547_s26 = int_to_ptr.hbm [resolvable:$true] %s3546_s26 }
  0x35   : > { %v4469_v12 = vld [vmem:[#allocation2 + $0x16c] sm:$0xf0]  ;;  %v3788_v47 = vld [vmem:[#allocation2 + $0x40] sm:$0xf]  ;;  %s4745_s27 = sshra.s32 %s3547_s26, 4  ;;  %s4746_s27 = int_to_ptr.hbm [resolvable:$true] %s4745_s27 }
  0x36   : > { %s4747_s29 = scalar_lea.hbm %s4746_s27, 480  ;;  %p4752_p3 = scmp.lt.s32.totalorder %s4746_s27, %s5892_s9 }
  0x37   : > { %3681 = vmatmul.msk.bf16.gmra.mxu0 %vm444_vm1, %v4398_v3  ;;  %715 = vmatpush.bf16.msra.mxu1 %v3709_v26  ;;  %p4748_p0 = scmp.ne.s32.totalorder %s4746_s27, %s4747_s29  ;;  %p4753_p4 = scmp.lt.s32.totalorder %s4751_s23, %s4747_s29 }
  0x38   : > { %4588 = vmatpush.bf16.msra.mxu3 %v3709_v26  ;;  %4594 = vmatpush.bf16.msra.mxu2 %v3729_v45 }
  0x39   : > { %p4749_p1 = pnand %p4748_p0, %p4899_p5  ;;  %p4754_p7 = por %p4753_p4, %p4752_p3 }
  0x3b   : > { %716 = vmatpush.bf16.msra.mxu1 %v3701_v29  ;;  %p4750_p2 = pneg %p4749_p1 }
  0x3c   : > { %4589 = vmatpush.bf16.msra.mxu3 %v3701_v29  ;;  %4595 = vmatpush.bf16.msra.mxu2 %v3721_v52  ;;  %v4449_v29 = vld [vmem:[#allocation2 + $0xcc] sm:$0xf0] }
  0x3d   : > { %v3853_v33 = vor.u32 %v4449_v29, %v3852_v28  ;;  %v3934_v28 = vld [vmem:[#allocation2 + $0x170] sm:$0xf0]  ;;  %v4451_v29 = vld [vmem:[#allocation2 + $0xe4] sm:$0xf]  ;;  %p4755_p8 = pnand %p4754_p7, %p4750_p2 }
  0x3f   : > { %717 = vmatpush.bf16.msra.mxu1 %v3693_v32 }
  0x40   : > { %4590 = vmatpush.bf16.msra.mxu3 %v3693_v32  ;;  %4596 = vmatpush.bf16.msra.mxu2 %v3713_v57 }
  0x43   : > { %769 = vmatpush.bf16.msrb.mxu1 %v3753_v36 }
  0x44   : > { %4597 = vmatpush.bf16.msra.mxu2 %v3705_v61  ;;  %1362 = vmatpush.bf16.msrb.mxu3 %v3869_v16 }
  0x47   : > { %3682 = vmatmul.msk.bf16.gmra.mxu0 %vm444_vm1, %v4399_v4  ;;  %770 = vmatpush.bf16.msrb.mxu1 %v3745_v39  ;;  %v3697_v4 = vor.u32 %v4407_v1, %v3694_v2  ;;  %v4479_v39 = vld [vmem:[#allocation2 + $0x1c4] sm:$0xf]  ;;  %v3820_v1 = vld [vmem:[#allocation2 + $0x80] sm:$0xf]  ;;  %v4441_v2 = vld [vmem:[#allocation2 + $0x8c] sm:$0xf0] }
  0x48   : > { %1363 = vmatpush.bf16.msrb.mxu3 %v3853_v33  ;;  %v3985_v43 = vor.u32 %v4479_v39, %v3982_v40  ;;  %v3916_v40 = vld [vmem:[#allocation2 + $0x140] sm:$0xf] }
  0x49   : > { %4598 = vmatpush.bf16.msra.mxu2 %v3697_v4 }
  0x4b   : > { %771 = vmatpush.bf16.msrb.mxu1 %v3737_v42 }
  0x4c   : > { %1364 = vmatpush.bf16.msrb.mxu3 %v3837_v49 }
  0x4f   : > { %772 = vmatpush.bf16.msrb.mxu1 %v3729_v45 }
  0x53   : > { %773 = vmatpush.bf16.msrb.mxu1 %v3721_v52 }
  0x57   : > { %3683 = vmatmul.msk.bf16.gmra.mxu0 %vm444_vm1, %v4400_v5  ;;  %774 = vmatpush.bf16.msrb.mxu1 %v3713_v57  ;;  %v4475_v57 = vld [vmem:[#allocation2 + $0x1a4] sm:$0xf] }
  0x5b   : > { %775 = vmatpush.bf16.msrb.mxu1 %v3705_v61  ;;  %v3949_v61 = vor.u32 %v4473_v56, %v3948_v55 }
  0x5f   : > { %776 = vmatpush.bf16.msrb.mxu1 %v3697_v4  ;;  %v3821_v4 = vor.u32 %v4441_v2, %v3820_v1  ;;  %v4431_v1 = vld [vmem:[#allocation2 + $0x44] sm:$0xf]  ;;  %v3790_v2 = vld [vmem:[#allocation2 + $0x50] sm:$0xf0] }
  0x61   : > { %1365 = vmatpush.bf16.msrb.mxu3 %v3821_v4  ;;  %v4463_v4 = vld [vmem:[#allocation2 + $0x144] sm:$0xf] }
  0x67   : > { %3684 = vmatmul.msk.bf16.gmra.mxu0 %vm444_vm1, %v4401_v6 }
  0x77   : > { %3685 = vmatmul.msk.bf16.gmra.mxu0 %vm444_vm1, %v4402_v10  ;;  %v3980_v10 = vld [vmem:[#allocation2 + $0x1c0] sm:$0xf] }
  0x78   : > { %v3981_v15 = vor.u32 %v4481_v11, %v3980_v10  ;;  %v3950_v10 = vld [vmem:[#allocation2 + $0x190] sm:$0xf0]  ;;  %v3932_v11 = vld [vmem:[#allocation2 + $0x160] sm:$0xf] }
  0x79   : > { %v3933_v16 = vor.u32 %v4469_v12, %v3932_v11  ;;  %v4423_v12 = vld [vmem:[#allocation2 + $0x4] sm:$0xf] }
  0x7a   : > { %1422 = vmatpush.bf16.msrb.mxu0 %v3981_v15 }
  0x7e   : > { %1423 = vmatpush.bf16.msrb.mxu0 %v3965_v34  ;;  %v3873_v34 = vor.u32 %v4451_v29, %v3870_v30  ;;  %v3902_v29 = vld [vmem:[#allocation2 + $0x130] sm:$0xf0] }
  0x82   : > { %1424 = vmatpush.bf16.msrb.mxu0 %v3949_v61 }
  0x86   : > { %1425 = vmatpush.bf16.msrb.mxu0 %v3933_v16 }
  0x87   : > { %3686 = vmatmul.msk.bf16.gmra.mxu0 %vm444_vm1, %v4403_v22  ;;  %v3998_v22 = vld [vmem:[#allocation2 + $0x1f0] sm:$0xf0] }
  0x88   : > { %v4001_v25 = vor.u32 %v4483_v21, %v3998_v22 }
  0x8a   : > { %1539 = vmatpush.bf16.msrb.mxu2 %v4001_v25 }
  0x8e   : > { %1540 = vmatpush.bf16.msrb.mxu2 %v3985_v43  ;;  %v3838_v43 = vld [vmem:[#allocation2 + $0xb0] sm:$0xf0] }
  0x97   : > { %3687 = vmatmul.msk.bf16.gmra.mxu0 %vm444_vm1, %v4404_v35 }
  0xa4   : > { %v488_v53 = vpop.f32.mrf.mxu0 }
  0xa5   : > { %v489_v58 = vadd.f32 %v5041_v54, %v488_v53 }
  0xa7   : > { %3688 = vmatmul.msk.bf16.gmra.mxu0 %vm444_vm1, %v4405_v51  ;;  %v558_v63 = vmul.f32 0.01, %v489_v58  ;;  %vm538_vm2 = vcmp.gt.f32.partialorder %v489_v58, 0.0 }
  0xa9   : > { %v578_v5 = vsel %vm538_vm2, %v489_v58, %v558_v63  ;;  %v3966_v58 = vld [vmem:[#allocation2 + $0x1b0] sm:$0xf0] }
  0xac   : > { %v490_v62 = vpop.f32.mrf.mxu0 }
  0xad   : > { %v491_v0 = vadd.f32 %v5041_v54, %v490_v62  ;;  %v3969_v62 = vor.u32 %v4475_v57, %v3966_v58  ;;  %v4435_v58 = vld [vmem:[#allocation2 + $0x64] sm:$0xf] }
  0xaf   : > { %v559_v3 = vmul.f32 0.01, %v491_v0  ;;  %vm539_vm3 = vcmp.gt.f32.partialorder %v491_v0, 0.0  ;;  %1541 = vmatpush.bf16.msrb.mxu2 %v3969_v62 }
  0xb1   : > { %v579_v6 = vsel %vm539_vm3, %v491_v0, %v559_v3 }
  0xb2   : > { %v598_v7 = vpack.c.bf16 %v579_v6, %v578_v5 }
  0xb4   : > { %v493_v9 = vpop.f32.mrf.mxu0  ;;  %718 = vmatmul.bf16.vlgmr.msra.gmra.mxu1 %v598_v7 }
  0xb5   : > { %v494_v14 = vadd.f32 %v5041_v54, %v493_v9  ;;  %v4471_v9 = vld [vmem:[#allocation2 + $0x184] sm:$0xf]  ;;  %1480 = vmatpush.bf16.msra.mxu1 %v3873_v34 }
  0xb6   : > { %v3953_v15 = vor.u32 %v4471_v9, %v3950_v10 }
  0xb7   : > { %3689 = vmatmul.msk.bf16.gmra.mxu0 %vm444_vm1, %v4406_v8  ;;  %v560_v18 = vmul.f32 0.01, %v494_v14  ;;  %vm540_vm4 = vcmp.gt.f32.partialorder %v494_v14, 0.0 }
  0xb8   : > { %1542 = vmatpush.bf16.msrb.mxu2 %v3953_v15 }
  0xb9   : > { %v580_v23 = vsel %vm540_vm4, %v494_v14, %v560_v18 }
  0xbc   : > { %v495_v17 = vpop.f32.mrf.mxu0 }
  0xbd   : > { %v496_v19 = vadd.f32 %v5041_v54, %v495_v17 }
  0xbf   : > { %v561_v20 = vmul.f32 0.01, %v496_v19  ;;  %vm541_vm5 = vcmp.gt.f32.partialorder %v496_v19, 0.0 }
  0xc1   : > { %v581_v24 = vsel %vm541_vm5, %v496_v19, %v561_v20  ;;  %v3804_v19 = vld [vmem:[#allocation2 + $0x60] sm:$0xf]  ;;  %v4437_v20 = vld [vmem:[#allocation2 + $0x6c] sm:$0xf0] }
  0xc2   : > { %v599_v26 = vpack.c.bf16 %v581_v24, %v580_v23  ;;  %v3805_v22 = vor.u32 %v4437_v20, %v3804_v19  ;;  %v4429_v19 = vld [vmem:[#allocation2 + $0x2c] sm:$0xf0]  ;;  %v3900_v20 = vld [vmem:[#allocation2 + $0x120] sm:$0xf] }
  0xc4   : > { %v498_v27 = vpop.f32.mrf.mxu0  ;;  %723 = vmatmul.bf16.gmra.mxu1 %v599_v26  ;;  %1366 = vmatpush.bf16.msrb.mxu3 %v3805_v22 }
  0xc5   : > { %v499_v32 = vadd.f32 %v5041_v54, %v498_v27  ;;  %v4467_v27 = vld [vmem:[#allocation2 + $0x164] sm:$0xf] }
  0xc6   : > { %v3937_v33 = vor.u32 %v4467_v27, %v3934_v28  ;;  %v4459_v28 = vld [vmem:[#allocation2 + $0x124] sm:$0xf] }
  0xc7   : > { %v562_v36 = vmul.f32 0.01, %v499_v32  ;;  %vm542_vm6 = vcmp.gt.f32.partialorder %v499_v32, 0.0  ;;  %v3905_v30 = vor.u32 %v4459_v28, %v3902_v29  ;;  %v3860_v28 = vld [vmem:[#allocation2 + $0xc8] sm:$0xf] }
  0xc8   : > { %1543 = vmatpush.bf16.msrb.mxu2 %v3937_v33  ;;  %v4450_v29 = vld [vmem:[#allocation2 + $0xd4] sm:$0xf0] }
  0xc9   : > { %v582_v41 = vsel %vm542_vm6, %v499_v32, %v562_v36 }
  0xcc   : > { %v500_v35 = vpop.f32.mrf.mxu0 }
  0xcd   : > { %v501_v37 = vadd.f32 %v5041_v54, %v500_v35 }
  0xcf   : > { %v563_v38 = vmul.f32 0.01, %v501_v37  ;;  %vm543_vm7 = vcmp.gt.f32.partialorder %v501_v37, 0.0 }
  0xd1   : > { %v583_v42 = vsel %vm543_vm7, %v501_v37, %v563_v38  ;;  %v4447_v37 = vld [vmem:[#allocation2 + $0xc4] sm:$0xf]  ;;  %v3854_v38 = vld [vmem:[#allocation2 + $0xd0] sm:$0xf0] }
  0xd2   : > { %v600_v44 = vpack.c.bf16 %v583_v42, %v582_v41  ;;  %v3857_v39 = vor.u32 %v4447_v37, %v3854_v38  ;;  %v4465_v41 = vld [vmem:[#allocation2 + $0x14c] sm:$0xf0]  ;;  %v4443_v42 = vld [vmem:[#allocation2 + $0xa4] sm:$0xf]  ;;  %v3756_v37 = vld [vmem:[#allocation2] sm:$0xf] }
  0xd3   : > { %v3841_v46 = vor.u32 %v4443_v42, %v3838_v43  ;;  %v4425_v38 = vld [vmem:[#allocation2 + $0xc] sm:$0xf0] }
  0xd4   : > { %v503_v45 = vpop.f32.mrf.mxu0  ;;  %728 = vmatmul.bf16.vlgmr.msra.gmra.mxu3 %v600_v44  ;;  %777 = vmatmul.bf16.vlgmr.msrb.gmra.mxu1 %v598_v7 }
  0xd5   : > { %787 = vmatmul.bf16.vlgmr.msra.gmra.mxu2 %v600_v44  ;;  %v504_v48 = vadd.f32 %v5041_v54, %v503_v45  ;;  %1481 = vmatpush.bf16.msra.mxu1 %v3857_v39  ;;  %v3917_v45 = vor.u32 %v4465_v41, %v3916_v40  ;;  %v3884_v39 = vld [vmem:[#allocation2 + $0x100] sm:$0xf]  ;;  %v4457_v40 = vld [vmem:[#allocation2 + $0x10c] sm:$0xf0] }
  0xd7   : > { %v564_v51 = vmul.f32 0.01, %v504_v48  ;;  %vm544_vm8 = vcmp.gt.f32.partialorder %v504_v48, 0.0  ;;  %1426 = vmatpush.bf16.msrb.mxu0 %v3917_v45  ;;  %v3885_v45 = vor.u32 %v4457_v40, %v3884_v39 }
  0xd9   : > { %v584_v59 = vsel %vm544_vm8, %v504_v48, %v564_v51  ;;  %v4433_v48 = vld [vmem:[#allocation2 + $0x4c] sm:$0xf0]  ;;  %1482 = vmatpush.bf16.msra.mxu1 %v3841_v46  ;;  %v4439_v51 = vld [vmem:[#allocation2 + $0x84] sm:$0xf] }
  0xda   : > { %v3789_v49 = vor.u32 %v4433_v48, %v3788_v47 }
  0xdc   : > { %v505_v50 = vpop.f32.mrf.mxu0  ;;  %1367 = vmatpush.bf16.msrb.mxu3 %v3789_v49 }
  0xdd   : > { %v506_v52 = vadd.f32 %v5041_v54, %v505_v50 }
  0xdf   : > { %v565_v53 = vmul.f32 0.01, %v506_v52  ;;  %vm545_vm9 = vcmp.gt.f32.partialorder %v506_v52, 0.0 }
  0xe1   : > { %v585_v60 = vsel %vm545_vm9, %v506_v52, %v565_v53  ;;  %v3822_v52 = vld [vmem:[#allocation2 + $0x90] sm:$0xf0] }
  0xe2   : > { %v601_v63 = vpack.c.bf16 %v585_v60, %v584_v59  ;;  %v3825_v56 = vor.u32 %v4439_v51, %v3822_v52  ;;  %v3806_v59 = vld [vmem:[#allocation2 + $0x70] sm:$0xf0] }
  0xe3   : > { %v3809_v62 = vor.u32 %v4435_v58, %v3806_v59  ;;  %v3886_v51 = vld [vmem:[#allocation2 + $0x110] sm:$0xf0] }
  0xe4   : > { %v508_v0 = vpop.f32.mrf.mxu0  ;;  %733 = vmatmul.bf16.gmra.mxu3 %v601_v63  ;;  %782 = vmatmul.bf16.gmra.mxu1 %v599_v26 }
  0xe5   : > { %792 = vmatmul.bf16.gmra.mxu2 %v601_v63  ;;  %v509_v3 = vadd.f32 %v5041_v54, %v508_v0  ;;  %1483 = vmatpush.bf16.msra.mxu1 %v3825_v56 }
  0xe7   : > { %v566_v6 = vmul.f32 0.01, %v509_v3  ;;  %vm546_vm10 = vcmp.gt.f32.partialorder %v509_v3, 0.0 }
  0xe9   : > { %v586_v13 = vsel %vm546_vm10, %v509_v3, %v566_v6  ;;  %1484 = vmatpush.bf16.msra.mxu1 %v3809_v62  ;;  %v3793_v3 = vor.u32 %v4431_v1, %v3790_v2  ;;  %v3876_v2 = vld [vmem:[#allocation2 + $0xe8] sm:$0xf] }
  0xec   : > { %v510_v5 = vpop.f32.mrf.mxu0 }
  0xed   : > { %v511_v7 = vadd.f32 %v5041_v54, %v510_v5  ;;  %v3918_v5 = vld [vmem:[#allocation2 + $0x150] sm:$0xf0]  ;;  %1485 = vmatpush.bf16.msra.mxu1 %v3793_v3  ;;  %v4454_v3 = vld [vmem:[#allocation2 + $0xf4] sm:$0xf0] }
  0xee   : > { %v3921_v6 = vor.u32 %v4463_v4, %v3918_v5 }
  0xef   : > { %v567_v8 = vmul.f32 0.01, %v511_v7  ;;  %vm547_vm11 = vcmp.gt.f32.partialorder %v511_v7, 0.0 }
  0xf0   : > { %1544 = vmatpush.bf16.msrb.mxu2 %v3921_v6 }
  0xf1   : > { %v587_v14 = vsel %vm547_vm11, %v511_v7, %v567_v8  ;;  %v4427_v7 = vld [vmem:[#allocation2 + $0x24] sm:$0xf]  ;;  %v3774_v8 = vld [vmem:[#allocation2 + $0x30] sm:$0xf0] }
  0xf2   : > { %v602_v17 = vpack.c.bf16 %v587_v14, %v586_v13  ;;  %v3777_v10 = vor.u32 %v4427_v7, %v3774_v8  ;;  %v3758_v13 = vld [vmem:[#allocation2 + $0x10] sm:$0xf0]  ;;  %v3877_v7 = vor.u32 %v4454_v3, %v3876_v2 }
  0xf3   : > { %v3761_v16 = vor.u32 %v4423_v12, %v3758_v13  ;;  %v4486_v13 = vld [vmem:[#allocation2 + $0x1f4] sm:$0xf0] }
  0xf4   : > { %v513_v18 = vpop.f32.mrf.mxu0  ;;  %738 = vmatmul.bf16.gmra.mxu3 %v602_v17  ;;  %1486 = vmatpush.bf16.msra.mxu1 %v3777_v10  ;;  %v4006_v10 = vld [vmem:[#allocation2 + $0x1f8] sm:$0xf0] }
  0xf5   : > { %797 = vmatmul.bf16.gmra.mxu2 %v602_v17  ;;  %v514_v21 = vadd.f32 %v5041_v54, %v513_v18  ;;  %v3772_v18 = vld [vmem:[#allocation2 + $0x20] sm:$0xf] }
  0xf6   : > { %1545 = vmatpush.bf16.msrb.mxu2 %v3905_v30  ;;  %v4480_v30 = vld [vmem:[#allocation2 + $0x1cc] sm:$0xf] }
  0xf7   : > { %v568_v24 = vmul.f32 0.01, %v514_v21  ;;  %vm548_vm12 = vcmp.gt.f32.partialorder %v514_v21, 0.0 }
  0xf8   : > { %1487 = vmatpush.bf16.msra.mxu1 %v3761_v16 }
  0xf9   : > { %v588_v31 = vsel %vm548_vm12, %v514_v21, %v568_v24  ;;  %v4461_v21 = vld [vmem:[#allocation2 + $0x12c] sm:$0xf0]  ;;  %v3773_v24 = vor.u32 %v4429_v19, %v3772_v18 }
  0xfb   : > { %1368 = vmatpush.bf16.msrb.mxu3 %v3773_v24 }
  0xfc   : > { %v515_v23 = vpop.f32.mrf.mxu0 }
  0xfd   : > { %v516_v25 = vadd.f32 %v5041_v54, %v515_v23 }
  0xff   : > { %v569_v26 = vmul.f32 0.01, %v516_v25  ;;  %vm549_vm13 = vcmp.gt.f32.partialorder %v516_v25, 0.0 }
 0x101   : > { %v589_v32 = vsel %vm549_vm13, %v516_v25, %v569_v26  ;;  %v3901_v25 = vor.u32 %v4461_v21, %v3900_v20 }
 0x102   : > { %v603_v35 = vpack.c.bf16 %v589_v32, %v588_v31 }
 0x103   : > { %1427 = vmatpush.bf16.msrb.mxu0 %v3901_v25 }
 0x104   : > { %v518_v36 = vpop.f32.mrf.mxu0  ;;  %743 = vmatmul.bf16.gmra.mxu3 %v603_v35 }
 0x105   : > { %802 = vmatmul.bf16.gmra.mxu2 %v603_v35  ;;  %v519_v44 = vadd.f32 %v5041_v54, %v518_v36  ;;  %v5085_v35 = vld [vmem:[%s5887_s4] sm:$0x3] }
 0x106   : > { %v5088_v46 = vperm.slane %v5085_v35, 0 }
 0x107   : > { %v570_v53 = vmul.f32 0.01, %v519_v44  ;;  %vm550_vm14 = vcmp.gt.f32.partialorder %v519_v44, 0.0  ;;  %1428 = vmatpush.bf16.msrb.mxu0 %v3885_v45 }
 0x109   : > { %v590_v60 = vsel %vm550_vm14, %v519_v44, %v570_v53  ;;  %v3757_v44 = vor.u32 %v4425_v38, %v3756_v37 }
 0x10b   : > { %1369 = vmatpush.bf16.msrb.mxu3 %v3757_v44 }
 0x10c   : > { %v520_v50 = vpop.f32.mrf.mxu0 }
 0x10d   : > { %v521_v55 = vadd.f32 %v5041_v54, %v520_v50  ;;  %v4455_v50 = vld [vmem:[#allocation2 + $0x104] sm:$0xf] }
 0x10e   : > { %v3889_v52 = vor.u32 %v4455_v50, %v3886_v51 }
 0x10f   : > { %v571_v57 = vmul.f32 0.01, %v521_v55  ;;  %vm551_vm15 = vcmp.gt.f32.partialorder %v521_v55, 0.0  ;;  %1598 = vmatpush.bf16.msra.mxu3 %v3877_v7 }
 0x110   : > { %1546 = vmatpush.bf16.msrb.mxu2 %v3889_v52 }
 0x111   : > { %v591_v61 = vsel %vm551_vm15, %v521_v55, %v571_v57 }
 0x112   : > { %v604_v63 = vpack.c.bf16 %v591_v61, %v590_v60 }
 0x114   : > { %v523_v0 = vpop.f32.mrf.mxu0  ;;  %748 = vmatmul.bf16.gmra.mxu3 %v604_v63 }
 0x115   : > { %807 = vmatmul.bf16.gmra.mxu2 %v604_v63  ;;  %v524_v9 = vadd.f32 %v5041_v54, %v523_v0 }
 0x117   : > { %v572_v14 = vmul.f32 0.01, %v524_v9  ;;  %vm552_vm0 = vcmp.gt.f32.partialorder %v524_v9, 0.0 }
 0x119   : > { %v592_v22 = vsel %vm552_vm0, %v524_v9, %v572_v14  ;;  %v4484_v9 = vld [vmem:[#allocation2 + $0x1ec] sm:$0xf] }
 0x11a   : > { %v4009_v12 = vor.u32 %v4484_v9, %v4006_v10  ;;  %v4452_v14 = vld [vmem:[#allocation2 + $0xec] sm:$0xf]  ;;  %v3974_v9 = vld [vmem:[#allocation2 + $0x1b8] sm:$0xf0]  ;;  %v3972_v10 = vld [vmem:[#allocation2 + $0x1a8] sm:$0xf] }
 0x11c   : > { %v525_v11 = vpop.f32.mrf.mxu0  ;;  %1775 = vmatpush.bf16.msra.mxu2 %v4009_v12 }
 0x11d   : > { %v526_v15 = vadd.f32 %v5041_v54, %v525_v11  ;;  %v4004_v11 = vld [vmem:[#allocation2 + $0x1e8] sm:$0xf] }
 0x11e   : > { %v4005_v16 = vor.u32 %v4486_v13, %v4004_v11 }
 0x11f   : > { %v573_v17 = vmul.f32 0.01, %v526_v15  ;;  %vm553_vm1 = vcmp.gt.f32.partialorder %v526_v15, 0.0 }
 0x120   : > { %1657 = vmatpush.bf16.msra.mxu0 %v4005_v16  ;;  %v3846_v16 = vld [vmem:[#allocation2 + $0xb8] sm:$0xf0] }
 0x121   : > { %v593_v23 = vsel %vm553_vm1, %v526_v15, %v573_v17  ;;  %v3878_v15 = vld [vmem:[#allocation2 + $0xf8] sm:$0xf0] }
 0x122   : > { %v605_v26 = vpack.c.bf16 %v593_v23, %v592_v22  ;;  %v3881_v17 = vor.u32 %v4452_v14, %v3878_v15  ;;  %v4478_v14 = vld [vmem:[#allocation2 + $0x1b4] sm:$0xf0]  ;;  %v4444_v15 = vld [vmem:[#allocation2 + $0xac] sm:$0xf] }
 0x124   : > { %v528_v27 = vpop.f32.mrf.mxu0  ;;  %753 = vmatmul.bf16.gmra.mxu3 %v605_v26  ;;  %1716 = vmatpush.bf16.msrb.mxu1 %v3881_v17 }
 0x125   : > { %812 = vmatmul.bf16.gmra.mxu2 %v605_v26  ;;  %v529_v31 = vadd.f32 %v5041_v54, %v528_v27  ;;  %v5103_v26 = vperm.slane %v5085_v35, 1 }
 0x127   : > { %v574_v33 = vmul.f32 0.01, %v529_v31  ;;  %vm554_vm2 = vcmp.gt.f32.partialorder %v529_v31, 0.0 }
 0x129   : > { %v594_v42 = vsel %vm554_vm2, %v529_v31, %v574_v33  ;;  %v3990_v33 = vld [vmem:[#allocation2 + $0x1d8] sm:$0xf0] }
 0x12c   : > { %v530_v32 = vpop.f32.mrf.mxu0 }
 0x12d   : > { %v531_v34 = vadd.f32 %v5041_v54, %v530_v32  ;;  %v3861_v32 = vor.u32 %v4450_v29, %v3860_v28 }
 0x12f   : > { %v575_v36 = vmul.f32 0.01, %v531_v34  ;;  %vm555_vm3 = vcmp.gt.f32.partialorder %v531_v34, 0.0  ;;  %1599 = vmatpush.bf16.msra.mxu3 %v3861_v32 }
 0x131   : > { %v719_v41 = vpop.f32.mrf.mxu1  ;;  %v595_v43 = vsel %vm555_vm3, %v531_v34, %v575_v36  ;;  %v3993_v36 = vor.u32 %v4480_v30, %v3990_v33 }
 0x132   : > { %v606_v47 = vpack.c.bf16 %v595_v43, %v594_v42  ;;  %v720_v49 = vadd.f32 %v719_v41, %v5088_v46  ;;  %v3988_v41 = vld [vmem:[#allocation2 + $0x1c8] sm:$0xf]  ;;  %v4482_v42 = vld [vmem:[#allocation2 + $0x1d4] sm:$0xf0]  ;;  %v4448_v43 = vld [vmem:[#allocation2 + $0xcc] sm:$0xf] }
 0x133   : > { %1776 = vmatpush.bf16.msra.mxu2 %v3993_v36 }
 0x134   : > { %v533_v48 = vpop.f32.mrf.mxu0  ;;  %758 = vmatmul.bf16.gmra.mxu3 %v606_v47  ;;  %v868_v56 = vmul.f32 0.01, %v720_v49  ;;  %vm828_vm4 = vcmp.gt.f32.partialorder %v720_v49, 0.0 }
 0x135   : > { %817 = vmatmul.bf16.gmra.mxu2 %v606_v47  ;;  %v534_v53 = vadd.f32 %v5041_v54, %v533_v48  ;;  %v3989_v47 = vor.u32 %v4482_v42, %v3988_v41  ;;  %v3862_v48 = vld [vmem:[#allocation2 + $0xd8] sm:$0xf0]  ;;  %v4472_v41 = vld [vmem:[#allocation2 + $0x18c] sm:$0xf] }
 0x136   : > { %v908_v62 = vsel %vm828_vm4, %v720_v49, %v868_v56  ;;  %v3865_v51 = vor.u32 %v4448_v43, %v3862_v48 }
 0x137   : > { %v576_v60 = vmul.f32 0.01, %v534_v53  ;;  %vm556_vm6 = vcmp.gt.f32.partialorder %v534_v53, 0.0  ;;  %1658 = vmatpush.bf16.msra.mxu0 %v3989_v47 }
 0x138   : > { %1717 = vmatpush.bf16.msrb.mxu1 %v3865_v51 }
 0x139   : > { %v721_v55 = vpop.f32.mrf.mxu1  ;;  %v596_v5 = vsel %vm556_vm6, %v534_v53, %v576_v60 }
 0x13a   : > { %v722_v57 = vadd.f32 %v721_v55, %v5088_v46 }
 0x13c   : > { %vm830_vm5 = vcmp.gt.f32.partialorder %v722_v57, 0.0  ;;  %v870_v58 = vmul.f32 0.01, %v722_v57  ;;  %v535_v59 = vpop.f32.mrf.mxu0 }
 0x13d   : > { %v536_v61 = vadd.f32 %v5041_v54, %v535_v59 }
 0x13e   : > { %v910_v63 = vsel %vm830_vm5, %v722_v57, %v870_v58 }
 0x13f   : > { %v5094_v0 = vpack.c.bf16 %v910_v63, %v908_v62  ;;  %v577_v1 = vmul.f32 0.01, %v536_v61  ;;  %vm557_vm7 = vcmp.gt.f32.partialorder %v536_v61, 0.0  ;;  %v3844_v62 = vld [vmem:[#allocation2 + $0xa8] sm:$0xf] }
 0x140   : > { %v4446_v63 = vld [vmem:[#allocation2 + $0xb4] sm:$0xf0] }
 0x141   : > { %v724_v4 = vpop.f32.mrf.mxu1  ;;  %1488 = vmatmul.bf16.vlgmr.msra.gmra.mxu1 %v5094_v0  ;;  %v597_v6 = vsel %vm557_vm7, %v536_v61, %v577_v1  ;;  %v3845_v2 = vor.u32 %v4446_v63, %v3844_v62  ;;  %v4440_v62 = vld [vmem:[#allocation2 + $0x8c] sm:$0xf] }
 0x142   : > { %v607_v8 = vpack.c.bf16 %v597_v6, %v596_v5  ;;  %v725_v54 = vadd.f32 %v724_v4, %v5088_v46 }
 0x143   : > { %1600 = vmatpush.bf16.msra.mxu3 %v3845_v2  ;;  %v3830_v2 = vld [vmem:[#allocation2 + $0x98] sm:$0xf0] }
 0x144   : > { %763 = vmatmul.bf16.gmra.mxu3 %v607_v8  ;;  %v872_v19 = vmul.f32 0.01, %v725_v54  ;;  %vm832_vm8 = vcmp.gt.f32.partialorder %v725_v54, 0.0 }
 0x145   : > { %822 = vmatmul.bf16.gmra.mxu2 %v607_v8 }
 0x146   : > { %v912_v22 = vsel %vm832_vm8, %v725_v54, %v872_v19  ;;  %v4476_v54 = vld [vmem:[#allocation2 + $0x1ac] sm:$0xf]  ;;  %v3973_v19 = vor.u32 %v4478_v14, %v3972_v10 }
 0x147   : > { %v3977_v13 = vor.u32 %v4476_v54, %v3974_v9  ;;  %v3812_v54 = vld [vmem:[#allocation2 + $0x68] sm:$0xf]  ;;  %v4438_v9 = vld [vmem:[#allocation2 + $0x74] sm:$0xf0] }
 0x148   : > { %1659 = vmatpush.bf16.msra.mxu0 %v3973_v19 }
 0x149   : > { %v726_v18 = vpop.f32.mrf.mxu1  ;;  %1777 = vmatpush.bf16.msra.mxu2 %v3977_v13 }
 0x14a   : > { %v727_v20 = vadd.f32 %v726_v18, %v5088_v46 }
 0x14c   : > { %vm834_vm9 = vcmp.gt.f32.partialorder %v727_v20, 0.0  ;;  %v874_v21 = vmul.f32 0.01, %v727_v20 }
 0x14e   : > { %v914_v23 = vsel %vm834_vm9, %v727_v20, %v874_v21  ;;  %v3849_v20 = vor.u32 %v4444_v15, %v3846_v16 }
 0x14f   : > { %v5099_v24 = vpack.c.bf16 %v914_v23, %v912_v22 }
 0x150   : > { %1718 = vmatpush.bf16.msrb.mxu1 %v3849_v20 }
 0x151   : > { %v778_v25 = vpop.f32.mrf.mxu1  ;;  %1493 = vmatmul.bf16.gmra.mxu1 %v5099_v24 }
 0x152   : > { %v779_v27 = vadd.f32 %v778_v25, %v5103_v26 }
 0x154   : > { %1370 = vmatmul.bf16.vlgmr.msrb.gmra.mxu3 %v5094_v0  ;;  %v869_v38 = vmul.f32 0.01, %v779_v27  ;;  %vm829_vm10 = vcmp.gt.f32.partialorder %v779_v27, 0.0 }
 0x156   : > { %v909_v44 = vsel %vm829_vm10, %v779_v27, %v869_v38 }
 0x157   : > { %v729_v31 = vpop.f32.mrf.mxu3 }
 0x158   : > { %v5107_v34 = vpop.f32.mrf.mxu2  ;;  %v730_v35 = vadd.f32 %v729_v31, %v5088_v46 }
 0x159   : > { %v780_v37 = vpop.f32.mrf.mxu1  ;;  %v789_v31 = vadd.f32 %v5107_v34, %v5103_v26 }
 0x15a   : > { %v781_v39 = vadd.f32 %v780_v37, %v5103_v26  ;;  %v876_v52 = vmul.f32 0.01, %v730_v35  ;;  %vm836_vm12 = vcmp.gt.f32.partialorder %v730_v35, 0.0 }
 0x15b   : > { %v877_v37 = vmul.f32 0.01, %v789_v31  ;;  %vm837_vm3 = vcmp.gt.f32.partialorder %v789_v31, 0.0 }
 0x15c   : > { %vm831_vm11 = vcmp.gt.f32.partialorder %v781_v39, 0.0  ;;  %v871_v40 = vmul.f32 0.01, %v781_v39  ;;  %v916_v58 = vsel %vm836_vm12, %v730_v35, %v876_v52  ;;  %v3828_v35 = vld [vmem:[#allocation2 + $0x88] sm:$0xf] }
 0x15d   : > { %v917_v42 = vsel %vm837_vm3, %v789_v31, %v877_v37  ;;  %v3814_v37 = vld [vmem:[#allocation2 + $0x78] sm:$0xf0] }
 0x15e   : > { %v911_v45 = vsel %vm831_vm11, %v781_v39, %v871_v40  ;;  %v4442_v40 = vld [vmem:[#allocation2 + $0x94] sm:$0xf0] }
 0x15f   : > { %v5111_v49 = vpack.c.bf16 %v911_v45, %v909_v44  ;;  %v731_v50 = vpop.f32.mrf.mxu3  ;;  %v3829_v43 = vor.u32 %v4442_v40, %v3828_v35  ;;  %v3958_v44 = vld [vmem:[#allocation2 + $0x198] sm:$0xf0] }
 0x160   : > { %v732_v53 = vadd.f32 %v731_v50, %v5088_v46  ;;  %v790_v55 = vpop.f32.mrf.mxu2  ;;  %v3961_v47 = vor.u32 %v4472_v41, %v3958_v44 }
 0x161   : > { %v783_v56 = vpop.f32.mrf.mxu1  ;;  %1429 = vmatmul.bf16.vlgmr.msrb.gmra.mxu0 %v5111_v49  ;;  %1547 = vmatmul.bf16.vlgmr.msrb.gmra.mxu2 %v5111_v49  ;;  %v791_v27 = vadd.f32 %v790_v55, %v5103_v26 }
 0x162   : > { %vm838_vm13 = vcmp.gt.f32.partialorder %v732_v53, 0.0  ;;  %v878_v57 = vmul.f32 0.01, %v732_v53  ;;  %v784_v61 = vadd.f32 %v783_v56, %v5103_v26  ;;  %1601 = vmatpush.bf16.msra.mxu3 %v3829_v43  ;;  %1778 = vmatpush.bf16.msra.mxu2 %v3961_v47 }
 0x163   : > { %v879_v33 = vmul.f32 0.01, %v791_v27  ;;  %vm839_vm2 = vcmp.gt.f32.partialorder %v791_v27, 0.0 }
 0x164   : > { %v918_v59 = vsel %vm838_vm13, %v732_v53, %v878_v57  ;;  %1375 = vmatmul.bf16.gmra.mxu3 %v5099_v24  ;;  %v873_v5 = vmul.f32 0.01, %v784_v61  ;;  %vm833_vm14 = vcmp.gt.f32.partialorder %v784_v61, 0.0 }
 0x165   : > { %v5117_v60 = vpack.c.bf16 %v918_v59, %v916_v58  ;;  %v919_v38 = vsel %vm839_vm2, %v791_v27, %v879_v33  ;;  %v3956_v59 = vld [vmem:[#allocation2 + $0x188] sm:$0xf]  ;;  %v3942_v27 = vld [vmem:[#allocation2 + $0x178] sm:$0xf0]  ;;  %v4436_v33 = vld [vmem:[#allocation2 + $0x6c] sm:$0xf] }
 0x166   : > { %v913_v11 = vsel %vm833_vm14, %v784_v61, %v873_v5  ;;  %v5140_v45 = vpack.c.bf16 %v919_v38, %v917_v42  ;;  %v4474_v61 = vld [vmem:[#allocation2 + $0x194] sm:$0xf0]  ;;  %v3817_v40 = vor.u32 %v4436_v33, %v3814_v37 }
 0x167   : > { %v734_v1 = vpop.f32.mrf.mxu3  ;;  %1498 = vmatmul.bf16.gmra.mxu1 %v5117_v60  ;;  %v4430_v33 = vld [vmem:[#allocation2 + $0x34] sm:$0xf0] }
 0x168   : > { %v5121_v3 = vpop.f32.mrf.mxu2  ;;  %v735_v7 = vadd.f32 %v734_v1, %v5088_v46  ;;  %v3957_v1 = vor.u32 %v4474_v61, %v3956_v59  ;;  %v3796_v59 = vld [vmem:[#allocation2 + $0x48] sm:$0xf]  ;;  %v4434_v61 = vld [vmem:[#allocation2 + $0x54] sm:$0xf0] }
 0x169   : > { %v785_v4 = vpop.f32.mrf.mxu1  ;;  %v794_v58 = vadd.f32 %v5121_v3, %v5103_v26 }
 0x16a   : > { %v786_v6 = vadd.f32 %v785_v4, %v5103_v26  ;;  %v880_v21 = vmul.f32 0.01, %v735_v7  ;;  %vm840_vm0 = vcmp.gt.f32.partialorder %v735_v7, 0.0  ;;  %1660 = vmatpush.bf16.msra.mxu0 %v3957_v1  ;;  %v3797_v1 = vor.u32 %v4434_v61, %v3796_v59 }
 0x16b   : > { %vm841_vm7 = vcmp.gt.f32.partialorder %v794_v58, 0.0 }
 0x16c   : > { %vm835_vm15 = vcmp.gt.f32.partialorder %v786_v6, 0.0  ;;  %v875_v8 = vmul.f32 0.01, %v786_v6  ;;  %v920_v28 = vsel %vm840_vm0, %v735_v7, %v880_v21  ;;  %v881_v7 = vmul.f32 0.01, %v794_v58 }
 0x16e   : > { %v915_v12 = vsel %vm835_vm15, %v786_v6, %v875_v8  ;;  %v3833_v6 = vor.u32 %v4440_v62, %v3830_v2  ;;  %v921_v10 = vsel %vm841_vm7, %v794_v58, %v881_v7  ;;  %v4464_v62 = vld [vmem:[#allocation2 + $0x14c] sm:$0xf]  ;;  %v3926_v2 = vld [vmem:[#allocation2 + $0x158] sm:$0xf0] }
 0x16f   : > { %v5125_v17 = vpack.c.bf16 %v915_v12, %v913_v11  ;;  %v736_v18 = vpop.f32.mrf.mxu3  ;;  %v3813_v11 = vor.u32 %v4438_v9, %v3812_v54  ;;  %v3924_v54 = vld [vmem:[#allocation2 + $0x148] sm:$0xf]  ;;  %v4466_v9 = vld [vmem:[#allocation2 + $0x154] sm:$0xf0] }
 0x170   : > { %v737_v22 = vadd.f32 %v736_v18, %v5088_v46  ;;  %v795_v23 = vpop.f32.mrf.mxu2  ;;  %1719 = vmatpush.bf16.msrb.mxu1 %v3833_v6  ;;  %v3929_v6 = vor.u32 %v4464_v62, %v3926_v2  ;;  %v4424_v2 = vld [vmem:[#allocation2 + $0xc] sm:$0xf] }
 0x171   : > { %1434 = vmatmul.bf16.gmra.mxu0 %v5125_v17  ;;  %1552 = vmatmul.bf16.gmra.mxu2 %v5125_v17  ;;  %v796_v53 = vadd.f32 %v795_v23, %v5103_v26 }
 0x172   : > { %vm842_vm1 = vcmp.gt.f32.partialorder %v737_v22, 0.0  ;;  %v882_v25 = vmul.f32 0.01, %v737_v22  ;;  %1602 = vmatpush.bf16.msra.mxu3 %v3813_v11 }
 0x173   : > { %v883_v4 = vmul.f32 0.01, %v796_v53  ;;  %vm843_vm6 = vcmp.gt.f32.partialorder %v796_v53, 0.0 }
 0x174   : > { %v922_v29 = vsel %vm842_vm1, %v737_v22, %v882_v25  ;;  %1380 = vmatmul.bf16.gmra.mxu3 %v5117_v60  ;;  %v4468_v25 = vld [vmem:[#allocation2 + $0x16c] sm:$0xf]  ;;  %1720 = vmatpush.bf16.msrb.mxu1 %v3817_v40 }
 0x175   : > { %v5132_v30 = vpack.c.bf16 %v922_v29, %v920_v28  ;;  %v923_v8 = vsel %vm843_vm6, %v796_v53, %v883_v4  ;;  %v3940_v28 = vld [vmem:[#allocation2 + $0x168] sm:$0xf]  ;;  %v3945_v31 = vor.u32 %v4468_v25, %v3942_v27  ;;  %v4460_v40 = vld [vmem:[#allocation2 + $0x12c] sm:$0xf] }
 0x176   : > { %v5155_v12 = vpack.c.bf16 %v923_v8, %v921_v10  ;;  %1603 = vmatpush.bf16.msra.mxu3 %v3797_v1  ;;  %v4432_v10 = vld [vmem:[#allocation2 + $0x4c] sm:$0xf] }
 0x177   : > { %v739_v32 = vpop.f32.mrf.mxu3  ;;  %1503 = vmatmul.bf16.gmra.mxu1 %v5132_v30  ;;  %1779 = vmatpush.bf16.msra.mxu2 %v3945_v31 }
 0x178   : > { %v5137_v36 = vpop.f32.mrf.mxu2  ;;  %v740_v39 = vadd.f32 %v739_v32, %v5088_v46  ;;  %v4470_v32 = vld [vmem:[#allocation2 + $0x174] sm:$0xf0] }
 0x179   : > { %v799_v23 = vadd.f32 %v5137_v36, %v5103_v26  ;;  %v3941_v35 = vor.u32 %v4470_v32, %v3940_v28  ;;  %v3780_v32 = vld [vmem:[#allocation2 + $0x28] sm:$0xf] }
 0x17a   : > { %v884_v48 = vmul.f32 0.01, %v740_v39  ;;  %vm844_vm4 = vcmp.gt.f32.partialorder %v740_v39, 0.0 }
 0x17b   : > { %v885_v41 = vmul.f32 0.01, %v799_v23  ;;  %1661 = vmatpush.bf16.msra.mxu0 %v3941_v35  ;;  %vm845_vm11 = vcmp.gt.f32.partialorder %v799_v23, 0.0  ;;  %1780 = vmatpush.bf16.msra.mxu2 %v3929_v6  ;;  %v3781_v35 = vor.u32 %v4430_v33, %v3780_v32 }
 0x17c   : > { %v924_v55 = vsel %vm844_vm4, %v740_v39, %v884_v48 }
 0x17d   : > { %v925_v43 = vsel %vm845_vm11, %v799_v23, %v885_v41  ;;  %v3910_v41 = vld [vmem:[#allocation2 + $0x138] sm:$0xf0]  ;;  %1604 = vmatpush.bf16.msra.mxu3 %v3781_v35 }
 0x17e   : > { %v3894_v35 = vld [vmem:[#allocation2 + $0x118] sm:$0xf0] }
 0x17f   : > { %v741_v34 = vpop.f32.mrf.mxu3 }
 0x180   : > { %v742_v50 = vadd.f32 %v741_v34, %v5088_v46  ;;  %v800_v51 = vpop.f32.mrf.mxu2 }
 0x181   : > { %1439 = vmatmul.bf16.gmra.mxu0 %v5140_v45  ;;  %1557 = vmatmul.bf16.gmra.mxu2 %v5140_v45  ;;  %v801_v19 = vadd.f32 %v800_v51, %v5103_v26 }
 0x182   : > { %vm846_vm5 = vcmp.gt.f32.partialorder %v742_v50, 0.0  ;;  %v886_v52 = vmul.f32 0.01, %v742_v50 }
 0x183   : > { %v887_v38 = vmul.f32 0.01, %v801_v19  ;;  %vm847_vm10 = vcmp.gt.f32.partialorder %v801_v19, 0.0 }
 0x184   : > { %v926_v56 = vsel %vm846_vm5, %v742_v50, %v886_v52  ;;  %1385 = vmatmul.bf16.gmra.mxu3 %v5132_v30 }
 0x185   : > { %v5147_v57 = vpack.c.bf16 %v926_v56, %v924_v55  ;;  %v927_v36 = vsel %vm847_vm10, %v801_v19, %v887_v38 }
 0x186   : > { %v5170_v44 = vpack.c.bf16 %v927_v36, %v925_v43  ;;  %v3908_v36 = vld [vmem:[#allocation2 + $0x128] sm:$0xf]  ;;  %v4462_v43 = vld [vmem:[#allocation2 + $0x134] sm:$0xf0] }
 0x187   : > { %v744_v63 = vpop.f32.mrf.mxu3  ;;  %1508 = vmatmul.bf16.gmra.mxu1 %v5147_v57 }
 0x188   : > { %v5152_v5 = vpop.f32.mrf.mxu2  ;;  %v745_v3 = vadd.f32 %v744_v63, %v5088_v46 }
 0x189   : > { %v804_v58 = vadd.f32 %v5152_v5, %v5103_v26 }
 0x18a   : > { %v888_v14 = vmul.f32 0.01, %v745_v3  ;;  %vm848_vm8 = vcmp.gt.f32.partialorder %v745_v3, 0.0 }
 0x18b   : > { %v889_v7 = vmul.f32 0.01, %v804_v58  ;;  %vm849_vm15 = vcmp.gt.f32.partialorder %v804_v58, 0.0 }
 0x18c   : > { %v928_v20 = vsel %vm848_vm8, %v745_v3, %v888_v14  ;;  %v3798_v14 = vld [vmem:[#allocation2 + $0x58] sm:$0xf0] }
 0x18d   : > { %v929_v11 = vsel %vm849_vm15, %v804_v58, %v889_v7 }
 0x18f   : > { %v746_v13 = vpop.f32.mrf.mxu3 }
 0x190   : > { %v747_v15 = vadd.f32 %v746_v13, %v5088_v46  ;;  %v805_v16 = vpop.f32.mrf.mxu2  ;;  %v3925_v13 = vor.u32 %v4466_v9, %v3924_v54 }
 0x191   : > { %1444 = vmatmul.bf16.gmra.mxu0 %v5155_v12  ;;  %1562 = vmatmul.bf16.gmra.mxu2 %v5155_v12  ;;  %v806_v52 = vadd.f32 %v805_v16, %v5103_v26 }
 0x192   : > { %vm850_vm9 = vcmp.gt.f32.partialorder %v747_v15, 0.0  ;;  %v890_v18 = vmul.f32 0.01, %v747_v15  ;;  %1662 = vmatpush.bf16.msra.mxu0 %v3925_v13 }
 0x193   : > { %v891_v4 = vmul.f32 0.01, %v806_v52  ;;  %vm851_vm14 = vcmp.gt.f32.partialorder %v806_v52, 0.0 }
 0x194   : > { %v930_v21 = vsel %vm850_vm9, %v747_v15, %v890_v18  ;;  %1390 = vmatmul.bf16.gmra.mxu3 %v5147_v57  ;;  %v3801_v18 = vor.u32 %v4432_v10, %v3798_v14 }
 0x195   : > { %v5162_v22 = vpack.c.bf16 %v930_v21, %v928_v20  ;;  %v931_v3 = vsel %vm851_vm14, %v806_v52, %v891_v4  ;;  %v3766_v4 = vld [vmem:[#allocation2 + $0x18] sm:$0xf0] }
 0x196   : > { %v5185_v15 = vpack.c.bf16 %v931_v3, %v929_v11  ;;  %1721 = vmatpush.bf16.msrb.mxu1 %v3801_v18 }
 0x197   : > { %v749_v29 = vpop.f32.mrf.mxu3  ;;  %1513 = vmatmul.bf16.gmra.mxu1 %v5162_v22 }
 0x198   : > { %v5167_v39 = vpop.f32.mrf.mxu2  ;;  %v750_v42 = vadd.f32 %v749_v29, %v5088_v46 }
 0x199   : > { %v809_v31 = vadd.f32 %v5167_v39, %v5103_v26 }
 0x19a   : > { %v892_v47 = vmul.f32 0.01, %v750_v42  ;;  %vm852_vm12 = vcmp.gt.f32.partialorder %v750_v42, 0.0 }
 0x19b   : > { %vm853_vm3 = vcmp.gt.f32.partialorder %v809_v31, 0.0 }
 0x19c   : > { %v932_v53 = vsel %vm852_vm12, %v750_v42, %v892_v47  ;;  %v3913_v42 = vor.u32 %v4460_v40, %v3910_v41  ;;  %v3782_v47 = vld [vmem:[#allocation2 + $0x38] sm:$0xf0] }
 0x19e   : > { %1781 = vmatpush.bf16.msra.mxu2 %v3913_v42 }
 0x19f   : > { %v751_v34 = vpop.f32.mrf.mxu3 }
 0x1a0   : > { %v752_v48 = vadd.f32 %v751_v34, %v5088_v46  ;;  %v810_v50 = vpop.f32.mrf.mxu2  ;;  %v4428_v34 = vld [vmem:[#allocation2 + $0x2c] sm:$0xf] }
 0x1a1   : > { %1449 = vmatmul.bf16.gmra.mxu0 %v5170_v44  ;;  %1567 = vmatmul.bf16.gmra.mxu2 %v5170_v44  ;;  %v811_v23 = vadd.f32 %v810_v50, %v5103_v26  ;;  %v3909_v50 = vor.u32 %v4462_v43, %v3908_v36  ;;  %v4458_v43 = vld [vmem:[#allocation2 + $0x114] sm:$0xf0] }
 0x1a2   : > { %vm854_vm13 = vcmp.gt.f32.partialorder %v752_v48, 0.0  ;;  %v894_v51 = vmul.f32 0.01, %v752_v48 }
 0x1a3   : > { %vm855_vm2 = vcmp.gt.f32.partialorder %v811_v23, 0.0  ;;  %v895_v37 = vmul.f32 0.01, %v811_v23  ;;  %1663 = vmatpush.bf16.msra.mxu0 %v3909_v50 }
 0x1a4   : > { %v934_v55 = vsel %vm854_vm13, %v752_v48, %v894_v51  ;;  %1395 = vmatmul.bf16.gmra.mxu3 %v5162_v22  ;;  %v893_v48 = vmul.f32 0.01, %v809_v31  ;;  %v3785_v51 = vor.u32 %v4428_v34, %v3782_v47 }
 0x1a5   : > { %v5177_v56 = vpack.c.bf16 %v934_v55, %v932_v53  ;;  %v935_v39 = vsel %vm855_vm2, %v811_v23, %v895_v37 }
 0x1a6   : > { %1722 = vmatpush.bf16.msrb.mxu1 %v3785_v51  ;;  %v933_v53 = vsel %vm853_vm3, %v809_v31, %v893_v48  ;;  %v5232_v51 = vld [vmem:[%s5889_s6] sm:$0xf] }
 0x1a7   : > { %v754_v63 = vpop.f32.mrf.mxu3  ;;  %1518 = vmatmul.bf16.gmra.mxu1 %v5177_v56  ;;  %v5201_v59 = vpack.c.bf16 %v935_v39, %v933_v53  ;;  %v4096_v53 = vld [vmem:[#allocation5 + $0xa8] sm:$0xf] }
 0x1a8   : > { %v5182_v8 = vpop.f32.mrf.mxu2  ;;  %v755_v5 = vadd.f32 %v754_v63, %v5088_v46 }
 0x1a9   : > { %v814_v9 = vadd.f32 %v5182_v8, %v5103_v26 }
 0x1aa   : > { %v896_v19 = vmul.f32 0.01, %v755_v5  ;;  %vm856_vm0 = vcmp.gt.f32.partialorder %v755_v5, 0.0 }
 0x1ab   : > { %vm857_vm7 = vcmp.gt.f32.partialorder %v814_v9, 0.0 }
 0x1ac   : > { %v936_v25 = vsel %vm856_vm0, %v755_v5, %v896_v19  ;;  %v3769_v5 = vor.u32 %v4424_v2, %v3766_v4 }
 0x1ae   : > { %1723 = vmatpush.bf16.msrb.mxu1 %v3769_v5 }
 0x1af   : > { %v756_v16 = vpop.f32.mrf.mxu3 }
 0x1b0   : > { %v757_v20 = vadd.f32 %v756_v16, %v5088_v46  ;;  %v815_v28 = vpop.f32.mrf.mxu2  ;;  %v897_v16 = vmul.f32 0.01, %v814_v9 }
 0x1b1   : > { %1454 = vmatmul.bf16.gmra.mxu0 %v5185_v15  ;;  %1572 = vmatmul.bf16.gmra.mxu2 %v5185_v15  ;;  %v816_v6 = vadd.f32 %v815_v28, %v5103_v26 }
 0x1b2   : > { %vm858_vm1 = vcmp.gt.f32.partialorder %v757_v20, 0.0  ;;  %v898_v21 = vmul.f32 0.01, %v757_v20 }
 0x1b3   : > { %v899_v11 = vmul.f32 0.01, %v816_v6  ;;  %vm859_vm6 = vcmp.gt.f32.partialorder %v816_v6, 0.0 }
 0x1b4   : > { %v938_v27 = vsel %vm858_vm1, %v757_v20, %v898_v21  ;;  %1400 = vmatmul.bf16.gmra.mxu3 %v5177_v56  ;;  %v3764_v20 = vld [vmem:[#allocation2 + $0x8] sm:$0xf]  ;;  %v4426_v21 = vld [vmem:[#allocation2 + $0x14] sm:$0xf0] }
 0x1b5   : > { %v5192_v29 = vpack.c.bf16 %v938_v27, %v936_v25  ;;  %v939_v18 = vsel %vm859_vm6, %v816_v6, %v899_v11  ;;  %v3765_v23 = vor.u32 %v4426_v21, %v3764_v20  ;;  %v937_v25 = vsel %vm857_vm7, %v814_v9, %v897_v16  ;;  %v4384_v11 = vld [vmem:[#allocation5 + $0x2e8] sm:$0xf] }
 0x1b6   : > { %v5216_v27 = vpack.c.bf16 %v939_v18, %v937_v25  ;;  %v4192_v16 = vld [vmem:[#allocation5 + $0x168] sm:$0xf]  ;;  %v4533_v18 = vld [vmem:[#allocation5 + $0x170] sm:$0xf0] }
 0x1b7   : > { %v759_v38 = vpop.f32.mrf.mxu3  ;;  %1523 = vmatmul.bf16.gmra.mxu1 %v5192_v29  ;;  %1605 = vmatpush.bf16.msra.mxu3 %v3765_v23  ;;  %v4193_v21 = vor.u32 %v4533_v18, %v4192_v16  ;;  %v4506_v18 = vld [vmem:[#allocation5 + $0x98] sm:$0xf0] }
 0x1b8   : > { %v760_v52 = vadd.f32 %v759_v38, %v5088_v46  ;;  %v818_v55 = vpop.f32.mrf.mxu2  ;;  %v4456_v38 = vld [vmem:[#allocation2 + $0x10c] sm:$0xf] }
 0x1b9   : > { %v3897_v42 = vor.u32 %v4456_v38, %v3894_v35  ;;  %v819_v48 = vadd.f32 %v818_v55, %v5103_v26 }
 0x1ba   : > { %v900_v62 = vmul.f32 0.01, %v760_v52  ;;  %vm860_vm4 = vcmp.gt.f32.partialorder %v760_v52, 0.0 }
 0x1bb   : > { %1782 = vmatpush.bf16.msra.mxu2 %v3897_v42  ;;  %vm861_vm11 = vcmp.gt.f32.partialorder %v819_v48, 0.0  ;;  %v4557_v42 = vld [vmem:[#allocation5 + $0x230] sm:$0xf0] }
 0x1bc   : > { %v940_v7 = vsel %vm860_vm4, %v760_v52, %v900_v62  ;;  %v5235_v52 = vperm.slane %v5232_v51, 0  ;;  %v901_v62 = vmul.f32 0.01, %v819_v48 }
 0x1be   : > { %v5199_v58 = vpop.f32.mrf.mxu1  ;;  %v941_v6 = vsel %vm861_vm11, %v819_v48, %v901_v62 }
 0x1bf   : > { %v761_v61 = vpop.f32.mrf.mxu3 }
 0x1c0   : > { %v762_v63 = vadd.f32 %v761_v61, %v5088_v46  ;;  %v820_v13 = vpop.f32.mrf.mxu2  ;;  %v4509_v61 = vld [vmem:[#allocation5 + $0xb0] sm:$0xf0] }
 0x1c1   : > { %1459 = vmatmul.bf16.gmra.mxu0 %v5201_v59  ;;  %1577 = vmatmul.bf16.gmra.mxu2 %v5201_v59  ;;  %v821_v40 = vadd.f32 %v820_v13, %v5103_v26  ;;  %v4581_v13 = vld [vmem:[#allocation5 + $0x2f0] sm:$0xf0] }
 0x1c2   : > { %vm862_vm5 = vcmp.gt.f32.partialorder %v762_v63, 0.0  ;;  %v902_v1 = vmul.f32 0.01, %v762_v63  ;;  %v4385_v20 = vor.u32 %v4581_v13, %v4384_v11  ;;  %v4084_v13 = vld [vmem:[#allocation5 + $0x90] sm:$0xf] }
 0x1c3   : > { %v903_v39 = vmul.f32 0.01, %v821_v40  ;;  %vm863_vm10 = vcmp.gt.f32.partialorder %v821_v40, 0.0 }
 0x1c4   : > { %v942_v3 = vsel %vm862_vm5, %v762_v63, %v902_v1  ;;  %1405 = vmatmul.bf16.gmra.mxu3 %v5192_v29  ;;  %v4097_v63 = vor.u32 %v4509_v61, %v4096_v53  ;;  %2939 = vmatpush.bf16.msrb.mxu2 %v4385_v20  ;;  %v4085_v20 = vor.u32 %v4506_v18, %v4084_v13  ;;  %v4503_v13 = vld [vmem:[#allocation5 + $0x80] sm:$0xf0] }
 0x1c5   : > { %v5208_v54 = vpack.c.bf16 %v942_v3, %v940_v7  ;;  %v943_v55 = vsel %vm863_vm10, %v821_v40, %v903_v39  ;;  %v5241_v3 = vperm.slane %v5232_v51, 1 }
 0x1c6   : > { %v5213_v14 = vpop.f32.mrf.mxu1  ;;  %2762 = vmatpush.bf16.msrb.mxu3 %v4097_v63  ;;  %v5243_v5 = vpack.c.bf16 %v943_v55, %v941_v6 }
 0x1c7   : > { %v764_v10 = vpop.f32.mrf.mxu3  ;;  %1528 = vmatmul.bf16.gmra.mxu1 %v5208_v54  ;;  %v1492_v48 = vadd.f32 %v5213_v14, %v5241_v3 }
 0x1c8   : > { %v765_v19 = vadd.f32 %v764_v10, %v5088_v46  ;;  %v823_v32 = vpop.f32.mrf.mxu2 }
 0x1ca   : > { %v904_v28 = vmul.f32 0.01, %v765_v19  ;;  %vm864_vm8 = vcmp.gt.f32.partialorder %v765_v19, 0.0  ;;  %2763 = vmatpush.bf16.msrb.mxu3 %v4085_v20 }
 0x1cc   : > { %v944_v41 = vsel %vm864_vm8, %v765_v19, %v904_v28  ;;  %v1490_v19 = vadd.f32 %v5199_v58, %v5241_v3 }
 0x1ce   : > { %v5221_v33 = vpop.f32.mrf.mxu1 }
 0x1cf   : > { %v766_v8 = vpop.f32.mrf.mxu3 }
 0x1d0   : > { %v767_v31 = vadd.f32 %v766_v8, %v5088_v46  ;;  %v3892_v46 = vld [vmem:[#allocation2 + $0x108] sm:$0xf]  ;;  %v825_v1 = vpop.f32.mrf.mxu2 }
 0x1d1   : > { %1464 = vmatmul.bf16.gmra.mxu0 %v5216_v27  ;;  %1582 = vmatmul.bf16.gmra.mxu2 %v5216_v27  ;;  %v3893_v47 = vor.u32 %v4458_v43, %v3892_v46  ;;  %v826_v23 = vadd.f32 %v825_v1, %v5103_v26 }
 0x1d2   : > { %vm866_vm9 = vcmp.gt.f32.partialorder %v767_v31, 0.0  ;;  %v906_v37 = vmul.f32 0.01, %v767_v31 }
 0x1d3   : > { %1664 = vmatpush.bf16.msra.mxu0 %v3893_v47  ;;  %vm867_vm13 = vcmp.gt.f32.partialorder %v826_v23, 0.0 }
 0x1d4   : > { %v946_v36 = vsel %vm866_vm9, %v767_v31, %v906_v37  ;;  %1410 = vmatmul.bf16.gmra.mxu3 %v5208_v54  ;;  %v824_v37 = vadd.f32 %v823_v32, %v5103_v26 }
 0x1d5   : > { %v5225_v34 = vpack.c.bf16 %v946_v36, %v944_v41  ;;  %v4288_v41 = vld [vmem:[#allocation5 + $0x228] sm:$0xf]  ;;  %v907_v36 = vmul.f32 0.01, %v826_v23 }
 0x1d6   : > { %v5237_v2 = vpop.f32.mrf.mxu1  ;;  %v4289_v43 = vor.u32 %v4557_v42, %v4288_v41  ;;  %v905_v47 = vmul.f32 0.01, %v824_v37  ;;  %vm865_vm15 = vcmp.gt.f32.partialorder %v824_v37, 0.0  ;;  %v4530_v42 = vld [vmem:[#allocation5 + $0x158] sm:$0xf0] }
 0x1d7   : > { %v1371_v50 = vpop.f32.mrf.mxu3  ;;  %1533 = vmatmul.bf16.gmra.mxu1 %v5225_v34  ;;  %2821 = vmatpush.bf16.msrb.mxu0 %v4193_v21 }
 0x1d8   : > { %v1372_v4 = vadd.f32 %v1371_v50, %v5235_v52  ;;  %2880 = vmatpush.bf16.msra.mxu1 %v4289_v43  ;;  %v947_v50 = vsel %vm867_vm13, %v826_v23, %v907_v36  ;;  %v945_v1 = vsel %vm865_vm15, %v824_v37, %v905_v47  ;;  %v4180_v36 = vld [vmem:[#allocation5 + $0x150] sm:$0xf]  ;;  %v4554_v43 = vld [vmem:[#allocation5 + $0x218] sm:$0xf0] }
 0x1d9   : > { %v5263_v6 = vpack.c.bf16 %v947_v50, %v945_v1  ;;  %v4181_v47 = vor.u32 %v4530_v42, %v4180_v36 }
 0x1db   : > { %2822 = vmatpush.bf16.msrb.mxu0 %v4181_v47 }
 0x1de   : > { %v1430_v7 = vpop.f32.mrf.mxu0 }
 0x1df   : > { %v1431_v9 = vadd.f32 %v1430_v7, %v1372_v4  ;;  %v1373_v10 = vpop.f32.mrf.mxu3 }
 0x1e0   : > { %v1374_v28 = vadd.f32 %v1373_v10, %v5235_v52 }
 0x1e1   : > { %1469 = vmatmul.bf16.gmra.mxu0 %v5243_v5  ;;  %1587 = vmatmul.bf16.gmra.mxu2 %v5243_v5  ;;  %v1914_v35 = vmul.f32 0.01, %v1431_v9  ;;  %vm1834_vm12 = vcmp.gt.f32.partialorder %v1431_v9, 0.0 }
 0x1e3   : > { %v1994_v26 = vsel %vm1834_vm12, %v1431_v9, %v1914_v35 }
 0x1e4   : > { %1415 = vmatmul.bf16.gmra.mxu3 %v5225_v34  ;;  %v5251_v25 = vpop.f32.mrf.mxu1  ;;  %v1548_v8 = vpop.f32.mrf.mxu2 }
 0x1e5   : > { %v1549_v31 = vadd.f32 %v1548_v8, %v1490_v19  ;;  %v1495_v19 = vadd.f32 %v5221_v33, %v5241_v3 }
 0x1e6   : > { %v1432_v38 = vpop.f32.mrf.mxu0 }
 0x1e7   : > { %v1433_v40 = vadd.f32 %v1432_v38, %v1374_v28  ;;  %v1376_v58 = vpop.f32.mrf.mxu3  ;;  %1724 = vmatmul.bf16.vlgmr.msrb.gmra.mxu1 %v5094_v0  ;;  %v1915_v62 = vmul.f32 0.01, %v1549_v31  ;;  %vm1835_vm0 = vcmp.gt.f32.partialorder %v1549_v31, 0.0 }
 0x1e8   : > { %v1377_v63 = vadd.f32 %v1376_v58, %v5235_v52  ;;  %v4578_v58 = vld [vmem:[#allocation5 + $0x2d8] sm:$0xf0] }
 0x1e9   : > { %vm1838_vm14 = vcmp.gt.f32.partialorder %v1433_v40, 0.0  ;;  %v1918_v46 = vmul.f32 0.01, %v1433_v40  ;;  %v1995_v10 = vsel %vm1835_vm0, %v1549_v31, %v1915_v62 }
 0x1eb   : > { %v1998_v32 = vsel %vm1838_vm14, %v1433_v40, %v1918_v46  ;;  %v4372_v40 = vld [vmem:[#allocation5 + $0x2d0] sm:$0xf] }
 0x1ec   : > { %v5258_v39 = vpack.c.bf16 %v1998_v32, %v1994_v26  ;;  %v5260_v53 = vpop.f32.mrf.mxu1  ;;  %v1550_v61 = vpop.f32.mrf.mxu2  ;;  %v4373_v41 = vor.u32 %v4578_v58, %v4372_v40  ;;  %v4276_v46 = vld [vmem:[#allocation5 + $0x210] sm:$0xf] }
 0x1ed   : > { %v1551_v55 = vadd.f32 %v1550_v61, %v1492_v48  ;;  %v4277_v48 = vor.u32 %v4554_v43, %v4276_v46  ;;  %v1502_v58 = vadd.f32 %v5260_v53, %v5241_v3 }
 0x1ee   : > { %v1435_v4 = vpop.f32.mrf.mxu0  ;;  %2940 = vmatpush.bf16.msrb.mxu2 %v4373_v41  ;;  %v4168_v41 = vld [vmem:[#allocation5 + $0x138] sm:$0xf] }
 0x1ef   : > { %vm1839_vm1 = vcmp.gt.f32.partialorder %v1551_v55, 0.0  ;;  %v1919_v14 = vmul.f32 0.01, %v1551_v55  ;;  %v1436_v7 = vadd.f32 %v1435_v4, %v1377_v63  ;;  %v1378_v9 = vpop.f32.mrf.mxu3  ;;  %2881 = vmatpush.bf16.msra.mxu1 %v4277_v48 }
 0x1f0   : > { %v1379_v8 = vadd.f32 %v1378_v9, %v5235_v52 }
 0x1f1   : > { %v1999_v11 = vsel %vm1839_vm1, %v1551_v55, %v1919_v14  ;;  %1474 = vmatmul.bf16.gmra.mxu0 %v5263_v6  ;;  %1592 = vmatmul.bf16.gmra.mxu2 %v5263_v6  ;;  %v1922_v37 = vmul.f32 0.01, %v1436_v7  ;;  %vm1842_vm2 = vcmp.gt.f32.partialorder %v1436_v7, 0.0 }
 0x1f2   : > { %v5267_v16 = vpack.c.bf16 %v1999_v11, %v1995_v10 }
 0x1f3   : > { %v2002_v26 = vsel %vm1842_vm2, %v1436_v7, %v1922_v37  ;;  %v4072_v7 = vld [vmem:[#allocation5 + $0x78] sm:$0xf] }
 0x1f4   : > { %v5271_v21 = vpop.f32.mrf.mxu1  ;;  %v1553_v23 = vpop.f32.mrf.mxu2  ;;  %1606 = vmatmul.bf16.vlgmr.msra.gmra.mxu3 %v5094_v0  ;;  %v1497_v0 = vadd.f32 %v5237_v2, %v5241_v3  ;;  %v4073_v20 = vor.u32 %v4503_v13, %v4072_v7 }
 0x1f5   : > { %v1554_v28 = vadd.f32 %v1553_v23, %v1495_v19  ;;  %v1500_v19 = vadd.f32 %v5251_v25, %v5241_v3  ;;  %v4360_v25 = vld [vmem:[#allocation5 + $0x2b8] sm:$0xf] }
 0x1f6   : > { %v1437_v31 = vpop.f32.mrf.mxu0  ;;  %2764 = vmatpush.bf16.msrb.mxu3 %v4073_v20 }
 0x1f7   : > { %v1438_v38 = vadd.f32 %v1437_v31, %v1379_v8  ;;  %v1381_v35 = vpop.f32.mrf.mxu3  ;;  %1729 = vmatmul.bf16.gmra.mxu1 %v5099_v24  ;;  %v1923_v63 = vmul.f32 0.01, %v1554_v28  ;;  %vm1843_vm4 = vcmp.gt.f32.partialorder %v1554_v28, 0.0 }
 0x1f8   : > { %v1382_v55 = vadd.f32 %v1381_v35, %v5235_v52 }
 0x1f9   : > { %vm1846_vm3 = vcmp.gt.f32.partialorder %v1438_v38, 0.0  ;;  %v1926_v33 = vmul.f32 0.01, %v1438_v38  ;;  %v2003_v10 = vsel %vm1843_vm4, %v1554_v28, %v1923_v63 }
 0x1fb   : > { %v2006_v32 = vsel %vm1846_vm3, %v1438_v38, %v1926_v33  ;;  %v4575_v33 = vld [vmem:[#allocation5 + $0x2c0] sm:$0xf0] }
 0x1fc   : > { %v5278_v50 = vpop.f32.mrf.mxu1  ;;  %v1555_v61 = vpop.f32.mrf.mxu2  ;;  %v5280_v62 = vpack.c.bf16 %v2006_v32, %v2002_v26  ;;  %v4361_v36 = vor.u32 %v4575_v33, %v4360_v25 }
 0x1fd   : > { %v1556_v1 = vadd.f32 %v1555_v61, %v1497_v0 }
 0x1fe   : > { %v1440_v2 = vpop.f32.mrf.mxu0  ;;  %2941 = vmatpush.bf16.msrb.mxu2 %v4361_v36 }
 0x1ff   : > { %vm1847_vm5 = vcmp.gt.f32.partialorder %v1556_v1, 0.0  ;;  %v1927_v4 = vmul.f32 0.01, %v1556_v1  ;;  %v1441_v14 = vadd.f32 %v1440_v2, %v1382_v55  ;;  %v1383_v9 = vpop.f32.mrf.mxu3  ;;  %v4264_v2 = vld [vmem:[#allocation5 + $0x1f8] sm:$0xf] }
 0x200   : > { %v1384_v31 = vadd.f32 %v1383_v9, %v5235_v52 }
 0x201   : > { %1665 = vmatmul.bf16.vlgmr.msra.gmra.mxu0 %v5111_v49  ;;  %1783 = vmatmul.bf16.vlgmr.msra.gmra.mxu2 %v5111_v49  ;;  %v2007_v11 = vsel %vm1847_vm5, %v1556_v1, %v1927_v4  ;;  %v1930_v38 = vmul.f32 0.01, %v1441_v14  ;;  %vm1850_vm6 = vcmp.gt.f32.partialorder %v1441_v14, 0.0  ;;  %v4551_v4 = vld [vmem:[#allocation5 + $0x200] sm:$0xf0] }
 0x202   : > { %v5285_v18 = vpack.c.bf16 %v2007_v11, %v2003_v10  ;;  %v1505_v11 = vadd.f32 %v5271_v21, %v5241_v3  ;;  %v4500_v21 = vld [vmem:[#allocation5 + $0x68] sm:$0xf0] }
 0x203   : > { %v2010_v42 = vsel %vm1850_vm6, %v1441_v14, %v1930_v38  ;;  %v4265_v14 = vor.u32 %v4551_v4, %v4264_v2  ;;  %v4252_v2 = vld [vmem:[#allocation5 + $0x1e0] sm:$0xf]  ;;  %v4548_v4 = vld [vmem:[#allocation5 + $0x1e8] sm:$0xf0] }
 0x204   : > { %v5289_v23 = vpop.f32.mrf.mxu1  ;;  %v1558_v8 = vpop.f32.mrf.mxu2  ;;  %1611 = vmatmul.bf16.gmra.mxu3 %v5099_v24  ;;  %v4527_v24 = vld [vmem:[#allocation5 + $0x140] sm:$0xf0] }
 0x205   : > { %v1559_v37 = vadd.f32 %v1558_v8, %v1500_v19  ;;  %v4169_v0 = vor.u32 %v4527_v24, %v4168_v41  ;;  %2882 = vmatpush.bf16.msra.mxu1 %v4265_v14 }
 0x206   : > { %v1442_v49 = vpop.f32.mrf.mxu0 }
 0x207   : > { %v1443_v28 = vadd.f32 %v1442_v49, %v1384_v31  ;;  %v1386_v35 = vpop.f32.mrf.mxu3  ;;  %1734 = vmatmul.bf16.gmra.mxu1 %v5117_v60  ;;  %v1931_v26 = vmul.f32 0.01, %v1559_v37  ;;  %2823 = vmatpush.bf16.msrb.mxu0 %v4169_v0  ;;  %vm1851_vm8 = vcmp.gt.f32.partialorder %v1559_v37, 0.0 }
 0x208   : > { %v1387_v32 = vadd.f32 %v1386_v35, %v5235_v52  ;;  %v1507_v35 = vadd.f32 %v5278_v50, %v5241_v3  ;;  %v4348_v50 = vld [vmem:[#allocation5 + $0x2a0] sm:$0xf] }
 0x209   : > { %vm1854_vm7 = vcmp.gt.f32.partialorder %v1443_v28, 0.0  ;;  %v1934_v40 = vmul.f32 0.01, %v1443_v28  ;;  %v2011_v9 = vsel %vm1851_vm8, %v1559_v37, %v1931_v26 }
 0x20b   : > { %v2014_v46 = vsel %vm1854_vm7, %v1443_v28, %v1934_v40  ;;  %v4060_v28 = vld [vmem:[#allocation5 + $0x60] sm:$0xf] }
 0x20c   : > { %v5296_v43 = vpop.f32.mrf.mxu1  ;;  %v1560_v47 = vpop.f32.mrf.mxu2  ;;  %v5298_v48 = vpack.c.bf16 %v2014_v46, %v2010_v42  ;;  %v4061_v40 = vor.u32 %v4500_v21, %v4060_v28  ;;  %v4497_v28 = vld [vmem:[#allocation5 + $0x50] sm:$0xf0] }
 0x20d   : > { %v1561_v61 = vadd.f32 %v1560_v47, %v1502_v58  ;;  %v1512_v21 = vadd.f32 %v5296_v43, %v5241_v3  ;;  %v4336_v43 = vld [vmem:[#allocation5 + $0x288] sm:$0xf] }
 0x20e   : > { %v1445_v53 = vpop.f32.mrf.mxu0  ;;  %2765 = vmatpush.bf16.msrb.mxu3 %v4061_v40 }
 0x20f   : > { %vm1855_vm9 = vcmp.gt.f32.partialorder %v1561_v61, 0.0  ;;  %v1935_v63 = vmul.f32 0.01, %v1561_v61  ;;  %v1446_v55 = vadd.f32 %v1445_v53, %v1387_v32  ;;  %v1388_v1 = vpop.f32.mrf.mxu3  ;;  %v4572_v32 = vld [vmem:[#allocation5 + $0x2a8] sm:$0xf0] }
 0x210   : > { %v1389_v20 = vadd.f32 %v1388_v1, %v5235_v52  ;;  %v4156_v53 = vld [vmem:[#allocation5 + $0x120] sm:$0xf]  ;;  %v4524_v1 = vld [vmem:[#allocation5 + $0x128] sm:$0xf0] }
 0x211   : > { %1670 = vmatmul.bf16.gmra.mxu0 %v5125_v17  ;;  %1788 = vmatmul.bf16.gmra.mxu2 %v5125_v17  ;;  %v2015_v7 = vsel %vm1855_vm9, %v1561_v61, %v1935_v63  ;;  %v1938_v49 = vmul.f32 0.01, %v1446_v55  ;;  %vm1858_vm10 = vcmp.gt.f32.partialorder %v1446_v55, 0.0  ;;  %v4349_v61 = vor.u32 %v4572_v32, %v4348_v50 }
 0x212   : > { %v5303_v10 = vpack.c.bf16 %v2015_v7, %v2011_v9  ;;  %v1510_v9 = vadd.f32 %v5289_v23, %v5241_v3  ;;  %v4157_v7 = vor.u32 %v4524_v1, %v4156_v53  ;;  %v4144_v53 = vld [vmem:[#allocation5 + $0x108] sm:$0xf] }
 0x213   : > { %v2018_v25 = vsel %vm1858_vm10, %v1446_v55, %v1938_v49  ;;  %2942 = vmatpush.bf16.msrb.mxu2 %v4349_v61  ;;  %v4569_v61 = vld [vmem:[#allocation5 + $0x290] sm:$0xf0] }
 0x214   : > { %v5307_v13 = vpop.f32.mrf.mxu1  ;;  %v1563_v19 = vpop.f32.mrf.mxu2  ;;  %1616 = vmatmul.bf16.gmra.mxu3 %v5117_v60  ;;  %2824 = vmatpush.bf16.msrb.mxu0 %v4157_v7 }
 0x215   : > { %v1564_v8 = vadd.f32 %v1563_v19, %v1505_v11  ;;  %v4253_v11 = vor.u32 %v4548_v4, %v4252_v2  ;;  %v1515_v1 = vadd.f32 %v5307_v13, %v5241_v3  ;;  %v4337_v2 = vor.u32 %v4569_v61, %v4336_v43  ;;  %v4545_v13 = vld [vmem:[#allocation5 + $0x1d0] sm:$0xf0] }
 0x216   : > { %v1447_v31 = vpop.f32.mrf.mxu0 }
 0x217   : > { %v1448_v17 = vadd.f32 %v1447_v31, %v1389_v20  ;;  %v1391_v38 = vpop.f32.mrf.mxu3  ;;  %1739 = vmatmul.bf16.gmra.mxu1 %v5132_v30  ;;  %v1939_v24 = vmul.f32 0.01, %v1564_v8  ;;  %vm1859_vm12 = vcmp.gt.f32.partialorder %v1564_v8, 0.0  ;;  %2943 = vmatpush.bf16.msrb.mxu2 %v4337_v2 }
 0x218   : > { %v1392_v36 = vadd.f32 %v1391_v38, %v5235_v52  ;;  %2883 = vmatpush.bf16.msra.mxu1 %v4253_v11 }
 0x219   : > { %vm1862_vm11 = vcmp.gt.f32.partialorder %v1448_v17, 0.0  ;;  %v1942_v37 = vmul.f32 0.01, %v1448_v17  ;;  %v2019_v63 = vsel %vm1859_vm12, %v1564_v8, %v1939_v24 }
 0x21b   : > { %v2022_v60 = vsel %vm1862_vm11, %v1448_v17, %v1942_v37  ;;  %v4048_v37 = vld [vmem:[#allocation5 + $0x48] sm:$0xf] }
 0x21c   : > { %v5314_v58 = vpop.f32.mrf.mxu1  ;;  %v1565_v33 = vpop.f32.mrf.mxu2  ;;  %v5316_v41 = vpack.c.bf16 %v2022_v60, %v2018_v25 }
 0x21d   : > { %v1566_v0 = vadd.f32 %v1565_v33, %v1507_v35 }
 0x21e   : > { %v1450_v42 = vpop.f32.mrf.mxu0 }
 0x21f   : > { %vm1863_vm13 = vcmp.gt.f32.partialorder %v1566_v0, 0.0  ;;  %v1943_v46 = vmul.f32 0.01, %v1566_v0  ;;  %v1451_v47 = vadd.f32 %v1450_v42, %v1392_v36  ;;  %v1393_v26 = vpop.f32.mrf.mxu3 }
 0x221   : > { %1675 = vmatmul.bf16.gmra.mxu0 %v5140_v45  ;;  %1793 = vmatmul.bf16.gmra.mxu2 %v5140_v45  ;;  %v2023_v55 = vsel %vm1863_vm13, %v1566_v0, %v1943_v46  ;;  %v1394_v45 = vadd.f32 %v1393_v26, %v5235_v52  ;;  %v1946_v49 = vmul.f32 0.01, %v1451_v47  ;;  %vm1866_vm14 = vcmp.gt.f32.partialorder %v1451_v47, 0.0 }
 0x222   : > { %v5321_v14 = vpack.c.bf16 %v2023_v55, %v2019_v63  ;;  %v4521_v63 = vld [vmem:[#allocation5 + $0x110] sm:$0xf0] }
 0x223   : > { %v2026_v35 = vsel %vm1866_vm14, %v1451_v47, %v1946_v49  ;;  %v4145_v4 = vor.u32 %v4521_v63, %v4144_v53  ;;  %v4240_v49 = vld [vmem:[#allocation5 + $0x1c8] sm:$0xf] }
 0x224   : > { %v5325_v19 = vpop.f32.mrf.mxu1  ;;  %v1568_v20 = vpop.f32.mrf.mxu2  ;;  %1621 = vmatmul.bf16.gmra.mxu3 %v5132_v30  ;;  %v4049_v30 = vor.u32 %v4497_v28, %v4048_v37 }
 0x225   : > { %v1569_v8 = vadd.f32 %v1568_v20, %v1510_v9  ;;  %2825 = vmatpush.bf16.msrb.mxu0 %v4145_v4 }
 0x226   : > { %v1452_v31 = vpop.f32.mrf.mxu0  ;;  %2766 = vmatpush.bf16.msrb.mxu3 %v4049_v30 }
 0x227   : > { %v1453_v17 = vadd.f32 %v1452_v31, %v1394_v45  ;;  %v1396_v38 = vpop.f32.mrf.mxu3  ;;  %1744 = vmatmul.bf16.gmra.mxu1 %v5147_v57  ;;  %v1947_v24 = vmul.f32 0.01, %v1569_v8  ;;  %vm1867_vm0 = vcmp.gt.f32.partialorder %v1569_v8, 0.0 }
 0x228   : > { %v1397_v36 = vadd.f32 %v1396_v38, %v5235_v52  ;;  %v4241_v38 = vor.u32 %v4545_v13, %v4240_v49  ;;  %v4542_v49 = vld [vmem:[#allocation5 + $0x1b8] sm:$0xf0] }
 0x229   : > { %vm1870_vm15 = vcmp.gt.f32.partialorder %v1453_v17, 0.0  ;;  %v1950_v23 = vmul.f32 0.01, %v1453_v17  ;;  %v2027_v47 = vsel %vm1867_vm0, %v1569_v8, %v1947_v24 }
 0x22a   : > { %2884 = vmatpush.bf16.msra.mxu1 %v4241_v38 }
 0x22b   : > { %v2030_v40 = vsel %vm1870_vm15, %v1453_v17, %v1950_v23 }
 0x22c   : > { %v5332_v25 = vpop.f32.mrf.mxu1  ;;  %v1570_v60 = vpop.f32.mrf.mxu2  ;;  %v5334_v33 = vpack.c.bf16 %v2030_v40, %v2026_v35 }
 0x22d   : > { %v1571_v0 = vadd.f32 %v1570_v60, %v1512_v21 }
 0x22e   : > { %v1455_v42 = vpop.f32.mrf.mxu0 }
 0x22f   : > { %vm1871_vm1 = vcmp.gt.f32.partialorder %v1571_v0, 0.0  ;;  %v1951_v46 = vmul.f32 0.01, %v1571_v0  ;;  %v1456_v26 = vadd.f32 %v1455_v42, %v1397_v36  ;;  %v1398_v50 = vpop.f32.mrf.mxu3 }
 0x231   : > { %1680 = vmatmul.bf16.gmra.mxu0 %v5155_v12  ;;  %1798 = vmatmul.bf16.gmra.mxu2 %v5155_v12  ;;  %v2031_v32 = vsel %vm1871_vm1, %v1571_v0, %v1951_v46  ;;  %v1399_v12 = vadd.f32 %v1398_v50, %v5235_v52  ;;  %v1954_v45 = vmul.f32 0.01, %v1456_v26  ;;  %vm1874_vm2 = vcmp.gt.f32.partialorder %v1456_v26, 0.0  ;;  %v4494_v50 = vld [vmem:[#allocation5 + $0x38] sm:$0xf0] }
 0x232   : > { %v5339_v55 = vpack.c.bf16 %v2031_v32, %v2027_v47  ;;  %v1520_v47 = vadd.f32 %v5325_v19, %v5241_v3 }
 0x233   : > { %v2034_v23 = vsel %vm1874_vm2, %v1456_v26, %v1954_v45  ;;  %v4132_v45 = vld [vmem:[#allocation5 + $0xf0] sm:$0xf] }
 0x234   : > { %v5343_v9 = vpop.f32.mrf.mxu1  ;;  %v1573_v7 = vpop.f32.mrf.mxu2  ;;  %1626 = vmatmul.bf16.gmra.mxu3 %v5147_v57  ;;  %v1517_v57 = vadd.f32 %v5314_v58, %v5241_v3  ;;  %v4036_v58 = vld [vmem:[#allocation5 + $0x30] sm:$0xf] }
 0x235   : > { %v1574_v11 = vadd.f32 %v1573_v7, %v1515_v1  ;;  %v4037_v32 = vor.u32 %v4494_v50, %v4036_v58 }
 0x236   : > { %v1457_v20 = vpop.f32.mrf.mxu0 }
 0x237   : > { %v1458_v8 = vadd.f32 %v1457_v20, %v1399_v12  ;;  %v1401_v31 = vpop.f32.mrf.mxu3  ;;  %1749 = vmatmul.bf16.gmra.mxu1 %v5162_v22  ;;  %v1955_v35 = vmul.f32 0.01, %v1574_v11  ;;  %vm1875_vm4 = vcmp.gt.f32.partialorder %v1574_v11, 0.0  ;;  %2767 = vmatpush.bf16.msrb.mxu3 %v4037_v32  ;;  %v4324_v12 = vld [vmem:[#allocation5 + $0x270] sm:$0xf] }
 0x238   : > { %v1402_v40 = vadd.f32 %v1401_v31, %v5235_v52  ;;  %v4228_v31 = vld [vmem:[#allocation5 + $0x1b0] sm:$0xf] }
 0x239   : > { %vm1878_vm3 = vcmp.gt.f32.partialorder %v1458_v8, 0.0  ;;  %v1958_v17 = vmul.f32 0.01, %v1458_v8  ;;  %v2035_v46 = vsel %vm1875_vm4, %v1574_v11, %v1955_v35  ;;  %v4566_v11 = vld [vmem:[#allocation5 + $0x278] sm:$0xf0] }
 0x23a   : > { %v4325_v20 = vor.u32 %v4566_v11, %v4324_v12 }
 0x23b   : > { %v2038_v37 = vsel %vm1878_vm3, %v1458_v8, %v1958_v17  ;;  %v4518_v8 = vld [vmem:[#allocation5 + $0xf8] sm:$0xf0]  ;;  %v4229_v17 = vor.u32 %v4542_v49, %v4228_v31 }
 0x23c   : > { %v5350_v28 = vpop.f32.mrf.mxu1  ;;  %v1575_v21 = vpop.f32.mrf.mxu2  ;;  %v5352_v30 = vpack.c.bf16 %v2038_v37, %v2034_v23  ;;  %2944 = vmatpush.bf16.msrb.mxu2 %v4325_v20  ;;  %v4133_v13 = vor.u32 %v4518_v8, %v4132_v45  ;;  %v4120_v20 = vld [vmem:[#allocation5 + $0xd8] sm:$0xf] }
 0x23d   : > { %v1576_v60 = vadd.f32 %v1575_v21, %v1517_v57  ;;  %2885 = vmatpush.bf16.msra.mxu1 %v4229_v17  ;;  %v1527_v11 = vadd.f32 %v5350_v28, %v5241_v3 }
 0x23e   : > { %5908 = vst [vmem:[#allocation11_spill] sm:$0xff] %v5352_v30  ;;  %v1460_v24 = vpop.f32.mrf.mxu0  ;;  %2826 = vmatpush.bf16.msrb.mxu0 %v4133_v13 }
 0x23f   : > { %vm1879_vm5 = vcmp.gt.f32.partialorder %v1576_v60, 0.0  ;;  %v1959_v36 = vmul.f32 0.01, %v1576_v60  ;;  %v1461_v0 = vadd.f32 %v1460_v24, %v1402_v40  ;;  %v1403_v42 = vpop.f32.mrf.mxu3 }
 0x240   : > { %v1404_v63 = vadd.f32 %v1403_v42, %v5235_v52 }
 0x241   : > { %1685 = vmatmul.bf16.gmra.mxu0 %v5170_v44  ;;  %1803 = vmatmul.bf16.gmra.mxu2 %v5170_v44  ;;  %v2039_v26 = vsel %vm1879_vm5, %v1576_v60, %v1959_v36  ;;  %v1962_v2 = vmul.f32 0.01, %v1461_v0  ;;  %vm1882_vm6 = vcmp.gt.f32.partialorder %v1461_v0, 0.0 }
 0x242   : > { %v5357_v43 = vpack.c.bf16 %v2039_v26, %v2035_v46  ;;  %v4491_v26 = vld [vmem:[#allocation5 + $0x20] sm:$0xf0] }
 0x243   : > { %v2042_v38 = vsel %vm1882_vm6, %v1461_v0, %v1962_v2  ;;  %v4024_v0 = vld [vmem:[#allocation5 + $0x18] sm:$0xf] }
 0x244   : > { %v5361_v61 = vpop.f32.mrf.mxu1  ;;  %v1578_v53 = vpop.f32.mrf.mxu2  ;;  %1631 = vmatmul.bf16.gmra.mxu3 %v5162_v22  ;;  %v1522_v22 = vadd.f32 %v5332_v25, %v5241_v3  ;;  %v4025_v32 = vor.u32 %v4491_v26, %v4024_v0 }
 0x245   : > { %v1579_v1 = vadd.f32 %v1578_v53, %v1520_v47  ;;  %v1525_v47 = vadd.f32 %v5343_v9, %v5241_v3  ;;  %v4312_v9 = vld [vmem:[#allocation5 + $0x258] sm:$0xf] }
 0x246   : > { %v1462_v44 = vpop.f32.mrf.mxu0  ;;  %2768 = vmatpush.bf16.msrb.mxu3 %v4025_v32 }
 0x247   : > { %v1463_v4 = vadd.f32 %v1462_v44, %v1404_v63  ;;  %v1406_v7 = vpop.f32.mrf.mxu3  ;;  %1754 = vmatmul.bf16.gmra.mxu1 %v5177_v56  ;;  %v1963_v35 = vmul.f32 0.01, %v1579_v1  ;;  %vm1883_vm8 = vcmp.gt.f32.partialorder %v1579_v1, 0.0 }
 0x248   : > { %v1407_v40 = vadd.f32 %v1406_v7, %v5235_v52 }
 0x249   : > { %vm1886_vm7 = vcmp.gt.f32.partialorder %v1463_v4, 0.0  ;;  %v1966_v19 = vmul.f32 0.01, %v1463_v4  ;;  %v2043_v58 = vsel %vm1883_vm8, %v1579_v1, %v1963_v35 }
 0x24b   : > { %v2046_v57 = vsel %vm1886_vm7, %v1463_v4, %v1966_v19  ;;  %v4563_v19 = vld [vmem:[#allocation5 + $0x260] sm:$0xf0] }
 0x24c   : > { %v5368_v23 = vpop.f32.mrf.mxu1  ;;  %v1580_v37 = vpop.f32.mrf.mxu2  ;;  %v5370_v21 = vpack.c.bf16 %v2046_v57, %v2042_v38  ;;  %v4313_v45 = vor.u32 %v4563_v19, %v4312_v9 }
 0x24d   : > { %v1581_v60 = vadd.f32 %v1580_v37, %v1522_v22 }
 0x24e   : > { %5909 = vst [vmem:[#allocation12_spill] sm:$0xff] %v5370_v21  ;;  %v1465_v25 = vpop.f32.mrf.mxu0  ;;  %2945 = vmatpush.bf16.msrb.mxu2 %v4313_v45 }
 0x24f   : > { %vm1887_vm9 = vcmp.gt.f32.partialorder %v1581_v60, 0.0  ;;  %v1967_v24 = vmul.f32 0.01, %v1581_v60  ;;  %v1466_v36 = vadd.f32 %v1465_v25, %v1407_v40  ;;  %v1408_v42 = vpop.f32.mrf.mxu3  ;;  %v4216_v25 = vld [vmem:[#allocation5 + $0x198] sm:$0xf] }
 0x250   : > { %v1409_v44 = vadd.f32 %v1408_v42, %v5235_v52 }
 0x251   : > { %1690 = vmatmul.bf16.gmra.mxu0 %v5185_v15  ;;  %1808 = vmatmul.bf16.gmra.mxu2 %v5185_v15  ;;  %v2047_v46 = vsel %vm1887_vm9, %v1581_v60, %v1967_v24  ;;  %v1970_v4 = vmul.f32 0.01, %v1466_v36  ;;  %vm1890_vm10 = vcmp.gt.f32.partialorder %v1466_v36, 0.0  ;;  %v4539_v24 = vld [vmem:[#allocation5 + $0x1a0] sm:$0xf0] }
 0x252   : > { %v5375_v50 = vpack.c.bf16 %v2047_v46, %v2043_v58  ;;  %v1530_v46 = vadd.f32 %v5361_v61, %v5241_v3  ;;  %v4536_v61 = vld [vmem:[#allocation5 + $0x188] sm:$0xf0] }
 0x253   : > { %v2050_v8 = vsel %vm1890_vm10, %v1466_v36, %v1970_v4  ;;  %v4217_v36 = vor.u32 %v4539_v24, %v4216_v25  ;;  %v4108_v25 = vld [vmem:[#allocation5 + $0xc0] sm:$0xf] }
 0x254   : > { %5910 = vst [vmem:[#allocation13_spill] sm:$0xff] %v5375_v50  ;;  %v5379_v53 = vpop.f32.mrf.mxu1  ;;  %v1583_v63 = vpop.f32.mrf.mxu2  ;;  %1636 = vmatmul.bf16.gmra.mxu3 %v5177_v56  ;;  %v4515_v56 = vld [vmem:[#allocation5 + $0xe0] sm:$0xf0] }
 0x255   : > { %v1584_v2 = vadd.f32 %v1583_v63, %v1525_v47  ;;  %v4121_v22 = vor.u32 %v4515_v56, %v4120_v20  ;;  %2886 = vmatpush.bf16.msra.mxu1 %v4217_v36  ;;  %v4012_v20 = vld [vmem:[#allocation5] sm:$0xf]  ;;  %v4488_v56 = vld [vmem:[#allocation5 + $0x8] sm:$0xf0]  ;;  %v1535_v36 = vadd.f32 %v5379_v53, %v5241_v3 }
 0x256   : > { %v1467_v15 = vpop.f32.mrf.mxu0 }
 0x257   : > { %v1468_v1 = vadd.f32 %v1467_v15, %v1409_v44  ;;  %v1411_v7 = vpop.f32.mrf.mxu3  ;;  %1759 = vmatmul.bf16.gmra.mxu1 %v5192_v29  ;;  %v1971_v38 = vmul.f32 0.01, %v1584_v2  ;;  %2827 = vmatpush.bf16.msrb.mxu0 %v4121_v22  ;;  %vm1891_vm12 = vcmp.gt.f32.partialorder %v1584_v2, 0.0 }
 0x258   : > { %v1412_v57 = vadd.f32 %v1411_v7, %v5235_v52  ;;  %v1532_v7 = vadd.f32 %v5368_v23, %v5241_v3 }
 0x259   : > { %vm1894_vm11 = vcmp.gt.f32.partialorder %v1468_v1, 0.0  ;;  %v1974_v12 = vmul.f32 0.01, %v1468_v1  ;;  %v2051_v42 = vsel %vm1891_vm12, %v1584_v2, %v1971_v38 }
 0x25b   : > { %v2054_v31 = vsel %vm1894_vm11, %v1468_v1, %v1974_v12  ;;  %v4204_v1 = vld [vmem:[#allocation5 + $0x180] sm:$0xf] }
 0x25c   : > { %v5386_v49 = vpop.f32.mrf.mxu1  ;;  %v1585_v13 = vpop.f32.mrf.mxu2  ;;  %v5388_v17 = vpack.c.bf16 %v2054_v31, %v2050_v8 }
 0x25d   : > { %v1586_v37 = vadd.f32 %v1585_v13, %v1527_v11  ;;  %v4013_v13 = vor.u32 %v4488_v56, %v4012_v20  ;;  %v5427_v20 = vperm.slane %v5232_v51, 2  ;;  %v4194_v51 = vld [vmem:[#allocation5 + $0x174] sm:$0xf0] }
 0x25e   : > { %5911 = vst [vmem:[#allocation14_spill] sm:$0xff] %v5388_v17  ;;  %v1470_v28 = vpop.f32.mrf.mxu0 }
 0x25f   : > { %vm1895_vm13 = vcmp.gt.f32.partialorder %v1586_v37, 0.0  ;;  %v1975_v35 = vmul.f32 0.01, %v1586_v37  ;;  %v1471_v40 = vadd.f32 %v1470_v28, %v1412_v57  ;;  %v1413_v60 = vpop.f32.mrf.mxu3  ;;  %2769 = vmatpush.bf16.msrb.mxu3 %v4013_v13 }
 0x260   : > { %v1414_v32 = vadd.f32 %v1413_v60, %v5235_v52  ;;  %v4560_v60 = vld [vmem:[#allocation5 + $0x248] sm:$0xf0] }
 0x261   : > { %1695 = vmatmul.bf16.gmra.mxu0 %v5201_v59  ;;  %1813 = vmatmul.bf16.gmra.mxu2 %v5201_v59  ;;  %v2055_v0 = vsel %vm1895_vm13, %v1586_v37, %v1975_v35  ;;  %v1978_v15 = vmul.f32 0.01, %v1471_v40  ;;  %vm1898_vm14 = vcmp.gt.f32.partialorder %v1471_v40, 0.0 }
 0x262   : > { %v5393_v58 = vpack.c.bf16 %v2055_v0, %v2051_v42  ;;  %v4512_v0 = vld [vmem:[#allocation5 + $0xc8] sm:$0xf0] }
 0x263   : > { %v2058_v12 = vsel %vm1898_vm14, %v1471_v40, %v1978_v15  ;;  %v4300_v40 = vld [vmem:[#allocation5 + $0x240] sm:$0xf] }
 0x264   : > { %v1588_v26 = vpop.f32.mrf.mxu2  ;;  %1641 = vmatmul.bf16.gmra.mxu3 %v5192_v29  ;;  %v5398_v47 = vpop.f32.mrf.mxu1  ;;  %v4205_v29 = vor.u32 %v4536_v61, %v4204_v1  ;;  %v4301_v42 = vor.u32 %v4560_v60, %v4300_v40  ;;  %v4098_v1 = vld [vmem:[#allocation5 + $0xb4] sm:$0xf0] }
 0x265   : > { %v1589_v63 = vadd.f32 %v1588_v26, %v1530_v46 }
 0x266   : > { %v1472_v44 = vpop.f32.mrf.mxu0  ;;  %2887 = vmatpush.bf16.msra.mxu1 %v4205_v29  ;;  %2946 = vmatpush.bf16.msrb.mxu2 %v4301_v42 }
 0x267   : > { %v1473_v59 = vadd.f32 %v1472_v44, %v1414_v32  ;;  %v1416_v4 = vpop.f32.mrf.mxu3  ;;  %1764 = vmatmul.bf16.gmra.mxu1 %v5208_v54  ;;  %v1979_v22 = vmul.f32 0.01, %v1589_v63  ;;  %vm1899_vm0 = vcmp.gt.f32.partialorder %v1589_v63, 0.0  ;;  %v4109_v32 = vor.u32 %v4512_v0, %v4108_v25 }
 0x268   : > { %v1417_v8 = vadd.f32 %v1416_v4, %v5235_v52 }
 0x269   : > { %vm1902_vm15 = vcmp.gt.f32.partialorder %v1473_v59, 0.0  ;;  %v1982_v2 = vmul.f32 0.01, %v1473_v59  ;;  %v2059_v28 = vsel %vm1899_vm0, %v1589_v63, %v1979_v22  ;;  %2828 = vmatpush.bf16.msrb.mxu0 %v4109_v32  ;;  %v4556_v32 = vld [vmem:[#allocation5 + $0x22c] sm:$0xf] }
 0x26b   : > { %v2062_v9 = vsel %vm1902_vm15, %v1473_v59, %v1982_v2  ;;  %v4508_v2 = vld [vmem:[#allocation5 + $0xac] sm:$0xf] }
 0x26c   : > { %v1590_v11 = vpop.f32.mrf.mxu2  ;;  %v5404_v19 = vpop.f32.mrf.mxu1  ;;  %v5406_v45 = vpack.c.bf16 %v2062_v9, %v2058_v12  ;;  %v4101_v61 = vor.u32 %v4508_v2, %v4098_v1  ;;  %v4669_v2 = vld [vmem:[%s5889_s6] sm:$0xf] }
 0x26d   : > { %v1591_v31 = vadd.f32 %v1590_v11, %v1532_v7  ;;  %v5445_v1 = vperm.slane %v4669_v2, 3 }
 0x26e   : > { %v1475_v38 = vpop.f32.mrf.mxu0  ;;  %2998 = vmatpush.bf16.msra.mxu3 %v4101_v61 }
 0x26f   : > { %vm1903_vm1 = vcmp.gt.f32.partialorder %v1591_v31, 0.0  ;;  %v1983_v23 = vmul.f32 0.01, %v1591_v31  ;;  %v1476_v57 = vadd.f32 %v1475_v38, %v1417_v8  ;;  %v1418_v37 = vpop.f32.mrf.mxu3 }
 0x271   : > { %1700 = vmatmul.bf16.gmra.mxu0 %v5216_v27  ;;  %1818 = vmatmul.bf16.gmra.mxu2 %v5216_v27  ;;  %v2063_v35 = vsel %vm1903_vm1, %v1591_v31, %v1983_v23  ;;  %v1419_v27 = vadd.f32 %v1418_v37, %v5235_v52  ;;  %v1986_v15 = vmul.f32 0.01, %v1476_v57  ;;  %vm1906_vm2 = vcmp.gt.f32.partialorder %v1476_v57, 0.0  ;;  %v4386_v23 = vld [vmem:[#allocation5 + $0x2f4] sm:$0xf0] }
 0x272   : > { %v5411_v24 = vpack.c.bf16 %v2063_v35, %v2059_v28 }
 0x273   : > { %v2066_v7 = vsel %vm1906_vm2, %v1476_v57, %v1986_v15  ;;  %v4532_v57 = vld [vmem:[#allocation5 + $0x16c] sm:$0xf] }
 0x274   : > { %v1593_v46 = vpop.f32.mrf.mxu2  ;;  %1646 = vmatmul.bf16.gmra.mxu3 %v5208_v54  ;;  %v5416_v26 = vpop.f32.mrf.mxu1  ;;  %v1537_v54 = vadd.f32 %v5386_v49, %v5241_v3  ;;  %v4580_v49 = vld [vmem:[#allocation5 + $0x2ec] sm:$0xf]  ;;  %v4197_v40 = vor.u32 %v4532_v57, %v4194_v51 }
 0x275   : > { %v1594_v63 = vadd.f32 %v1593_v46, %v1535_v36  ;;  %v4389_v35 = vor.u32 %v4580_v49, %v4386_v23 }
 0x276   : > { %v1477_v44 = vpop.f32.mrf.mxu0  ;;  %3057 = vmatpush.bf16.msra.mxu0 %v4197_v40 }
 0x277   : > { %v1478_v59 = vadd.f32 %v1477_v44, %v1419_v27  ;;  %v1607_v4 = vpop.f32.mrf.mxu3  ;;  %1769 = vmatmul.bf16.gmra.mxu1 %v5225_v34  ;;  %v1987_v11 = vmul.f32 0.01, %v1594_v63  ;;  %vm1907_vm4 = vcmp.gt.f32.partialorder %v1594_v63, 0.0  ;;  %3175 = vmatpush.bf16.msra.mxu2 %v4389_v35  ;;  %v4290_v27 = vld [vmem:[#allocation5 + $0x234] sm:$0xf0] }
 0x278   : > { %v1608_v3 = vadd.f32 %v1607_v4, %v5427_v20  ;;  %v4293_v44 = vor.u32 %v4556_v32, %v4290_v27  ;;  %v4374_v35 = vld [vmem:[#allocation5 + $0x2dc] sm:$0xf0] }
 0x279   : > { %vm1910_vm3 = vcmp.gt.f32.partialorder %v1478_v59, 0.0  ;;  %v1990_v53 = vmul.f32 0.01, %v1478_v59  ;;  %v2067_v13 = vsel %vm1907_vm4, %v1594_v63, %v1987_v11  ;;  %v1728_v11 = vadd.f32 %v5404_v19, %v5445_v1 }
 0x27a   : > { %3116 = vmatpush.bf16.msrb.mxu1 %v4293_v44 }
 0x27b   : > { %v2070_v52 = vsel %vm1910_vm3, %v1478_v59, %v1990_v53 }
 0x27c   : > { %v1595_v29 = vpop.f32.mrf.mxu2  ;;  %v5422_v12 = vpop.f32.mrf.mxu1  ;;  %v5424_v9 = vpack.c.bf16 %v2070_v52, %v2066_v7  ;;  %v1726_v7 = vadd.f32 %v5398_v47, %v5445_v1 }
 0x27d   : > { %v1596_v56 = vadd.f32 %v1595_v29, %v1537_v54  ;;  %v4505_v29 = vld [vmem:[#allocation5 + $0x94] sm:$0xf] }
 0x27e   : > { %v1666_v22 = vpop.f32.mrf.mxu0 }
 0x27f   : > { %vm1911_vm5 = vcmp.gt.f32.partialorder %v1596_v56, 0.0  ;;  %v1991_v8 = vmul.f32 0.01, %v1596_v56  ;;  %v1609_v31 = vpop.f32.mrf.mxu3  ;;  %v1667_v28 = vadd.f32 %v1666_v22, %v1608_v3 }
 0x280   : > { %v1610_v36 = vadd.f32 %v1609_v31, %v5427_v20 }
 0x281   : > { %1705 = vmatmul.bf16.gmra.mxu0 %v5243_v5  ;;  %1823 = vmatmul.bf16.gmra.mxu2 %v5243_v5  ;;  %v2071_v38 = vsel %vm1911_vm5, %v1596_v56, %v1991_v8  ;;  %v1916_v42 = vmul.f32 0.01, %v1667_v28  ;;  %vm1836_vm6 = vcmp.gt.f32.partialorder %v1667_v28, 0.0  ;;  %v4086_v56 = vld [vmem:[#allocation5 + $0x9c] sm:$0xf0] }
 0x282   : > { %v5432_v37 = vpack.c.bf16 %v2071_v38, %v2067_v13  ;;  %v4089_v31 = vor.u32 %v4505_v29, %v4086_v56  ;;  %v4502_v29 = vld [vmem:[#allocation5 + $0x7c] sm:$0xf]  ;;  %v1733_v56 = vadd.f32 %v5422_v12, %v5445_v1 }
 0x283   : > { %v1996_v15 = vsel %vm1836_vm6, %v1667_v28, %v1916_v42  ;;  %v4577_v28 = vld [vmem:[#allocation5 + $0x2d4] sm:$0xf] }
 0x284   : > { %1651 = vmatmul.bf16.gmra.mxu3 %v5225_v34  ;;  %v5435_v60 = vpop.f32.mrf.mxu1  ;;  %v1784_v25 = vpop.f32.mrf.mxu2  ;;  %v4553_v42 = vld [vmem:[#allocation5 + $0x214] sm:$0xf] }
 0x285   : > { %v1785_v22 = vadd.f32 %v1784_v25, %v1726_v7  ;;  %2999 = vmatpush.bf16.msra.mxu3 %v4089_v31  ;;  %v4377_v25 = vor.u32 %v4577_v28, %v4374_v35  ;;  %v4574_v35 = vld [vmem:[#allocation5 + $0x2bc] sm:$0xf] }
 0x286   : > { %v1668_v5 = vpop.f32.mrf.mxu0 }
 0x287   : > { %v1669_v0 = vadd.f32 %v1668_v5, %v1610_v36  ;;  %v1612_v46 = vpop.f32.mrf.mxu3  ;;  %v1917_v23 = vmul.f32 0.01, %v1785_v22  ;;  %vm1837_vm8 = vcmp.gt.f32.partialorder %v1785_v22, 0.0  ;;  %v4529_v36 = vld [vmem:[#allocation5 + $0x154] sm:$0xf]  ;;  %3176 = vmatpush.bf16.msra.mxu2 %v4377_v25 }
 0x288   : > { %v1613_v52 = vadd.f32 %v1612_v46, %v5427_v20  ;;  %v4182_v5 = vld [vmem:[#allocation5 + $0x15c] sm:$0xf0]  ;;  %v4526_v25 = vld [vmem:[#allocation5 + $0x13c] sm:$0xf] }
 0x289   : > { %vm1840_vm7 = vcmp.gt.f32.partialorder %v1669_v0, 0.0  ;;  %v1920_v63 = vmul.f32 0.01, %v1669_v0  ;;  %v4185_v27 = vor.u32 %v4529_v36, %v4182_v5  ;;  %v1997_v2 = vsel %vm1837_vm8, %v1785_v22, %v1917_v23  ;;  %v4074_v22 = vld [vmem:[#allocation5 + $0x84] sm:$0xf0] }
 0x28a   : > { %v4077_v31 = vor.u32 %v4502_v29, %v4074_v22  ;;  %v4170_v36 = vld [vmem:[#allocation5 + $0x144] sm:$0xf0] }
 0x28b   : > { %v2000_v59 = vsel %vm1840_vm7, %v1669_v0, %v1920_v63  ;;  %v4278_v0 = vld [vmem:[#allocation5 + $0x21c] sm:$0xf0]  ;;  %3058 = vmatpush.bf16.msra.mxu0 %v4185_v27  ;;  %v4266_v29 = vld [vmem:[#allocation5 + $0x204] sm:$0xf0] }
 0x28c   : > { %v5438_v34 = vpack.c.bf16 %v2000_v59, %v1996_v15  ;;  %v5440_v4 = vpop.f32.mrf.mxu1  ;;  %v1786_v53 = vpop.f32.mrf.mxu2  ;;  %v4281_v63 = vor.u32 %v4553_v42, %v4278_v0  ;;  %3000 = vmatpush.bf16.msra.mxu3 %v4077_v31  ;;  %v1736_v31 = vadd.f32 %v5435_v60, %v5445_v1 }
 0x28d   : > { %v1787_v3 = vadd.f32 %v1786_v53, %v1728_v11  ;;  %v1731_v11 = vadd.f32 %v5416_v26, %v5445_v1  ;;  %v1738_v22 = vadd.f32 %v5440_v4, %v5445_v1 }
 0x28e   : > { %v1671_v54 = vpop.f32.mrf.mxu0  ;;  %2888 = vmatmul.bf16.vlgmr.msra.gmra.mxu1 %v5438_v34 }
 0x28f   : > { %v1614_v61 = vpop.f32.mrf.mxu3  ;;  %v1672_v8 = vadd.f32 %v1671_v54, %v1613_v52  ;;  %v1921_v19 = vmul.f32 0.01, %v1787_v3  ;;  %vm1841_vm10 = vcmp.gt.f32.partialorder %v1787_v3, 0.0  ;;  %3117 = vmatpush.bf16.msrb.mxu1 %v4281_v63 }
 0x290   : > { %v1615_v47 = vadd.f32 %v1614_v61, %v5427_v20 }
 0x291   : > { %1710 = vmatmul.bf16.gmra.mxu0 %v5263_v6  ;;  %1828 = vmatmul.bf16.gmra.mxu2 %v5263_v6  ;;  %v1924_v6 = vmul.f32 0.01, %v1672_v8  ;;  %vm1844_vm9 = vcmp.gt.f32.partialorder %v1672_v8, 0.0  ;;  %v2001_v44 = vsel %vm1841_vm10, %v1787_v3, %v1921_v19 }
 0x292   : > { %v5465_v61 = vpack.c.bf16 %v2001_v44, %v1997_v2 }
 0x293   : > { %v2004_v46 = vsel %vm1844_vm9, %v1672_v8, %v1924_v6 }
 0x294   : > { %v5455_v49 = vpop.f32.mrf.mxu1  ;;  %v1789_v13 = vpop.f32.mrf.mxu2  ;;  %2770 = vmatmul.bf16.vlgmr.msrb.gmra.mxu3 %v5258_v39 }
 0x295   : > { %v1790_v3 = vadd.f32 %v1789_v13, %v1731_v11 }
 0x296   : > { %v1673_v38 = vpop.f32.mrf.mxu0 }
 0x297   : > { %v1674_v57 = vadd.f32 %v1673_v38, %v1615_v47  ;;  %v1617_v51 = vpop.f32.mrf.mxu3  ;;  %vm1845_vm12 = vcmp.gt.f32.partialorder %v1790_v3, 0.0  ;;  %v1925_v19 = vmul.f32 0.01, %v1790_v3 }
 0x298   : > { %v1618_v52 = vadd.f32 %v1617_v51, %v5427_v20 }
 0x299   : > { %vm1848_vm11 = vcmp.gt.f32.partialorder %v1674_v57, 0.0  ;;  %v1928_v40 = vmul.f32 0.01, %v1674_v57  ;;  %v2005_v2 = vsel %vm1845_vm12, %v1790_v3, %v1925_v19 }
 0x29b   : > { %v2008_v32 = vsel %vm1848_vm11, %v1674_v57, %v1928_v40  ;;  %v4362_v40 = vld [vmem:[#allocation5 + $0x2c4] sm:$0xf0] }
 0x29c   : > { %v5459_v15 = vpop.f32.mrf.mxu1  ;;  %v1791_v59 = vpop.f32.mrf.mxu2  ;;  %v5461_v53 = vpack.c.bf16 %v2008_v32, %v2004_v46  ;;  %v4365_v0 = vor.u32 %v4574_v35, %v4362_v40  ;;  %v4173_v46 = vor.u32 %v4526_v25, %v4170_v36  ;;  %v4499_v35 = vld [vmem:[#allocation5 + $0x64] sm:$0xf]  ;;  %v4062_v40 = vld [vmem:[#allocation5 + $0x6c] sm:$0xf0] }
 0x29d   : > { %v1792_v47 = vadd.f32 %v1791_v59, %v1733_v56 }
 0x29e   : > { %v1676_v54 = vpop.f32.mrf.mxu0  ;;  %2893 = vmatmul.bf16.gmra.mxu1 %v5461_v53  ;;  %3177 = vmatpush.bf16.msra.mxu2 %v4365_v0 }
 0x29f   : > { %v1619_v7 = vpop.f32.mrf.mxu3  ;;  %v1677_v8 = vadd.f32 %v1676_v54, %v1618_v52  ;;  %v1929_v12 = vmul.f32 0.01, %v1792_v47  ;;  %vm1849_vm14 = vcmp.gt.f32.partialorder %v1792_v47, 0.0  ;;  %3059 = vmatpush.bf16.msra.mxu0 %v4173_v46  ;;  %v4550_v52 = vld [vmem:[#allocation5 + $0x1fc] sm:$0xf] }
 0x2a0   : > { %v1620_v6 = vadd.f32 %v1619_v7, %v5427_v20  ;;  %v4269_v56 = vor.u32 %v4550_v52, %v4266_v29  ;;  %v4350_v52 = vld [vmem:[#allocation5 + $0x2ac] sm:$0xf0] }
 0x2a1   : > { %2829 = vmatmul.bf16.vlgmr.msrb.gmra.mxu0 %v5267_v16  ;;  %2947 = vmatmul.bf16.vlgmr.msrb.gmra.mxu2 %v5465_v61  ;;  %v1932_v51 = vmul.f32 0.01, %v1677_v8  ;;  %vm1852_vm13 = vcmp.gt.f32.partialorder %v1677_v8, 0.0  ;;  %v2009_v44 = vsel %vm1849_vm14, %v1792_v47, %v1929_v12 }
 0x2a2   : > { %v5484_v7 = vpack.c.bf16 %v2009_v44, %v2005_v2  ;;  %3118 = vmatpush.bf16.msrb.mxu1 %v4269_v56  ;;  %v4523_v56 = vld [vmem:[#allocation5 + $0x124] sm:$0xf] }
 0x2a3   : > { %v2012_v5 = vsel %vm1852_vm13, %v1677_v8, %v1932_v51 }
 0x2a4   : > { %v5474_v38 = vpop.f32.mrf.mxu1  ;;  %v1794_v23 = vpop.f32.mrf.mxu2  ;;  %2775 = vmatmul.bf16.gmra.mxu3 %v5280_v62 }
 0x2a5   : > { %v1795_v51 = vadd.f32 %v1794_v23, %v1736_v31  ;;  %v4547_v31 = vld [vmem:[#allocation5 + $0x1e4] sm:$0xf] }
 0x2a6   : > { %v1678_v57 = vpop.f32.mrf.mxu0 }
 0x2a7   : > { %v1679_v28 = vadd.f32 %v1678_v57, %v1620_v6  ;;  %v1622_v26 = vpop.f32.mrf.mxu3  ;;  %v1933_v60 = vmul.f32 0.01, %v1795_v51  ;;  %vm1853_vm3 = vcmp.gt.f32.partialorder %v1795_v51, 0.0 }
 0x2a8   : > { %v1623_v11 = vadd.f32 %v1622_v26, %v5427_v20 }
 0x2a9   : > { %vm1856_vm15 = vcmp.gt.f32.partialorder %v1679_v28, 0.0  ;;  %v1936_v13 = vmul.f32 0.01, %v1679_v28  ;;  %v2013_v44 = vsel %vm1853_vm3, %v1795_v51, %v1933_v60 }
 0x2ab   : > { %v2016_v42 = vsel %vm1856_vm15, %v1679_v28, %v1936_v13 }
 0x2ac   : > { %v5478_v32 = vpop.f32.mrf.mxu1  ;;  %v1796_v27 = vpop.f32.mrf.mxu2  ;;  %v5480_v63 = vpack.c.bf16 %v2016_v42, %v2012_v5  ;;  %v4065_v5 = vor.u32 %v4499_v35, %v4062_v40 }
 0x2ad   : > { %v1797_v3 = vadd.f32 %v1796_v27, %v1738_v22  ;;  %v1743_v22 = vadd.f32 %v5459_v15, %v5445_v1 }
 0x2ae   : > { %v1681_v59 = vpop.f32.mrf.mxu0  ;;  %2898 = vmatmul.bf16.gmra.mxu1 %v5480_v63  ;;  %3001 = vmatpush.bf16.msra.mxu3 %v4065_v5  ;;  %v4496_v5 = vld [vmem:[#allocation5 + $0x4c] sm:$0xf] }
 0x2af   : > { %v1624_v54 = vpop.f32.mrf.mxu3  ;;  %v1682_v8 = vadd.f32 %v1681_v59, %v1623_v11  ;;  %v1937_v13 = vmul.f32 0.01, %v1797_v3  ;;  %vm1857_vm1 = vcmp.gt.f32.partialorder %v1797_v3, 0.0 }
 0x2b0   : > { %v1625_v57 = vadd.f32 %v1624_v54, %v5427_v20  ;;  %v4571_v54 = vld [vmem:[#allocation5 + $0x2a4] sm:$0xf] }
 0x2b1   : > { %2834 = vmatmul.bf16.gmra.mxu0 %v5285_v18  ;;  %2952 = vmatmul.bf16.gmra.mxu2 %v5484_v7  ;;  %v1940_v26 = vmul.f32 0.01, %v1682_v8  ;;  %vm1860_vm0 = vcmp.gt.f32.partialorder %v1682_v8, 0.0  ;;  %v2017_v46 = vsel %vm1857_vm1, %v1797_v3, %v1937_v13  ;;  %v4353_v11 = vor.u32 %v4571_v54, %v4350_v52  ;;  %v4254_v3 = vld [vmem:[#allocation5 + $0x1ec] sm:$0xf0] }
 0x2b2   : > { %v5502_v2 = vpack.c.bf16 %v2017_v46, %v2013_v44  ;;  %v4050_v46 = vld [vmem:[#allocation5 + $0x54] sm:$0xf0] }
 0x2b3   : > { %v2020_v25 = vsel %vm1860_vm0, %v1682_v8, %v1940_v26  ;;  %v4158_v8 = vld [vmem:[#allocation5 + $0x12c] sm:$0xf0]  ;;  %3178 = vmatpush.bf16.msra.mxu2 %v4353_v11  ;;  %v1741_v26 = vadd.f32 %v5455_v49, %v5445_v1  ;;  %v4053_v54 = vor.u32 %v4496_v5, %v4050_v46 }
 0x2b4   : > { %v5493_v47 = vpop.f32.mrf.mxu1  ;;  %v1799_v6 = vpop.f32.mrf.mxu2  ;;  %2780 = vmatmul.bf16.gmra.mxu3 %v5298_v48  ;;  %v4161_v51 = vor.u32 %v4523_v56, %v4158_v8 }
 0x2b5   : > { %v1800_v15 = vadd.f32 %v1799_v6, %v1741_v26  ;;  %3002 = vmatpush.bf16.msra.mxu3 %v4053_v54  ;;  %v4146_v26 = vld [vmem:[#allocation5 + $0x114] sm:$0xf0] }
 0x2b6   : > { %v1683_v28 = vpop.f32.mrf.mxu0  ;;  %3060 = vmatpush.bf16.msra.mxu0 %v4161_v51  ;;  %v4338_v51 = vld [vmem:[#allocation5 + $0x294] sm:$0xf0] }
 0x2b7   : > { %v1684_v19 = vadd.f32 %v1683_v28, %v1625_v57  ;;  %v1627_v12 = vpop.f32.mrf.mxu3  ;;  %v4257_v28 = vor.u32 %v4547_v31, %v4254_v3  ;;  %vm1861_vm7 = vcmp.gt.f32.partialorder %v1800_v15, 0.0  ;;  %v4568_v3 = vld [vmem:[#allocation5 + $0x28c] sm:$0xf]  ;;  %v4242_v54 = vld [vmem:[#allocation5 + $0x1d4] sm:$0xf0] }
 0x2b8   : > { %v1628_v29 = vadd.f32 %v1627_v12, %v5427_v20 }
 0x2b9   : > { %vm1864_vm2 = vcmp.gt.f32.partialorder %v1684_v19, 0.0  ;;  %v1944_v4 = vmul.f32 0.01, %v1684_v19  ;;  %3119 = vmatpush.bf16.msrb.mxu1 %v4257_v28  ;;  %v4520_v28 = vld [vmem:[#allocation5 + $0x10c] sm:$0xf] }
 0x2bb   : > { %v2024_v36 = vsel %vm1864_vm2, %v1684_v19, %v1944_v4 }
 0x2bc   : > { %v5497_v42 = vpop.f32.mrf.mxu1  ;;  %v1801_v0 = vpop.f32.mrf.mxu2  ;;  %v5499_v23 = vpack.c.bf16 %v2024_v36, %v2020_v25 }
 0x2bd   : > { %v1802_v19 = vadd.f32 %v1801_v0, %v1743_v22  ;;  %v1941_v0 = vmul.f32 0.01, %v1800_v15 }
 0x2be   : > { %v1686_v27 = vpop.f32.mrf.mxu0  ;;  %2903 = vmatmul.bf16.gmra.mxu1 %v5499_v23 }
 0x2bf   : > { %v1629_v59 = vpop.f32.mrf.mxu3  ;;  %v1687_v57 = vadd.f32 %v1686_v27, %v1628_v29  ;;  %v1945_v36 = vmul.f32 0.01, %v1802_v19  ;;  %vm1865_vm5 = vcmp.gt.f32.partialorder %v1802_v19, 0.0  ;;  %v2021_v56 = vsel %vm1861_vm7, %v1800_v15, %v1941_v0 }
 0x2c0   : > { %v1630_v4 = vadd.f32 %v1629_v59, %v5427_v20  ;;  %v1746_v15 = vadd.f32 %v5474_v38, %v5445_v1 }
 0x2c1   : > { %2839 = vmatmul.bf16.gmra.mxu0 %v5303_v10  ;;  %2957 = vmatmul.bf16.gmra.mxu2 %v5502_v2  ;;  %v1948_v60 = vmul.f32 0.01, %v1687_v57  ;;  %vm1868_vm4 = vcmp.gt.f32.partialorder %v1687_v57, 0.0  ;;  %v2025_v29 = vsel %vm1865_vm5, %v1802_v19, %v1945_v36 }
 0x2c2   : > { %v5520_v8 = vpack.c.bf16 %v2025_v29, %v2021_v56 }
 0x2c3   : > { %v2028_v27 = vsel %vm1868_vm4, %v1687_v57, %v1948_v60  ;;  %v1748_v57 = vadd.f32 %v5478_v32, %v5445_v1 }
 0x2c4   : > { %v5511_v12 = vpop.f32.mrf.mxu1  ;;  %v1804_v13 = vpop.f32.mrf.mxu2  ;;  %2785 = vmatmul.bf16.gmra.mxu3 %v5316_v41 }
 0x2c5   : > { %v1805_v32 = vadd.f32 %v1804_v13, %v1746_v15  ;;  %v1753_v15 = vadd.f32 %v5497_v42, %v5445_v1 }
 0x2c6   : > { %v1688_v35 = vpop.f32.mrf.mxu0 }
 0x2c7   : > { %v1689_v40 = vadd.f32 %v1688_v35, %v1630_v4  ;;  %v1632_v25 = vpop.f32.mrf.mxu3  ;;  %v4341_v4 = vor.u32 %v4568_v3, %v4338_v51  ;;  %v4149_v35 = vor.u32 %v4520_v28, %v4146_v26  ;;  %v1949_v29 = vmul.f32 0.01, %v1805_v32 }
 0x2c8   : > { %v1633_v31 = vadd.f32 %v1632_v25, %v5427_v20  ;;  %vm1869_vm11 = vcmp.gt.f32.partialorder %v1805_v32, 0.0 }
 0x2c9   : > { %vm1872_vm6 = vcmp.gt.f32.partialorder %v1689_v40, 0.0  ;;  %v1952_v49 = vmul.f32 0.01, %v1689_v40  ;;  %3179 = vmatpush.bf16.msra.mxu2 %v4341_v4  ;;  %3061 = vmatpush.bf16.msra.mxu0 %v4149_v35  ;;  %v2029_v51 = vsel %vm1869_vm11, %v1805_v32, %v1949_v29  ;;  %v1751_v4 = vadd.f32 %v5493_v47, %v5445_v1  ;;  %v4493_v35 = vld [vmem:[#allocation5 + $0x34] sm:$0xf] }
 0x2ca   : > { %v4565_v29 = vld [vmem:[#allocation5 + $0x274] sm:$0xf] }
 0x2cb   : > { %v2032_v44 = vsel %vm1872_vm6, %v1689_v40, %v1952_v49 }
 0x2cc   : > { %v5515_v59 = vpop.f32.mrf.mxu1  ;;  %v1806_v52 = vpop.f32.mrf.mxu2  ;;  %v5517_v6 = vpack.c.bf16 %v2032_v44, %v2028_v27  ;;  %v4544_v27 = vld [vmem:[#allocation5 + $0x1cc] sm:$0xf] }
 0x2cd   : > { %v1807_v60 = vadd.f32 %v1806_v52, %v1748_v57  ;;  %v4245_v52 = vor.u32 %v4544_v27, %v4242_v54 }
 0x2ce   : > { %v1691_v11 = vpop.f32.mrf.mxu0  ;;  %2908 = vmatmul.bf16.gmra.mxu1 %v5517_v6 }
 0x2cf   : > { %v1634_v22 = vpop.f32.mrf.mxu3  ;;  %v1692_v19 = vadd.f32 %v1691_v11, %v1633_v31  ;;  %v1953_v44 = vmul.f32 0.01, %v1807_v60  ;;  %vm1873_vm9 = vcmp.gt.f32.partialorder %v1807_v60, 0.0  ;;  %3120 = vmatpush.bf16.msrb.mxu1 %v4245_v52 }
 0x2d0   : > { %v1635_v36 = vadd.f32 %v1634_v22, %v5427_v20 }
 0x2d1   : > { %2844 = vmatmul.bf16.gmra.mxu0 %v5321_v14  ;;  %2962 = vmatmul.bf16.gmra.mxu2 %v5520_v8  ;;  %v1956_v5 = vmul.f32 0.01, %v1692_v19  ;;  %vm1876_vm8 = vcmp.gt.f32.partialorder %v1692_v19, 0.0  ;;  %v2033_v3 = vsel %vm1873_vm9, %v1807_v60, %v1953_v44  ;;  %v4038_v60 = vld [vmem:[#allocation5 + $0x3c] sm:$0xf0] }
 0x2d2   : > { %v5538_v26 = vpack.c.bf16 %v2033_v3, %v2029_v51  ;;  %v4041_v32 = vor.u32 %v4493_v35, %v4038_v60  ;;  %v4134_v3 = vld [vmem:[#allocation5 + $0xfc] sm:$0xf0] }
 0x2d3   : > { %v2036_v11 = vsel %vm1876_vm8, %v1692_v19, %v1956_v5  ;;  %v4230_v51 = vld [vmem:[#allocation5 + $0x1bc] sm:$0xf0] }
 0x2d4   : > { %v5529_v40 = vpop.f32.mrf.mxu1  ;;  %v1809_v25 = vpop.f32.mrf.mxu2  ;;  %2790 = vmatmul.bf16.gmra.mxu3 %v5334_v33 }
 0x2d5   : > { %3003 = vmatpush.bf16.msra.mxu3 %v4041_v32 }
 0x2d6   : > { %v1693_v49 = vpop.f32.mrf.mxu0 }
 0x2d7   : > { %v1694_v0 = vadd.f32 %v1693_v49, %v1635_v36  ;;  %v1637_v46 = vpop.f32.mrf.mxu3  ;;  %v1810_v36 = vadd.f32 %v1809_v25, %v1751_v4  ;;  %v4326_v25 = vld [vmem:[#allocation5 + $0x27c] sm:$0xf0] }
 0x2d8   : > { %v1638_v19 = vadd.f32 %v1637_v46, %v5427_v20 }
 0x2d9   : > { %vm1880_vm10 = vcmp.gt.f32.partialorder %v1694_v0, 0.0  ;;  %v1960_v38 = vmul.f32 0.01, %v1694_v0  ;;  %v1957_v44 = vmul.f32 0.01, %v1810_v36  ;;  %vm1877_vm12 = vcmp.gt.f32.partialorder %v1810_v36, 0.0 }
 0x2db   : > { %v2040_v56 = vsel %vm1880_vm10, %v1694_v0, %v1960_v38 }
 0x2dc   : > { %v5533_v22 = vpop.f32.mrf.mxu1  ;;  %v1811_v13 = vpop.f32.mrf.mxu2  ;;  %v5535_v31 = vpack.c.bf16 %v2040_v56, %v2036_v11  ;;  %v4329_v56 = vor.u32 %v4565_v29, %v4326_v25 }
 0x2dd   : > { %v1812_v5 = vadd.f32 %v1811_v13, %v1753_v15  ;;  %v4517_v13 = vld [vmem:[#allocation5 + $0xf4] sm:$0xf] }
 0x2de   : > { %v1696_v57 = vpop.f32.mrf.mxu0  ;;  %2913 = vmatmul.bf16.gmra.mxu1 %v5535_v31  ;;  %3180 = vmatpush.bf16.msra.mxu2 %v4329_v56 }
 0x2df   : > { %v1639_v28 = vpop.f32.mrf.mxu3  ;;  %v1697_v49 = vadd.f32 %v1696_v57, %v1638_v19  ;;  %v1961_v42 = vmul.f32 0.01, %v1812_v5  ;;  %vm1881_vm14 = vcmp.gt.f32.partialorder %v1812_v5, 0.0  ;;  %v4541_v57 = vld [vmem:[#allocation5 + $0x1b4] sm:$0xf]  ;;  %v4137_v19 = vor.u32 %v4517_v13, %v4134_v3 }
 0x2e0   : > { %v1640_v47 = vadd.f32 %v1639_v28, %v5427_v20  ;;  %v4233_v35 = vor.u32 %v4541_v57, %v4230_v51 }
 0x2e1   : > { %2849 = vmatmul.bf16.gmra.mxu0 %v5339_v55  ;;  %2967 = vmatmul.bf16.gmra.mxu2 %v5538_v26  ;;  %v1964_v54 = vmul.f32 0.01, %v1697_v49  ;;  %vm1884_vm13 = vcmp.gt.f32.partialorder %v1697_v49, 0.0  ;;  %v2041_v32 = vsel %vm1881_vm14, %v1812_v5, %v1961_v42  ;;  %v1758_v5 = vadd.f32 %v5515_v59, %v5445_v1  ;;  %v4026_v42 = vld [vmem:[#allocation5 + $0x24] sm:$0xf0] }
 0x2e2   : > { %3062 = vmatpush.bf16.msra.mxu0 %v4137_v19  ;;  %3121 = vmatpush.bf16.msrb.mxu1 %v4233_v35  ;;  %v4562_v19 = vld [vmem:[#allocation5 + $0x25c] sm:$0xf] }
 0x2e3   : > { %v2044_v28 = vsel %vm1884_vm13, %v1697_v49, %v1964_v54 }
 0x2e4   : > { %v1814_v0 = vpop.f32.mrf.mxu2  ;;  %2795 = vmatmul.bf16.gmra.mxu3 %v5352_v30  ;;  %v5549_v27 = vpop.f32.mrf.mxu1 }
 0x2e6   : > { %v1698_v46 = vpop.f32.mrf.mxu0 }
 0x2e7   : > { %v1699_v38 = vadd.f32 %v1698_v46, %v1640_v47  ;;  %v1642_v52 = vpop.f32.mrf.mxu3  ;;  %v2037_v46 = vsel %vm1877_vm12, %v1810_v36, %v1957_v44  ;;  %v1756_v36 = vadd.f32 %v5511_v12, %v5445_v1 }
 0x2e8   : > { %v5557_v30 = vpack.c.bf16 %v2041_v32, %v2037_v46  ;;  %v1643_v49 = vadd.f32 %v1642_v52, %v5427_v20 }
 0x2e9   : > { %vm1888_vm15 = vcmp.gt.f32.partialorder %v1699_v38, 0.0  ;;  %v1968_v11 = vmul.f32 0.01, %v1699_v38  ;;  %v1815_v13 = vadd.f32 %v1814_v0, %v1756_v36  ;;  %v4514_v0 = vld [vmem:[#allocation5 + $0xdc] sm:$0xf] }
 0x2eb   : > { %v2048_v4 = vsel %vm1888_vm15, %v1699_v38, %v1968_v11  ;;  %v4490_v38 = vld [vmem:[#allocation5 + $0x1c] sm:$0xf]  ;;  %v1965_v35 = vmul.f32 0.01, %v1815_v13  ;;  %vm1885_vm3 = vcmp.gt.f32.partialorder %v1815_v13, 0.0 }
 0x2ec   : > { %v1816_v15 = vpop.f32.mrf.mxu2  ;;  %v5551_v60 = vpack.c.bf16 %v2048_v4, %v2044_v28  ;;  %v5555_v29 = vpop.f32.mrf.mxu1  ;;  %v4029_v56 = vor.u32 %v4490_v38, %v4026_v42 }
 0x2ed   : > { %v1817_v44 = vadd.f32 %v1816_v15, %v1758_v5  ;;  %v4314_v15 = vld [vmem:[#allocation5 + $0x264] sm:$0xf0] }
 0x2ee   : > { %v1701_v47 = vpop.f32.mrf.mxu0  ;;  %2918 = vmatmul.bf16.gmra.mxu1 %v5551_v60  ;;  %3004 = vmatpush.bf16.msra.mxu3 %v4029_v56  ;;  %v4317_v46 = vor.u32 %v4562_v19, %v4314_v15  ;;  %v2045_v56 = vsel %vm1885_vm3, %v1815_v13, %v1965_v35  ;;  %v1761_v19 = vadd.f32 %v5529_v40, %v5445_v1 }
 0x2ef   : > { %v1644_v25 = vpop.f32.mrf.mxu3  ;;  %v1702_v54 = vadd.f32 %v1701_v47, %v1643_v49  ;;  %v1969_v59 = vmul.f32 0.01, %v1817_v44  ;;  %vm1889_vm1 = vcmp.gt.f32.partialorder %v1817_v44, 0.0 }
 0x2f0   : > { %v1645_v52 = vadd.f32 %v1644_v25, %v5427_v20  ;;  %v4122_v25 = vld [vmem:[#allocation5 + $0xe4] sm:$0xf0]  ;;  %3181 = vmatpush.bf16.msra.mxu2 %v4317_v46 }
 0x2f1   : > { %2854 = vmatmul.bf16.gmra.mxu0 %v5357_v43  ;;  %2972 = vmatmul.bf16.gmra.mxu2 %v5557_v30  ;;  %v1972_v57 = vmul.f32 0.01, %v1702_v54  ;;  %vm1892_vm0 = vcmp.gt.f32.partialorder %v1702_v54, 0.0  ;;  %v2049_v38 = vsel %vm1889_vm1, %v1817_v44, %v1969_v59  ;;  %v4125_v42 = vor.u32 %v4514_v0, %v4122_v25  ;;  %v4014_v25 = vld [vmem:[#allocation5 + $0xc] sm:$0xf0] }
 0x2f3   : > { %v2052_v32 = vsel %vm1892_vm0, %v1702_v54, %v1972_v57  ;;  %3063 = vmatpush.bf16.msra.mxu0 %v4125_v42  ;;  %v4218_v54 = vld [vmem:[#allocation5 + $0x1a4] sm:$0xf0]  ;;  %v1763_v57 = vadd.f32 %v5533_v22, %v5445_v1  ;;  %v4535_v42 = vld [vmem:[#allocation5 + $0x184] sm:$0xf] }
 0x2f4   : > { %v1819_v11 = vpop.f32.mrf.mxu2  ;;  %2800 = vmatmul.bf16.gmra.mxu3 %v5370_v21  ;;  %v5568_v4 = vpop.f32.mrf.mxu1  ;;  %v4538_v21 = vld [vmem:[#allocation5 + $0x19c] sm:$0xf] }
 0x2f5   : > { %v4221_v44 = vor.u32 %v4538_v21, %v4218_v54  ;;  %v1820_v15 = vadd.f32 %v1819_v11, %v1761_v19  ;;  %v4487_v21 = vld [vmem:[#allocation5 + $0x4] sm:$0xf] }
 0x2f6   : > { %v1703_v3 = vpop.f32.mrf.mxu0 }
 0x2f7   : > { %v1704_v51 = vadd.f32 %v1703_v3, %v1645_v52  ;;  %v1647_v28 = vpop.f32.mrf.mxu3  ;;  %v5573_v3 = vpack.c.bf16 %v2049_v38, %v2045_v56  ;;  %3122 = vmatpush.bf16.msrb.mxu1 %v4221_v44  ;;  %v4017_v38 = vor.u32 %v4487_v21, %v4014_v25  ;;  %v1973_v40 = vmul.f32 0.01, %v1820_v15  ;;  %v4559_v25 = vld [vmem:[#allocation5 + $0x244] sm:$0xf] }
 0x2f8   : > { %vm1893_vm7 = vcmp.gt.f32.partialorder %v1820_v15, 0.0 }
 0x2f9   : > { %vm1896_vm2 = vcmp.gt.f32.partialorder %v1704_v51, 0.0  ;;  %v1976_v12 = vmul.f32 0.01, %v1704_v51  ;;  %5912 = vst [vmem:[#allocation15_spill] sm:$0xff] %v5573_v3  ;;  %3005 = vmatpush.bf16.msra.mxu3 %v4017_v38 }
 0x2fb   : > { %v2056_v47 = vsel %vm1896_vm2, %v1704_v51, %v1976_v12  ;;  %v1648_v51 = vadd.f32 %v1647_v28, %v5427_v20 }
 0x2fc   : > { %v1821_v49 = vpop.f32.mrf.mxu2  ;;  %v5570_v5 = vpack.c.bf16 %v2056_v47, %v2052_v32  ;;  %v5580_v59 = vpop.f32.mrf.mxu1 }
 0x2fd   : > { %v1822_v12 = vadd.f32 %v1821_v49, %v1763_v57 }
 0x2fe   : > { %v1706_v36 = vpop.f32.mrf.mxu0  ;;  %2923 = vmatmul.bf16.gmra.mxu1 %v5570_v5 }
 0x2ff   : > { %v1649_v52 = vpop.f32.mrf.mxu3  ;;  %v1707_v13 = vadd.f32 %v1706_v36, %v1648_v51  ;;  %v1977_v32 = vmul.f32 0.01, %v1822_v12  ;;  %vm1897_vm5 = vcmp.gt.f32.partialorder %v1822_v12, 0.0  ;;  %v4206_v36 = vld [vmem:[#allocation5 + $0x18c] sm:$0xf0] }
 0x300   : > { %v1650_v22 = vadd.f32 %v1649_v52, %v5427_v20  ;;  %v4209_v54 = vor.u32 %v4535_v42, %v4206_v36 }
 0x301   : > { %2859 = vmatmul.bf16.gmra.mxu0 %v5375_v50  ;;  %2977 = vmatmul.bf16.gmra.mxu2 %v5573_v3  ;;  %v1980_v47 = vmul.f32 0.01, %v1707_v13  ;;  %vm1900_vm4 = vcmp.gt.f32.partialorder %v1707_v13, 0.0  ;;  %v2057_v44 = vsel %vm1897_vm5, %v1822_v12, %v1977_v32  ;;  %v4511_v3 = vld [vmem:[#allocation5 + $0xc4] sm:$0xf]  ;;  %v1768_v12 = vadd.f32 %v5555_v29, %v5445_v1 }
 0x302   : > { %3123 = vmatpush.bf16.msrb.mxu1 %v4209_v54  ;;  %v4110_v50 = vld [vmem:[#allocation5 + $0xcc] sm:$0xf0] }
 0x303   : > { %v2060_v52 = vsel %vm1900_vm4, %v1707_v13, %v1980_v47  ;;  %v4113_v32 = vor.u32 %v4511_v3, %v4110_v50  ;;  %v5607_v50 = vld [vmem:[%s5891_s8] sm:$0x7] }
 0x304   : > { %v1824_v35 = vpop.f32.mrf.mxu2  ;;  %2805 = vmatmul.bf16.gmra.mxu3 %v5388_v17  ;;  %v4302_v17 = vld [vmem:[#allocation5 + $0x24c] sm:$0xf0] }
 0x305   : > { %v4305_v47 = vor.u32 %v4559_v25, %v4302_v17  ;;  %3064 = vmatpush.bf16.msra.mxu0 %v4113_v32 }
 0x306   : > { %v1708_v28 = vpop.f32.mrf.mxu0 }
 0x307   : > { %v1709_v46 = vadd.f32 %v1708_v28, %v1650_v22  ;;  %v1652_v0 = vpop.f32.mrf.mxu3  ;;  %v2053_v22 = vsel %vm1893_vm7, %v1820_v15, %v1973_v40  ;;  %3182 = vmatpush.bf16.msra.mxu2 %v4305_v47 }
 0x308   : > { %v5591_v21 = vpack.c.bf16 %v2057_v44, %v2053_v22  ;;  %v1653_v13 = vadd.f32 %v1652_v0, %v5427_v20  ;;  %v4104_v44 = vld [vmem:[#allocation5 + $0xb0] sm:$0xf] }
 0x309   : > { %vm1904_vm6 = vcmp.gt.f32.partialorder %v1709_v46, 0.0  ;;  %v1984_v49 = vmul.f32 0.01, %v1709_v46 }
 0x30b   : > { %v5586_v56 = vpop.f32.mrf.mxu1  ;;  %v2064_v11 = vsel %vm1904_vm6, %v1709_v46, %v1984_v49  ;;  %v1766_v49 = vadd.f32 %v5549_v27, %v5445_v1 }
 0x30c   : > { %v1826_v57 = vpop.f32.mrf.mxu2  ;;  %v5588_v51 = vpack.c.bf16 %v2064_v11, %v2060_v52  ;;  %v5610_v11 = vperm.slane %v5607_v50, 0 }
 0x30d   : > { %v1827_v38 = vadd.f32 %v1826_v57, %v1768_v12  ;;  %v1825_v40 = vadd.f32 %v1824_v35, %v1766_v49 }
 0x30e   : > { %v1711_v19 = vpop.f32.mrf.mxu0  ;;  %2928 = vmatmul.bf16.gmra.mxu1 %v5588_v51 }
 0x30f   : > { %v1654_v28 = vpop.f32.mrf.mxu3  ;;  %v1712_v46 = vadd.f32 %v1711_v19, %v1653_v13  ;;  %v1985_v52 = vmul.f32 0.01, %v1827_v38  ;;  %vm1905_vm9 = vcmp.gt.f32.partialorder %v1827_v38, 0.0  ;;  %vm1901_vm11 = vcmp.gt.f32.partialorder %v1825_v40, 0.0  ;;  %v4510_v19 = vld [vmem:[#allocation5 + $0xb8] sm:$0xf0] }
 0x310   : > { %v1655_v0 = vadd.f32 %v1654_v28, %v5427_v20  ;;  %v1981_v20 = vmul.f32 0.01, %v1825_v40  ;;  %v4105_v13 = vor.u32 %v4510_v19, %v4104_v44 }
 0x311   : > { %2864 = vmatmul.bf16.gmra.mxu0 %v5393_v58  ;;  %2982 = vmatmul.bf16.gmra.mxu2 %v5591_v21  ;;  %v1988_v29 = vmul.f32 0.01, %v1712_v46  ;;  %vm1908_vm8 = vcmp.gt.f32.partialorder %v1712_v46, 0.0  ;;  %v2065_v25 = vsel %vm1905_vm9, %v1827_v38, %v1985_v52  ;;  %v4392_v38 = vld [vmem:[#allocation5 + $0x2f0] sm:$0xf] }
 0x312   : > { %v2061_v32 = vsel %vm1901_vm11, %v1825_v40, %v1981_v20  ;;  %3234 = vmatpush.bf16.msrb.mxu3 %v4105_v13  ;;  %v4200_v52 = vld [vmem:[#allocation5 + $0x170] sm:$0xf]  ;;  %v1771_v20 = vadd.f32 %v5568_v4, %v5445_v1 }
 0x313   : > { %v5598_v15 = vpop.f32.mrf.mxu1  ;;  %v2068_v54 = vsel %vm1908_vm8, %v1712_v46, %v1988_v29  ;;  %v5619_v46 = vpack.c.bf16 %v2065_v25, %v2061_v32  ;;  %v1773_v29 = vadd.f32 %v5580_v59, %v5445_v1  ;;  %v4558_v1 = vld [vmem:[#allocation5 + $0x238] sm:$0xf0] }
 0x314   : > { %v1829_v42 = vpop.f32.mrf.mxu2  ;;  %2810 = vmatmul.bf16.gmra.mxu3 %v5406_v45 }
 0x315   : > { %v1830_v59 = vadd.f32 %v1829_v42, %v1771_v20 }
 0x316   : > { %v1713_v17 = vpop.f32.mrf.mxu0 }
 0x317   : > { %v1714_v3 = vadd.f32 %v1713_v17, %v1655_v0  ;;  %v2771_v36 = vpop.f32.mrf.mxu3  ;;  %v4582_v17 = vld [vmem:[#allocation5 + $0x2f8] sm:$0xf0]  ;;  %v1989_v32 = vmul.f32 0.01, %v1830_v59  ;;  %vm1909_vm13 = vcmp.gt.f32.partialorder %v1830_v59, 0.0 }
 0x318   : > { %v2772_v47 = vadd.f32 %v2771_v36, %v5610_v11 }
 0x319   : > { %vm1912_vm10 = vcmp.gt.f32.partialorder %v1714_v3, 0.0  ;;  %v1992_v27 = vmul.f32 0.01, %v1714_v3 }
 0x31b   : > { %v5612_v35 = vpop.f32.mrf.mxu1  ;;  %v2072_v57 = vsel %vm1912_vm10, %v1714_v3, %v1992_v27  ;;  %v4393_v3 = vor.u32 %v4582_v17, %v4392_v38  ;;  %v4534_v27 = vld [vmem:[#allocation5 + $0x178] sm:$0xf0] }
 0x31c   : > { %v1831_v22 = vpop.f32.mrf.mxu2  ;;  %v5614_v28 = vpack.c.bf16 %v2072_v57, %v2068_v54  ;;  %v4201_v44 = vor.u32 %v4534_v27, %v4200_v52 }
 0x31d   : > { %v1832_v54 = vadd.f32 %v1831_v22, %v1773_v29  ;;  %3411 = vmatpush.bf16.msrb.mxu2 %v4393_v3 }
 0x31e   : > { %v2830_v12 = vpop.f32.mrf.mxu0  ;;  %2933 = vmatmul.bf16.gmra.mxu1 %v5614_v28  ;;  %3293 = vmatpush.bf16.msrb.mxu0 %v4201_v44  ;;  %v4507_v44 = vld [vmem:[#allocation5 + $0xa0] sm:$0xf0] }
 0x31f   : > { %v2831_v49 = vadd.f32 %v2830_v12, %v2772_v47  ;;  %v2773_v0 = vpop.f32.mrf.mxu3  ;;  %v4296_v12 = vld [vmem:[#allocation5 + $0x230] sm:$0xf]  ;;  %v1993_v4 = vmul.f32 0.01, %v1832_v54  ;;  %vm1913_vm12 = vcmp.gt.f32.partialorder %v1832_v54, 0.0 }
 0x320   : > { %v2774_v19 = vadd.f32 %v2773_v0, %v5610_v11  ;;  %v4297_v22 = vor.u32 %v4558_v1, %v4296_v12  ;;  %v4380_v1 = vld [vmem:[#allocation5 + $0x2d8] sm:$0xf] }
 0x321   : > { %2869 = vmatmul.bf16.gmra.mxu0 %v5411_v24  ;;  %2987 = vmatmul.bf16.gmra.mxu2 %v5619_v46  ;;  %v2890_v40 = vadd.f32 %v5586_v56, %v2831_v49  ;;  %v2073_v38 = vsel %vm1913_vm12, %v1832_v54, %v1993_v4  ;;  %v4579_v4 = vld [vmem:[#allocation5 + $0x2e0] sm:$0xf0] }
 0x322   : > { %3352 = vmatpush.bf16.msra.mxu1 %v4297_v22  ;;  %v4381_v22 = vor.u32 %v4579_v4, %v4380_v1 }
 0x323   : > { %v5627_v36 = vpop.f32.mrf.mxu1 }
 0x324   : > { %2815 = vmatmul.bf16.gmra.mxu3 %v5424_v9  ;;  %v2948_v57 = vpop.f32.mrf.mxu2  ;;  %3412 = vmatpush.bf16.msrb.mxu2 %v4381_v22 }
 0x325   : > { %v2949_v25 = vadd.f32 %v2948_v57, %v2890_v40  ;;  %v2069_v40 = vsel %vm1909_vm13, %v1830_v59, %v1989_v32  ;;  %v4092_v57 = vld [vmem:[#allocation5 + $0x98] sm:$0xf] }
 0x326   : > { %v2832_v13 = vpop.f32.mrf.mxu0  ;;  %v5641_v20 = vpack.c.bf16 %v2073_v38, %v2069_v40  ;;  %v4188_v32 = vld [vmem:[#allocation5 + $0x158] sm:$0xf] }
 0x327   : > { %3470 = vst [vmem:[%s5634_s17] sm:$0xff] %v2949_v25  ;;  %v2833_v56 = vadd.f32 %v2832_v13, %v2774_v19  ;;  %v2776_v47 = vpop.f32.mrf.mxu3 }
 0x328   : > { %v2777_v17 = vadd.f32 %v2776_v47, %v5610_v11 }
 0x329   : > { %v2892_v42 = vadd.f32 %v5598_v15, %v2833_v56  ;;  %v4093_v15 = vor.u32 %v4507_v44, %v4092_v57 }
 0x32b   : > { %v2899_v49 = vpop.f32.mrf.mxu1  ;;  %3235 = vmatpush.bf16.msrb.mxu3 %v4093_v15 }
 0x32c   : > { %v2950_v0 = vpop.f32.mrf.mxu2 }
 0x32d   : > { %v2951_v29 = vadd.f32 %v2950_v0, %v2892_v42  ;;  %v4531_v42 = vld [vmem:[#allocation5 + $0x160] sm:$0xf0]  ;;  %v4284_v0 = vld [vmem:[#allocation5 + $0x218] sm:$0xf] }
 0x32e   : > { %v2835_v3 = vpop.f32.mrf.mxu0  ;;  %3124 = vmatmul.bf16.vlgmr.msrb.gmra.mxu1 %v5438_v34  ;;  %v4189_v38 = vor.u32 %v4531_v42, %v4188_v32  ;;  %v4368_v32 = vld [vmem:[#allocation5 + $0x2c0] sm:$0xf]  ;;  %v4576_v42 = vld [vmem:[#allocation5 + $0x2c8] sm:$0xf0] }
 0x32f   : > { %3473 = vst [vmem:[%s5634_s17 + $0x18] sm:$0xff] %v2951_v29  ;;  %v2836_v52 = vadd.f32 %v2835_v3, %v2777_v17  ;;  %v2778_v27 = vpop.f32.mrf.mxu3 }
 0x330   : > { %v2779_v59 = vadd.f32 %v2778_v27, %v5610_v11  ;;  %3294 = vmatpush.bf16.msrb.mxu0 %v4189_v38 }
 0x331   : > { %2874 = vmatmul.bf16.gmra.mxu0 %v5432_v37  ;;  %2992 = vmatmul.bf16.gmra.mxu2 %v5641_v20  ;;  %v2895_v19 = vadd.f32 %v5612_v35, %v2836_v52  ;;  %v4555_v35 = vld [vmem:[#allocation5 + $0x220] sm:$0xf0] }
 0x332   : > { %v4285_v17 = vor.u32 %v4555_v35, %v4284_v0  ;;  %v4369_v0 = vor.u32 %v4576_v42, %v4368_v32  ;;  %v4176_v35 = vld [vmem:[#allocation5 + $0x140] sm:$0xf]  ;;  %v4068_v32 = vld [vmem:[#allocation5 + $0x68] sm:$0xf]  ;;  %v4501_v42 = vld [vmem:[#allocation5 + $0x70] sm:$0xf0] }
 0x333   : > { %v2901_v54 = vpop.f32.mrf.mxu1 }
 0x334   : > { %v2953_v25 = vpop.f32.mrf.mxu2  ;;  %3006 = vmatmul.bf16.vlgmr.msra.gmra.mxu3 %v5258_v39  ;;  %3353 = vmatpush.bf16.msra.mxu1 %v4285_v17  ;;  %v4528_v17 = vld [vmem:[#allocation5 + $0x148] sm:$0xf0] }
 0x335   : > { %v2954_v13 = vadd.f32 %v2953_v25, %v2895_v19  ;;  %3413 = vmatpush.bf16.msrb.mxu2 %v4369_v0  ;;  %v4069_v0 = vor.u32 %v4501_v42, %v4068_v32 }
 0x336   : > { %v2837_v56 = vpop.f32.mrf.mxu0 }
 0x337   : > { %3476 = vst [vmem:[%s5634_s17 + $0x30] sm:$0xff] %v2954_v13  ;;  %v2838_v47 = vadd.f32 %v2837_v56, %v2779_v59  ;;  %v2781_v12 = vpop.f32.mrf.mxu3  ;;  %v4504_v59 = vld [vmem:[#allocation5 + $0x88] sm:$0xf0] }
 0x338   : > { %v2782_v52 = vadd.f32 %v2781_v12, %v5610_v11 }
 0x339   : > { %v2897_v3 = vadd.f32 %v5627_v36, %v2838_v47  ;;  %v4080_v36 = vld [vmem:[#allocation5 + $0x80] sm:$0xf] }
 0x33a   : > { %v4081_v56 = vor.u32 %v4504_v59, %v4080_v36  ;;  %v4552_v36 = vld [vmem:[#allocation5 + $0x208] sm:$0xf0] }
 0x33b   : > { %v2904_v29 = vpop.f32.mrf.mxu1 }
 0x33c   : > { %v2955_v40 = vpop.f32.mrf.mxu2  ;;  %3236 = vmatpush.bf16.msrb.mxu3 %v4081_v56 }
 0x33d   : > { %v2956_v27 = vadd.f32 %v2955_v40, %v2897_v3  ;;  %v4177_v40 = vor.u32 %v4528_v17, %v4176_v35 }
 0x33e   : > { %v2840_v57 = vpop.f32.mrf.mxu0  ;;  %3129 = vmatmul.bf16.gmra.mxu1 %v5461_v53 }
 0x33f   : > { %3479 = vst [vmem:[%s5634_s17 + $0x48] sm:$0xff] %v2956_v27  ;;  %v2841_v44 = vadd.f32 %v2840_v57, %v2782_v52  ;;  %v2783_v15 = vpop.f32.mrf.mxu3  ;;  %3295 = vmatpush.bf16.msrb.mxu0 %v4177_v40 }
 0x340   : > { %v2784_v47 = vadd.f32 %v2783_v15, %v5610_v11  ;;  %3237 = vmatpush.bf16.msrb.mxu3 %v4069_v0 }
 0x341   : > { %3065 = vmatmul.bf16.vlgmr.msra.gmra.mxu0 %v5267_v16  ;;  %3183 = vmatmul.bf16.vlgmr.msra.gmra.mxu2 %v5465_v61  ;;  %v2900_v25 = vadd.f32 %v2899_v49, %v2841_v44 }
 0x343   : > { %v2906_v19 = vpop.f32.mrf.mxu1 }
 0x344   : > { %v2958_v13 = vpop.f32.mrf.mxu2  ;;  %3011 = vmatmul.bf16.gmra.mxu3 %v5280_v62 }
 0x345   : > { %v2959_v12 = vadd.f32 %v2958_v13, %v2900_v25  ;;  %v4272_v25 = vld [vmem:[#allocation5 + $0x200] sm:$0xf] }
 0x346   : > { %v2842_v1 = vpop.f32.mrf.mxu0  ;;  %v4273_v59 = vor.u32 %v4552_v36, %v4272_v25  ;;  %v4164_v25 = vld [vmem:[#allocation5 + $0x128] sm:$0xf]  ;;  %v4525_v36 = vld [vmem:[#allocation5 + $0x130] sm:$0xf0] }
 0x347   : > { %3482 = vst [vmem:[%s5634_s17 + $0x60] sm:$0xff] %v2959_v12  ;;  %v2843_v4 = vadd.f32 %v2842_v1, %v2784_v47  ;;  %v2786_v22 = vpop.f32.mrf.mxu3 }
 0x348   : > { %v2787_v52 = vadd.f32 %v2786_v22, %v5610_v11  ;;  %3354 = vmatpush.bf16.msra.mxu1 %v4273_v59  ;;  %v4260_v59 = vld [vmem:[#allocation5 + $0x1e8] sm:$0xf] }
 0x349   : > { %v2902_v49 = vadd.f32 %v2901_v54, %v2843_v4 }
 0x34b   : > { %v2909_v38 = vpop.f32.mrf.mxu1 }
 0x34c   : > { %v2960_v3 = vpop.f32.mrf.mxu2 }
 0x34d   : > { %v2961_v27 = vadd.f32 %v2960_v3, %v2902_v49 }
 0x34e   : > { %v2845_v57 = vpop.f32.mrf.mxu0  ;;  %3134 = vmatmul.bf16.gmra.mxu1 %v5480_v63 }
 0x34f   : > { %3485 = vst [vmem:[%s5634_s17 + $0x78] sm:$0xff] %v2961_v27  ;;  %v2846_v44 = vadd.f32 %v2845_v57, %v2787_v52  ;;  %v2788_v15 = vpop.f32.mrf.mxu3  ;;  %v4356_v57 = vld [vmem:[#allocation5 + $0x2a8] sm:$0xf] }
 0x350   : > { %v2789_v47 = vadd.f32 %v2788_v15, %v5610_v11 }
 0x351   : > { %3070 = vmatmul.bf16.gmra.mxu0 %v5285_v18  ;;  %3188 = vmatmul.bf16.gmra.mxu2 %v5484_v7  ;;  %v2905_v13 = vadd.f32 %v2904_v29, %v2846_v44  ;;  %v4573_v44 = vld [vmem:[#allocation5 + $0x2b0] sm:$0xf0] }
 0x352   : > { %v4357_v15 = vor.u32 %v4573_v44, %v4356_v57 }
 0x353   : > { %v2911_v54 = vpop.f32.mrf.mxu1 }
 0x354   : > { %v2963_v56 = vpop.f32.mrf.mxu2  ;;  %3016 = vmatmul.bf16.gmra.mxu3 %v5298_v48  ;;  %3414 = vmatpush.bf16.msrb.mxu2 %v4357_v15 }
 0x355   : > { %v2964_v12 = vadd.f32 %v2963_v56, %v2905_v13  ;;  %v4549_v13 = vld [vmem:[#allocation5 + $0x1f0] sm:$0xf0] }
 0x356   : > { %v2847_v1 = vpop.f32.mrf.mxu0  ;;  %v4261_v56 = vor.u32 %v4549_v13, %v4260_v59  ;;  %v4152_v13 = vld [vmem:[#allocation5 + $0x110] sm:$0xf] }
 0x357   : > { %3488 = vst [vmem:[%s5634_s17 + $0x90] sm:$0xff] %v2964_v12  ;;  %v2848_v4 = vadd.f32 %v2847_v1, %v2789_v47  ;;  %v2791_v22 = vpop.f32.mrf.mxu3 }
 0x358   : > { %v2792_v29 = vadd.f32 %v2791_v22, %v5610_v11  ;;  %3355 = vmatpush.bf16.msra.mxu1 %v4261_v56  ;;  %v4522_v56 = vld [vmem:[#allocation5 + $0x118] sm:$0xf0] }
 0x359   : > { %v2907_v35 = vadd.f32 %v2906_v19, %v2848_v4  ;;  %v4165_v19 = vor.u32 %v4525_v36, %v4164_v25  ;;  %v4570_v25 = vld [vmem:[#allocation5 + $0x298] sm:$0xf0] }
 0x35b   : > { %v2914_v49 = vpop.f32.mrf.mxu1  ;;  %3296 = vmatpush.bf16.msrb.mxu0 %v4165_v19 }
 0x35c   : > { %v2965_v17 = vpop.f32.mrf.mxu2 }
 0x35d   : > { %v2966_v3 = vadd.f32 %v2965_v17, %v2907_v35 }
 0x35e   : > { %v2850_v40 = vpop.f32.mrf.mxu0  ;;  %3139 = vmatmul.bf16.gmra.mxu1 %v5499_v23 }
 0x35f   : > { %3491 = vst [vmem:[%s5634_s17 + $0xa8] sm:$0xff] %v2966_v3  ;;  %v2851_v52 = vadd.f32 %v2850_v40, %v2792_v29  ;;  %v2793_v27 = vpop.f32.mrf.mxu3  ;;  %v4056_v29 = vld [vmem:[#allocation5 + $0x50] sm:$0xf]  ;;  %v4498_v3 = vld [vmem:[#allocation5 + $0x58] sm:$0xf0] }
 0x360   : > { %v2794_v4 = vadd.f32 %v2793_v27, %v5610_v11  ;;  %v4057_v57 = vor.u32 %v4498_v3, %v4056_v29  ;;  %v4546_v29 = vld [vmem:[#allocation5 + $0x1d8] sm:$0xf0] }
 0x361   : > { %3075 = vmatmul.bf16.gmra.mxu0 %v5303_v10  ;;  %3193 = vmatmul.bf16.gmra.mxu2 %v5502_v2  ;;  %v2910_v12 = vadd.f32 %v2909_v38, %v2851_v52 }
 0x362   : > { %3238 = vmatpush.bf16.msrb.mxu3 %v4057_v57 }
 0x363   : > { %v2916_v47 = vpop.f32.mrf.mxu1 }
 0x364   : > { %v2968_v1 = vpop.f32.mrf.mxu2  ;;  %3021 = vmatmul.bf16.gmra.mxu3 %v5316_v41 }
 0x365   : > { %v2969_v22 = vadd.f32 %v2968_v1, %v2910_v12  ;;  %v4153_v1 = vor.u32 %v4522_v56, %v4152_v13  ;;  %v5913_v56 = vld [vmem:[#allocation11_spill] sm:$0xff] }
 0x366   : > { %v2852_v32 = vpop.f32.mrf.mxu0 }
 0x367   : > { %3494 = vst [vmem:[%s5634_s17 + $0xc0] sm:$0xff] %v2969_v22  ;;  %v2853_v42 = vadd.f32 %v2852_v32, %v2794_v4  ;;  %v2796_v0 = vpop.f32.mrf.mxu3  ;;  %3297 = vmatpush.bf16.msrb.mxu0 %v4153_v1 }
 0x368   : > { %v2797_v38 = vadd.f32 %v2796_v0, %v5610_v11 }
 0x369   : > { %v2912_v17 = vadd.f32 %v2911_v54, %v2853_v42  ;;  %v4344_v54 = vld [vmem:[#allocation5 + $0x290] sm:$0xf] }
 0x36a   : > { %v4345_v36 = vor.u32 %v4570_v25, %v4344_v54  ;;  %v4044_v54 = vld [vmem:[#allocation5 + $0x38] sm:$0xf]  ;;  %v4495_v25 = vld [vmem:[#allocation5 + $0x40] sm:$0xf0] }
 0x36b   : > { %v2919_v35 = vpop.f32.mrf.mxu1 }
 0x36c   : > { %v2970_v40 = vpop.f32.mrf.mxu2  ;;  %3415 = vmatpush.bf16.msrb.mxu2 %v4345_v36  ;;  %v4045_v36 = vor.u32 %v4495_v25, %v4044_v54 }
 0x36d   : > { %v2971_v52 = vadd.f32 %v2970_v40, %v2912_v17  ;;  %v4248_v17 = vld [vmem:[#allocation5 + $0x1d0] sm:$0xf] }
 0x36e   : > { %v2855_v44 = vpop.f32.mrf.mxu0  ;;  %3144 = vmatmul.bf16.gmra.mxu1 %v5517_v6  ;;  %v4249_v3 = vor.u32 %v4546_v29, %v4248_v17  ;;  %3239 = vmatpush.bf16.msrb.mxu3 %v4045_v36  ;;  %v4140_v29 = vld [vmem:[#allocation5 + $0xf8] sm:$0xf] }
 0x36f   : > { %3497 = vst [vmem:[%s5634_s17 + $0xd8] sm:$0xff] %v2971_v52  ;;  %v2856_v27 = vadd.f32 %v2855_v44, %v2797_v38  ;;  %v2798_v15 = vpop.f32.mrf.mxu3 }
 0x370   : > { %v2799_v4 = vadd.f32 %v2798_v15, %v5610_v11  ;;  %3356 = vmatpush.bf16.msra.mxu1 %v4249_v3  ;;  %v4519_v3 = vld [vmem:[#allocation5 + $0x100] sm:$0xf0] }
 0x371   : > { %3080 = vmatmul.bf16.gmra.mxu0 %v5321_v14  ;;  %3198 = vmatmul.bf16.gmra.mxu2 %v5520_v8  ;;  %v2915_v59 = vadd.f32 %v2914_v49, %v2856_v27 }
 0x373   : > { %v2921_v19 = vpop.f32.mrf.mxu1 }
 0x374   : > { %v2973_v12 = vpop.f32.mrf.mxu2  ;;  %3026 = vmatmul.bf16.gmra.mxu3 %v5334_v33 }
 0x375   : > { %v2974_v22 = vadd.f32 %v2973_v12, %v2915_v59 }
 0x376   : > { %v2857_v32 = vpop.f32.mrf.mxu0 }
 0x377   : > { %3500 = vst [vmem:[%s5634_s17 + $0xf0] sm:$0xff] %v2974_v22  ;;  %v2858_v42 = vadd.f32 %v2857_v32, %v2799_v4  ;;  %v2801_v0 = vpop.f32.mrf.mxu3 }
 0x378   : > { %v2802_v38 = vadd.f32 %v2801_v0, %v5610_v11  ;;  %v4567_v0 = vld [vmem:[#allocation5 + $0x280] sm:$0xf0] }
 0x379   : > { %v2917_v40 = vadd.f32 %v2916_v47, %v2858_v42  ;;  %v4332_v42 = vld [vmem:[#allocation5 + $0x278] sm:$0xf] }
 0x37a   : > { %v4333_v17 = vor.u32 %v4567_v0, %v4332_v42 }
 0x37b   : > { %v2924_v49 = vpop.f32.mrf.mxu1 }
 0x37c   : > { %v2975_v57 = vpop.f32.mrf.mxu2  ;;  %3416 = vmatpush.bf16.msrb.mxu2 %v4333_v17 }
 0x37d   : > { %v2976_v52 = vadd.f32 %v2975_v57, %v2917_v40  ;;  %v4236_v40 = vld [vmem:[#allocation5 + $0x1b8] sm:$0xf]  ;;  %v4141_v57 = vor.u32 %v4519_v3, %v4140_v29 }
 0x37e   : > { %v2860_v44 = vpop.f32.mrf.mxu0  ;;  %3149 = vmatmul.bf16.gmra.mxu1 %v5535_v31 }
 0x37f   : > { %3503 = vst [vmem:[%s5634_s17 + $0x108] sm:$0xff] %v2976_v52  ;;  %v2861_v27 = vadd.f32 %v2860_v44, %v2802_v38  ;;  %v2803_v15 = vpop.f32.mrf.mxu3  ;;  %3298 = vmatpush.bf16.msrb.mxu0 %v4141_v57  ;;  %v4564_v57 = vld [vmem:[#allocation5 + $0x268] sm:$0xf0] }
 0x380   : > { %v2804_v12 = vadd.f32 %v2803_v15, %v5610_v11 }
 0x381   : > { %3085 = vmatmul.bf16.gmra.mxu0 %v5339_v55  ;;  %3203 = vmatmul.bf16.gmra.mxu2 %v5538_v26  ;;  %v2920_v47 = vadd.f32 %v2919_v35, %v2861_v27  ;;  %v4543_v35 = vld [vmem:[#allocation5 + $0x1c0] sm:$0xf0] }
 0x382   : > { %v4237_v38 = vor.u32 %v4543_v35, %v4236_v40  ;;  %v4320_v40 = vld [vmem:[#allocation5 + $0x260] sm:$0xf] }
 0x383   : > { %v2926_v59 = vpop.f32.mrf.mxu1  ;;  %v4321_v35 = vor.u32 %v4564_v57, %v4320_v40 }
 0x384   : > { %v2978_v13 = vpop.f32.mrf.mxu2  ;;  %3031 = vmatmul.bf16.gmra.mxu3 %v5913_v56  ;;  %3357 = vmatpush.bf16.msra.mxu1 %v4237_v38 }
 0x385   : > { %v2979_v1 = vadd.f32 %v2978_v13, %v2920_v47  ;;  %3417 = vmatpush.bf16.msrb.mxu2 %v4321_v35 }
 0x386   : > { %v2862_v4 = vpop.f32.mrf.mxu0 }
 0x387   : > { %3506 = vst [vmem:[%s5634_s17 + $0x120] sm:$0xff] %v2979_v1  ;;  %v2863_v22 = vadd.f32 %v2862_v4, %v2804_v12  ;;  %v2806_v32 = vpop.f32.mrf.mxu3  ;;  %v4492_v1 = vld [vmem:[#allocation5 + $0x28] sm:$0xf0] }
 0x388   : > { %v2807_v15 = vadd.f32 %v2806_v32, %v5610_v11 }
 0x389   : > { %v2922_v44 = vadd.f32 %v2921_v19, %v2863_v22  ;;  %v4032_v19 = vld [vmem:[#allocation5 + $0x20] sm:$0xf]  ;;  %v5914_v22 = vld [vmem:[#allocation12_spill] sm:$0xff] }
 0x38a   : > { %v4033_v32 = vor.u32 %v4492_v1, %v4032_v19  ;;  %v4224_v1 = vld [vmem:[#allocation5 + $0x1a0] sm:$0xf] }
 0x38b   : > { %v2929_v52 = vpop.f32.mrf.mxu1 }
 0x38c   : > { %v2980_v27 = vpop.f32.mrf.mxu2  ;;  %3240 = vmatpush.bf16.msrb.mxu3 %v4033_v32 }
 0x38d   : > { %v2981_v54 = vadd.f32 %v2980_v27, %v2922_v44  ;;  %v4128_v44 = vld [vmem:[#allocation5 + $0xe0] sm:$0xf]  ;;  %v4516_v27 = vld [vmem:[#allocation5 + $0xe8] sm:$0xf0] }
 0x38e   : > { %v2865_v25 = vpop.f32.mrf.mxu0  ;;  %3154 = vmatmul.bf16.gmra.mxu1 %v5551_v60 }
 0x38f   : > { %3509 = vst [vmem:[%s5634_s17 + $0x138] sm:$0xff] %v2981_v54  ;;  %v2866_v36 = vadd.f32 %v2865_v25, %v2807_v15  ;;  %v2808_v47 = vpop.f32.mrf.mxu3  ;;  %v4129_v54 = vor.u32 %v4516_v27, %v4128_v44  ;;  %v4020_v27 = vld [vmem:[#allocation5 + $0x8] sm:$0xf] }
 0x390   : > { %v2809_v42 = vadd.f32 %v2808_v47, %v5610_v11 }
 0x391   : > { %3090 = vmatmul.bf16.gmra.mxu0 %v5357_v43  ;;  %3208 = vmatmul.bf16.gmra.mxu2 %v5557_v30  ;;  %v2925_v12 = vadd.f32 %v2924_v49, %v2866_v36 }
 0x392   : > { %3299 = vmatpush.bf16.msrb.mxu0 %v4129_v54 }
 0x393   : > { %v2931_v13 = vpop.f32.mrf.mxu1 }
 0x394   : > { %v2983_v4 = vpop.f32.mrf.mxu2  ;;  %3036 = vmatmul.bf16.gmra.mxu3 %v5914_v22 }
 0x395   : > { %v2984_v0 = vadd.f32 %v2983_v4, %v2925_v12  ;;  %v4540_v4 = vld [vmem:[#allocation5 + $0x1a8] sm:$0xf0] }
 0x396   : > { %v2867_v17 = vpop.f32.mrf.mxu0  ;;  %v4225_v32 = vor.u32 %v4540_v4, %v4224_v1 }
 0x397   : > { %3512 = vst [vmem:[%s5634_s17 + $0x150] sm:$0xff] %v2984_v0  ;;  %v2868_v29 = vadd.f32 %v2867_v17, %v2809_v42  ;;  %v2811_v3 = vpop.f32.mrf.mxu3  ;;  %v5916_v42 = vld [vmem:[#allocation15_spill] sm:$0xff] }
 0x398   : > { %v2812_v25 = vadd.f32 %v2811_v3, %v5610_v11  ;;  %3358 = vmatpush.bf16.msra.mxu1 %v4225_v32  ;;  %v5917_v3 = vld [vmem:[#allocation14_spill] sm:$0xff] }
 0x399   : > { %v2927_v49 = vadd.f32 %v2926_v59, %v2868_v29  ;;  %v5915_v59 = vld [vmem:[#allocation13_spill] sm:$0xff] }
 0x39b   : > { %v2934_v38 = vpop.f32.mrf.mxu1 }
 0x39c   : > { %v2985_v15 = vpop.f32.mrf.mxu2 }
 0x39d   : > { %v2986_v36 = vadd.f32 %v2985_v15, %v2927_v49  ;;  %v4489_v15 = vld [vmem:[#allocation5 + $0x10] sm:$0xf0] }
 0x39e   : > { %v2870_v47 = vpop.f32.mrf.mxu0  ;;  %3159 = vmatmul.bf16.gmra.mxu1 %v5570_v5  ;;  %v4021_v54 = vor.u32 %v4489_v15, %v4020_v27  ;;  %v4116_v27 = vld [vmem:[#allocation5 + $0xc8] sm:$0xf]  ;;  %v4513_v15 = vld [vmem:[#allocation5 + $0xd0] sm:$0xf0] }
 0x39f   : > { %3515 = vst [vmem:[%s5634_s17 + $0x168] sm:$0xff] %v2986_v36  ;;  %v2871_v12 = vadd.f32 %v2870_v47, %v2812_v25  ;;  %v2813_v19 = vpop.f32.mrf.mxu3  ;;  %v4212_v25 = vld [vmem:[#allocation5 + $0x188] sm:$0xf]  ;;  %v4537_v36 = vld [vmem:[#allocation5 + $0x190] sm:$0xf0] }
 0x3a0   : > { %v2814_v40 = vadd.f32 %v2813_v19, %v5610_v11  ;;  %v4213_v47 = vor.u32 %v4537_v36, %v4212_v25  ;;  %3241 = vmatpush.bf16.msrb.mxu3 %v4021_v54 }
 0x3a1   : > { %3095 = vmatmul.bf16.gmra.mxu0 %v5915_v59  ;;  %3213 = vmatmul.bf16.gmra.mxu2 %v5916_v42  ;;  %v2930_v17 = vadd.f32 %v2929_v52, %v2871_v12 }
 0x3a2   : > { %3359 = vmatpush.bf16.msra.mxu1 %v4213_v47 }
 0x3a3   : > { %v2936_v0 = vpop.f32.mrf.mxu1 }
 0x3a4   : > { %v2988_v29 = vpop.f32.mrf.mxu2  ;;  %3041 = vmatmul.bf16.gmra.mxu3 %v5917_v3 }
 0x3a5   : > { %v2989_v57 = vadd.f32 %v2988_v29, %v2930_v17 }
 0x3a6   : > { %v2872_v35 = vpop.f32.mrf.mxu0 }
 0x3a7   : > { %3518 = vst [vmem:[%s5634_s17 + $0x180] sm:$0xff] %v2989_v57  ;;  %v2873_v49 = vadd.f32 %v2872_v35, %v2814_v40  ;;  %v2816_v44 = vpop.f32.mrf.mxu3  ;;  %v4308_v40 = vld [vmem:[#allocation5 + $0x248] sm:$0xf]  ;;  %v4561_v57 = vld [vmem:[#allocation5 + $0x250] sm:$0xf0] }
 0x3a8   : > { %v2817_v12 = vadd.f32 %v2816_v44, %v5610_v11  ;;  %v4309_v35 = vor.u32 %v4561_v57, %v4308_v40 }
 0x3a9   : > { %v2932_v4 = vadd.f32 %v2931_v13, %v2873_v49  ;;  %v4117_v13 = vor.u32 %v4513_v15, %v4116_v27 }
 0x3aa   : > { %3418 = vmatpush.bf16.msrb.mxu2 %v4309_v35 }
 0x3ab   : > { %v3125_v1 = vpop.f32.mrf.mxu1  ;;  %3300 = vmatpush.bf16.msrb.mxu0 %v4117_v13 }
 0x3ac   : > { %v2990_v52 = vpop.f32.mrf.mxu2 }
 0x3ad   : > { %v2991_v19 = vadd.f32 %v2990_v52, %v2932_v4 }
 0x3ae   : > { %v2875_v32 = vpop.f32.mrf.mxu0  ;;  %3164 = vmatmul.bf16.gmra.mxu1 %v5588_v51 }
 0x3af   : > { %3521 = vst [vmem:[%s5634_s17 + $0x198] sm:$0xff] %v2991_v19  ;;  %v2876_v17 = vadd.f32 %v2875_v32, %v2817_v12  ;;  %v2818_v29 = vpop.f32.mrf.mxu3  ;;  %v5715_v12 = vperm.slane %v5607_v50, 1 }
 0x3b0   : > { %v2819_v25 = vadd.f32 %v2818_v29, %v5610_v11 }
 0x3b1   : > { %3100 = vmatmul.bf16.gmra.mxu0 %v5393_v58  ;;  %3218 = vmatmul.bf16.gmra.mxu2 %v5591_v21  ;;  %v2935_v44 = vadd.f32 %v2934_v38, %v2876_v17 }
 0x3b3   : > { %v3127_v49 = vpop.f32.mrf.mxu1 }
 0x3b4   : > { %v2993_v54 = vpop.f32.mrf.mxu2  ;;  %3046 = vmatmul.bf16.gmra.mxu3 %v5406_v45 }
 0x3b5   : > { %v2994_v36 = vadd.f32 %v2993_v54, %v2935_v44 }
 0x3b6   : > { %v2877_v47 = vpop.f32.mrf.mxu0 }
 0x3b7   : > { %3524 = vst [vmem:[%s5634_s17 + $0x1b0] sm:$0xff] %v2994_v36  ;;  %v2878_v4 = vadd.f32 %v2877_v47, %v2819_v25  ;;  %v3007_v52 = vpop.f32.mrf.mxu3 }
 0x3b8   : > { %v3008_v38 = vadd.f32 %v3007_v52, %v5715_v12 }
 0x3b9   : > { %v2937_v32 = vadd.f32 %v2936_v0, %v2878_v4 }
 0x3bb   : > { %v3130_v19 = vpop.f32.mrf.mxu1 }
 0x3bc   : > { %v2995_v40 = vpop.f32.mrf.mxu2 }
 0x3bd   : > { %v2996_v17 = vadd.f32 %v2995_v40, %v2937_v32 }
 0x3be   : > { %v3066_v57 = vpop.f32.mrf.mxu0  ;;  %3169 = vmatmul.bf16.gmra.mxu1 %v5614_v28 }
 0x3bf   : > { %3527 = vst [vmem:[%s5634_s17 + $0x1c8] sm:$0xff] %v2996_v17  ;;  %v3067_v11 = vadd.f32 %v3066_v57, %v3008_v38  ;;  %v3009_v29 = vpop.f32.mrf.mxu3 }
 0x3c0   : > { %v3010_v27 = vadd.f32 %v3009_v29, %v5715_v12 }
 0x3c1   : > { %3105 = vmatmul.bf16.gmra.mxu0 %v5411_v24  ;;  %3223 = vmatmul.bf16.gmra.mxu2 %v5619_v46  ;;  %v3126_v50 = vadd.f32 %v3125_v1, %v3067_v11 }
 0x3c3   : > { %v3132_v35 = vpop.f32.mrf.mxu1 }
 0x3c4   : > { %3051 = vmatmul.bf16.gmra.mxu3 %v5424_v9  ;;  %v3184_v0 = vpop.f32.mrf.mxu2 }
 0x3c5   : > { %v3185_v15 = vadd.f32 %v3184_v0, %v3126_v50 }
 0x3c6   : > { %v3068_v13 = vpop.f32.mrf.mxu0 }
 0x3c7   : > { %3471 = vst [vmem:[%s5634_s17 + $0x8] sm:$0xff] %v3185_v15  ;;  %v3069_v44 = vadd.f32 %v3068_v13, %v3010_v27  ;;  %v3012_v54 = vpop.f32.mrf.mxu3 }
 0x3c8   : > { %v3013_v4 = vadd.f32 %v3012_v54, %v5715_v12 }
 0x3c9   : > { %v3128_v36 = vadd.f32 %v3127_v49, %v3069_v44 }
 0x3cb   : > { %v3135_v25 = vpop.f32.mrf.mxu1 }
 0x3cc   : > { %v3186_v47 = vpop.f32.mrf.mxu2 }
 0x3cd   : > { %v3187_v52 = vadd.f32 %v3186_v47, %v3128_v36 }
 0x3ce   : > { %v3071_v32 = vpop.f32.mrf.mxu0  ;;  %3360 = vmatmul.bf16.vlgmr.msra.gmra.mxu1 %v5438_v34 }
 0x3cf   : > { %3474 = vst [vmem:[%s5634_s17 + $0x20] sm:$0xff] %v3187_v52  ;;  %v3072_v1 = vadd.f32 %v3071_v32, %v3013_v4  ;;  %v3014_v40 = vpop.f32.mrf.mxu3 }
 0x3d0   : > { %v3015_v49 = vadd.f32 %v3014_v40, %v5715_v12 }
 0x3d1   : > { %3110 = vmatmul.bf16.gmra.mxu0 %v5432_v37  ;;  %3228 = vmatmul.bf16.gmra.mxu2 %v5641_v20  ;;  %v3131_v17 = vadd.f32 %v3130_v19, %v3072_v1 }
 0x3d3   : > { %v3137_v38 = vpop.f32.mrf.mxu1 }
 0x3d4   : > { %v3189_v57 = vpop.f32.mrf.mxu2  ;;  %3242 = vmatmul.bf16.vlgmr.msrb.gmra.mxu3 %v5258_v39 }
 0x3d5   : > { %v3190_v11 = vadd.f32 %v3189_v57, %v3131_v17 }
 0x3d6   : > { %v3073_v29 = vpop.f32.mrf.mxu0 }
 0x3d7   : > { %3477 = vst [vmem:[%s5634_s17 + $0x38] sm:$0xff] %v3190_v11  ;;  %v3074_v50 = vadd.f32 %v3073_v29, %v3015_v49  ;;  %v3017_v34 = vpop.f32.mrf.mxu3 }
 0x3d8   : > { %v3018_v13 = vadd.f32 %v3017_v34, %v5715_v12 }
 0x3d9   : > { %v3133_v27 = vadd.f32 %v3132_v35, %v3074_v50 }
 0x3db   : > { %v3140_v0 = vpop.f32.mrf.mxu1 }
 0x3dc   : > { %v3191_v15 = vpop.f32.mrf.mxu2 }
 0x3dd   : > { %v3192_v44 = vadd.f32 %v3191_v15, %v3133_v27 }
 0x3de   : > { %v3076_v54 = vpop.f32.mrf.mxu0  ;;  %3365 = vmatmul.bf16.gmra.mxu1 %v5461_v53 }
 0x3df   : > { %3480 = vst [vmem:[%s5634_s17 + $0x50] sm:$0xff] %v3192_v44  ;;  %v3077_v19 = vadd.f32 %v3076_v54, %v3018_v13  ;;  %v3019_v39 = vpop.f32.mrf.mxu3 }
 0x3e0   : > { %v3020_v35 = vadd.f32 %v3019_v39, %v5715_v12 }
 0x3e1   : > { %3301 = vmatmul.bf16.vlgmr.msrb.gmra.mxu0 %v5267_v16  ;;  %3419 = vmatmul.bf16.vlgmr.msrb.gmra.mxu2 %v5465_v61  ;;  %v3136_v47 = vadd.f32 %v3135_v25, %v3077_v19 }
 0x3e3   : > { %v3142_v36 = vpop.f32.mrf.mxu1 }
 0x3e4   : > { %v3194_v4 = vpop.f32.mrf.mxu2  ;;  %3247 = vmatmul.bf16.gmra.mxu3 %v5280_v62 }
 0x3e5   : > { %v3195_v52 = vadd.f32 %v3194_v4, %v3136_v47 }
 0x3e6   : > { %v3078_v32 = vpop.f32.mrf.mxu0 }
 0x3e7   : > { %3483 = vst [vmem:[%s5634_s17 + $0x68] sm:$0xff] %v3195_v52  ;;  %v3079_v1 = vadd.f32 %v3078_v32, %v3020_v35  ;;  %v3022_v53 = vpop.f32.mrf.mxu3 }
 0x3e8   : > { %v3023_v16 = vadd.f32 %v3022_v53, %v5715_v12 }
 0x3e9   : > { %v3138_v17 = vadd.f32 %v3137_v38, %v3079_v1 }
 0x3eb   : > { %v3145_v40 = vpop.f32.mrf.mxu1 }
 0x3ec   : > { %v3196_v57 = vpop.f32.mrf.mxu2 }
 0x3ed   : > { %v3197_v61 = vadd.f32 %v3196_v57, %v3138_v17 }
 0x3ee   : > { %v3081_v49 = vpop.f32.mrf.mxu0  ;;  %3370 = vmatmul.bf16.gmra.mxu1 %v5480_v63 }
 0x3ef   : > { %3486 = vst [vmem:[%s5634_s17 + $0x80] sm:$0xff] %v3197_v61  ;;  %v3082_v25 = vadd.f32 %v3081_v49, %v3023_v16  ;;  %v3024_v62 = vpop.f32.mrf.mxu3 }
 0x3f0   : > { %v3025_v38 = vadd.f32 %v3024_v62, %v5715_v12 }
 0x3f1   : > { %3306 = vmatmul.bf16.gmra.mxu0 %v5285_v18  ;;  %3424 = vmatmul.bf16.gmra.mxu2 %v5484_v7  ;;  %v3141_v29 = vadd.f32 %v3140_v0, %v3082_v25 }
 0x3f3   : > { %v3147_v11 = vpop.f32.mrf.mxu1 }
 0x3f4   : > { %v3199_v50 = vpop.f32.mrf.mxu2  ;;  %3252 = vmatmul.bf16.gmra.mxu3 %v5298_v48 }
 0x3f5   : > { %v3200_v34 = vadd.f32 %v3199_v50, %v3141_v29 }
 0x3f6   : > { %v3083_v27 = vpop.f32.mrf.mxu0 }
 0x3f7   : > { %3489 = vst [vmem:[%s5634_s17 + $0x98] sm:$0xff] %v3200_v34  ;;  %v3084_v15 = vadd.f32 %v3083_v27, %v3025_v38  ;;  %v3027_v63 = vpop.f32.mrf.mxu3 }
 0x3f8   : > { %v3028_v18 = vadd.f32 %v3027_v63, %v5715_v12 }
 0x3f9   : > { %v3143_v44 = vadd.f32 %v3142_v36, %v3084_v15 }
 0x3fb   : > { %v3150_v13 = vpop.f32.mrf.mxu1 }
 0x3fc   : > { %v3201_v54 = vpop.f32.mrf.mxu2 }
 0x3fd   : > { %v3202_v7 = vadd.f32 %v3201_v54, %v3143_v44 }
 0x3fe   : > { %v3086_v19 = vpop.f32.mrf.mxu0  ;;  %3375 = vmatmul.bf16.gmra.mxu1 %v5499_v23 }
 0x3ff   : > { %3492 = vst [vmem:[%s5634_s17 + $0xb0] sm:$0xff] %v3202_v7  ;;  %v3087_v0 = vadd.f32 %v3086_v19, %v3028_v18  ;;  %v3029_v48 = vpop.f32.mrf.mxu3 }
 0x400   : > { %v3030_v36 = vadd.f32 %v3029_v48, %v5715_v12 }
 0x401   : > { %3311 = vmatmul.bf16.gmra.mxu0 %v5303_v10  ;;  %3429 = vmatmul.bf16.gmra.mxu2 %v5502_v2  ;;  %v3146_v47 = vadd.f32 %v3145_v40, %v3087_v0 }
 0x403   : > { %v3152_v39 = vpop.f32.mrf.mxu1 }
 0x404   : > { %v3204_v4 = vpop.f32.mrf.mxu2  ;;  %3257 = vmatmul.bf16.gmra.mxu3 %v5316_v41 }
 0x405   : > { %v3205_v35 = vadd.f32 %v3204_v4, %v3146_v47 }
 0x406   : > { %v3088_v52 = vpop.f32.mrf.mxu0 }
 0x407   : > { %3495 = vst [vmem:[%s5634_s17 + $0xc8] sm:$0xff] %v3205_v35  ;;  %v3089_v32 = vadd.f32 %v3088_v52, %v3030_v36  ;;  %v3032_v23 = vpop.f32.mrf.mxu3 }
 0x408   : > { %v3033_v10 = vadd.f32 %v3032_v23, %v5715_v12 }
 0x409   : > { %v3148_v53 = vadd.f32 %v3147_v11, %v3089_v32 }
 0x40b   : > { %v3155_v1 = vpop.f32.mrf.mxu1 }
 0x40c   : > { %v3206_v17 = vpop.f32.mrf.mxu2 }
 0x40d   : > { %v3207_v2 = vadd.f32 %v3206_v17, %v3148_v53 }
 0x40e   : > { %v3091_v57 = vpop.f32.mrf.mxu0  ;;  %3380 = vmatmul.bf16.gmra.mxu1 %v5517_v6 }
 0x40f   : > { %3498 = vst [vmem:[%s5634_s17 + $0xe0] sm:$0xff] %v3207_v2  ;;  %v3092_v40 = vadd.f32 %v3091_v57, %v3033_v10  ;;  %v3034_v41 = vpop.f32.mrf.mxu3 }
 0x410   : > { %v3035_v25 = vadd.f32 %v3034_v41, %v5715_v12 }
 0x411   : > { %3316 = vmatmul.bf16.gmra.mxu0 %v5321_v14  ;;  %3434 = vmatmul.bf16.gmra.mxu2 %v5520_v8  ;;  %v3151_v61 = vadd.f32 %v3150_v13, %v3092_v40 }
 0x413   : > { %v3157_v16 = vpop.f32.mrf.mxu1 }
 0x414   : > { %v3209_v49 = vpop.f32.mrf.mxu2  ;;  %3262 = vmatmul.bf16.gmra.mxu3 %v5334_v33 }
 0x415   : > { %v3210_v62 = vadd.f32 %v3209_v49, %v3151_v61 }
 0x416   : > { %v3093_v11 = vpop.f32.mrf.mxu0 }
 0x417   : > { %3501 = vst [vmem:[%s5634_s17 + $0xf8] sm:$0xff] %v3210_v62  ;;  %v3094_v29 = vadd.f32 %v3093_v11, %v3035_v25  ;;  %v3037_v6 = vpop.f32.mrf.mxu3 }
 0x418   : > { %v3038_v14 = vadd.f32 %v3037_v6, %v5715_v12 }
 0x419   : > { %v3153_v38 = vadd.f32 %v3152_v39, %v3094_v29 }
 0x41b   : > { %v3160_v50 = vpop.f32.mrf.mxu1 }
 0x41c   : > { %v3211_v34 = vpop.f32.mrf.mxu2 }
 0x41d   : > { %v3212_v8 = vadd.f32 %v3211_v34, %v3153_v38 }
 0x41e   : > { %v3096_v27 = vpop.f32.mrf.mxu0  ;;  %3385 = vmatmul.bf16.gmra.mxu1 %v5535_v31 }
 0x41f   : > { %3504 = vst [vmem:[%s5634_s17 + $0x110] sm:$0xff] %v3212_v8  ;;  %v3097_v15 = vadd.f32 %v3096_v27, %v3038_v14  ;;  %v3039_v33 = vpop.f32.mrf.mxu3 }
 0x420   : > { %v3040_v54 = vadd.f32 %v3039_v33, %v5715_v12 }
 0x421   : > { %3321 = vmatmul.bf16.gmra.mxu0 %v5339_v55  ;;  %3439 = vmatmul.bf16.gmra.mxu2 %v5538_v26  ;;  %v3156_v13 = vadd.f32 %v3155_v1, %v3097_v15 }
 0x423   : > { %v3162_v63 = vpop.f32.mrf.mxu1 }
 0x424   : > { %v3214_v44 = vpop.f32.mrf.mxu2  ;;  %3267 = vmatmul.bf16.gmra.mxu3 %v5913_v56 }
 0x425   : > { %v3215_v18 = vadd.f32 %v3214_v44, %v3156_v13  ;;  %v4670_v44 = vld [vmem:[%s5891_s8] sm:$0x7] }
 0x426   : > { %v3098_v7 = vpop.f32.mrf.mxu0 }
 0x427   : > { %3507 = vst [vmem:[%s5634_s17 + $0x128] sm:$0xff] %v3215_v18  ;;  %v3099_v19 = vadd.f32 %v3098_v7, %v3040_v54  ;;  %v3042_v31 = vpop.f32.mrf.mxu3 }
 0x428   : > { %v3043_v55 = vadd.f32 %v3042_v31, %v5715_v12 }
 0x429   : > { %v3158_v48 = vadd.f32 %v3157_v16, %v3099_v19 }
 0x42b   : > { %v3165_v0 = vpop.f32.mrf.mxu1 }
 0x42c   : > { %v3216_v39 = vpop.f32.mrf.mxu2 }
 0x42d   : > { %v3217_v26 = vadd.f32 %v3216_v39, %v3158_v48 }
 0x42e   : > { %v3101_v47 = vpop.f32.mrf.mxu0  ;;  %3390 = vmatmul.bf16.gmra.mxu1 %v5551_v60 }
 0x42f   : > { %3510 = vst [vmem:[%s5634_s17 + $0x140] sm:$0xff] %v3217_v26  ;;  %v3102_v4 = vadd.f32 %v3101_v47, %v3043_v55  ;;  %v3044_v56 = vpop.f32.mrf.mxu3 }
 0x430   : > { %v3045_v32 = vadd.f32 %v3044_v56, %v5715_v12 }
 0x431   : > { %3326 = vmatmul.bf16.gmra.mxu0 %v5357_v43  ;;  %3444 = vmatmul.bf16.gmra.mxu2 %v5557_v30  ;;  %v3161_v35 = vadd.f32 %v3160_v50, %v3102_v4 }
 0x433   : > { %v3167_v36 = vpop.f32.mrf.mxu1 }
 0x434   : > { %v3219_v52 = vpop.f32.mrf.mxu2  ;;  %3272 = vmatmul.bf16.gmra.mxu3 %v5914_v22 }
 0x435   : > { %v3220_v23 = vadd.f32 %v3219_v52, %v3161_v35 }
 0x436   : > { %v3103_v1 = vpop.f32.mrf.mxu0 }
 0x437   : > { %3513 = vst [vmem:[%s5634_s17 + $0x158] sm:$0xff] %v3220_v23  ;;  %v3104_v53 = vadd.f32 %v3103_v1, %v3045_v32  ;;  %v3047_v60 = vpop.f32.mrf.mxu3 }
 0x438   : > { %v3048_v43 = vadd.f32 %v3047_v60, %v5715_v12 }
 0x439   : > { %v3163_v10 = vadd.f32 %v3162_v63, %v3104_v53 }
 0x43b   : > { %v3170_v17 = vpop.f32.mrf.mxu1 }
 0x43c   : > { %v3221_v2 = vpop.f32.mrf.mxu2 }
 0x43d   : > { %v3222_v30 = vadd.f32 %v3221_v2, %v3163_v10 }
 0x43e   : > { %v3106_v57 = vpop.f32.mrf.mxu0  ;;  %3395 = vmatmul.bf16.gmra.mxu1 %v5570_v5 }
 0x43f   : > { %3516 = vst [vmem:[%s5634_s17 + $0x170] sm:$0xff] %v3222_v30  ;;  %v3107_v40 = vadd.f32 %v3106_v57, %v3048_v43  ;;  %v3049_v22 = vpop.f32.mrf.mxu3 }
 0x440   : > { %v3050_v49 = vadd.f32 %v3049_v22, %v5715_v12 }
 0x441   : > { %3331 = vmatmul.bf16.gmra.mxu0 %v5915_v59  ;;  %3449 = vmatmul.bf16.gmra.mxu2 %v5916_v42  ;;  %v3166_v16 = vadd.f32 %v3165_v0, %v3107_v40 }
 0x443   : > { %v3172_v41 = vpop.f32.mrf.mxu1 }
 0x444   : > { %v3224_v61 = vpop.f32.mrf.mxu2  ;;  %3277 = vmatmul.bf16.gmra.mxu3 %v5917_v3 }
 0x445   : > { %v3225_v25 = vadd.f32 %v3224_v61, %v3166_v16 }
 0x446   : > { %v3108_v62 = vpop.f32.mrf.mxu0 }
 0x447   : > { %3519 = vst [vmem:[%s5634_s17 + $0x188] sm:$0xff] %v3225_v25  ;;  %v3109_v11 = vadd.f32 %v3108_v62, %v3050_v49  ;;  %v3052_v5 = vpop.f32.mrf.mxu3 }
 0x448   : > { %v3053_v59 = vadd.f32 %v3052_v5, %v5715_v12 }
 0x449   : > { %v3168_v6 = vadd.f32 %v3167_v36, %v3109_v11 }
 0x44b   : > { %v3361_v29 = vpop.f32.mrf.mxu1 }
 0x44c   : > { %v3226_v50 = vpop.f32.mrf.mxu2 }
 0x44d   : > { %v3227_v42 = vadd.f32 %v3226_v50, %v3168_v6 }
 0x44e   : > { %v3111_v38 = vpop.f32.mrf.mxu0  ;;  %3400 = vmatmul.bf16.gmra.mxu1 %v5588_v51 }
 0x44f   : > { %3522 = vst [vmem:[%s5634_s17 + $0x1a0] sm:$0xff] %v3227_v42  ;;  %v3112_v34 = vadd.f32 %v3111_v38, %v3053_v59  ;;  %v3054_v3 = vpop.f32.mrf.mxu3 }
 0x450   : > { %v3055_v15 = vadd.f32 %v3054_v3, %v5715_v12 }
 0x451   : > { %3336 = vmatmul.bf16.gmra.mxu0 %v5393_v58  ;;  %3454 = vmatmul.bf16.gmra.mxu2 %v5591_v21  ;;  %v3171_v8 = vadd.f32 %v3170_v17, %v3112_v34  ;;  %v5800_v58 = vperm.slane %v4670_v44, 2 }
 0x453   : > { %v3363_v14 = vpop.f32.mrf.mxu1 }
 0x454   : > { %v3229_v27 = vpop.f32.mrf.mxu2  ;;  %3282 = vmatmul.bf16.gmra.mxu3 %v5406_v45 }
 0x455   : > { %v3230_v33 = vadd.f32 %v3229_v27, %v3171_v8 }
 0x456   : > { %v3113_v63 = vpop.f32.mrf.mxu0 }
 0x457   : > { %3525 = vst [vmem:[%s5634_s17 + $0x1b8] sm:$0xff] %v3230_v33  ;;  %v3114_v13 = vadd.f32 %v3113_v63, %v3055_v15  ;;  %v3243_v51 = vpop.f32.mrf.mxu3 }
 0x458   : > { %v3244_v7 = vadd.f32 %v3243_v51, %v5800_v58 }
 0x459   : > { %v3173_v54 = vadd.f32 %v3172_v41, %v3114_v13 }
 0x45b   : > { %v3366_v21 = vpop.f32.mrf.mxu1 }
 0x45c   : > { %v3231_v18 = vpop.f32.mrf.mxu2 }
 0x45d   : > { %v3232_v45 = vadd.f32 %v3231_v18, %v3173_v54 }
 0x45e   : > { %v3302_v19 = vpop.f32.mrf.mxu0  ;;  %3405 = vmatmul.bf16.gmra.mxu1 %v5614_v28 }
 0x45f   : > { %3528 = vst [vmem:[%s5634_s17 + $0x1d0] sm:$0xff] %v3232_v45  ;;  %v3303_v12 = vadd.f32 %v3302_v19, %v3244_v7  ;;  %v3245_v31 = vpop.f32.mrf.mxu3 }
 0x460   : > { %v3246_v55 = vadd.f32 %v3245_v31, %v5800_v58 }
 0x461   : > { %3341 = vmatmul.bf16.gmra.mxu0 %v5411_v24  ;;  %3459 = vmatmul.bf16.gmra.mxu2 %v5619_v46  ;;  %v3362_v48 = vadd.f32 %v3361_v29, %v3303_v12 }
 0x463   : > { %v3368_v0 = vpop.f32.mrf.mxu1 }
 0x464   : > { %3287 = vmatmul.bf16.gmra.mxu3 %v5424_v9  ;;  %v3420_v39 = vpop.f32.mrf.mxu2 }
 0x465   : > { %v3421_v26 = vadd.f32 %v3420_v39, %v3362_v48 }
 0x466   : > { %v3304_v47 = vpop.f32.mrf.mxu0 }
 0x467   : > { %3472 = vst [vmem:[%s5634_s17 + $0x10] sm:$0xff] %v3421_v26  ;;  %v3305_v4 = vadd.f32 %v3304_v47, %v3246_v55  ;;  %v3248_v28 = vpop.f32.mrf.mxu3 }
 0x468   : > { %v3249_v24 = vadd.f32 %v3248_v28, %v5800_v58 }
 0x469   : > { %v3364_v36 = vadd.f32 %v3363_v14, %v3305_v4 }
 0x46b   : > { %v3371_v56 = vpop.f32.mrf.mxu1 }
 0x46c   : > { %v3422_v35 = vpop.f32.mrf.mxu2 }
 0x46d   : > { %v3423_v46 = vadd.f32 %v3422_v35, %v3364_v36 }
 0x46e   : > { %v3307_v52 = vpop.f32.mrf.mxu0 }
 0x46f   : > { %3475 = vst [vmem:[%s5634_s17 + $0x28] sm:$0xff] %v3423_v46  ;;  %v3308_v32 = vadd.f32 %v3307_v52, %v3249_v24  ;;  %v3250_v23 = vpop.f32.mrf.mxu3 }
 0x470   : > { %v3251_v60 = vadd.f32 %v3250_v23, %v5800_v58 }
 0x471   : > { %3346 = vmatmul.bf16.gmra.mxu0 %v5432_v37  ;;  %3464 = vmatmul.bf16.gmra.mxu2 %v5641_v20  ;;  %v3367_v1 = vadd.f32 %v3366_v21, %v3308_v32 }
 0x473   : > { %v3373_v9 = vpop.f32.mrf.mxu1 }
 0x474   : > { %v3425_v53 = vpop.f32.mrf.mxu2 }
 0x475   : > { %v3426_v17 = vadd.f32 %v3425_v53, %v3367_v1 }
 0x476   : > { %v3309_v10 = vpop.f32.mrf.mxu0 }
 0x477   : > { %3478 = vst [vmem:[%s5634_s17 + $0x40] sm:$0xff] %v3426_v17  ;;  %v3310_v2 = vadd.f32 %v3309_v10, %v3251_v60  ;;  %v3253_v43 = vpop.f32.mrf.mxu3 }
 0x478   : > { %v3254_v22 = vadd.f32 %v3253_v43, %v5800_v58 }
 0x479   : > { %v3369_v57 = vadd.f32 %v3368_v0, %v3310_v2 }
 0x47b   : > { %v3376_v30 = vpop.f32.mrf.mxu1 }
 0x47c   : > { %v3427_v40 = vpop.f32.mrf.mxu2 }
 0x47d   : > { %v3428_v37 = vadd.f32 %v3427_v40, %v3369_v57 }
 0x47e   : > { %v3312_v41 = vpop.f32.mrf.mxu0 }
 0x47f   : > { %3481 = vst [vmem:[%s5634_s17 + $0x58] sm:$0xff] %v3428_v37  ;;  %v3313_v20 = vadd.f32 %v3312_v41, %v3254_v22  ;;  %v3255_v16 = vpop.f32.mrf.mxu3 }
 0x480   : > { %v3256_v62 = vadd.f32 %v3255_v16, %v5800_v58 }
 0x481   : > { %v3372_v49 = vadd.f32 %v3371_v56, %v3313_v20 }
 0x483   : > { %v3378_v61 = vpop.f32.mrf.mxu1 }
 0x484   : > { %v3430_v25 = vpop.f32.mrf.mxu2 }
 0x485   : > { %v3431_v11 = vadd.f32 %v3430_v25, %v3372_v49 }
 0x486   : > { %v3314_v5 = vpop.f32.mrf.mxu0 }
 0x487   : > { %3484 = vst [vmem:[%s5634_s17 + $0x70] sm:$0xff] %v3431_v11  ;;  %v3315_v29 = vadd.f32 %v3314_v5, %v3256_v62  ;;  %v3258_v6 = vpop.f32.mrf.mxu3 }
 0x488   : > { %v3259_v38 = vadd.f32 %v3258_v6, %v5800_v58 }
 0x489   : > { %v3374_v50 = vadd.f32 %v3373_v9, %v3315_v29 }
 0x48b   : > { %v3381_v59 = vpop.f32.mrf.mxu1 }
 0x48c   : > { %v3432_v42 = vpop.f32.mrf.mxu2 }
 0x48d   : > { %v3433_v34 = vadd.f32 %v3432_v42, %v3374_v50 }
 0x48e   : > { %v3317_v3 = vpop.f32.mrf.mxu0 }
 0x48f   : > { %3487 = vst [vmem:[%s5634_s17 + $0x88] sm:$0xff] %v3433_v34  ;;  %v3318_v14 = vadd.f32 %v3317_v3, %v3259_v38  ;;  %v3260_v8 = vpop.f32.mrf.mxu3 }
 0x490   : > { %v3261_v33 = vadd.f32 %v3260_v8, %v5800_v58 }
 0x491   : > { %v3377_v27 = vadd.f32 %v3376_v30, %v3318_v14 }
 0x493   : > { %v3383_v13 = vpop.f32.mrf.mxu1 }
 0x494   : > { %v3435_v15 = vpop.f32.mrf.mxu2 }
 0x495   : > { %v3436_v63 = vadd.f32 %v3435_v15, %v3377_v27 }
 0x496   : > { %v3319_v51 = vpop.f32.mrf.mxu0 }
 0x497   : > { %3490 = vst [vmem:[%s5634_s17 + $0xa0] sm:$0xff] %v3436_v63  ;;  %v3320_v44 = vadd.f32 %v3319_v51, %v3261_v33  ;;  %v3263_v21 = vpop.f32.mrf.mxu3 }
 0x498   : > { %v3264_v7 = vadd.f32 %v3263_v21, %v5800_v58 }
 0x499   : > { %v3379_v54 = vadd.f32 %v3378_v61, %v3320_v44 }
 0x49b   : > { %v3386_v0 = vpop.f32.mrf.mxu1 }
 0x49c   : > { %v3437_v18 = vpop.f32.mrf.mxu2 }
 0x49d   : > { %v3438_v45 = vadd.f32 %v3437_v18, %v3379_v54 }
 0x49e   : > { %v3322_v19 = vpop.f32.mrf.mxu0 }
 0x49f   : > { %3493 = vst [vmem:[%s5634_s17 + $0xb8] sm:$0xff] %v3438_v45  ;;  %v3323_v12 = vadd.f32 %v3322_v19, %v3264_v7  ;;  %v3265_v31 = vpop.f32.mrf.mxu3 }
 0x4a0   : > { %v3266_v55 = vadd.f32 %v3265_v31, %v5800_v58 }
 0x4a1   : > { %v3382_v48 = vadd.f32 %v3381_v59, %v3323_v12 }
 0x4a3   : > { %v3388_v56 = vpop.f32.mrf.mxu1 }
 0x4a4   : > { %v3440_v39 = vpop.f32.mrf.mxu2 }
 0x4a5   : > { %v3441_v26 = vadd.f32 %v3440_v39, %v3382_v48 }
 0x4a6   : > { %v3324_v47 = vpop.f32.mrf.mxu0 }
 0x4a7   : > { %3496 = vst [vmem:[%s5634_s17 + $0xd0] sm:$0xff] %v3441_v26  ;;  %v3325_v4 = vadd.f32 %v3324_v47, %v3266_v55  ;;  %v3268_v28 = vpop.f32.mrf.mxu3 }
 0x4a8   : > { %v3269_v24 = vadd.f32 %v3268_v28, %v5800_v58 }
 0x4a9   : > { %v3384_v36 = vadd.f32 %v3383_v13, %v3325_v4 }
 0x4ab   : > { %v3391_v1 = vpop.f32.mrf.mxu1 }
 0x4ac   : > { %v3442_v35 = vpop.f32.mrf.mxu2 }
 0x4ad   : > { %v3443_v46 = vadd.f32 %v3442_v35, %v3384_v36 }
 0x4ae   : > { %v3327_v52 = vpop.f32.mrf.mxu0 }
 0x4af   : > { %3499 = vst [vmem:[%s5634_s17 + $0xe8] sm:$0xff] %v3443_v46  ;;  %v3328_v32 = vadd.f32 %v3327_v52, %v3269_v24  ;;  %v3270_v23 = vpop.f32.mrf.mxu3 }
 0x4b0   : > { %v3271_v60 = vadd.f32 %v3270_v23, %v5800_v58 }
 0x4b1   : > { %v3387_v9 = vadd.f32 %v3386_v0, %v3328_v32 }
 0x4b3   : > { %v3393_v37 = vpop.f32.mrf.mxu1 }
 0x4b4   : > { %v3445_v53 = vpop.f32.mrf.mxu2 }
 0x4b5   : > { %v3446_v17 = vadd.f32 %v3445_v53, %v3387_v9 }
 0x4b6   : > { %v3329_v10 = vpop.f32.mrf.mxu0 }
 0x4b7   : > { %3502 = vst [vmem:[%s5634_s17 + $0x100] sm:$0xff] %v3446_v17  ;;  %v3330_v2 = vadd.f32 %v3329_v10, %v3271_v60  ;;  %v3273_v43 = vpop.f32.mrf.mxu3 }
 0x4b8   : > { %v3274_v40 = vadd.f32 %v3273_v43, %v5800_v58 }
 0x4b9   : > { %v3389_v30 = vadd.f32 %v3388_v56, %v3330_v2 }
 0x4bb   : > { %v3396_v6 = vpop.f32.mrf.mxu1 }
 0x4bc   : > { %v3447_v57 = vpop.f32.mrf.mxu2 }
 0x4bd   : > { %v3448_v22 = vadd.f32 %v3447_v57, %v3389_v30 }
 0x4be   : > { %v3332_v41 = vpop.f32.mrf.mxu0 }
 0x4bf   : > { %3505 = vst [vmem:[%s5634_s17 + $0x118] sm:$0xff] %v3448_v22  ;;  %v3333_v20 = vadd.f32 %v3332_v41, %v3274_v40  ;;  %v3275_v16 = vpop.f32.mrf.mxu3 }
 0x4c0   : > { %v3276_v25 = vadd.f32 %v3275_v16, %v5800_v58 }
 0x4c1   : > { %v3392_v61 = vadd.f32 %v3391_v1, %v3333_v20 }
 0x4c3   : > { %v3398_v8 = vpop.f32.mrf.mxu1 }
 0x4c4   : > { %v3450_v49 = vpop.f32.mrf.mxu2 }
 0x4c5   : > { %v3451_v62 = vadd.f32 %v3450_v49, %v3392_v61 }
 0x4c6   : > { %v3334_v11 = vpop.f32.mrf.mxu0 }
 0x4c7   : > { %3508 = vst [vmem:[%s5634_s17 + $0x130] sm:$0xff] %v3451_v62  ;;  %v3335_v5 = vadd.f32 %v3334_v11, %v3276_v25  ;;  %v3278_v29 = vpop.f32.mrf.mxu3 }
 0x4c8   : > { %v3279_v42 = vadd.f32 %v3278_v29, %v5800_v58 }
 0x4c9   : > { %v3394_v50 = vadd.f32 %v3393_v37, %v3335_v5 }
 0x4cb   : > { %v3401_v54 = vpop.f32.mrf.mxu1 }
 0x4cc   : > { %v3452_v59 = vpop.f32.mrf.mxu2 }
 0x4cd   : > { %v3453_v38 = vadd.f32 %v3452_v59, %v3394_v50 }
 0x4ce   : > { %v3337_v34 = vpop.f32.mrf.mxu0 }
 0x4cf   : > { %3511 = vst [vmem:[%s5634_s17 + $0x148] sm:$0xff] %v3453_v38  ;;  %v3338_v3 = vadd.f32 %v3337_v34, %v3279_v42  ;;  %v3280_v14 = vpop.f32.mrf.mxu3 }
 0x4d0   : > { %v3281_v33 = vadd.f32 %v3280_v14, %v5800_v58 }
 0x4d1   : > { %v3397_v27 = vadd.f32 %v3396_v6, %v3338_v3 }
 0x4d3   : > { %v3403_v26 = vpop.f32.mrf.mxu1 }
 0x4d4   : > { %v3455_v15 = vpop.f32.mrf.mxu2 }
 0x4d5   : > { %v3456_v63 = vadd.f32 %v3455_v15, %v3397_v27 }
 0x4d6   : > { %v3339_v13 = vpop.f32.mrf.mxu0 }
 0x4d7   : > { %3514 = vst [vmem:[%s5634_s17 + $0x160] sm:$0xff] %v3456_v63  ;;  %v3340_v51 = vadd.f32 %v3339_v13, %v3281_v33  ;;  %v3283_v44 = vpop.f32.mrf.mxu3 }
 0x4d8   : > { %v3284_v7 = vadd.f32 %v3283_v44, %v5800_v58 }
 0x4d9   : > { %v3399_v21 = vadd.f32 %v3398_v8, %v3340_v51 }
 0x4db   : > { %v3406_v32 = vpop.f32.mrf.mxu1 }
 0x4dc   : > { %v3457_v18 = vpop.f32.mrf.mxu2 }
 0x4dd   : > { %v3458_v45 = vadd.f32 %v3457_v18, %v3399_v21 }
 0x4de   : > { %v3342_v19 = vpop.f32.mrf.mxu0 }
 0x4df   : > { %3517 = vst [vmem:[%s5634_s17 + $0x178] sm:$0xff] %v3458_v45  ;;  %v3343_v12 = vadd.f32 %v3342_v19, %v3284_v7  ;;  %v3285_v31 = vpop.f32.mrf.mxu3 }
 0x4e0   : > { %v3286_v39 = vadd.f32 %v3285_v31, %v5800_v58 }
 0x4e1   : > { %v3402_v0 = vadd.f32 %v3401_v54, %v3343_v12 }
 0x4e3   : > { %v3408_v2 = vpop.f32.mrf.mxu1 }
 0x4e4   : > { %v3460_v48 = vpop.f32.mrf.mxu2 }
 0x4e5   : > { %v3461_v55 = vadd.f32 %v3460_v48, %v3402_v0 }
 0x4e6   : > { %v3344_v47 = vpop.f32.mrf.mxu0 }
 0x4e7   : > { %3520 = vst [vmem:[%s5634_s17 + $0x190] sm:$0xff] %v3461_v55  ;;  %v3345_v4 = vadd.f32 %v3344_v47, %v3286_v39  ;;  %v3288_v28 = vpop.f32.mrf.mxu3 }
 0x4e8   : > { %v3289_v35 = vadd.f32 %v3288_v28, %v5800_v58 }
 0x4e9   : > { %v3404_v56 = vadd.f32 %v3403_v26, %v3345_v4 }
 0x4ec   : > { %v3462_v36 = vpop.f32.mrf.mxu2 }
 0x4ed   : > { %v3463_v24 = vadd.f32 %v3462_v36, %v3404_v56 }
 0x4ee   : > { %v3347_v46 = vpop.f32.mrf.mxu0 }
 0x4ef   : > { %3523 = vst [vmem:[%s5634_s17 + $0x1a8] sm:$0xff] %v3463_v24  ;;  %v3348_v52 = vadd.f32 %v3347_v46, %v3289_v35  ;;  %v3290_v23 = vpop.f32.mrf.mxu3 }
 0x4f0   : > { %v3291_v53 = vadd.f32 %v3290_v23, %v5800_v58 }
 0x4f1   : > { %v3407_v9 = vadd.f32 %v3406_v32, %v3348_v52 }
 0x4f4   : > { %v3465_v1 = vpop.f32.mrf.mxu2 }
 0x4f5   : > { %v3466_v60 = vadd.f32 %v3465_v1, %v3407_v9 }
 0x4f6   : > { %v3349_v17 = vpop.f32.mrf.mxu0 }
 0x4f7   : > { %3526 = vst [vmem:[%s5634_s17 + $0x1c0] sm:$0xff] %v3466_v60  ;;  %v3350_v10 = vadd.f32 %v3349_v17, %v3291_v53 }
 0x4f9   : > { %v3409_v43 = vadd.f32 %v3408_v2, %v3350_v10 }
 0x4fc   : > { %v3467_v30 = vpop.f32.mrf.mxu2 }
 0x4fd   : > { %v3468_v57 = vadd.f32 %v3467_v30, %v3409_v43 }
 0x4ff   : > { %3529 = vst [vmem:[%s5634_s17 + $0x1d8] sm:$0xff] %v3468_v57 }
 0x500   : > { %4758 = shalt.err (!%p4755_p8)
}
 0x501   : > { %s4809_s14 = smov 384   ;;  %s4810_s17 = smov 24  }
 0x502   : > { %4609 = dma.vmem_to_hbm [thread:$0]  (%p4899_p5), %s3545_s25, 7680, %s3547_s26, %s3531_s13, %s4809_s14, %s4809_s14, %s4810_s17  }
 0x503 PF: > { %p4627_p9 = scmp.ge.s32.totalorder %s4801_s12, 2  ;;  %s3561_s5 = sand.u32 1, %s4789_s30  }
 0x504   : > { %s3562_s21 = scalar_lea.sflag [#allocation4], %s3561_s5 }
 0x505   : > { %p4619_p10 = pnand %p4627_p9, %p4903_p6 }
 0x507   : > { %p4620_p11 = pneg %p4619_p10 }
 0x509   : > { %4784 = dma.done.wait (%p4620_p11), %s3562_s21, 7680  }
 0x50a   : > { %4786 = vsyncadd (%p4620_p11), %s3562_s21, 4294959616  ;;  %p21_p12 = scmp.ge.s32.totalorder %s4886_s15, 4   ;;  %s5918_s30 = smov %s4793_s10 }
 0x50b   : > { %s5919_s10 = smov %s4797_s11  ;;  %s5920_s11 = smov %s4897_s18 }
 0x50c   : > { %s5921_s12 = smov %s4886_s15  ;;  %23 = sbr.rel (!%p21_p12) target bundleno = 7 (0x7), region = 100 }
 0x511   :  { %3568 = vsyncpa [#allocation3], 1 }
 0x512   :  { %3570 = vsyncpa [#allocation3 + $0x1], 1 }
 0x513   :  { %3571 = vsyncpa [#allocation6], 1 }
 0x514   :  { %3572 = vsyncpa [#allocation4], 1 }
 0x515   :  { %3574 = vsyncpa [#allocation4 + $0x1], 1 }

// kernel: tpu_custom_call.1
= control target key start
LH: loop header
LB: loop body
LE: loop exit
PB: predicated region body
PF: predicated region fallthrough
CT: control target
= control target key end

     0   :  { %s5883_s0 = inlined_call_operand.vmem [shape: bf16[320,8], index: 0, kind: input, shape index: {}]   ;;  %s5884_s1 = inlined_call_operand.vmem [shape: bf16[8,128], index: 1, kind: input, shape index: {}]   ;;  %s5885_s2 = inlined_call_operand.vmem [shape: f32[1,128], index: 2, kind: input, shape index: {}]   ;;  %s5886_s3 = inlined_call_operand.vmem [shape: bf16[128,256], index: 3, kind: input, shape index: {}]   ;;  %s5887_s4 = inlined_call_operand.vmem [shape: f32[1,256], index: 4, kind: input, shape index: {}]   ;;  %s5888_s5 = inlined_call_operand.hbm [shape: bf16[256,512], index: 5, kind: input, shape index: {}]   ;;  %s5889_s6 = inlined_call_operand.vmem [shape: f32[1,512], index: 6, kind: input, shape index: {}]   ;;  %s5890_s7 = inlined_call_operand.hbm [shape: bf16[512,384], index: 7, kind: input, shape index: {}]   ;;  %s5891_s8 = inlined_call_operand.vmem [shape: f32[1,384], index: 8, kind: input, shape index: {}]   ;;  %s5892_s9 = inlined_call_operand.hbm [shape: f32[320,384], index: 9, kind: output, shape index: {}]  }
   0x1   :  { %5903 = sst [smem:[#allocation16_spill]] %s5888_s5 }
   0x2   :  { %14 = vsyncpa [#allocation3], 0 }
   0x3   :  { %15 = vsyncpa [#allocation6], 0 }
   0x4   :  { %16 = vsyncpa [#allocation4], 0 }
   0x5   :  { %18 = vsyncpa [#allocation4 + $0x1], 0  ;;  %s4861_s30 = smov 0   ;;  %s4863_s10 = smov 0  }
   0x6   :  { %s4865_s11 = smov 0   ;;  %s4867_s12 = smov 0  }
   0x7 LB: > { %s4882_s13 = sadd.s32 4294967295, %s4801_s12   ;;  %s3631_s14 = sadd.s32 4294967294, %s4801_s12   ;;  %s4801_s12 = sphi %s4867_s12, %s5921_s12   ;;  %s4797_s11 = sphi %s4865_s11, %s5920_s11   ;;  %s4793_s10 = sphi %s4863_s10, %s5919_s10   ;;  %s4789_s30 = sphi %s4861_s30, %s5918_s30  }
   0x8   : > { %s4886_s15 = sadd.s32 1, %s4801_s12   ;;  %s225_s16 = sadd.s32 1, %s4797_s11 }
   0x9   : > { %s222_s17 = ssub.s32 %s4801_s12, %s4886_s15  ;;  %p235_p0 = scmp.ne.s32.totalorder %s4797_s11, %s4793_s10 }
   0xa   : > { %p223_p1 = scmp.eq.s32.totalorder %s222_s17, 0  ;;  %p236_p2 = scmp.eq.s32.totalorder %s4882_s13, 1 }
   0xb   : > { %p241_p3 = scmp.ne.s32.totalorder %s4793_s10, %s4789_s30  ;;  %p242_p4 = scmp.eq.s32.totalorder %s3631_s14, 1 }
   0xc   : > { %s4897_s18 = scalar_select %p223_p1, %s4797_s11, %s225_s16  }
   0xd   : > { %p4899_p5 = por %p236_p2, %p235_p0  ;;  %p4903_p6 = por %p242_p4, %p241_p3 }
   0xe   : > { %p3632_p7 = scmp.ge.s32.totalorder %s4801_s12, 1  ;;  %p249_p8 = scmp.lt.s32.totalorder %s4801_s12, 3 }
   0xf   : > { %p4622_p9 = scmp.eq.s32.totalorder %s4882_s13, 0  ;;  %s5907_s5 = sld [smem:[#allocation16_spill]] }
  0x10   : > { %p4910_p10 = pnand %p3632_p7, %p249_p8  ;;  %s4803_s25 = smov [#allocation2]  }
  0x11   : > { %s274_s26 = sshll.u32 %s4803_s25, 4  ;;  %s289_s29 = sshll.u32 %s5890_s7, 4  ;;  %s275_s26 = int_to_ptr.vmem [resolvable:$true] %s274_s26  ;;  %s290_s29 = int_to_ptr.hbm [resolvable:$true] %s289_s29 }
  0x12   : > { %p4611_p11 = pneg %p4910_p10  ;;  %s4804_s14 = smov 256  }
  0x13   : > { %s4805_s16 = smov 16   ;;  %s4806_s17 = smov [#allocation5]  }
  0x14   : > { %p4612_p12 = pnand %p4622_p9, %p4611_p11  ;;  %s291_s22 = sshll.u32 %s4806_s17, 4  ;;  %s292_s22 = int_to_ptr.vmem [resolvable:$true] %s291_s22 }
  0x15   : > { %s272_s24 = sshll.u32 %s5907_s5, 4  ;;  %s4807_s23 = smov 192   ;;  %s273_s24 = int_to_ptr.hbm [resolvable:$true] %s272_s24 }
  0x16   : > { %4614 = dma.hbm_to_vmem [thread:$0]  (!%p4612_p12), %s273_s24, 8192, %s275_s26, [#allocation3], %s4804_s14, %s4804_s14, %s4805_s16  }
  0x17   : > { %s4808_s5 = smov 12   ;;  %319 = sbr.rel (%p4910_p10) target bundleno = 1283 (0x503), region = 56 }
  0x18   : > { %4617 = dma.hbm_to_vmem [thread:$0]  (!%p4612_p12), %s290_s29, 12288, %s292_s22, [#allocation6], %s4807_s23, %s4807_s23, %s4808_s5  }
  0x1c   : > { %4776 = dma.done.wait (%p4622_p9), [#allocation3], 8192  }
  0x1d   : > { %4778 = vsyncadd (%p4622_p9), [#allocation3], 4294959104 }
  0x1e   : > { %4780 = dma.done.wait (%p4622_p9), [#allocation6], 12288  }
  0x1f   : > { %4782 = vsyncadd (%p4622_p9), [#allocation6], 4294955008  ;;  %s361_s24 = smul.u32 20, %s4882_s13  ;;  %vm475_vm0 = vcmask 1043456   ;;  %v389_v0 = vld [vmem:[%s5884_s1] sm:$0xf] }
  0x20   : > { %v477_v1 = vsel %vm475_vm0, %v389_v0, 0  ;;  %vm444_vm1 = vcmask 64512   ;;  %v3748_v7 = vld [vmem:[%s5886_s3 + $0x70] sm:$0xf]  ;;  %v4422_v8 = vld [vmem:[%s5886_s3 + $0x74] sm:$0xf0] }
  0x21   : > { %p362_p13 = scmp.lt.s32.totalorder %s361_s24, 39  ;;  %486 = vmatpush.bf16.msra.mxu0 %v477_v1  ;;  %v3749_v9 = vor.u32 %v4422_v8, %v3748_v7  ;;  %v3740_v11 = vld [vmem:[%s5886_s3 + $0x60] sm:$0xf]  ;;  %v4420_v12 = vld [vmem:[%s5886_s3 + $0x64] sm:$0xf0]  ;;  %s358_s14 = sand.u32 1, %s4793_s10  }
  0x22   : > { %v3741_v13 = vor.u32 %v4420_v12, %v3740_v11  ;;  %v3732_v14 = vld [vmem:[%s5886_s3 + $0x50] sm:$0xf]  ;;  %v4418_v15 = vld [vmem:[%s5886_s3 + $0x54] sm:$0xf0]  ;;  %v3724_v17 = vld [vmem:[%s5886_s3 + $0x40] sm:$0xf] }
  0x23   : > { %s5923_s24 = smov (!%p362_p13, %s361_s24), 39  ;;  %710 = vmatpush.bf16.msra.mxu1 %v3749_v9  ;;  %4583 = vmatpush.bf16.msra.mxu3 %v3749_v9  ;;  %v3733_v16 = vor.u32 %v4418_v15, %v3732_v14  ;;  %v4416_v18 = vld [vmem:[%s5886_s3 + $0x44] sm:$0xf0]  ;;  %v3716_v20 = vld [vmem:[%s5886_s3 + $0x30] sm:$0xf]  ;;  %s4599_s16 = smul.u32 480, %s358_s14 }
  0x24   : > { %s3639_s5 = sshll.u32 %s5923_s24, 2  ;;  %v3725_v19 = vor.u32 %v4416_v18, %v3724_v17  ;;  %v4414_v21 = vld [vmem:[%s5886_s3 + $0x34] sm:$0xf0]  ;;  %v3708_v24 = vld [vmem:[%s5886_s3 + $0x20] sm:$0xf]  ;;  %s4751_s23 = scalar_lea.hbm %s5892_s9, 960 }
  0x25   : > { %s4941_s28 = scalar_lea.vmem %s5883_s0, %s3639_s5  ;;  %v3717_v23 = vor.u32 %v4414_v21, %v3716_v20  ;;  %v4412_v25 = vld [vmem:[%s5886_s3 + $0x24] sm:$0xf0]  ;;  %v3700_v27 = vld [vmem:[%s5886_s3 + $0x10] sm:$0xf]  ;;  %v4410_v28 = vld [vmem:[%s5886_s3 + $0x14] sm:$0xf0] }
  0x26   : > { %v4397_v2 = vld [vmem:[%s4941_s28] sm:$0xff]  ;;  %v4398_v3 = vld [vmem:[%s4941_s28 + $0x8] sm:$0xff]  ;;  %v4399_v4 = vld [vmem:[%s4941_s28 + $0x10] sm:$0xff]  ;;  %v3709_v26 = vor.u32 %v4412_v25, %v3708_v24  ;;  %v3701_v29 = vor.u32 %v4410_v28, %v3700_v27  ;;  %s5634_s17 = scalar_lea.vmem [#allocation7], %s4599_s16 }
  0x27   : > { %3680 = vmatmul.msk.bf16.vlgmr.msra.gmra.mxu0 %vm444_vm1, %v4397_v2  ;;  %v4400_v5 = vld [vmem:[%s4941_s28 + $0x18] sm:$0xff]  ;;  %v4401_v6 = vld [vmem:[%s4941_s28 + $0x20] sm:$0xff]  ;;  %v4402_v10 = vld [vmem:[%s4941_s28 + $0x28] sm:$0xff]  ;;  %711 = vmatpush.bf16.msra.mxu1 %v3741_v13  ;;  %s3544_s25 = sshll.u32 %s5634_s17, 4  ;;  %s3545_s25 = int_to_ptr.vmem [resolvable:$true] %s3544_s25 }
  0x28   : > { %4584 = vmatpush.bf16.msra.mxu3 %v3741_v13  ;;  %v4403_v22 = vld [vmem:[%s4941_s28 + $0x30] sm:$0xff]  ;;  %v3692_v30 = vld [vmem:[%s5886_s3] sm:$0xf]  ;;  %v4408_v31 = vld [vmem:[%s5886_s3 + $0x4] sm:$0xf0] }
  0x29   : > { %v3693_v32 = vor.u32 %v4408_v31, %v3692_v30  ;;  %v4421_v33 = vld [vmem:[%s5886_s3 + $0x74] sm:$0xf]  ;;  %v3750_v34 = vld [vmem:[%s5886_s3 + $0x78] sm:$0xf0]  ;;  %v4419_v37 = vld [vmem:[%s5886_s3 + $0x64] sm:$0xf] }
  0x2a   : > { %v4404_v35 = vld [vmem:[%s4941_s28 + $0x38] sm:$0xff]  ;;  %v3753_v36 = vor.u32 %v4421_v33, %v3750_v34  ;;  %v3742_v38 = vld [vmem:[%s5886_s3 + $0x68] sm:$0xf0]  ;;  %v4417_v40 = vld [vmem:[%s5886_s3 + $0x54] sm:$0xf] }
  0x2b   : > { %712 = vmatpush.bf16.msra.mxu1 %v3733_v16  ;;  %v3745_v39 = vor.u32 %v4419_v37, %v3742_v38  ;;  %v3734_v41 = vld [vmem:[%s5886_s3 + $0x58] sm:$0xf0]  ;;  %v4415_v43 = vld [vmem:[%s5886_s3 + $0x44] sm:$0xf]  ;;  %v3726_v44 = vld [vmem:[%s5886_s3 + $0x48] sm:$0xf0] }
  0x2c   : > { %4585 = vmatpush.bf16.msra.mxu3 %v3733_v16  ;;  %4591 = vmatpush.bf16.msra.mxu2 %v3753_v36  ;;  %v3737_v42 = vor.u32 %v4417_v40, %v3734_v41  ;;  %v3729_v45 = vor.u32 %v4415_v43, %v3726_v44  ;;  %v3996_v46 = vld [vmem:[#allocation2 + $0x1e0] sm:$0xf]  ;;  %v4485_v47 = vld [vmem:[#allocation2 + $0x1ec] sm:$0xf0]  ;;  %v4413_v49 = vld [vmem:[%s5886_s3 + $0x34] sm:$0xf] }
  0x2d   : > { %v3997_v48 = vor.u32 %v4485_v47, %v3996_v46  ;;  %v3718_v50 = vld [vmem:[%s5886_s3 + $0x38] sm:$0xf0]  ;;  %v4405_v51 = vld [vmem:[%s4941_s28 + $0x40] sm:$0xff]  ;;  %v3710_v56 = vld [vmem:[%s5886_s3 + $0x28] sm:$0xf0] }
  0x2e   : > { %v3721_v52 = vor.u32 %v4413_v49, %v3718_v50  ;;  %v5041_v54 = vld [vmem:[%s5885_s2] ss:$0 sm:$0xff]  ;;  %v4411_v55 = vld [vmem:[%s5886_s3 + $0x24] sm:$0xf]  ;;  %v4409_v59 = vld [vmem:[%s5886_s3 + $0x14] sm:$0xf] }
  0x2f   : > { %713 = vmatpush.bf16.msra.mxu1 %v3725_v19  ;;  %1421 = vmatpush.bf16.msrb.mxu0 %v3997_v48  ;;  %v3713_v57 = vor.u32 %v4411_v55, %v3710_v56  ;;  %v3702_v60 = vld [vmem:[%s5886_s3 + $0x18] sm:$0xf0]  ;;  %v4407_v1 = vld [vmem:[%s5886_s3 + $0x4] sm:$0xf]  ;;  %v3694_v2 = vld [vmem:[%s5886_s3 + $0x8] sm:$0xf0] }
  0x30   : > { %4586 = vmatpush.bf16.msra.mxu3 %v3725_v19  ;;  %4592 = vmatpush.bf16.msra.mxu2 %v3745_v39  ;;  %v3705_v61 = vor.u32 %v4409_v59, %v3702_v60  ;;  %v4406_v8 = vld [vmem:[%s4941_s28 + $0x48] sm:$0xff]  ;;  %v4481_v11 = vld [vmem:[#allocation2 + $0x1cc] sm:$0xf0]  ;;  %v3868_v12 = vld [vmem:[#allocation2 + $0xe0] sm:$0xf]  ;;  %s4626_s28 = smul.u32 480, %s4882_s13 }
  0x31   : > { %v4453_v13 = vld [vmem:[#allocation2 + $0xec] sm:$0xf0]  ;;  %v4483_v21 = vld [vmem:[#allocation2 + $0x1e4] sm:$0xf]  ;;  %v3852_v28 = vld [vmem:[#allocation2 + $0xc0] sm:$0xf] }
  0x32   : > { %v3869_v16 = vor.u32 %v4453_v13, %v3868_v12  ;;  %v3964_v30 = vld [vmem:[#allocation2 + $0x1a0] sm:$0xf]  ;;  %v4477_v31 = vld [vmem:[#allocation2 + $0x1ac] sm:$0xf0]  ;;  %v3982_v40 = vld [vmem:[#allocation2 + $0x1d0] sm:$0xf0]  ;;  %s3543_s21 = scalar_lea.hbm %s5892_s9, %s4626_s28 }
  0x33   : > { %714 = vmatpush.bf16.msra.mxu1 %v3717_v23  ;;  %v3965_v34 = vor.u32 %v4477_v31, %v3964_v30  ;;  %v3836_v46 = vld [vmem:[#allocation2 + $0xa0] sm:$0xf]  ;;  %v4445_v47 = vld [vmem:[#allocation2 + $0xac] sm:$0xf0]  ;;  %v3870_v30 = vld [vmem:[#allocation2 + $0xf0] sm:$0xf0] }
  0x34   : > { %4587 = vmatpush.bf16.msra.mxu3 %v3717_v23  ;;  %4593 = vmatpush.bf16.msra.mxu2 %v3737_v42  ;;  %v3837_v49 = vor.u32 %v4445_v47, %v3836_v46  ;;  %v3948_v55 = vld [vmem:[#allocation2 + $0x180] sm:$0xf]  ;;  %v4473_v56 = vld [vmem:[#allocation2 + $0x18c] sm:$0xf0]  ;;  %s3546_s26 = sshll.u32 %s3543_s21, 4  ;;  %s3531_s13 = scalar_lea.sflag [#allocation4], %s358_s14  ;;  %s3547_s26 = int_to_ptr.hbm [resolvable:$true] %s3546_s26 }
  0x35   : > { %v4469_v12 = vld [vmem:[#allocation2 + $0x16c] sm:$0xf0]  ;;  %v3788_v47 = vld [vmem:[#allocation2 + $0x40] sm:$0xf]  ;;  %s4745_s27 = sshra.s32 %s3547_s26, 4  ;;  %s4746_s27 = int_to_ptr.hbm [resolvable:$true] %s4745_s27 }
  0x36   : > { %s4747_s29 = scalar_lea.hbm %s4746_s27, 480  ;;  %p4752_p3 = scmp.lt.s32.totalorder %s4746_s27, %s5892_s9 }
  0x37   : > { %3681 = vmatmul.msk.bf16.gmra.mxu0 %vm444_vm1, %v4398_v3  ;;  %715 = vmatpush.bf16.msra.mxu1 %v3709_v26  ;;  %p4748_p0 = scmp.ne.s32.totalorder %s4746_s27, %s4747_s29  ;;  %p4753_p4 = scmp.lt.s32.totalorder %s4751_s23, %s4747_s29 }
  0x38   : > { %4588 = vmatpush.bf16.msra.mxu3 %v3709_v26  ;;  %4594 = vmatpush.bf16.msra.mxu2 %v3729_v45 }
  0x39   : > { %p4749_p1 = pnand %p4748_p0, %p4899_p5  ;;  %p4754_p7 = por %p4753_p4, %p4752_p3 }
  0x3b   : > { %716 = vmatpush.bf16.msra.mxu1 %v3701_v29  ;;  %p4750_p2 = pneg %p4749_p1 }
  0x3c   : > { %4589 = vmatpush.bf16.msra.mxu3 %v3701_v29  ;;  %4595 = vmatpush.bf16.msra.mxu2 %v3721_v52  ;;  %v4449_v29 = vld [vmem:[#allocation2 + $0xcc] sm:$0xf0] }
  0x3d   : > { %v3853_v33 = vor.u32 %v4449_v29, %v3852_v28  ;;  %v3934_v28 = vld [vmem:[#allocation2 + $0x170] sm:$0xf0]  ;;  %v4451_v29 = vld [vmem:[#allocation2 + $0xe4] sm:$0xf]  ;;  %p4755_p8 = pnand %p4754_p7, %p4750_p2 }
  0x3f   : > { %717 = vmatpush.bf16.msra.mxu1 %v3693_v32 }
  0x40   : > { %4590 = vmatpush.bf16.msra.mxu3 %v3693_v32  ;;  %4596 = vmatpush.bf16.msra.mxu2 %v3713_v57 }
  0x43   : > { %769 = vmatpush.bf16.msrb.mxu1 %v3753_v36 }
  0x44   : > { %4597 = vmatpush.bf16.msra.mxu2 %v3705_v61  ;;  %1362 = vmatpush.bf16.msrb.mxu3 %v3869_v16 }
  0x47   : > { %3682 = vmatmul.msk.bf16.gmra.mxu0 %vm444_vm1, %v4399_v4  ;;  %770 = vmatpush.bf16.msrb.mxu1 %v3745_v39  ;;  %v3697_v4 = vor.u32 %v4407_v1, %v3694_v2  ;;  %v4479_v39 = vld [vmem:[#allocation2 + $0x1c4] sm:$0xf]  ;;  %v3820_v1 = vld [vmem:[#allocation2 + $0x80] sm:$0xf]  ;;  %v4441_v2 = vld [vmem:[#allocation2 + $0x8c] sm:$0xf0] }
  0x48   : > { %1363 = vmatpush.bf16.msrb.mxu3 %v3853_v33  ;;  %v3985_v43 = vor.u32 %v4479_v39, %v3982_v40  ;;  %v3916_v40 = vld [vmem:[#allocation2 + $0x140] sm:$0xf] }
  0x49   : > { %4598 = vmatpush.bf16.msra.mxu2 %v3697_v4 }
  0x4b   : > { %771 = vmatpush.bf16.msrb.mxu1 %v3737_v42 }
  0x4c   : > { %1364 = vmatpush.bf16.msrb.mxu3 %v3837_v49 }
  0x4f   : > { %772 = vmatpush.bf16.msrb.mxu1 %v3729_v45 }
  0x53   : > { %773 = vmatpush.bf16.msrb.mxu1 %v3721_v52 }
  0x57   : > { %3683 = vmatmul.msk.bf16.gmra.mxu0 %vm444_vm1, %v4400_v5  ;;  %774 = vmatpush.bf16.msrb.mxu1 %v3713_v57  ;;  %v4475_v57 = vld [vmem:[#allocation2 + $0x1a4] sm:$0xf] }
  0x5b   : > { %775 = vmatpush.bf16.msrb.mxu1 %v3705_v61  ;;  %v3949_v61 = vor.u32 %v4473_v56, %v3948_v55 }
  0x5f   : > { %776 = vmatpush.bf16.msrb.mxu1 %v3697_v4  ;;  %v3821_v4 = vor.u32 %v4441_v2, %v3820_v1  ;;  %v4431_v1 = vld [vmem:[#allocation2 + $0x44] sm:$0xf]  ;;  %v3790_v2 = vld [vmem:[#allocation2 + $0x50] sm:$0xf0] }
  0x61   : > { %1365 = vmatpush.bf16.msrb.mxu3 %v3821_v4  ;;  %v4463_v4 = vld [vmem:[#allocation2 + $0x144] sm:$0xf] }
  0x67   : > { %3684 = vmatmul.msk.bf16.gmra.mxu0 %vm444_vm1, %v4401_v6 }
  0x77   : > { %3685 = vmatmul.msk.bf16.gmra.mxu0 %vm444_vm1, %v4402_v10  ;;  %v3980_v10 = vld [vmem:[#allocation2 + $0x1c0] sm:$0xf] }
  0x78   : > { %v3981_v15 = vor.u32 %v4481_v11, %v3980_v10  ;;  %v3950_v10 = vld [vmem:[#allocation2 + $0x190] sm:$0xf0]  ;;  %v3932_v11 = vld [vmem:[#allocation2 + $0x160] sm:$0xf] }
  0x79   : > { %v3933_v16 = vor.u32 %v4469_v12, %v3932_v11  ;;  %v4423_v12 = vld [vmem:[#allocation2 + $0x4] sm:$0xf] }
  0x7a   : > { %1422 = vmatpush.bf16.msrb.mxu0 %v3981_v15 }
  0x7e   : > { %1423 = vmatpush.bf16.msrb.mxu0 %v3965_v34  ;;  %v3873_v34 = vor.u32 %v4451_v29, %v3870_v30  ;;  %v3902_v29 = vld [vmem:[#allocation2 + $0x130] sm:$0xf0] }
  0x82   : > { %1424 = vmatpush.bf16.msrb.mxu0 %v3949_v61 }
  0x86   : > { %1425 = vmatpush.bf16.msrb.mxu0 %v3933_v16 }
  0x87   : > { %3686 = vmatmul.msk.bf16.gmra.mxu0 %vm444_vm1, %v4403_v22  ;;  %v3998_v22 = vld [vmem:[#allocation2 + $0x1f0] sm:$0xf0] }
  0x88   : > { %v4001_v25 = vor.u32 %v4483_v21, %v3998_v22 }
  0x8a   : > { %1539 = vmatpush.bf16.msrb.mxu2 %v4001_v25 }
  0x8e   : > { %1540 = vmatpush.bf16.msrb.mxu2 %v3985_v43  ;;  %v3838_v43 = vld [vmem:[#allocation2 + $0xb0] sm:$0xf0] }
  0x97   : > { %3687 = vmatmul.msk.bf16.gmra.mxu0 %vm444_vm1, %v4404_v35 }
  0xa4   : > { %v488_v53 = vpop.f32.mrf.mxu0 }
  0xa5   : > { %v489_v58 = vadd.f32 %v5041_v54, %v488_v53 }
  0xa7   : > { %3688 = vmatmul.msk.bf16.gmra.mxu0 %vm444_vm1, %v4405_v51  ;;  %v558_v63 = vmul.f32 0.01, %v489_v58  ;;  %vm538_vm2 = vcmp.gt.f32.partialorder %v489_v58, 0.0 }
  0xa9   : > { %v578_v5 = vsel %vm538_vm2, %v489_v58, %v558_v63  ;;  %v3966_v58 = vld [vmem:[#allocation2 + $0x1b0] sm:$0xf0] }
  0xac   : > { %v490_v62 = vpop.f32.mrf.mxu0 }
  0xad   : > { %v491_v0 = vadd.f32 %v5041_v54, %v490_v62  ;;  %v3969_v62 = vor.u32 %v4475_v57, %v3966_v58  ;;  %v4435_v58 = vld [vmem:[#allocation2 + $0x64] sm:$0xf] }
  0xaf   : > { %v559_v3 = vmul.f32 0.01, %v491_v0  ;;  %vm539_vm3 = vcmp.gt.f32.partialorder %v491_v0, 0.0  ;;  %1541 = vmatpush.bf16.msrb.mxu2 %v3969_v62 }
  0xb1   : > { %v579_v6 = vsel %vm539_vm3, %v491_v0, %v559_v3 }
  0xb2   : > { %v598_v7 = vpack.c.bf16 %v579_v6, %v578_v5 }
  0xb4   : > { %v493_v9 = vpop.f32.mrf.mxu0  ;;  %718 = vmatmul.bf16.vlgmr.msra.gmra.mxu1 %v598_v7 }
  0xb5   : > { %v494_v14 = vadd.f32 %v5041_v54, %v493_v9  ;;  %v4471_v9 = vld [vmem:[#allocation2 + $0x184] sm:$0xf]  ;;  %1480 = vmatpush.bf16.msra.mxu1 %v3873_v34 }
  0xb6   : > { %v3953_v15 = vor.u32 %v4471_v9, %v3950_v10 }
  0xb7   : > { %3689 = vmatmul.msk.bf16.gmra.mxu0 %vm444_vm1, %v4406_v8  ;;  %v560_v18 = vmul.f32 0.01, %v494_v14  ;;  %vm540_vm4 = vcmp.gt.f32.partialorder %v494_v14, 0.0 }
  0xb8   : > { %1542 = vmatpush.bf16.msrb.mxu2 %v3953_v15 }
  0xb9   : > { %v580_v23 = vsel %vm540_vm4, %v494_v14, %v560_v18 }
  0xbc   : > { %v495_v17 = vpop.f32.mrf.mxu0 }
  0xbd   : > { %v496_v19 = vadd.f32 %v5041_v54, %v495_v17 }
  0xbf   : > { %v561_v20 = vmul.f32 0.01, %v496_v19  ;;  %vm541_vm5 = vcmp.gt.f32.partialorder %v496_v19, 0.0 }
  0xc1   : > { %v581_v24 = vsel %vm541_vm5, %v496_v19, %v561_v20  ;;  %v3804_v19 = vld [vmem:[#allocation2 + $0x60] sm:$0xf]  ;;  %v4437_v20 = vld [vmem:[#allocation2 + $0x6c] sm:$0xf0] }
  0xc2   : > { %v599_v26 = vpack.c.bf16 %v581_v24, %v580_v23  ;;  %v3805_v22 = vor.u32 %v4437_v20, %v3804_v19  ;;  %v4429_v19 = vld [vmem:[#allocation2 + $0x2c] sm:$0xf0]  ;;  %v3900_v20 = vld [vmem:[#allocation2 + $0x120] sm:$0xf] }
  0xc4   : > { %v498_v27 = vpop.f32.mrf.mxu0  ;;  %723 = vmatmul.bf16.gmra.mxu1 %v599_v26  ;;  %1366 = vmatpush.bf16.msrb.mxu3 %v3805_v22 }
  0xc5   : > { %v499_v32 = vadd.f32 %v5041_v54, %v498_v27  ;;  %v4467_v27 = vld [vmem:[#allocation2 + $0x164] sm:$0xf] }
  0xc6   : > { %v3937_v33 = vor.u32 %v4467_v27, %v3934_v28  ;;  %v4459_v28 = vld [vmem:[#allocation2 + $0x124] sm:$0xf] }
  0xc7   : > { %v562_v36 = vmul.f32 0.01, %v499_v32  ;;  %vm542_vm6 = vcmp.gt.f32.partialorder %v499_v32, 0.0  ;;  %v3905_v30 = vor.u32 %v4459_v28, %v3902_v29  ;;  %v3860_v28 = vld [vmem:[#allocation2 + $0xc8] sm:$0xf] }
  0xc8   : > { %1543 = vmatpush.bf16.msrb.mxu2 %v3937_v33  ;;  %v4450_v29 = vld [vmem:[#allocation2 + $0xd4] sm:$0xf0] }
  0xc9   : > { %v582_v41 = vsel %vm542_vm6, %v499_v32, %v562_v36 }
  0xcc   : > { %v500_v35 = vpop.f32.mrf.mxu0 }
  0xcd   : > { %v501_v37 = vadd.f32 %v5041_v54, %v500_v35 }
  0xcf   : > { %v563_v38 = vmul.f32 0.01, %v501_v37  ;;  %vm543_vm7 = vcmp.gt.f32.partialorder %v501_v37, 0.0 }
  0xd1   : > { %v583_v42 = vsel %vm543_vm7, %v501_v37, %v563_v38  ;;  %v4447_v37 = vld [vmem:[#allocation2 + $0xc4] sm:$0xf]  ;;  %v3854_v38 = vld [vmem:[#allocation2 + $0xd0] sm:$0xf0] }
  0xd2   : > { %v600_v44 = vpack.c.bf16 %v583_v42, %v582_v41  ;;  %v3857_v39 = vor.u32 %v4447_v37, %v3854_v38  ;;  %v4465_v41 = vld [vmem:[#allocation2 + $0x14c] sm:$0xf0]  ;;  %v4443_v42 = vld [vmem:[#allocation2 + $0xa4] sm:$0xf]  ;;  %v3756_v37 = vld [vmem:[#allocation2] sm:$0xf] }
  0xd3   : > { %v3841_v46 = vor.u32 %v4443_v42, %v3838_v43  ;;  %v4425_v38 = vld [vmem:[#allocation2 + $0xc] sm:$0xf0] }
  0xd4   : > { %v503_v45 = vpop.f32.mrf.mxu0  ;;  %728 = vmatmul.bf16.vlgmr.msra.gmra.mxu3 %v600_v44  ;;  %777 = vmatmul.bf16.vlgmr.msrb.gmra.mxu1 %v598_v7 }
  0xd5   : > { %787 = vmatmul.bf16.vlgmr.msra.gmra.mxu2 %v600_v44  ;;  %v504_v48 = vadd.f32 %v5041_v54, %v503_v45  ;;  %1481 = vmatpush.bf16.msra.mxu1 %v3857_v39  ;;  %v3917_v45 = vor.u32 %v4465_v41, %v3916_v40  ;;  %v3884_v39 = vld [vmem:[#allocation2 + $0x100] sm:$0xf]  ;;  %v4457_v40 = vld [vmem:[#allocation2 + $0x10c] sm:$0xf0] }
  0xd7   : > { %v564_v51 = vmul.f32 0.01, %v504_v48  ;;  %vm544_vm8 = vcmp.gt.f32.partialorder %v504_v48, 0.0  ;;  %1426 = vmatpush.bf16.msrb.mxu0 %v3917_v45  ;;  %v3885_v45 = vor.u32 %v4457_v40, %v3884_v39 }
  0xd9   : > { %v584_v59 = vsel %vm544_vm8, %v504_v48, %v564_v51  ;;  %v4433_v48 = vld [vmem:[#allocation2 + $0x4c] sm:$0xf0]  ;;  %1482 = vmatpush.bf16.msra.mxu1 %v3841_v46  ;;  %v4439_v51 = vld [vmem:[#allocation2 + $0x84] sm:$0xf] }
  0xda   : > { %v3789_v49 = vor.u32 %v4433_v48, %v3788_v47 }
  0xdc   : > { %v505_v50 = vpop.f32.mrf.mxu0  ;;  %1367 = vmatpush.bf16.msrb.mxu3 %v3789_v49 }
  0xdd   : > { %v506_v52 = vadd.f32 %v5041_v54, %v505_v50 }
  0xdf   : > { %v565_v53 = vmul.f32 0.01, %v506_v52  ;;  %vm545_vm9 = vcmp.gt.f32.partialorder %v506_v52, 0.0 }
  0xe1   : > { %v585_v60 = vsel %vm545_vm9, %v506_v52, %v565_v53  ;;  %v3822_v52 = vld [vmem:[#allocation2 + $0x90] sm:$0xf0] }
  0xe2   : > { %v601_v63 = vpack.c.bf16 %v585_v60, %v584_v59  ;;  %v3825_v56 = vor.u32 %v4439_v51, %v3822_v52  ;;  %v3806_v59 = vld [vmem:[#allocation2 + $0x70] sm:$0xf0] }
  0xe3   : > { %v3809_v62 = vor.u32 %v4435_v58, %v3806_v59  ;;  %v3886_v51 = vld [vmem:[#allocation2 + $0x110] sm:$0xf0] }
  0xe4   : > { %v508_v0 = vpop.f32.mrf.mxu0  ;;  %733 = vmatmul.bf16.gmra.mxu3 %v601_v63  ;;  %782 = vmatmul.bf16.gmra.mxu1 %v599_v26 }
  0xe5   : > { %792 = vmatmul.bf16.gmra.mxu2 %v601_v63  ;;  %v509_v3 = vadd.f32 %v5041_v54, %v508_v0  ;;  %1483 = vmatpush.bf16.msra.mxu1 %v3825_v56 }
  0xe7   : > { %v566_v6 = vmul.f32 0.01, %v509_v3  ;;  %vm546_vm10 = vcmp.gt.f32.partialorder %v509_v3, 0.0 }
  0xe9   : > { %v586_v13 = vsel %vm546_vm10, %v509_v3, %v566_v6  ;;  %1484 = vmatpush.bf16.msra.mxu1 %v3809_v62  ;;  %v3793_v3 = vor.u32 %v4431_v1, %v3790_v2  ;;  %v3876_v2 = vld [vmem:[#allocation2 + $0xe8] sm:$0xf] }
  0xec   : > { %v510_v5 = vpop.f32.mrf.mxu0 }
  0xed   : > { %v511_v7 = vadd.f32 %v5041_v54, %v510_v5  ;;  %v3918_v5 = vld [vmem:[#allocation2 + $0x150] sm:$0xf0]  ;;  %1485 = vmatpush.bf16.msra.mxu1 %v3793_v3  ;;  %v4454_v3 = vld [vmem:[#allocation2 + $0xf4] sm:$0xf0] }
  0xee   : > { %v3921_v6 = vor.u32 %v4463_v4, %v3918_v5 }
  0xef   : > { %v567_v8 = vmul.f32 0.01, %v511_v7  ;;  %vm547_vm11 = vcmp.gt.f32.partialorder %v511_v7, 0.0 }
  0xf0   : > { %1544 = vmatpush.bf16.msrb.mxu2 %v3921_v6 }
  0xf1   : > { %v587_v14 = vsel %vm547_vm11, %v511_v7, %v567_v8  ;;  %v4427_v7 = vld [vmem:[#allocation2 + $0x24] sm:$0xf]  ;;  %v3774_v8 = vld [vmem:[#allocation2 + $0x30] sm:$0xf0] }
  0xf2   : > { %v602_v17 = vpack.c.bf16 %v587_v14, %v586_v13  ;;  %v3777_v10 = vor.u32 %v4427_v7, %v3774_v8  ;;  %v3758_v13 = vld [vmem:[#allocation2 + $0x10] sm:$0xf0]  ;;  %v3877_v7 = vor.u32 %v4454_v3, %v3876_v2 }
  0xf3   : > { %v3761_v16 = vor.u32 %v4423_v12, %v3758_v13  ;;  %v4486_v13 = vld [vmem:[#allocation2 + $0x1f4] sm:$0xf0] }
  0xf4   : > { %v513_v18 = vpop.f32.mrf.mxu0  ;;  %738 = vmatmul.bf16.gmra.mxu3 %v602_v17  ;;  %1486 = vmatpush.bf16.msra.mxu1 %v3777_v10  ;;  %v4006_v10 = vld [vmem:[#allocation2 + $0x1f8] sm:$0xf0] }
  0xf5   : > { %797 = vmatmul.bf16.gmra.mxu2 %v602_v17  ;;  %v514_v21 = vadd.f32 %v5041_v54, %v513_v18  ;;  %v3772_v18 = vld [vmem:[#allocation2 + $0x20] sm:$0xf] }
  0xf6   : > { %1545 = vmatpush.bf16.msrb.mxu2 %v3905_v30  ;;  %v4480_v30 = vld [vmem:[#allocation2 + $0x1cc] sm:$0xf] }
  0xf7   : > { %v568_v24 = vmul.f32 0.01, %v514_v21  ;;  %vm548_vm12 = vcmp.gt.f32.partialorder %v514_v21, 0.0 }
  0xf8   : > { %1487 = vmatpush.bf16.msra.mxu1 %v3761_v16 }
  0xf9   : > { %v588_v31 = vsel %vm548_vm12, %v514_v21, %v568_v24  ;;  %v4461_v21 = vld [vmem:[#allocation2 + $0x12c] sm:$0xf0]  ;;  %v3773_v24 = vor.u32 %v4429_v19, %v3772_v18 }
  0xfb   : > { %1368 = vmatpush.bf16.msrb.mxu3 %v3773_v24 }
  0xfc   : > { %v515_v23 = vpop.f32.mrf.mxu0 }
  0xfd   : > { %v516_v25 = vadd.f32 %v5041_v54, %v515_v23 }
  0xff   : > { %v569_v26 = vmul.f32 0.01, %v516_v25  ;;  %vm549_vm13 = vcmp.gt.f32.partialorder %v516_v25, 0.0 }
 0x101   : > { %v589_v32 = vsel %vm549_vm13, %v516_v25, %v569_v26  ;;  %v3901_v25 = vor.u32 %v4461_v21, %v3900_v20 }
 0x102   : > { %v603_v35 = vpack.c.bf16 %v589_v32, %v588_v31 }
 0x103   : > { %1427 = vmatpush.bf16.msrb.mxu0 %v3901_v25 }
 0x104   : > { %v518_v36 = vpop.f32.mrf.mxu0  ;;  %743 = vmatmul.bf16.gmra.mxu3 %v603_v35 }
 0x105   : > { %802 = vmatmul.bf16.gmra.mxu2 %v603_v35  ;;  %v519_v44 = vadd.f32 %v5041_v54, %v518_v36  ;;  %v5085_v35 = vld [vmem:[%s5887_s4] sm:$0x3] }
 0x106   : > { %v5088_v46 = vperm.slane %v5085_v35, 0 }
 0x107   : > { %v570_v53 = vmul.f32 0.01, %v519_v44  ;;  %vm550_vm14 = vcmp.gt.f32.partialorder %v519_v44, 0.0  ;;  %1428 = vmatpush.bf16.msrb.mxu0 %v3885_v45 }
 0x109   : > { %v590_v60 = vsel %vm550_vm14, %v519_v44, %v570_v53  ;;  %v3757_v44 = vor.u32 %v4425_v38, %v3756_v37 }
 0x10b   : > { %1369 = vmatpush.bf16.msrb.mxu3 %v3757_v44 }
 0x10c   : > { %v520_v50 = vpop.f32.mrf.mxu0 }
 0x10d   : > { %v521_v55 = vadd.f32 %v5041_v54, %v520_v50  ;;  %v4455_v50 = vld [vmem:[#allocation2 + $0x104] sm:$0xf] }
 0x10e   : > { %v3889_v52 = vor.u32 %v4455_v50, %v3886_v51 }
 0x10f   : > { %v571_v57 = vmul.f32 0.01, %v521_v55  ;;  %vm551_vm15 = vcmp.gt.f32.partialorder %v521_v55, 0.0  ;;  %1598 = vmatpush.bf16.msra.mxu3 %v3877_v7 }
 0x110   : > { %1546 = vmatpush.bf16.msrb.mxu2 %v3889_v52 }
 0x111   : > { %v591_v61 = vsel %vm551_vm15, %v521_v55, %v571_v57 }
 0x112   : > { %v604_v63 = vpack.c.bf16 %v591_v61, %v590_v60 }
 0x114   : > { %v523_v0 = vpop.f32.mrf.mxu0  ;;  %748 = vmatmul.bf16.gmra.mxu3 %v604_v63 }
 0x115   : > { %807 = vmatmul.bf16.gmra.mxu2 %v604_v63  ;;  %v524_v9 = vadd.f32 %v5041_v54, %v523_v0 }
 0x117   : > { %v572_v14 = vmul.f32 0.01, %v524_v9  ;;  %vm552_vm0 = vcmp.gt.f32.partialorder %v524_v9, 0.0 }
 0x119   : > { %v592_v22 = vsel %vm552_vm0, %v524_v9, %v572_v14  ;;  %v4484_v9 = vld [vmem:[#allocation2 + $0x1ec] sm:$0xf] }
 0x11a   : > { %v4009_v12 = vor.u32 %v4484_v9, %v4006_v10  ;;  %v4452_v14 = vld [vmem:[#allocation2 + $0xec] sm:$0xf]  ;;  %v3974_v9 = vld [vmem:[#allocation2 + $0x1b8] sm:$0xf0]  ;;  %v3972_v10 = vld [vmem:[#allocation2 + $0x1a8] sm:$0xf] }
 0x11c   : > { %v525_v11 = vpop.f32.mrf.mxu0  ;;  %1775 = vmatpush.bf16.msra.mxu2 %v4009_v12 }
 0x11d   : > { %v526_v15 = vadd.f32 %v5041_v54, %v525_v11  ;;  %v4004_v11 = vld [vmem:[#allocation2 + $0x1e8] sm:$0xf] }
 0x11e   : > { %v4005_v16 = vor.u32 %v4486_v13, %v4004_v11 }
 0x11f   : > { %v573_v17 = vmul.f32 0.01, %v526_v15  ;;  %vm553_vm1 = vcmp.gt.f32.partialorder %v526_v15, 0.0 }
 0x120   : > { %1657 = vmatpush.bf16.msra.mxu0 %v4005_v16  ;;  %v3846_v16 = vld [vmem:[#allocation2 + $0xb8] sm:$0xf0] }
 0x121   : > { %v593_v23 = vsel %vm553_vm1, %v526_v15, %v573_v17  ;;  %v3878_v15 = vld [vmem:[#allocation2 + $0xf8] sm:$0xf0] }
 0x122   : > { %v605_v26 = vpack.c.bf16 %v593_v23, %v592_v22  ;;  %v3881_v17 = vor.u32 %v4452_v14, %v3878_v15  ;;  %v4478_v14 = vld [vmem:[#allocation2 + $0x1b4] sm:$0xf0]  ;;  %v4444_v15 = vld [vmem:[#allocation2 + $0xac] sm:$0xf] }
 0x124   : > { %v528_v27 = vpop.f32.mrf.mxu0  ;;  %753 = vmatmul.bf16.gmra.mxu3 %v605_v26  ;;  %1716 = vmatpush.bf16.msrb.mxu1 %v3881_v17 }
 0x125   : > { %812 = vmatmul.bf16.gmra.mxu2 %v605_v26  ;;  %v529_v31 = vadd.f32 %v5041_v54, %v528_v27  ;;  %v5103_v26 = vperm.slane %v5085_v35, 1 }
 0x127   : > { %v574_v33 = vmul.f32 0.01, %v529_v31  ;;  %vm554_vm2 = vcmp.gt.f32.partialorder %v529_v31, 0.0 }
 0x129   : > { %v594_v42 = vsel %vm554_vm2, %v529_v31, %v574_v33  ;;  %v3990_v33 = vld [vmem:[#allocation2 + $0x1d8] sm:$0xf0] }
 0x12c   : > { %v530_v32 = vpop.f32.mrf.mxu0 }
 0x12d   : > { %v531_v34 = vadd.f32 %v5041_v54, %v530_v32  ;;  %v3861_v32 = vor.u32 %v4450_v29, %v3860_v28 }
 0x12f   : > { %v575_v36 = vmul.f32 0.01, %v531_v34  ;;  %vm555_vm3 = vcmp.gt.f32.partialorder %v531_v34, 0.0  ;;  %1599 = vmatpush.bf16.msra.mxu3 %v3861_v32 }
 0x131   : > { %v719_v41 = vpop.f32.mrf.mxu1  ;;  %v595_v43 = vsel %vm555_vm3, %v531_v34, %v575_v36  ;;  %v3993_v36 = vor.u32 %v4480_v30, %v3990_v33 }
 0x132   : > { %v606_v47 = vpack.c.bf16 %v595_v43, %v594_v42  ;;  %v720_v49 = vadd.f32 %v719_v41, %v5088_v46  ;;  %v3988_v41 = vld [vmem:[#allocation2 + $0x1c8] sm:$0xf]  ;;  %v4482_v42 = vld [vmem:[#allocation2 + $0x1d4] sm:$0xf0]  ;;  %v4448_v43 = vld [vmem:[#allocation2 + $0xcc] sm:$0xf] }
 0x133   : > { %1776 = vmatpush.bf16.msra.mxu2 %v3993_v36 }
 0x134   : > { %v533_v48 = vpop.f32.mrf.mxu0  ;;  %758 = vmatmul.bf16.gmra.mxu3 %v606_v47  ;;  %v868_v56 = vmul.f32 0.01, %v720_v49  ;;  %vm828_vm4 = vcmp.gt.f32.partialorder %v720_v49, 0.0 }
 0x135   : > { %817 = vmatmul.bf16.gmra.mxu2 %v606_v47  ;;  %v534_v53 = vadd.f32 %v5041_v54, %v533_v48  ;;  %v3989_v47 = vor.u32 %v4482_v42, %v3988_v41  ;;  %v3862_v48 = vld [vmem:[#allocation2 + $0xd8] sm:$0xf0]  ;;  %v4472_v41 = vld [vmem:[#allocation2 + $0x18c] sm:$0xf] }
 0x136   : > { %v908_v62 = vsel %vm828_vm4, %v720_v49, %v868_v56  ;;  %v3865_v51 = vor.u32 %v4448_v43, %v3862_v48 }
 0x137   : > { %v576_v60 = vmul.f32 0.01, %v534_v53  ;;  %vm556_vm6 = vcmp.gt.f32.partialorder %v534_v53, 0.0  ;;  %1658 = vmatpush.bf16.msra.mxu0 %v3989_v47 }
 0x138   : > { %1717 = vmatpush.bf16.msrb.mxu1 %v3865_v51 }
 0x139   : > { %v721_v55 = vpop.f32.mrf.mxu1  ;;  %v596_v5 = vsel %vm556_vm6, %v534_v53, %v576_v60 }
 0x13a   : > { %v722_v57 = vadd.f32 %v721_v55, %v5088_v46 }
 0x13c   : > { %vm830_vm5 = vcmp.gt.f32.partialorder %v722_v57, 0.0  ;;  %v870_v58 = vmul.f32 0.01, %v722_v57  ;;  %v535_v59 = vpop.f32.mrf.mxu0 }
 0x13d   : > { %v536_v61 = vadd.f32 %v5041_v54, %v535_v59 }
 0x13e   : > { %v910_v63 = vsel %vm830_vm5, %v722_v57, %v870_v58 }
 0x13f   : > { %v5094_v0 = vpack.c.bf16 %v910_v63, %v908_v62  ;;  %v577_v1 = vmul.f32 0.01, %v536_v61  ;;  %vm557_vm7 = vcmp.gt.f32.partialorder %v536_v61, 0.0  ;;  %v3844_v62 = vld [vmem:[#allocation2 + $0xa8] sm:$0xf] }
 0x140   : > { %v4446_v63 = vld [vmem:[#allocation2 + $0xb4] sm:$0xf0] }
 0x141   : > { %v724_v4 = vpop.f32.mrf.mxu1  ;;  %1488 = vmatmul.bf16.vlgmr.msra.gmra.mxu1 %v5094_v0  ;;  %v597_v6 = vsel %vm557_vm7, %v536_v61, %v577_v1  ;;  %v3845_v2 = vor.u32 %v4446_v63, %v3844_v62  ;;  %v4440_v62 = vld [vmem:[#allocation2 + $0x8c] sm:$0xf] }
 0x142   : > { %v607_v8 = vpack.c.bf16 %v597_v6, %v596_v5  ;;  %v725_v54 = vadd.f32 %v724_v4, %v5088_v46 }
 0x143   : > { %1600 = vmatpush.bf16.msra.mxu3 %v3845_v2  ;;  %v3830_v2 = vld [vmem:[#allocation2 + $0x98] sm:$0xf0] }
 0x144   : > { %763 = vmatmul.bf16.gmra.mxu3 %v607_v8  ;;  %v872_v19 = vmul.f32 0.01, %v725_v54  ;;  %vm832_vm8 = vcmp.gt.f32.partialorder %v725_v54, 0.0 }
 0x145   : > { %822 = vmatmul.bf16.gmra.mxu2 %v607_v8 }
 0x146   : > { %v912_v22 = vsel %vm832_vm8, %v725_v54, %v872_v19  ;;  %v4476_v54 = vld [vmem:[#allocation2 + $0x1ac] sm:$0xf]  ;;  %v3973_v19 = vor.u32 %v4478_v14, %v3972_v10 }
 0x147   : > { %v3977_v13 = vor.u32 %v4476_v54, %v3974_v9  ;;  %v3812_v54 = vld [vmem:[#allocation2 + $0x68] sm:$0xf]  ;;  %v4438_v9 = vld [vmem:[#allocation2 + $0x74] sm:$0xf0] }
 0x148   : > { %1659 = vmatpush.bf16.msra.mxu0 %v3973_v19 }
 0x149   : > { %v726_v18 = vpop.f32.mrf.mxu1  ;;  %1777 = vmatpush.bf16.msra.mxu2 %v3977_v13 }
 0x14a   : > { %v727_v20 = vadd.f32 %v726_v18, %v5088_v46 }
 0x14c   : > { %vm834_vm9 = vcmp.gt.f32.partialorder %v727_v20, 0.0  ;;  %v874_v21 = vmul.f32 0.01, %v727_v20 }
 0x14e   : > { %v914_v23 = vsel %vm834_vm9, %v727_v20, %v874_v21  ;;  %v3849_v20 = vor.u32 %v4444_v15, %v3846_v16 }
 0x14f   : > { %v5099_v24 = vpack.c.bf16 %v914_v23, %v912_v22 }
 0x150   : > { %1718 = vmatpush.bf16.msrb.mxu1 %v3849_v20 }
 0x151   : > { %v778_v25 = vpop.f32.mrf.mxu1  ;;  %1493 = vmatmul.bf16.gmra.mxu1 %v5099_v24 }
 0x152   : > { %v779_v27 = vadd.f32 %v778_v25, %v5103_v26 }
 0x154   : > { %1370 = vmatmul.bf16.vlgmr.msrb.gmra.mxu3 %v5094_v0  ;;  %v869_v38 = vmul.f32 0.01, %v779_v27  ;;  %vm829_vm10 = vcmp.gt.f32.partialorder %v779_v27, 0.0 }
 0x156   : > { %v909_v44 = vsel %vm829_vm10, %v779_v27, %v869_v38 }
 0x157   : > { %v729_v31 = vpop.f32.mrf.mxu3 }
 0x158   : > { %v5107_v34 = vpop.f32.mrf.mxu2  ;;  %v730_v35 = vadd.f32 %v729_v31, %v5088_v46 }
 0x159   : > { %v780_v37 = vpop.f32.mrf.mxu1  ;;  %v789_v31 = vadd.f32 %v5107_v34, %v5103_v26 }
 0x15a   : > { %v781_v39 = vadd.f32 %v780_v37, %v5103_v26  ;;  %v876_v52 = vmul.f32 0.01, %v730_v35  ;;  %vm836_vm12 = vcmp.gt.f32.partialorder %v730_v35, 0.0 }
 0x15b   : > { %v877_v37 = vmul.f32 0.01, %v789_v31  ;;  %vm837_vm3 = vcmp.gt.f32.partialorder %v789_v31, 0.0 }
 0x15c   : > { %vm831_vm11 = vcmp.gt.f32.partialorder %v781_v39, 0.0  ;;  %v871_v40 = vmul.f32 0.01, %v781_v39  ;;  %v916_v58 = vsel %vm836_vm12, %v730_v35, %v876_v52  ;;  %v3828_v35 = vld [vmem:[#allocation2 + $0x88] sm:$0xf] }
 0x15d   : > { %v917_v42 = vsel %vm837_vm3, %v789_v31, %v877_v37  ;;  %v3814_v37 = vld [vmem:[#allocation2 + $0x78] sm:$0xf0] }
 0x15e   : > { %v911_v45 = vsel %vm831_vm11, %v781_v39, %v871_v40  ;;  %v4442_v40 = vld [vmem:[#allocation2 + $0x94] sm:$0xf0] }
 0x15f   : > { %v5111_v49 = vpack.c.bf16 %v911_v45, %v909_v44  ;;  %v731_v50 = vpop.f32.mrf.mxu3  ;;  %v3829_v43 = vor.u32 %v4442_v40, %v3828_v35  ;;  %v3958_v44 = vld [vmem:[#allocation2 + $0x198] sm:$0xf0] }
 0x160   : > { %v732_v53 = vadd.f32 %v731_v50, %v5088_v46  ;;  %v790_v55 = vpop.f32.mrf.mxu2  ;;  %v3961_v47 = vor.u32 %v4472_v41, %v3958_v44 }
 0x161   : > { %v783_v56 = vpop.f32.mrf.mxu1  ;;  %1429 = vmatmul.bf16.vlgmr.msrb.gmra.mxu0 %v5111_v49  ;;  %1547 = vmatmul.bf16.vlgmr.msrb.gmra.mxu2 %v5111_v49  ;;  %v791_v27 = vadd.f32 %v790_v55, %v5103_v26 }
 0x162   : > { %vm838_vm13 = vcmp.gt.f32.partialorder %v732_v53, 0.0  ;;  %v878_v57 = vmul.f32 0.01, %v732_v53  ;;  %v784_v61 = vadd.f32 %v783_v56, %v5103_v26  ;;  %1601 = vmatpush.bf16.msra.mxu3 %v3829_v43  ;;  %1778 = vmatpush.bf16.msra.mxu2 %v3961_v47 }
 0x163   : > { %v879_v33 = vmul.f32 0.01, %v791_v27  ;;  %vm839_vm2 = vcmp.gt.f32.partialorder %v791_v27, 0.0 }
 0x164   : > { %v918_v59 = vsel %vm838_vm13, %v732_v53, %v878_v57  ;;  %1375 = vmatmul.bf16.gmra.mxu3 %v5099_v24  ;;  %v873_v5 = vmul.f32 0.01, %v784_v61  ;;  %vm833_vm14 = vcmp.gt.f32.partialorder %v784_v61, 0.0 }
 0x165   : > { %v5117_v60 = vpack.c.bf16 %v918_v59, %v916_v58  ;;  %v919_v38 = vsel %vm839_vm2, %v791_v27, %v879_v33  ;;  %v3956_v59 = vld [vmem:[#allocation2 + $0x188] sm:$0xf]  ;;  %v3942_v27 = vld [vmem:[#allocation2 + $0x178] sm:$0xf0]  ;;  %v4436_v33 = vld [vmem:[#allocation2 + $0x6c] sm:$0xf] }
 0x166   : > { %v913_v11 = vsel %vm833_vm14, %v784_v61, %v873_v5  ;;  %v5140_v45 = vpack.c.bf16 %v919_v38, %v917_v42  ;;  %v4474_v61 = vld [vmem:[#allocation2 + $0x194] sm:$0xf0]  ;;  %v3817_v40 = vor.u32 %v4436_v33, %v3814_v37 }
 0x167   : > { %v734_v1 = vpop.f32.mrf.mxu3  ;;  %1498 = vmatmul.bf16.gmra.mxu1 %v5117_v60  ;;  %v4430_v33 = vld [vmem:[#allocation2 + $0x34] sm:$0xf0] }
 0x168   : > { %v5121_v3 = vpop.f32.mrf.mxu2  ;;  %v735_v7 = vadd.f32 %v734_v1, %v5088_v46  ;;  %v3957_v1 = vor.u32 %v4474_v61, %v3956_v59  ;;  %v3796_v59 = vld [vmem:[#allocation2 + $0x48] sm:$0xf]  ;;  %v4434_v61 = vld [vmem:[#allocation2 + $0x54] sm:$0xf0] }
 0x169   : > { %v785_v4 = vpop.f32.mrf.mxu1  ;;  %v794_v58 = vadd.f32 %v5121_v3, %v5103_v26 }
 0x16a   : > { %v786_v6 = vadd.f32 %v785_v4, %v5103_v26  ;;  %v880_v21 = vmul.f32 0.01, %v735_v7  ;;  %vm840_vm0 = vcmp.gt.f32.partialorder %v735_v7, 0.0  ;;  %1660 = vmatpush.bf16.msra.mxu0 %v3957_v1  ;;  %v3797_v1 = vor.u32 %v4434_v61, %v3796_v59 }
 0x16b   : > { %vm841_vm7 = vcmp.gt.f32.partialorder %v794_v58, 0.0 }
 0x16c   : > { %vm835_vm15 = vcmp.gt.f32.partialorder %v786_v6, 0.0  ;;  %v875_v8 = vmul.f32 0.01, %v786_v6  ;;  %v920_v28 = vsel %vm840_vm0, %v735_v7, %v880_v21  ;;  %v881_v7 = vmul.f32 0.01, %v794_v58 }
 0x16e   : > { %v915_v12 = vsel %vm835_vm15, %v786_v6, %v875_v8  ;;  %v3833_v6 = vor.u32 %v4440_v62, %v3830_v2  ;;  %v921_v10 = vsel %vm841_vm7, %v794_v58, %v881_v7  ;;  %v4464_v62 = vld [vmem:[#allocation2 + $0x14c] sm:$0xf]  ;;  %v3926_v2 = vld [vmem:[#allocation2 + $0x158] sm:$0xf0] }
 0x16f   : > { %v5125_v17 = vpack.c.bf16 %v915_v12, %v913_v11  ;;  %v736_v18 = vpop.f32.mrf.mxu3  ;;  %v3813_v11 = vor.u32 %v4438_v9, %v3812_v54  ;;  %v3924_v54 = vld [vmem:[#allocation2 + $0x148] sm:$0xf]  ;;  %v4466_v9 = vld [vmem:[#allocation2 + $0x154] sm:$0xf0] }
 0x170   : > { %v737_v22 = vadd.f32 %v736_v18, %v5088_v46  ;;  %v795_v23 = vpop.f32.mrf.mxu2  ;;  %1719 = vmatpush.bf16.msrb.mxu1 %v3833_v6  ;;  %v3929_v6 = vor.u32 %v4464_v62, %v3926_v2  ;;  %v4424_v2 = vld [vmem:[#allocation2 + $0xc] sm:$0xf] }
 0x171   : > { %1434 = vmatmul.bf16.gmra.mxu0 %v5125_v17  ;;  %1552 = vmatmul.bf16.gmra.mxu2 %v5125_v17  ;;  %v796_v53 = vadd.f32 %v795_v23, %v5103_v26 }
 0x172   : > { %vm842_vm1 = vcmp.gt.f32.partialorder %v737_v22, 0.0  ;;  %v882_v25 = vmul.f32 0.01, %v737_v22  ;;  %1602 = vmatpush.bf16.msra.mxu3 %v3813_v11 }
 0x173   : > { %v883_v4 = vmul.f32 0.01, %v796_v53  ;;  %vm843_vm6 = vcmp.gt.f32.partialorder %v796_v53, 0.0 }
 0x174   : > { %v922_v29 = vsel %vm842_vm1, %v737_v22, %v882_v25  ;;  %1380 = vmatmul.bf16.gmra.mxu3 %v5117_v60  ;;  %v4468_v25 = vld [vmem:[#allocation2 + $0x16c] sm:$0xf]  ;;  %1720 = vmatpush.bf16.msrb.mxu1 %v3817_v40 }
 0x175   : > { %v5132_v30 = vpack.c.bf16 %v922_v29, %v920_v28  ;;  %v923_v8 = vsel %vm843_vm6, %v796_v53, %v883_v4  ;;  %v3940_v28 = vld [vmem:[#allocation2 + $0x168] sm:$0xf]  ;;  %v3945_v31 = vor.u32 %v4468_v25, %v3942_v27  ;;  %v4460_v40 = vld [vmem:[#allocation2 + $0x12c] sm:$0xf] }
 0x176   : > { %v5155_v12 = vpack.c.bf16 %v923_v8, %v921_v10  ;;  %1603 = vmatpush.bf16.msra.mxu3 %v3797_v1  ;;  %v4432_v10 = vld [vmem:[#allocation2 + $0x4c] sm:$0xf] }
 0x177   : > { %v739_v32 = vpop.f32.mrf.mxu3  ;;  %1503 = vmatmul.bf16.gmra.mxu1 %v5132_v30  ;;  %1779 = vmatpush.bf16.msra.mxu2 %v3945_v31 }
 0x178   : > { %v5137_v36 = vpop.f32.mrf.mxu2  ;;  %v740_v39 = vadd.f32 %v739_v32, %v5088_v46  ;;  %v4470_v32 = vld [vmem:[#allocation2 + $0x174] sm:$0xf0] }
 0x179   : > { %v799_v23 = vadd.f32 %v5137_v36, %v5103_v26  ;;  %v3941_v35 = vor.u32 %v4470_v32, %v3940_v28  ;;  %v3780_v32 = vld [vmem:[#allocation2 + $0x28] sm:$0xf] }
 0x17a   : > { %v884_v48 = vmul.f32 0.01, %v740_v39  ;;  %vm844_vm4 = vcmp.gt.f32.partialorder %v740_v39, 0.0 }
 0x17b   : > { %v885_v41 = vmul.f32 0.01, %v799_v23  ;;  %1661 = vmatpush.bf16.msra.mxu0 %v3941_v35  ;;  %vm845_vm11 = vcmp.gt.f32.partialorder %v799_v23, 0.0  ;;  %1780 = vmatpush.bf16.msra.mxu2 %v3929_v6  ;;  %v3781_v35 = vor.u32 %v4430_v33, %v3780_v32 }
 0x17c   : > { %v924_v55 = vsel %vm844_vm4, %v740_v39, %v884_v48 }
 0x17d   : > { %v925_v43 = vsel %vm845_vm11, %v799_v23, %v885_v41  ;;  %v3910_v41 = vld [vmem:[#allocation2 + $0x138] sm:$0xf0]  ;;  %1604 = vmatpush.bf16.msra.mxu3 %v3781_v35 }
 0x17e   : > { %v3894_v35 = vld [vmem:[#allocation2 + $0x118] sm:$0xf0] }
 0x17f   : > { %v741_v34 = vpop.f32.mrf.mxu3 }
 0x180   : > { %v742_v50 = vadd.f32 %v741_v34, %v5088_v46  ;;  %v800_v51 = vpop.f32.mrf.mxu2 }
 0x181   : > { %1439 = vmatmul.bf16.gmra.mxu0 %v5140_v45  ;;  %1557 = vmatmul.bf16.gmra.mxu2 %v5140_v45  ;;  %v801_v19 = vadd.f32 %v800_v51, %v5103_v26 }
 0x182   : > { %vm846_vm5 = vcmp.gt.f32.partialorder %v742_v50, 0.0  ;;  %v886_v52 = vmul.f32 0.01, %v742_v50 }
 0x183   : > { %v887_v38 = vmul.f32 0.01, %v801_v19  ;;  %vm847_vm10 = vcmp.gt.f32.partialorder %v801_v19, 0.0 }
 0x184   : > { %v926_v56 = vsel %vm846_vm5, %v742_v50, %v886_v52  ;;  %1385 = vmatmul.bf16.gmra.mxu3 %v5132_v30 }
 0x185   : > { %v5147_v57 = vpack.c.bf16 %v926_v56, %v924_v55  ;;  %v927_v36 = vsel %vm847_vm10, %v801_v19, %v887_v38 }
 0x186   : > { %v5170_v44 = vpack.c.bf16 %v927_v36, %v925_v43  ;;  %v3908_v36 = vld [vmem:[#allocation2 + $0x128] sm:$0xf]  ;;  %v4462_v43 = vld [vmem:[#allocation2 + $0x134] sm:$0xf0] }
 0x187   : > { %v744_v63 = vpop.f32.mrf.mxu3  ;;  %1508 = vmatmul.bf16.gmra.mxu1 %v5147_v57 }
 0x188   : > { %v5152_v5 = vpop.f32.mrf.mxu2  ;;  %v745_v3 = vadd.f32 %v744_v63, %v5088_v46 }
 0x189   : > { %v804_v58 = vadd.f32 %v5152_v5, %v5103_v26 }
 0x18a   : > { %v888_v14 = vmul.f32 0.01, %v745_v3  ;;  %vm848_vm8 = vcmp.gt.f32.partialorder %v745_v3, 0.0 }
 0x18b   : > { %v889_v7 = vmul.f32 0.01, %v804_v58  ;;  %vm849_vm15 = vcmp.gt.f32.partialorder %v804_v58, 0.0 }
 0x18c   : > { %v928_v20 = vsel %vm848_vm8, %v745_v3, %v888_v14  ;;  %v3798_v14 = vld [vmem:[#allocation2 + $0x58] sm:$0xf0] }
 0x18d   : > { %v929_v11 = vsel %vm849_vm15, %v804_v58, %v889_v7 }
 0x18f   : > { %v746_v13 = vpop.f32.mrf.mxu3 }
 0x190   : > { %v747_v15 = vadd.f32 %v746_v13, %v5088_v46  ;;  %v805_v16 = vpop.f32.mrf.mxu2  ;;  %v3925_v13 = vor.u32 %v4466_v9, %v3924_v54 }
 0x191   : > { %1444 = vmatmul.bf16.gmra.mxu0 %v5155_v12  ;;  %1562 = vmatmul.bf16.gmra.mxu2 %v5155_v12  ;;  %v806_v52 = vadd.f32 %v805_v16, %v5103_v26 }
 0x192   : > { %vm850_vm9 = vcmp.gt.f32.partialorder %v747_v15, 0.0  ;;  %v890_v18 = vmul.f32 0.01, %v747_v15  ;;  %1662 = vmatpush.bf16.msra.mxu0 %v3925_v13 }
 0x193   : > { %v891_v4 = vmul.f32 0.01, %v806_v52  ;;  %vm851_vm14 = vcmp.gt.f32.partialorder %v806_v52, 0.0 }
 0x194   : > { %v930_v21 = vsel %vm850_vm9, %v747_v15, %v890_v18  ;;  %1390 = vmatmul.bf16.gmra.mxu3 %v5147_v57  ;;  %v3801_v18 = vor.u32 %v4432_v10, %v3798_v14 }
 0x195   : > { %v5162_v22 = vpack.c.bf16 %v930_v21, %v928_v20  ;;  %v931_v3 = vsel %vm851_vm14, %v806_v52, %v891_v4  ;;  %v3766_v4 = vld [vmem:[#allocation2 + $0x18] sm:$0xf0] }
 0x196   : > { %v5185_v15 = vpack.c.bf16 %v931_v3, %v929_v11  ;;  %1721 = vmatpush.bf16.msrb.mxu1 %v3801_v18 }
 0x197   : > { %v749_v29 = vpop.f32.mrf.mxu3  ;;  %1513 = vmatmul.bf16.gmra.mxu1 %v5162_v22 }
 0x198   : > { %v5167_v39 = vpop.f32.mrf.mxu2  ;;  %v750_v42 = vadd.f32 %v749_v29, %v5088_v46 }
 0x199   : > { %v809_v31 = vadd.f32 %v5167_v39, %v5103_v26 }
 0x19a   : > { %v892_v47 = vmul.f32 0.01, %v750_v42  ;;  %vm852_vm12 = vcmp.gt.f32.partialorder %v750_v42, 0.0 }
 0x19b   : > { %vm853_vm3 = vcmp.gt.f32.partialorder %v809_v31, 0.0 }
 0x19c   : > { %v932_v53 = vsel %vm852_vm12, %v750_v42, %v892_v47  ;;  %v3913_v42 = vor.u32 %v4460_v40, %v3910_v41  ;;  %v3782_v47 = vld [vmem:[#allocation2 + $0x38] sm:$0xf0] }
 0x19e   : > { %1781 = vmatpush.bf16.msra.mxu2 %v3913_v42 }
 0x19f   : > { %v751_v34 = vpop.f32.mrf.mxu3 }
 0x1a0   : > { %v752_v48 = vadd.f32 %v751_v34, %v5088_v46  ;;  %v810_v50 = vpop.f32.mrf.mxu2  ;;  %v4428_v34 = vld [vmem:[#allocation2 + $0x2c] sm:$0xf] }
 0x1a1   : > { %1449 = vmatmul.bf16.gmra.mxu0 %v5170_v44  ;;  %1567 = vmatmul.bf16.gmra.mxu2 %v5170_v44  ;;  %v811_v23 = vadd.f32 %v810_v50, %v5103_v26  ;;  %v3909_v50 = vor.u32 %v4462_v43, %v3908_v36  ;;  %v4458_v43 = vld [vmem:[#allocation2 + $0x114] sm:$0xf0] }
 0x1a2   : > { %vm854_vm13 = vcmp.gt.f32.partialorder %v752_v48, 0.0  ;;  %v894_v51 = vmul.f32 0.01, %v752_v48 }
 0x1a3   : > { %vm855_vm2 = vcmp.gt.f32.partialorder %v811_v23, 0.0  ;;  %v895_v37 = vmul.f32 0.01, %v811_v23  ;;  %1663 = vmatpush.bf16.msra.mxu0 %v3909_v50 }
 0x1a4   : > { %v934_v55 = vsel %vm854_vm13, %v752_v48, %v894_v51  ;;  %1395 = vmatmul.bf16.gmra.mxu3 %v5162_v22  ;;  %v893_v48 = vmul.f32 0.01, %v809_v31  ;;  %v3785_v51 = vor.u32 %v4428_v34, %v3782_v47 }
 0x1a5   : > { %v5177_v56 = vpack.c.bf16 %v934_v55, %v932_v53  ;;  %v935_v39 = vsel %vm855_vm2, %v811_v23, %v895_v37 }
 0x1a6   : > { %1722 = vmatpush.bf16.msrb.mxu1 %v3785_v51  ;;  %v933_v53 = vsel %vm853_vm3, %v809_v31, %v893_v48  ;;  %v5232_v51 = vld [vmem:[%s5889_s6] sm:$0xf] }
 0x1a7   : > { %v754_v63 = vpop.f32.mrf.mxu3  ;;  %1518 = vmatmul.bf16.gmra.mxu1 %v5177_v56  ;;  %v5201_v59 = vpack.c.bf16 %v935_v39, %v933_v53  ;;  %v4096_v53 = vld [vmem:[#allocation5 + $0xa8] sm:$0xf] }
 0x1a8   : > { %v5182_v8 = vpop.f32.mrf.mxu2  ;;  %v755_v5 = vadd.f32 %v754_v63, %v5088_v46 }
 0x1a9   : > { %v814_v9 = vadd.f32 %v5182_v8, %v5103_v26 }
 0x1aa   : > { %v896_v19 = vmul.f32 0.01, %v755_v5  ;;  %vm856_vm0 = vcmp.gt.f32.partialorder %v755_v5, 0.0 }
 0x1ab   : > { %vm857_vm7 = vcmp.gt.f32.partialorder %v814_v9, 0.0 }
 0x1ac   : > { %v936_v25 = vsel %vm856_vm0, %v755_v5, %v896_v19  ;;  %v3769_v5 = vor.u32 %v4424_v2, %v3766_v4 }
 0x1ae   : > { %1723 = vmatpush.bf16.msrb.mxu1 %v3769_v5 }
 0x1af   : > { %v756_v16 = vpop.f32.mrf.mxu3 }
 0x1b0   : > { %v757_v20 = vadd.f32 %v756_v16, %v5088_v46  ;;  %v815_v28 = vpop.f32.mrf.mxu2  ;;  %v897_v16 = vmul.f32 0.01, %v814_v9 }
 0x1b1   : > { %1454 = vmatmul.bf16.gmra.mxu0 %v5185_v15  ;;  %1572 = vmatmul.bf16.gmra.mxu2 %v5185_v15  ;;  %v816_v6 = vadd.f32 %v815_v28, %v5103_v26 }
 0x1b2   : > { %vm858_vm1 = vcmp.gt.f32.partialorder %v757_v20, 0.0  ;;  %v898_v21 = vmul.f32 0.01, %v757_v20 }
 0x1b3   : > { %v899_v11 = vmul.f32 0.01, %v816_v6  ;;  %vm859_vm6 = vcmp.gt.f32.partialorder %v816_v6, 0.0 }
 0x1b4   : > { %v938_v27 = vsel %vm858_vm1, %v757_v20, %v898_v21  ;;  %1400 = vmatmul.bf16.gmra.mxu3 %v5177_v56  ;;  %v3764_v20 = vld [vmem:[#allocation2 + $0x8] sm:$0xf]  ;;  %v4426_v21 = vld [vmem:[#allocation2 + $0x14] sm:$0xf0] }
 0x1b5   : > { %v5192_v29 = vpack.c.bf16 %v938_v27, %v936_v25  ;;  %v939_v18 = vsel %vm859_vm6, %v816_v6, %v899_v11  ;;  %v3765_v23 = vor.u32 %v4426_v21, %v3764_v20  ;;  %v937_v25 = vsel %vm857_vm7, %v814_v9, %v897_v16  ;;  %v4384_v11 = vld [vmem:[#allocation5 + $0x2e8] sm:$0xf] }
 0x1b6   : > { %v5216_v27 = vpack.c.bf16 %v939_v18, %v937_v25  ;;  %v4192_v16 = vld [vmem:[#allocation5 + $0x168] sm:$0xf]  ;;  %v4533_v18 = vld [vmem:[#allocation5 + $0x170] sm:$0xf0] }
 0x1b7   : > { %v759_v38 = vpop.f32.mrf.mxu3  ;;  %1523 = vmatmul.bf16.gmra.mxu1 %v5192_v29  ;;  %1605 = vmatpush.bf16.msra.mxu3 %v3765_v23  ;;  %v4193_v21 = vor.u32 %v4533_v18, %v4192_v16  ;;  %v4506_v18 = vld [vmem:[#allocation5 + $0x98] sm:$0xf0] }
 0x1b8   : > { %v760_v52 = vadd.f32 %v759_v38, %v5088_v46  ;;  %v818_v55 = vpop.f32.mrf.mxu2  ;;  %v4456_v38 = vld [vmem:[#allocation2 + $0x10c] sm:$0xf] }
 0x1b9   : > { %v3897_v42 = vor.u32 %v4456_v38, %v3894_v35  ;;  %v819_v48 = vadd.f32 %v818_v55, %v5103_v26 }
 0x1ba   : > { %v900_v62 = vmul.f32 0.01, %v760_v52  ;;  %vm860_vm4 = vcmp.gt.f32.partialorder %v760_v52, 0.0 }
 0x1bb   : > { %1782 = vmatpush.bf16.msra.mxu2 %v3897_v42  ;;  %vm861_vm11 = vcmp.gt.f32.partialorder %v819_v48, 0.0  ;;  %v4557_v42 = vld [vmem:[#allocation5 + $0x230] sm:$0xf0] }
 0x1bc   : > { %v940_v7 = vsel %vm860_vm4, %v760_v52, %v900_v62  ;;  %v5235_v52 = vperm.slane %v5232_v51, 0  ;;  %v901_v62 = vmul.f32 0.01, %v819_v48 }
 0x1be   : > { %v5199_v58 = vpop.f32.mrf.mxu1  ;;  %v941_v6 = vsel %vm861_vm11, %v819_v48, %v901_v62 }
 0x1bf   : > { %v761_v61 = vpop.f32.mrf.mxu3 }
 0x1c0   : > { %v762_v63 = vadd.f32 %v761_v61, %v5088_v46  ;;  %v820_v13 = vpop.f32.mrf.mxu2  ;;  %v4509_v61 = vld [vmem:[#allocation5 + $0xb0] sm:$0xf0] }
 0x1c1   : > { %1459 = vmatmul.bf16.gmra.mxu0 %v5201_v59  ;;  %1577 = vmatmul.bf16.gmra.mxu2 %v5201_v59  ;;  %v821_v40 = vadd.f32 %v820_v13, %v5103_v26  ;;  %v4581_v13 = vld [vmem:[#allocation5 + $0x2f0] sm:$0xf0] }
 0x1c2   : > { %vm862_vm5 = vcmp.gt.f32.partialorder %v762_v63, 0.0  ;;  %v902_v1 = vmul.f32 0.01, %v762_v63  ;;  %v4385_v20 = vor.u32 %v4581_v13, %v4384_v11  ;;  %v4084_v13 = vld [vmem:[#allocation5 + $0x90] sm:$0xf] }
 0x1c3   : > { %v903_v39 = vmul.f32 0.01, %v821_v40  ;;  %vm863_vm10 = vcmp.gt.f32.partialorder %v821_v40, 0.0 }
 0x1c4   : > { %v942_v3 = vsel %vm862_vm5, %v762_v63, %v902_v1  ;;  %1405 = vmatmul.bf16.gmra.mxu3 %v5192_v29  ;;  %v4097_v63 = vor.u32 %v4509_v61, %v4096_v53  ;;  %2939 = vmatpush.bf16.msrb.mxu2 %v4385_v20  ;;  %v4085_v20 = vor.u32 %v4506_v18, %v4084_v13  ;;  %v4503_v13 = vld [vmem:[#allocation5 + $0x80] sm:$0xf0] }
 0x1c5   : > { %v5208_v54 = vpack.c.bf16 %v942_v3, %v940_v7  ;;  %v943_v55 = vsel %vm863_vm10, %v821_v40, %v903_v39  ;;  %v5241_v3 = vperm.slane %v5232_v51, 1 }
 0x1c6   : > { %v5213_v14 = vpop.f32.mrf.mxu1  ;;  %2762 = vmatpush.bf16.msrb.mxu3 %v4097_v63  ;;  %v5243_v5 = vpack.c.bf16 %v943_v55, %v941_v6 }
 0x1c7   : > { %v764_v10 = vpop.f32.mrf.mxu3  ;;  %1528 = vmatmul.bf16.gmra.mxu1 %v5208_v54  ;;  %v1492_v48 = vadd.f32 %v5213_v14, %v5241_v3 }
 0x1c8   : > { %v765_v19 = vadd.f32 %v764_v10, %v5088_v46  ;;  %v823_v32 = vpop.f32.mrf.mxu2 }
 0x1ca   : > { %v904_v28 = vmul.f32 0.01, %v765_v19  ;;  %vm864_vm8 = vcmp.gt.f32.partialorder %v765_v19, 0.0  ;;  %2763 = vmatpush.bf16.msrb.mxu3 %v4085_v20 }
 0x1cc   : > { %v944_v41 = vsel %vm864_vm8, %v765_v19, %v904_v28  ;;  %v1490_v19 = vadd.f32 %v5199_v58, %v5241_v3 }
 0x1ce   : > { %v5221_v33 = vpop.f32.mrf.mxu1 }
 0x1cf   : > { %v766_v8 = vpop.f32.mrf.mxu3 }
 0x1d0   : > { %v767_v31 = vadd.f32 %v766_v8, %v5088_v46  ;;  %v3892_v46 = vld [vmem:[#allocation2 + $0x108] sm:$0xf]  ;;  %v825_v1 = vpop.f32.mrf.mxu2 }
 0x1d1   : > { %1464 = vmatmul.bf16.gmra.mxu0 %v5216_v27  ;;  %1582 = vmatmul.bf16.gmra.mxu2 %v5216_v27  ;;  %v3893_v47 = vor.u32 %v4458_v43, %v3892_v46  ;;  %v826_v23 = vadd.f32 %v825_v1, %v5103_v26 }
 0x1d2   : > { %vm866_vm9 = vcmp.gt.f32.partialorder %v767_v31, 0.0  ;;  %v906_v37 = vmul.f32 0.01, %v767_v31 }
 0x1d3   : > { %1664 = vmatpush.bf16.msra.mxu0 %v3893_v47  ;;  %vm867_vm13 = vcmp.gt.f32.partialorder %v826_v23, 0.0 }
 0x1d4   : > { %v946_v36 = vsel %vm866_vm9, %v767_v31, %v906_v37  ;;  %1410 = vmatmul.bf16.gmra.mxu3 %v5208_v54  ;;  %v824_v37 = vadd.f32 %v823_v32, %v5103_v26 }
 0x1d5   : > { %v5225_v34 = vpack.c.bf16 %v946_v36, %v944_v41  ;;  %v4288_v41 = vld [vmem:[#allocation5 + $0x228] sm:$0xf]  ;;  %v907_v36 = vmul.f32 0.01, %v826_v23 }
 0x1d6   : > { %v5237_v2 = vpop.f32.mrf.mxu1  ;;  %v4289_v43 = vor.u32 %v4557_v42, %v4288_v41  ;;  %v905_v47 = vmul.f32 0.01, %v824_v37  ;;  %vm865_vm15 = vcmp.gt.f32.partialorder %v824_v37, 0.0  ;;  %v4530_v42 = vld [vmem:[#allocation5 + $0x158] sm:$0xf0] }
 0x1d7   : > { %v1371_v50 = vpop.f32.mrf.mxu3  ;;  %1533 = vmatmul.bf16.gmra.mxu1 %v5225_v34  ;;  %2821 = vmatpush.bf16.msrb.mxu0 %v4193_v21 }
 0x1d8   : > { %v1372_v4 = vadd.f32 %v1371_v50, %v5235_v52  ;;  %2880 = vmatpush.bf16.msra.mxu1 %v4289_v43  ;;  %v947_v50 = vsel %vm867_vm13, %v826_v23, %v907_v36  ;;  %v945_v1 = vsel %vm865_vm15, %v824_v37, %v905_v47  ;;  %v4180_v36 = vld [vmem:[#allocation5 + $0x150] sm:$0xf]  ;;  %v4554_v43 = vld [vmem:[#allocation5 + $0x218] sm:$0xf0] }
 0x1d9   : > { %v5263_v6 = vpack.c.bf16 %v947_v50, %v945_v1  ;;  %v4181_v47 = vor.u32 %v4530_v42, %v4180_v36 }
 0x1db   : > { %2822 = vmatpush.bf16.msrb.mxu0 %v4181_v47 }
 0x1de   : > { %v1430_v7 = vpop.f32.mrf.mxu0 }
 0x1df   : > { %v1431_v9 = vadd.f32 %v1430_v7, %v1372_v4  ;;  %v1373_v10 = vpop.f32.mrf.mxu3 }
 0x1e0   : > { %v1374_v28 = vadd.f32 %v1373_v10, %v5235_v52 }
 0x1e1   : > { %1469 = vmatmul.bf16.gmra.mxu0 %v5243_v5  ;;  %1587 = vmatmul.bf16.gmra.mxu2 %v5243_v5  ;;  %v1914_v35 = vmul.f32 0.01, %v1431_v9  ;;  %vm1834_vm12 = vcmp.gt.f32.partialorder %v1431_v9, 0.0 }
 0x1e3   : > { %v1994_v26 = vsel %vm1834_vm12, %v1431_v9, %v1914_v35 }
 0x1e4   : > { %1415 = vmatmul.bf16.gmra.mxu3 %v5225_v34  ;;  %v5251_v25 = vpop.f32.mrf.mxu1  ;;  %v1548_v8 = vpop.f32.mrf.mxu2 }
 0x1e5   : > { %v1549_v31 = vadd.f32 %v1548_v8, %v1490_v19  ;;  %v1495_v19 = vadd.f32 %v5221_v33, %v5241_v3 }
 0x1e6   : > { %v1432_v38 = vpop.f32.mrf.mxu0 }
 0x1e7   : > { %v1433_v40 = vadd.f32 %v1432_v38, %v1374_v28  ;;  %v1376_v58 = vpop.f32.mrf.mxu3  ;;  %1724 = vmatmul.bf16.vlgmr.msrb.gmra.mxu1 %v5094_v0  ;;  %v1915_v62 = vmul.f32 0.01, %v1549_v31  ;;  %vm1835_vm0 = vcmp.gt.f32.partialorder %v1549_v31, 0.0 }
 0x1e8   : > { %v1377_v63 = vadd.f32 %v1376_v58, %v5235_v52  ;;  %v4578_v58 = vld [vmem:[#allocation5 + $0x2d8] sm:$0xf0] }
 0x1e9   : > { %vm1838_vm14 = vcmp.gt.f32.partialorder %v1433_v40, 0.0  ;;  %v1918_v46 = vmul.f32 0.01, %v1433_v40  ;;  %v1995_v10 = vsel %vm1835_vm0, %v1549_v31, %v1915_v62 }
 0x1eb   : > { %v1998_v32 = vsel %vm1838_vm14, %v1433_v40, %v1918_v46  ;;  %v4372_v40 = vld [vmem:[#allocation5 + $0x2d0] sm:$0xf] }
 0x1ec   : > { %v5258_v39 = vpack.c.bf16 %v1998_v32, %v1994_v26  ;;  %v5260_v53 = vpop.f32.mrf.mxu1  ;;  %v1550_v61 = vpop.f32.mrf.mxu2  ;;  %v4373_v41 = vor.u32 %v4578_v58, %v4372_v40  ;;  %v4276_v46 = vld [vmem:[#allocation5 + $0x210] sm:$0xf] }
 0x1ed   : > { %v1551_v55 = vadd.f32 %v1550_v61, %v1492_v48  ;;  %v4277_v48 = vor.u32 %v4554_v43, %v4276_v46  ;;  %v1502_v58 = vadd.f32 %v5260_v53, %v5241_v3 }
 0x1ee   : > { %v1435_v4 = vpop.f32.mrf.mxu0  ;;  %2940 = vmatpush.bf16.msrb.mxu2 %v4373_v41  ;;  %v4168_v41 = vld [vmem:[#allocation5 + $0x138] sm:$0xf] }
 0x1ef   : > { %vm1839_vm1 = vcmp.gt.f32.partialorder %v1551_v55, 0.0  ;;  %v1919_v14 = vmul.f32 0.01, %v1551_v55  ;;  %v1436_v7 = vadd.f32 %v1435_v4, %v1377_v63  ;;  %v1378_v9 = vpop.f32.mrf.mxu3  ;;  %2881 = vmatpush.bf16.msra.mxu1 %v4277_v48 }
 0x1f0   : > { %v1379_v8 = vadd.f32 %v1378_v9, %v5235_v52 }
 0x1f1   : > { %v1999_v11 = vsel %vm1839_vm1, %v1551_v55, %v1919_v14  ;;  %1474 = vmatmul.bf16.gmra.mxu0 %v5263_v6  ;;  %1592 = vmatmul.bf16.gmra.mxu2 %v5263_v6  ;;  %v1922_v37 = vmul.f32 0.01, %v1436_v7  ;;  %vm1842_vm2 = vcmp.gt.f32.partialorder %v1436_v7, 0.0 }
 0x1f2   : > { %v5267_v16 = vpack.c.bf16 %v1999_v11, %v1995_v10 }
 0x1f3   : > { %v2002_v26 = vsel %vm1842_vm2, %v1436_v7, %v1922_v37  ;;  %v4072_v7 = vld [vmem:[#allocation5 + $0x78] sm:$0xf] }
 0x1f4   : > { %v5271_v21 = vpop.f32.mrf.mxu1  ;;  %v1553_v23 = vpop.f32.mrf.mxu2  ;;  %1606 = vmatmul.bf16.vlgmr.msra.gmra.mxu3 %v5094_v0  ;;  %v1497_v0 = vadd.f32 %v5237_v2, %v5241_v3  ;;  %v4073_v20 = vor.u32 %v4503_v13, %v4072_v7 }
 0x1f5   : > { %v1554_v28 = vadd.f32 %v1553_v23, %v1495_v19  ;;  %v1500_v19 = vadd.f32 %v5251_v25, %v5241_v3  ;;  %v4360_v25 = vld [vmem:[#allocation5 + $0x2b8] sm:$0xf] }
 0x1f6   : > { %v1437_v31 = vpop.f32.mrf.mxu0  ;;  %2764 = vmatpush.bf16.msrb.mxu3 %v4073_v20 }
 0x1f7   : > { %v1438_v38 = vadd.f32 %v1437_v31, %v1379_v8  ;;  %v1381_v35 = vpop.f32.mrf.mxu3  ;;  %1729 = vmatmul.bf16.gmra.mxu1 %v5099_v24  ;;  %v1923_v63 = vmul.f32 0.01, %v1554_v28  ;;  %vm1843_vm4 = vcmp.gt.f32.partialorder %v1554_v28, 0.0 }
 0x1f8   : > { %v1382_v55 = vadd.f32 %v1381_v35, %v5235_v52 }
 0x1f9   : > { %vm1846_vm3 = vcmp.gt.f32.partialorder %v1438_v38, 0.0  ;;  %v1926_v33 = vmul.f32 0.01, %v1438_v38  ;;  %v2003_v10 = vsel %vm1843_vm4, %v1554_v28, %v1923_v63 }
 0x1fb   : > { %v2006_v32 = vsel %vm1846_vm3, %v1438_v38, %v1926_v33  ;;  %v4575_v33 = vld [vmem:[#allocation5 + $0x2c0] sm:$0xf0] }
 0x1fc   : > { %v5278_v50 = vpop.f32.mrf.mxu1  ;;  %v1555_v61 = vpop.f32.mrf.mxu2  ;;  %v5280_v62 = vpack.c.bf16 %v2006_v32, %v2002_v26  ;;  %v4361_v36 = vor.u32 %v4575_v33, %v4360_v25 }
 0x1fd   : > { %v1556_v1 = vadd.f32 %v1555_v61, %v1497_v0 }
 0x1fe   : > { %v1440_v2 = vpop.f32.mrf.mxu0  ;;  %2941 = vmatpush.bf16.msrb.mxu2 %v4361_v36 }
 0x1ff   : > { %vm1847_vm5 = vcmp.gt.f32.partialorder %v1556_v1, 0.0  ;;  %v1927_v4 = vmul.f32 0.01, %v1556_v1  ;;  %v1441_v14 = vadd.f32 %v1440_v2, %v1382_v55  ;;  %v1383_v9 = vpop.f32.mrf.mxu3  ;;  %v4264_v2 = vld [vmem:[#allocation5 + $0x1f8] sm:$0xf] }
 0x200   : > { %v1384_v31 = vadd.f32 %v1383_v9, %v5235_v52 }
 0x201   : > { %1665 = vmatmul.bf16.vlgmr.msra.gmra.mxu0 %v5111_v49  ;;  %1783 = vmatmul.bf16.vlgmr.msra.gmra.mxu2 %v5111_v49  ;;  %v2007_v11 = vsel %vm1847_vm5, %v1556_v1, %v1927_v4  ;;  %v1930_v38 = vmul.f32 0.01, %v1441_v14  ;;  %vm1850_vm6 = vcmp.gt.f32.partialorder %v1441_v14, 0.0  ;;  %v4551_v4 = vld [vmem:[#allocation5 + $0x200] sm:$0xf0] }
 0x202   : > { %v5285_v18 = vpack.c.bf16 %v2007_v11, %v2003_v10  ;;  %v1505_v11 = vadd.f32 %v5271_v21, %v5241_v3  ;;  %v4500_v21 = vld [vmem:[#allocation5 + $0x68] sm:$0xf0] }
 0x203   : > { %v2010_v42 = vsel %vm1850_vm6, %v1441_v14, %v1930_v38  ;;  %v4265_v14 = vor.u32 %v4551_v4, %v4264_v2  ;;  %v4252_v2 = vld [vmem:[#allocation5 + $0x1e0] sm:$0xf]  ;;  %v4548_v4 = vld [vmem:[#allocation5 + $0x1e8] sm:$0xf0] }
 0x204   : > { %v5289_v23 = vpop.f32.mrf.mxu1  ;;  %v1558_v8 = vpop.f32.mrf.mxu2  ;;  %1611 = vmatmul.bf16.gmra.mxu3 %v5099_v24  ;;  %v4527_v24 = vld [vmem:[#allocation5 + $0x140] sm:$0xf0] }
 0x205   : > { %v1559_v37 = vadd.f32 %v1558_v8, %v1500_v19  ;;  %v4169_v0 = vor.u32 %v4527_v24, %v4168_v41  ;;  %2882 = vmatpush.bf16.msra.mxu1 %v4265_v14 }
 0x206   : > { %v1442_v49 = vpop.f32.mrf.mxu0 }
 0x207   : > { %v1443_v28 = vadd.f32 %v1442_v49, %v1384_v31  ;;  %v1386_v35 = vpop.f32.mrf.mxu3  ;;  %1734 = vmatmul.bf16.gmra.mxu1 %v5117_v60  ;;  %v1931_v26 = vmul.f32 0.01, %v1559_v37  ;;  %2823 = vmatpush.bf16.msrb.mxu0 %v4169_v0  ;;  %vm1851_vm8 = vcmp.gt.f32.partialorder %v1559_v37, 0.0 }
 0x208   : > { %v1387_v32 = vadd.f32 %v1386_v35, %v5235_v52  ;;  %v1507_v35 = vadd.f32 %v5278_v50, %v5241_v3  ;;  %v4348_v50 = vld [vmem:[#allocation5 + $0x2a0] sm:$0xf] }
 0x209   : > { %vm1854_vm7 = vcmp.gt.f32.partialorder %v1443_v28, 0.0  ;;  %v1934_v40 = vmul.f32 0.01, %v1443_v28  ;;  %v2011_v9 = vsel %vm1851_vm8, %v1559_v37, %v1931_v26 }
 0x20b   : > { %v2014_v46 = vsel %vm1854_vm7, %v1443_v28, %v1934_v40  ;;  %v4060_v28 = vld [vmem:[#allocation5 + $0x60] sm:$0xf] }
 0x20c   : > { %v5296_v43 = vpop.f32.mrf.mxu1  ;;  %v1560_v47 = vpop.f32.mrf.mxu2  ;;  %v5298_v48 = vpack.c.bf16 %v2014_v46, %v2010_v42  ;;  %v4061_v40 = vor.u32 %v4500_v21, %v4060_v28  ;;  %v4497_v28 = vld [vmem:[#allocation5 + $0x50] sm:$0xf0] }
 0x20d   : > { %v1561_v61 = vadd.f32 %v1560_v47, %v1502_v58  ;;  %v1512_v21 = vadd.f32 %v5296_v43, %v5241_v3  ;;  %v4336_v43 = vld [vmem:[#allocation5 + $0x288] sm:$0xf] }
 0x20e   : > { %v1445_v53 = vpop.f32.mrf.mxu0  ;;  %2765 = vmatpush.bf16.msrb.mxu3 %v4061_v40 }
 0x20f   : > { %vm1855_vm9 = vcmp.gt.f32.partialorder %v1561_v61, 0.0  ;;  %v1935_v63 = vmul.f32 0.01, %v1561_v61  ;;  %v1446_v55 = vadd.f32 %v1445_v53, %v1387_v32  ;;  %v1388_v1 = vpop.f32.mrf.mxu3  ;;  %v4572_v32 = vld [vmem:[#allocation5 + $0x2a8] sm:$0xf0] }
 0x210   : > { %v1389_v20 = vadd.f32 %v1388_v1, %v5235_v52  ;;  %v4156_v53 = vld [vmem:[#allocation5 + $0x120] sm:$0xf]  ;;  %v4524_v1 = vld [vmem:[#allocation5 + $0x128] sm:$0xf0] }
 0x211   : > { %1670 = vmatmul.bf16.gmra.mxu0 %v5125_v17  ;;  %1788 = vmatmul.bf16.gmra.mxu2 %v5125_v17  ;;  %v2015_v7 = vsel %vm1855_vm9, %v1561_v61, %v1935_v63  ;;  %v1938_v49 = vmul.f32 0.01, %v1446_v55  ;;  %vm1858_vm10 = vcmp.gt.f32.partialorder %v1446_v55, 0.0  ;;  %v4349_v61 = vor.u32 %v4572_v32, %v4348_v50 }
 0x212   : > { %v5303_v10 = vpack.c.bf16 %v2015_v7, %v2011_v9  ;;  %v1510_v9 = vadd.f32 %v5289_v23, %v5241_v3  ;;  %v4157_v7 = vor.u32 %v4524_v1, %v4156_v53  ;;  %v4144_v53 = vld [vmem:[#allocation5 + $0x108] sm:$0xf] }
 0x213   : > { %v2018_v25 = vsel %vm1858_vm10, %v1446_v55, %v1938_v49  ;;  %2942 = vmatpush.bf16.msrb.mxu2 %v4349_v61  ;;  %v4569_v61 = vld [vmem:[#allocation5 + $0x290] sm:$0xf0] }
 0x214   : > { %v5307_v13 = vpop.f32.mrf.mxu1  ;;  %v1563_v19 = vpop.f32.mrf.mxu2  ;;  %1616 = vmatmul.bf16.gmra.mxu3 %v5117_v60  ;;  %2824 = vmatpush.bf16.msrb.mxu0 %v4157_v7 }
 0x215   : > { %v1564_v8 = vadd.f32 %v1563_v19, %v1505_v11  ;;  %v4253_v11 = vor.u32 %v4548_v4, %v4252_v2  ;;  %v1515_v1 = vadd.f32 %v5307_v13, %v5241_v3  ;;  %v4337_v2 = vor.u32 %v4569_v61, %v4336_v43  ;;  %v4545_v13 = vld [vmem:[#allocation5 + $0x1d0] sm:$0xf0] }
 0x216   : > { %v1447_v31 = vpop.f32.mrf.mxu0 }
 0x217   : > { %v1448_v17 = vadd.f32 %v1447_v31, %v1389_v20  ;;  %v1391_v38 = vpop.f32.mrf.mxu3  ;;  %1739 = vmatmul.bf16.gmra.mxu1 %v5132_v30  ;;  %v1939_v24 = vmul.f32 0.01, %v1564_v8  ;;  %vm1859_vm12 = vcmp.gt.f32.partialorder %v1564_v8, 0.0  ;;  %2943 = vmatpush.bf16.msrb.mxu2 %v4337_v2 }
 0x218   : > { %v1392_v36 = vadd.f32 %v1391_v38, %v5235_v52  ;;  %2883 = vmatpush.bf16.msra.mxu1 %v4253_v11 }
 0x219   : > { %vm1862_vm11 = vcmp.gt.f32.partialorder %v1448_v17, 0.0  ;;  %v1942_v37 = vmul.f32 0.01, %v1448_v17  ;;  %v2019_v63 = vsel %vm1859_vm12, %v1564_v8, %v1939_v24 }
 0x21b   : > { %v2022_v60 = vsel %vm1862_vm11, %v1448_v17, %v1942_v37  ;;  %v4048_v37 = vld [vmem:[#allocation5 + $0x48] sm:$0xf] }
 0x21c   : > { %v5314_v58 = vpop.f32.mrf.mxu1  ;;  %v1565_v33 = vpop.f32.mrf.mxu2  ;;  %v5316_v41 = vpack.c.bf16 %v2022_v60, %v2018_v25 }
 0x21d   : > { %v1566_v0 = vadd.f32 %v1565_v33, %v1507_v35 }
 0x21e   : > { %v1450_v42 = vpop.f32.mrf.mxu0 }
 0x21f   : > { %vm1863_vm13 = vcmp.gt.f32.partialorder %v1566_v0, 0.0  ;;  %v1943_v46 = vmul.f32 0.01, %v1566_v0  ;;  %v1451_v47 = vadd.f32 %v1450_v42, %v1392_v36  ;;  %v1393_v26 = vpop.f32.mrf.mxu3 }
 0x221   : > { %1675 = vmatmul.bf16.gmra.mxu0 %v5140_v45  ;;  %1793 = vmatmul.bf16.gmra.mxu2 %v5140_v45  ;;  %v2023_v55 = vsel %vm1863_vm13, %v1566_v0, %v1943_v46  ;;  %v1394_v45 = vadd.f32 %v1393_v26, %v5235_v52  ;;  %v1946_v49 = vmul.f32 0.01, %v1451_v47  ;;  %vm1866_vm14 = vcmp.gt.f32.partialorder %v1451_v47, 0.0 }
 0x222   : > { %v5321_v14 = vpack.c.bf16 %v2023_v55, %v2019_v63  ;;  %v4521_v63 = vld [vmem:[#allocation5 + $0x110] sm:$0xf0] }
 0x223   : > { %v2026_v35 = vsel %vm1866_vm14, %v1451_v47, %v1946_v49  ;;  %v4145_v4 = vor.u32 %v4521_v63, %v4144_v53  ;;  %v4240_v49 = vld [vmem:[#allocation5 + $0x1c8] sm:$0xf] }
 0x224   : > { %v5325_v19 = vpop.f32.mrf.mxu1  ;;  %v1568_v20 = vpop.f32.mrf.mxu2  ;;  %1621 = vmatmul.bf16.gmra.mxu3 %v5132_v30  ;;  %v4049_v30 = vor.u32 %v4497_v28, %v4048_v37 }
 0x225   : > { %v1569_v8 = vadd.f32 %v1568_v20, %v1510_v9  ;;  %2825 = vmatpush.bf16.msrb.mxu0 %v4145_v4 }
 0x226   : > { %v1452_v31 = vpop.f32.mrf.mxu0  ;;  %2766 = vmatpush.bf16.msrb.mxu3 %v4049_v30 }
 0x227   : > { %v1453_v17 = vadd.f32 %v1452_v31, %v1394_v45  ;;  %v1396_v38 = vpop.f32.mrf.mxu3  ;;  %1744 = vmatmul.bf16.gmra.mxu1 %v5147_v57  ;;  %v1947_v24 = vmul.f32 0.01, %v1569_v8  ;;  %vm1867_vm0 = vcmp.gt.f32.partialorder %v1569_v8, 0.0 }
 0x228   : > { %v1397_v36 = vadd.f32 %v1396_v38, %v5235_v52  ;;  %v4241_v38 = vor.u32 %v4545_v13, %v4240_v49  ;;  %v4542_v49 = vld [vmem:[#allocation5 + $0x1b8] sm:$0xf0] }
 0x229   : > { %vm1870_vm15 = vcmp.gt.f32.partialorder %v1453_v17, 0.0  ;;  %v1950_v23 = vmul.f32 0.01, %v1453_v17  ;;  %v2027_v47 = vsel %vm1867_vm0, %v1569_v8, %v1947_v24 }
 0x22a   : > { %2884 = vmatpush.bf16.msra.mxu1 %v4241_v38 }
 0x22b   : > { %v2030_v40 = vsel %vm1870_vm15, %v1453_v17, %v1950_v23 }
 0x22c   : > { %v5332_v25 = vpop.f32.mrf.mxu1  ;;  %v1570_v60 = vpop.f32.mrf.mxu2  ;;  %v5334_v33 = vpack.c.bf16 %v2030_v40, %v2026_v35 }
 0x22d   : > { %v1571_v0 = vadd.f32 %v1570_v60, %v1512_v21 }
 0x22e   : > { %v1455_v42 = vpop.f32.mrf.mxu0 }
 0x22f   : > { %vm1871_vm1 = vcmp.gt.f32.partialorder %v1571_v0, 0.0  ;;  %v1951_v46 = vmul.f32 0.01, %v1571_v0  ;;  %v1456_v26 = vadd.f32 %v1455_v42, %v1397_v36  ;;  %v1398_v50 = vpop.f32.mrf.mxu3 }
 0x231   : > { %1680 = vmatmul.bf16.gmra.mxu0 %v5155_v12  ;;  %1798 = vmatmul.bf16.gmra.mxu2 %v5155_v12  ;;  %v2031_v32 = vsel %vm1871_vm1, %v1571_v0, %v1951_v46  ;;  %v1399_v12 = vadd.f32 %v1398_v50, %v5235_v52  ;;  %v1954_v45 = vmul.f32 0.01, %v1456_v26  ;;  %vm1874_vm2 = vcmp.gt.f32.partialorder %v1456_v26, 0.0  ;;  %v4494_v50 = vld [vmem:[#allocation5 + $0x38] sm:$0xf0] }
 0x232   : > { %v5339_v55 = vpack.c.bf16 %v2031_v32, %v2027_v47  ;;  %v1520_v47 = vadd.f32 %v5325_v19, %v5241_v3 }
 0x233   : > { %v2034_v23 = vsel %vm1874_vm2, %v1456_v26, %v1954_v45  ;;  %v4132_v45 = vld [vmem:[#allocation5 + $0xf0] sm:$0xf] }
 0x234   : > { %v5343_v9 = vpop.f32.mrf.mxu1  ;;  %v1573_v7 = vpop.f32.mrf.mxu2  ;;  %1626 = vmatmul.bf16.gmra.mxu3 %v5147_v57  ;;  %v1517_v57 = vadd.f32 %v5314_v58, %v5241_v3  ;;  %v4036_v58 = vld [vmem:[#allocation5 + $0x30] sm:$0xf] }
 0x235   : > { %v1574_v11 = vadd.f32 %v1573_v7, %v1515_v1  ;;  %v4037_v32 = vor.u32 %v4494_v50, %v4036_v58 }
 0x236   : > { %v1457_v20 = vpop.f32.mrf.mxu0 }
 0x237   : > { %v1458_v8 = vadd.f32 %v1457_v20, %v1399_v12  ;;  %v1401_v31 = vpop.f32.mrf.mxu3  ;;  %1749 = vmatmul.bf16.gmra.mxu1 %v5162_v22  ;;  %v1955_v35 = vmul.f32 0.01, %v1574_v11  ;;  %vm1875_vm4 = vcmp.gt.f32.partialorder %v1574_v11, 0.0  ;;  %2767 = vmatpush.bf16.msrb.mxu3 %v4037_v32  ;;  %v4324_v12 = vld [vmem:[#allocation5 + $0x270] sm:$0xf] }
 0x238   : > { %v1402_v40 = vadd.f32 %v1401_v31, %v5235_v52  ;;  %v4228_v31 = vld [vmem:[#allocation5 + $0x1b0] sm:$0xf] }
 0x239   : > { %vm1878_vm3 = vcmp.gt.f32.partialorder %v1458_v8, 0.0  ;;  %v1958_v17 = vmul.f32 0.01, %v1458_v8  ;;  %v2035_v46 = vsel %vm1875_vm4, %v1574_v11, %v1955_v35  ;;  %v4566_v11 = vld [vmem:[#allocation5 + $0x278] sm:$0xf0] }
 0x23a   : > { %v4325_v20 = vor.u32 %v4566_v11, %v4324_v12 }
 0x23b   : > { %v2038_v37 = vsel %vm1878_vm3, %v1458_v8, %v1958_v17  ;;  %v4518_v8 = vld [vmem:[#allocation5 + $0xf8] sm:$0xf0]  ;;  %v4229_v17 = vor.u32 %v4542_v49, %v4228_v31 }
 0x23c   : > { %v5350_v28 = vpop.f32.mrf.mxu1  ;;  %v1575_v21 = vpop.f32.mrf.mxu2  ;;  %v5352_v30 = vpack.c.bf16 %v2038_v37, %v2034_v23  ;;  %2944 = vmatpush.bf16.msrb.mxu2 %v4325_v20  ;;  %v4133_v13 = vor.u32 %v4518_v8, %v4132_v45  ;;  %v4120_v20 = vld [vmem:[#allocation5 + $0xd8] sm:$0xf] }
 0x23d   : > { %v1576_v60 = vadd.f32 %v1575_v21, %v1517_v57  ;;  %2885 = vmatpush.bf16.msra.mxu1 %v4229_v17  ;;  %v1527_v11 = vadd.f32 %v5350_v28, %v5241_v3 }
 0x23e   : > { %5908 = vst [vmem:[#allocation11_spill] sm:$0xff] %v5352_v30  ;;  %v1460_v24 = vpop.f32.mrf.mxu0  ;;  %2826 = vmatpush.bf16.msrb.mxu0 %v4133_v13 }
 0x23f   : > { %vm1879_vm5 = vcmp.gt.f32.partialorder %v1576_v60, 0.0  ;;  %v1959_v36 = vmul.f32 0.01, %v1576_v60  ;;  %v1461_v0 = vadd.f32 %v1460_v24, %v1402_v40  ;;  %v1403_v42 = vpop.f32.mrf.mxu3 }
 0x240   : > { %v1404_v63 = vadd.f32 %v1403_v42, %v5235_v52 }
 0x241   : > { %1685 = vmatmul.bf16.gmra.mxu0 %v5170_v44  ;;  %1803 = vmatmul.bf16.gmra.mxu2 %v5170_v44  ;;  %v2039_v26 = vsel %vm1879_vm5, %v1576_v60, %v1959_v36  ;;  %v1962_v2 = vmul.f32 0.01, %v1461_v0  ;;  %vm1882_vm6 = vcmp.gt.f32.partialorder %v1461_v0, 0.0 }
 0x242   : > { %v5357_v43 = vpack.c.bf16 %v2039_v26, %v2035_v46  ;;  %v4491_v26 = vld [vmem:[#allocation5 + $0x20] sm:$0xf0] }
 0x243   : > { %v2042_v38 = vsel %vm1882_vm6, %v1461_v0, %v1962_v2  ;;  %v4024_v0 = vld [vmem:[#allocation5 + $0x18] sm:$0xf] }
 0x244   : > { %v5361_v61 = vpop.f32.mrf.mxu1  ;;  %v1578_v53 = vpop.f32.mrf.mxu2  ;;  %1631 = vmatmul.bf16.gmra.mxu3 %v5162_v22  ;;  %v1522_v22 = vadd.f32 %v5332_v25, %v5241_v3  ;;  %v4025_v32 = vor.u32 %v4491_v26, %v4024_v0 }
 0x245   : > { %v1579_v1 = vadd.f32 %v1578_v53, %v1520_v47  ;;  %v1525_v47 = vadd.f32 %v5343_v9, %v5241_v3  ;;  %v4312_v9 = vld [vmem:[#allocation5 + $0x258] sm:$0xf] }
 0x246   : > { %v1462_v44 = vpop.f32.mrf.mxu0  ;;  %2768 = vmatpush.bf16.msrb.mxu3 %v4025_v32 }
 0x247   : > { %v1463_v4 = vadd.f32 %v1462_v44, %v1404_v63  ;;  %v1406_v7 = vpop.f32.mrf.mxu3  ;;  %1754 = vmatmul.bf16.gmra.mxu1 %v5177_v56  ;;  %v1963_v35 = vmul.f32 0.01, %v1579_v1  ;;  %vm1883_vm8 = vcmp.gt.f32.partialorder %v1579_v1, 0.0 }
 0x248   : > { %v1407_v40 = vadd.f32 %v1406_v7, %v5235_v52 }
 0x249   : > { %vm1886_vm7 = vcmp.gt.f32.partialorder %v1463_v4, 0.0  ;;  %v1966_v19 = vmul.f32 0.01, %v1463_v4  ;;  %v2043_v58 = vsel %vm1883_vm8, %v1579_v1, %v1963_v35 }
 0x24b   : > { %v2046_v57 = vsel %vm1886_vm7, %v1463_v4, %v1966_v19  ;;  %v4563_v19 = vld [vmem:[#allocation5 + $0x260] sm:$0xf0] }
 0x24c   : > { %v5368_v23 = vpop.f32.mrf.mxu1  ;;  %v1580_v37 = vpop.f32.mrf.mxu2  ;;  %v5370_v21 = vpack.c.bf16 %v2046_v57, %v2042_v38  ;;  %v4313_v45 = vor.u32 %v4563_v19, %v4312_v9 }
 0x24d   : > { %v1581_v60 = vadd.f32 %v1580_v37, %v1522_v22 }
 0x24e   : > { %5909 = vst [vmem:[#allocation12_spill] sm:$0xff] %v5370_v21  ;;  %v1465_v25 = vpop.f32.mrf.mxu0  ;;  %2945 = vmatpush.bf16.msrb.mxu2 %v4313_v45 }
 0x24f   : > { %vm1887_vm9 = vcmp.gt.f32.partialorder %v1581_v60, 0.0  ;;  %v1967_v24 = vmul.f32 0.01, %v1581_v60  ;;  %v1466_v36 = vadd.f32 %v1465_v25, %v1407_v40  ;;  %v1408_v42 = vpop.f32.mrf.mxu3  ;;  %v4216_v25 = vld [vmem:[#allocation5 + $0x198] sm:$0xf] }
 0x250   : > { %v1409_v44 = vadd.f32 %v1408_v42, %v5235_v52 }
 0x251   : > { %1690 = vmatmul.bf16.gmra.mxu0 %v5185_v15  ;;  %1808 = vmatmul.bf16.gmra.mxu2 %v5185_v15  ;;  %v2047_v46 = vsel %vm1887_vm9, %v1581_v60, %v1967_v24  ;;  %v1970_v4 = vmul.f32 0.01, %v1466_v36  ;;  %vm1890_vm10 = vcmp.gt.f32.partialorder %v1466_v36, 0.0  ;;  %v4539_v24 = vld [vmem:[#allocation5 + $0x1a0] sm:$0xf0] }
 0x252   : > { %v5375_v50 = vpack.c.bf16 %v2047_v46, %v2043_v58  ;;  %v1530_v46 = vadd.f32 %v5361_v61, %v5241_v3  ;;  %v4536_v61 = vld [vmem:[#allocation5 + $0x188] sm:$0xf0] }
 0x253   : > { %v2050_v8 = vsel %vm1890_vm10, %v1466_v36, %v1970_v4  ;;  %v4217_v36 = vor.u32 %v4539_v24, %v4216_v25  ;;  %v4108_v25 = vld [vmem:[#allocation5 + $0xc0] sm:$0xf] }
 0x254   : > { %5910 = vst [vmem:[#allocation13_spill] sm:$0xff] %v5375_v50  ;;  %v5379_v53 = vpop.f32.mrf.mxu1  ;;  %v1583_v63 = vpop.f32.mrf.mxu2  ;;  %1636 = vmatmul.bf16.gmra.mxu3 %v5177_v56  ;;  %v4515_v56 = vld [vmem:[#allocation5 + $0xe0] sm:$0xf0] }
 0x255   : > { %v1584_v2 = vadd.f32 %v1583_v63, %v1525_v47  ;;  %v4121_v22 = vor.u32 %v4515_v56, %v4120_v20  ;;  %2886 = vmatpush.bf16.msra.mxu1 %v4217_v36  ;;  %v4012_v20 = vld [vmem:[#allocation5] sm:$0xf]  ;;  %v4488_v56 = vld [vmem:[#allocation5 + $0x8] sm:$0xf0]  ;;  %v1535_v36 = vadd.f32 %v5379_v53, %v5241_v3 }
 0x256   : > { %v1467_v15 = vpop.f32.mrf.mxu0 }
 0x257   : > { %v1468_v1 = vadd.f32 %v1467_v15, %v1409_v44  ;;  %v1411_v7 = vpop.f32.mrf.mxu3  ;;  %1759 = vmatmul.bf16.gmra.mxu1 %v5192_v29  ;;  %v1971_v38 = vmul.f32 0.01, %v1584_v2  ;;  %2827 = vmatpush.bf16.msrb.mxu0 %v4121_v22  ;;  %vm1891_vm12 = vcmp.gt.f32.partialorder %v1584_v2, 0.0 }
 0x258   : > { %v1412_v57 = vadd.f32 %v1411_v7, %v5235_v52  ;;  %v1532_v7 = vadd.f32 %v5368_v23, %v5241_v3 }
 0x259   : > { %vm1894_vm11 = vcmp.gt.f32.partialorder %v1468_v1, 0.0  ;;  %v1974_v12 = vmul.f32 0.01, %v1468_v1  ;;  %v2051_v42 = vsel %vm1891_vm12, %v1584_v2, %v1971_v38 }
 0x25b   : > { %v2054_v31 = vsel %vm1894_vm11, %v1468_v1, %v1974_v12  ;;  %v4204_v1 = vld [vmem:[#allocation5 + $0x180] sm:$0xf] }
 0x25c   : > { %v5386_v49 = vpop.f32.mrf.mxu1  ;;  %v1585_v13 = vpop.f32.mrf.mxu2  ;;  %v5388_v17 = vpack.c.bf16 %v2054_v31, %v2050_v8 }
 0x25d   : > { %v1586_v37 = vadd.f32 %v1585_v13, %v1527_v11  ;;  %v4013_v13 = vor.u32 %v4488_v56, %v4012_v20  ;;  %v5427_v20 = vperm.slane %v5232_v51, 2  ;;  %v4194_v51 = vld [vmem:[#allocation5 + $0x174] sm:$0xf0] }
 0x25e   : > { %5911 = vst [vmem:[#allocation14_spill] sm:$0xff] %v5388_v17  ;;  %v1470_v28 = vpop.f32.mrf.mxu0 }
 0x25f   : > { %vm1895_vm13 = vcmp.gt.f32.partialorder %v1586_v37, 0.0  ;;  %v1975_v35 = vmul.f32 0.01, %v1586_v37  ;;  %v1471_v40 = vadd.f32 %v1470_v28, %v1412_v57  ;;  %v1413_v60 = vpop.f32.mrf.mxu3  ;;  %2769 = vmatpush.bf16.msrb.mxu3 %v4013_v13 }
 0x260   : > { %v1414_v32 = vadd.f32 %v1413_v60, %v5235_v52  ;;  %v4560_v60 = vld [vmem:[#allocation5 + $0x248] sm:$0xf0] }
 0x261   : > { %1695 = vmatmul.bf16.gmra.mxu0 %v5201_v59  ;;  %1813 = vmatmul.bf16.gmra.mxu2 %v5201_v59  ;;  %v2055_v0 = vsel %vm1895_vm13, %v1586_v37, %v1975_v35  ;;  %v1978_v15 = vmul.f32 0.01, %v1471_v40  ;;  %vm1898_vm14 = vcmp.gt.f32.partialorder %v1471_v40, 0.0 }
 0x262   : > { %v5393_v58 = vpack.c.bf16 %v2055_v0, %v2051_v42  ;;  %v4512_v0 = vld [vmem:[#allocation5 + $0xc8] sm:$0xf0] }
 0x263   : > { %v2058_v12 = vsel %vm1898_vm14, %v1471_v40, %v1978_v15  ;;  %v4300_v40 = vld [vmem:[#allocation5 + $0x240] sm:$0xf] }
 0x264   : > { %v1588_v26 = vpop.f32.mrf.mxu2  ;;  %1641 = vmatmul.bf16.gmra.mxu3 %v5192_v29  ;;  %v5398_v47 = vpop.f32.mrf.mxu1  ;;  %v4205_v29 = vor.u32 %v4536_v61, %v4204_v1  ;;  %v4301_v42 = vor.u32 %v4560_v60, %v4300_v40  ;;  %v4098_v1 = vld [vmem:[#allocation5 + $0xb4] sm:$0xf0] }
 0x265   : > { %v1589_v63 = vadd.f32 %v1588_v26, %v1530_v46 }
 0x266   : > { %v1472_v44 = vpop.f32.mrf.mxu0  ;;  %2887 = vmatpush.bf16.msra.mxu1 %v4205_v29  ;;  %2946 = vmatpush.bf16.msrb.mxu2 %v4301_v42 }
 0x267   : > { %v1473_v59 = vadd.f32 %v1472_v44, %v1414_v32  ;;  %v1416_v4 = vpop.f32.mrf.mxu3  ;;  %1764 = vmatmul.bf16.gmra.mxu1 %v5208_v54  ;;  %v1979_v22 = vmul.f32 0.01, %v1589_v63  ;;  %vm1899_vm0 = vcmp.gt.f32.partialorder %v1589_v63, 0.0  ;;  %v4109_v32 = vor.u32 %v4512_v0, %v4108_v25 }
 0x268   : > { %v1417_v8 = vadd.f32 %v1416_v4, %v5235_v52 }
 0x269   : > { %vm1902_vm15 = vcmp.gt.f32.partialorder %v1473_v59, 0.0  ;;  %v1982_v2 = vmul.f32 0.01, %v1473_v59  ;;  %v2059_v28 = vsel %vm1899_vm0, %v1589_v63, %v1979_v22  ;;  %2828 = vmatpush.bf16.msrb.mxu0 %v4109_v32  ;;  %v4556_v32 = vld [vmem:[#allocation5 + $0x22c] sm:$0xf] }
 0x26b   : > { %v2062_v9 = vsel %vm1902_vm15, %v1473_v59, %v1982_v2  ;;  %v4508_v2 = vld [vmem:[#allocation5 + $0xac] sm:$0xf] }
 0x26c   : > { %v1590_v11 = vpop.f32.mrf.mxu2  ;;  %v5404_v19 = vpop.f32.mrf.mxu1  ;;  %v5406_v45 = vpack.c.bf16 %v2062_v9, %v2058_v12  ;;  %v4101_v61 = vor.u32 %v4508_v2, %v4098_v1  ;;  %v4669_v2 = vld [vmem:[%s5889_s6] sm:$0xf] }
 0x26d   : > { %v1591_v31 = vadd.f32 %v1590_v11, %v1532_v7  ;;  %v5445_v1 = vperm.slane %v4669_v2, 3 }
 0x26e   : > { %v1475_v38 = vpop.f32.mrf.mxu0  ;;  %2998 = vmatpush.bf16.msra.mxu3 %v4101_v61 }
 0x26f   : > { %vm1903_vm1 = vcmp.gt.f32.partialorder %v1591_v31, 0.0  ;;  %v1983_v23 = vmul.f32 0.01, %v1591_v31  ;;  %v1476_v57 = vadd.f32 %v1475_v38, %v1417_v8  ;;  %v1418_v37 = vpop.f32.mrf.mxu3 }
 0x271   : > { %1700 = vmatmul.bf16.gmra.mxu0 %v5216_v27  ;;  %1818 = vmatmul.bf16.gmra.mxu2 %v5216_v27  ;;  %v2063_v35 = vsel %vm1903_vm1, %v1591_v31, %v1983_v23  ;;  %v1419_v27 = vadd.f32 %v1418_v37, %v5235_v52  ;;  %v1986_v15 = vmul.f32 0.01, %v1476_v57  ;;  %vm1906_vm2 = vcmp.gt.f32.partialorder %v1476_v57, 0.0  ;;  %v4386_v23 = vld [vmem:[#allocation5 + $0x2f4] sm:$0xf0] }
 0x272   : > { %v5411_v24 = vpack.c.bf16 %v2063_v35, %v2059_v28 }
 0x273   : > { %v2066_v7 = vsel %vm1906_vm2, %v1476_v57, %v1986_v15  ;;  %v4532_v57 = vld [vmem:[#allocation5 + $0x16c] sm:$0xf] }
 0x274   : > { %v1593_v46 = vpop.f32.mrf.mxu2  ;;  %1646 = vmatmul.bf16.gmra.mxu3 %v5208_v54  ;;  %v5416_v26 = vpop.f32.mrf.mxu1  ;;  %v1537_v54 = vadd.f32 %v5386_v49, %v5241_v3  ;;  %v4580_v49 = vld [vmem:[#allocation5 + $0x2ec] sm:$0xf]  ;;  %v4197_v40 = vor.u32 %v4532_v57, %v4194_v51 }
 0x275   : > { %v1594_v63 = vadd.f32 %v1593_v46, %v1535_v36  ;;  %v4389_v35 = vor.u32 %v4580_v49, %v4386_v23 }
 0x276   : > { %v1477_v44 = vpop.f32.mrf.mxu0  ;;  %3057 = vmatpush.bf16.msra.mxu0 %v4197_v40 }
 0x277   : > { %v1478_v59 = vadd.f32 %v1477_v44, %v1419_v27  ;;  %v1607_v4 = vpop.f32.mrf.mxu3  ;;  %1769 = vmatmul.bf16.gmra.mxu1 %v5225_v34  ;;  %v1987_v11 = vmul.f32 0.01, %v1594_v63  ;;  %vm1907_vm4 = vcmp.gt.f32.partialorder %v1594_v63, 0.0  ;;  %3175 = vmatpush.bf16.msra.mxu2 %v4389_v35  ;;  %v4290_v27 = vld [vmem:[#allocation5 + $0x234] sm:$0xf0] }
 0x278   : > { %v1608_v3 = vadd.f32 %v1607_v4, %v5427_v20  ;;  %v4293_v44 = vor.u32 %v4556_v32, %v4290_v27  ;;  %v4374_v35 = vld [vmem:[#allocation5 + $0x2dc] sm:$0xf0] }
 0x279   : > { %vm1910_vm3 = vcmp.gt.f32.partialorder %v1478_v59, 0.0  ;;  %v1990_v53 = vmul.f32 0.01, %v1478_v59  ;;  %v2067_v13 = vsel %vm1907_vm4, %v1594_v63, %v1987_v11  ;;  %v1728_v11 = vadd.f32 %v5404_v19, %v5445_v1 }
 0x27a   : > { %3116 = vmatpush.bf16.msrb.mxu1 %v4293_v44 }
 0x27b   : > { %v2070_v52 = vsel %vm1910_vm3, %v1478_v59, %v1990_v53 }
 0x27c   : > { %v1595_v29 = vpop.f32.mrf.mxu2  ;;  %v5422_v12 = vpop.f32.mrf.mxu1  ;;  %v5424_v9 = vpack.c.bf16 %v2070_v52, %v2066_v7  ;;  %v1726_v7 = vadd.f32 %v5398_v47, %v5445_v1 }
 0x27d   : > { %v1596_v56 = vadd.f32 %v1595_v29, %v1537_v54  ;;  %v4505_v29 = vld [vmem:[#allocation5 + $0x94] sm:$0xf] }
 0x27e   : > { %v1666_v22 = vpop.f32.mrf.mxu0 }
 0x27f   : > { %vm1911_vm5 = vcmp.gt.f32.partialorder %v1596_v56, 0.0  ;;  %v1991_v8 = vmul.f32 0.01, %v1596_v56  ;;  %v1609_v31 = vpop.f32.mrf.mxu3  ;;  %v1667_v28 = vadd.f32 %v1666_v22, %v1608_v3 }
 0x280   : > { %v1610_v36 = vadd.f32 %v1609_v31, %v5427_v20 }
 0x281   : > { %1705 = vmatmul.bf16.gmra.mxu0 %v5243_v5  ;;  %1823 = vmatmul.bf16.gmra.mxu2 %v5243_v5  ;;  %v2071_v38 = vsel %vm1911_vm5, %v1596_v56, %v1991_v8  ;;  %v1916_v42 = vmul.f32 0.01, %v1667_v28  ;;  %vm1836_vm6 = vcmp.gt.f32.partialorder %v1667_v28, 0.0  ;;  %v4086_v56 = vld [vmem:[#allocation5 + $0x9c] sm:$0xf0] }
 0x282   : > { %v5432_v37 = vpack.c.bf16 %v2071_v38, %v2067_v13  ;;  %v4089_v31 = vor.u32 %v4505_v29, %v4086_v56  ;;  %v4502_v29 = vld [vmem:[#allocation5 + $0x7c] sm:$0xf]  ;;  %v1733_v56 = vadd.f32 %v5422_v12, %v5445_v1 }
 0x283   : > { %v1996_v15 = vsel %vm1836_vm6, %v1667_v28, %v1916_v42  ;;  %v4577_v28 = vld [vmem:[#allocation5 + $0x2d4] sm:$0xf] }
 0x284   : > { %1651 = vmatmul.bf16.gmra.mxu3 %v5225_v34  ;;  %v5435_v60 = vpop.f32.mrf.mxu1  ;;  %v1784_v25 = vpop.f32.mrf.mxu2  ;;  %v4553_v42 = vld [vmem:[#allocation5 + $0x214] sm:$0xf] }
 0x285   : > { %v1785_v22 = vadd.f32 %v1784_v25, %v1726_v7  ;;  %2999 = vmatpush.bf16.msra.mxu3 %v4089_v31  ;;  %v4377_v25 = vor.u32 %v4577_v28, %v4374_v35  ;;  %v4574_v35 = vld [vmem:[#allocation5 + $0x2bc] sm:$0xf] }
 0x286   : > { %v1668_v5 = vpop.f32.mrf.mxu0 }
 0x287   : > { %v1669_v0 = vadd.f32 %v1668_v5, %v1610_v36  ;;  %v1612_v46 = vpop.f32.mrf.mxu3  ;;  %v1917_v23 = vmul.f32 0.01, %v1785_v22  ;;  %vm1837_vm8 = vcmp.gt.f32.partialorder %v1785_v22, 0.0  ;;  %v4529_v36 = vld [vmem:[#allocation5 + $0x154] sm:$0xf]  ;;  %3176 = vmatpush.bf16.msra.mxu2 %v4377_v25 }
 0x288   : > { %v1613_v52 = vadd.f32 %v1612_v46, %v5427_v20  ;;  %v4182_v5 = vld [vmem:[#allocation5 + $0x15c] sm:$0xf0]  ;;  %v4526_v25 = vld [vmem:[#allocation5 + $0x13c] sm:$0xf] }
 0x289   : > { %vm1840_vm7 = vcmp.gt.f32.partialorder %v1669_v0, 0.0  ;;  %v1920_v63 = vmul.f32 0.01, %v1669_v0  ;;  %v4185_v27 = vor.u32 %v4529_v36, %v4182_v5  ;;  %v1997_v2 = vsel %vm1837_vm8, %v1785_v22, %v1917_v23  ;;  %v4074_v22 = vld [vmem:[#allocation5 + $0x84] sm:$0xf0] }
 0x28a   : > { %v4077_v31 = vor.u32 %v4502_v29, %v4074_v22  ;;  %v4170_v36 = vld [vmem:[#allocation5 + $0x144] sm:$0xf0] }
 0x28b   : > { %v2000_v59 = vsel %vm1840_vm7, %v1669_v0, %v1920_v63  ;;  %v4278_v0 = vld [vmem:[#allocation5 + $0x21c] sm:$0xf0]  ;;  %3058 = vmatpush.bf16.msra.mxu0 %v4185_v27  ;;  %v4266_v29 = vld [vmem:[#allocation5 + $0x204] sm:$0xf0] }
 0x28c   : > { %v5438_v34 = vpack.c.bf16 %v2000_v59, %v1996_v15  ;;  %v5440_v4 = vpop.f32.mrf.mxu1  ;;  %v1786_v53 = vpop.f32.mrf.mxu2  ;;  %v4281_v63 = vor.u32 %v4553_v42, %v4278_v0  ;;  %3000 = vmatpush.bf16.msra.mxu3 %v4077_v31  ;;  %v1736_v31 = vadd.f32 %v5435_v60, %v5445_v1 }
 0x28d   : > { %v1787_v3 = vadd.f32 %v1786_v53, %v1728_v11  ;;  %v1731_v11 = vadd.f32 %v5416_v26, %v5445_v1  ;;  %v1738_v22 = vadd.f32 %v5440_v4, %v5445_v1 }
 0x28e   : > { %v1671_v54 = vpop.f32.mrf.mxu0  ;;  %2888 = vmatmul.bf16.vlgmr.msra.gmra.mxu1 %v5438_v34 }
 0x28f   : > { %v1614_v61 = vpop.f32.mrf.mxu3  ;;  %v1672_v8 = vadd.f32 %v1671_v54, %v1613_v52  ;;  %v1921_v19 = vmul.f32 0.01, %v1787_v3  ;;  %vm1841_vm10 = vcmp.gt.f32.partialorder %v1787_v3, 0.0  ;;  %3117 = vmatpush.bf16.msrb.mxu1 %v4281_v63 }
 0x290   : > { %v1615_v47 = vadd.f32 %v1614_v61, %v5427_v20 }
 0x291   : > { %1710 = vmatmul.bf16.gmra.mxu0 %v5263_v6  ;;  %1828 = vmatmul.bf16.gmra.mxu2 %v5263_v6  ;;  %v1924_v6 = vmul.f32 0.01, %v1672_v8  ;;  %vm1844_vm9 = vcmp.gt.f32.partialorder %v1672_v8, 0.0  ;;  %v2001_v44 = vsel %vm1841_vm10, %v1787_v3, %v1921_v19 }
 0x292   : > { %v5465_v61 = vpack.c.bf16 %v2001_v44, %v1997_v2 }
 0x293   : > { %v2004_v46 = vsel %vm1844_vm9, %v1672_v8, %v1924_v6 }
 0x294   : > { %v5455_v49 = vpop.f32.mrf.mxu1  ;;  %v1789_v13 = vpop.f32.mrf.mxu2  ;;  %2770 = vmatmul.bf16.vlgmr.msrb.gmra.mxu3 %v5258_v39 }
 0x295   : > { %v1790_v3 = vadd.f32 %v1789_v13, %v1731_v11 }
 0x296   : > { %v1673_v38 = vpop.f32.mrf.mxu0 }
 0x297   : > { %v1674_v57 = vadd.f32 %v1673_v38, %v1615_v47  ;;  %v1617_v51 = vpop.f32.mrf.mxu3  ;;  %vm1845_vm12 = vcmp.gt.f32.partialorder %v1790_v3, 0.0  ;;  %v1925_v19 = vmul.f32 0.01, %v1790_v3 }
 0x298   : > { %v1618_v52 = vadd.f32 %v1617_v51, %v5427_v20 }
 0x299   : > { %vm1848_vm11 = vcmp.gt.f32.partialorder %v1674_v57, 0.0  ;;  %v1928_v40 = vmul.f32 0.01, %v1674_v57  ;;  %v2005_v2 = vsel %vm1845_vm12, %v1790_v3, %v1925_v19 }
 0x29b   : > { %v2008_v32 = vsel %vm1848_vm11, %v1674_v57, %v1928_v40  ;;  %v4362_v40 = vld [vmem:[#allocation5 + $0x2c4] sm:$0xf0] }
 0x29c   : > { %v5459_v15 = vpop.f32.mrf.mxu1  ;;  %v1791_v59 = vpop.f32.mrf.mxu2  ;;  %v5461_v53 = vpack.c.bf16 %v2008_v32, %v2004_v46  ;;  %v4365_v0 = vor.u32 %v4574_v35, %v4362_v40  ;;  %v4173_v46 = vor.u32 %v4526_v25, %v4170_v36  ;;  %v4499_v35 = vld [vmem:[#allocation5 + $0x64] sm:$0xf]  ;;  %v4062_v40 = vld [vmem:[#allocation5 + $0x6c] sm:$0xf0] }
 0x29d   : > { %v1792_v47 = vadd.f32 %v1791_v59, %v1733_v56 }
 0x29e   : > { %v1676_v54 = vpop.f32.mrf.mxu0  ;;  %2893 = vmatmul.bf16.gmra.mxu1 %v5461_v53  ;;  %3177 = vmatpush.bf16.msra.mxu2 %v4365_v0 }
 0x29f   : > { %v1619_v7 = vpop.f32.mrf.mxu3  ;;  %v1677_v8 = vadd.f32 %v1676_v54, %v1618_v52  ;;  %v1929_v12 = vmul.f32 0.01, %v1792_v47  ;;  %vm1849_vm14 = vcmp.gt.f32.partialorder %v1792_v47, 0.0  ;;  %3059 = vmatpush.bf16.msra.mxu0 %v4173_v46  ;;  %v4550_v52 = vld [vmem:[#allocation5 + $0x1fc] sm:$0xf] }
 0x2a0   : > { %v1620_v6 = vadd.f32 %v1619_v7, %v5427_v20  ;;  %v4269_v56 = vor.u32 %v4550_v52, %v4266_v29  ;;  %v4350_v52 = vld [vmem:[#allocation5 + $0x2ac] sm:$0xf0] }
 0x2a1   : > { %2829 = vmatmul.bf16.vlgmr.msrb.gmra.mxu0 %v5267_v16  ;;  %2947 = vmatmul.bf16.vlgmr.msrb.gmra.mxu2 %v5465_v61  ;;  %v1932_v51 = vmul.f32 0.01, %v1677_v8  ;;  %vm1852_vm13 = vcmp.gt.f32.partialorder %v1677_v8, 0.0  ;;  %v2009_v44 = vsel %vm1849_vm14, %v1792_v47, %v1929_v12 }
 0x2a2   : > { %v5484_v7 = vpack.c.bf16 %v2009_v44, %v2005_v2  ;;  %3118 = vmatpush.bf16.msrb.mxu1 %v4269_v56  ;;  %v4523_v56 = vld [vmem:[#allocation5 + $0x124] sm:$0xf] }
 0x2a3   : > { %v2012_v5 = vsel %vm1852_vm13, %v1677_v8, %v1932_v51 }
 0x2a4   : > { %v5474_v38 = vpop.f32.mrf.mxu1  ;;  %v1794_v23 = vpop.f32.mrf.mxu2  ;;  %2775 = vmatmul.bf16.gmra.mxu3 %v5280_v62 }
 0x2a5   : > { %v1795_v51 = vadd.f32 %v1794_v23, %v1736_v31  ;;  %v4547_v31 = vld [vmem:[#allocation5 + $0x1e4] sm:$0xf] }
 0x2a6   : > { %v1678_v57 = vpop.f32.mrf.mxu0 }
 0x2a7   : > { %v1679_v28 = vadd.f32 %v1678_v57, %v1620_v6  ;;  %v1622_v26 = vpop.f32.mrf.mxu3  ;;  %v1933_v60 = vmul.f32 0.01, %v1795_v51  ;;  %vm1853_vm3 = vcmp.gt.f32.partialorder %v1795_v51, 0.0 }
 0x2a8   : > { %v1623_v11 = vadd.f32 %v1622_v26, %v5427_v20 }
 0x2a9   : > { %vm1856_vm15 = vcmp.gt.f32.partialorder %v1679_v28, 0.0  ;;  %v1936_v13 = vmul.f32 0.01, %v1679_v28  ;;  %v2013_v44 = vsel %vm1853_vm3, %v1795_v51, %v1933_v60 }
 0x2ab   : > { %v2016_v42 = vsel %vm1856_vm15, %v1679_v28, %v1936_v13 }
 0x2ac   : > { %v5478_v32 = vpop.f32.mrf.mxu1  ;;  %v1796_v27 = vpop.f32.mrf.mxu2  ;;  %v5480_v63 = vpack.c.bf16 %v2016_v42, %v2012_v5  ;;  %v4065_v5 = vor.u32 %v4499_v35, %v4062_v40 }
 0x2ad   : > { %v1797_v3 = vadd.f32 %v1796_v27, %v1738_v22  ;;  %v1743_v22 = vadd.f32 %v5459_v15, %v5445_v1 }
 0x2ae   : > { %v1681_v59 = vpop.f32.mrf.mxu0  ;;  %2898 = vmatmul.bf16.gmra.mxu1 %v5480_v63  ;;  %3001 = vmatpush.bf16.msra.mxu3 %v4065_v5  ;;  %v4496_v5 = vld [vmem:[#allocation5 + $0x4c] sm:$0xf] }
 0x2af   : > { %v1624_v54 = vpop.f32.mrf.mxu3  ;;  %v1682_v8 = vadd.f32 %v1681_v59, %v1623_v11  ;;  %v1937_v13 = vmul.f32 0.01, %v1797_v3  ;;  %vm1857_vm1 = vcmp.gt.f32.partialorder %v1797_v3, 0.0 }
 0x2b0   : > { %v1625_v57 = vadd.f32 %v1624_v54, %v5427_v20  ;;  %v4571_v54 = vld [vmem:[#allocation5 + $0x2a4] sm:$0xf] }
 0x2b1   : > { %2834 = vmatmul.bf16.gmra.mxu0 %v5285_v18  ;;  %2952 = vmatmul.bf16.gmra.mxu2 %v5484_v7  ;;  %v1940_v26 = vmul.f32 0.01, %v1682_v8  ;;  %vm1860_vm0 = vcmp.gt.f32.partialorder %v1682_v8, 0.0  ;;  %v2017_v46 = vsel %vm1857_vm1, %v1797_v3, %v1937_v13  ;;  %v4353_v11 = vor.u32 %v4571_v54, %v4350_v52  ;;  %v4254_v3 = vld [vmem:[#allocation5 + $0x1ec] sm:$0xf0] }
 0x2b2   : > { %v5502_v2 = vpack.c.bf16 %v2017_v46, %v2013_v44  ;;  %v4050_v46 = vld [vmem:[#allocation5 + $0x54] sm:$0xf0] }
 0x2b3   : > { %v2020_v25 = vsel %vm1860_vm0, %v1682_v8, %v1940_v26  ;;  %v4158_v8 = vld [vmem:[#allocation5 + $0x12c] sm:$0xf0]  ;;  %3178 = vmatpush.bf16.msra.mxu2 %v4353_v11  ;;  %v1741_v26 = vadd.f32 %v5455_v49, %v5445_v1  ;;  %v4053_v54 = vor.u32 %v4496_v5, %v4050_v46 }
 0x2b4   : > { %v5493_v47 = vpop.f32.mrf.mxu1  ;;  %v1799_v6 = vpop.f32.mrf.mxu2  ;;  %2780 = vmatmul.bf16.gmra.mxu3 %v5298_v48  ;;  %v4161_v51 = vor.u32 %v4523_v56, %v4158_v8 }
 0x2b5   : > { %v1800_v15 = vadd.f32 %v1799_v6, %v1741_v26  ;;  %3002 = vmatpush.bf16.msra.mxu3 %v4053_v54  ;;  %v4146_v26 = vld [vmem:[#allocation5 + $0x114] sm:$0xf0] }
 0x2b6   : > { %v1683_v28 = vpop.f32.mrf.mxu0  ;;  %3060 = vmatpush.bf16.msra.mxu0 %v4161_v51  ;;  %v4338_v51 = vld [vmem:[#allocation5 + $0x294] sm:$0xf0] }
 0x2b7   : > { %v1684_v19 = vadd.f32 %v1683_v28, %v1625_v57  ;;  %v1627_v12 = vpop.f32.mrf.mxu3  ;;  %v4257_v28 = vor.u32 %v4547_v31, %v4254_v3  ;;  %vm1861_vm7 = vcmp.gt.f32.partialorder %v1800_v15, 0.0  ;;  %v4568_v3 = vld [vmem:[#allocation5 + $0x28c] sm:$0xf]  ;;  %v4242_v54 = vld [vmem:[#allocation5 + $0x1d4] sm:$0xf0] }
 0x2b8   : > { %v1628_v29 = vadd.f32 %v1627_v12, %v5427_v20 }
 0x2b9   : > { %vm1864_vm2 = vcmp.gt.f32.partialorder %v1684_v19, 0.0  ;;  %v1944_v4 = vmul.f32 0.01, %v1684_v19  ;;  %3119 = vmatpush.bf16.msrb.mxu1 %v4257_v28  ;;  %v4520_v28 = vld [vmem:[#allocation5 + $0x10c] sm:$0xf] }
 0x2bb   : > { %v2024_v36 = vsel %vm1864_vm2, %v1684_v19, %v1944_v4 }
 0x2bc   : > { %v5497_v42 = vpop.f32.mrf.mxu1  ;;  %v1801_v0 = vpop.f32.mrf.mxu2  ;;  %v5499_v23 = vpack.c.bf16 %v2024_v36, %v2020_v25 }
 0x2bd   : > { %v1802_v19 = vadd.f32 %v1801_v0, %v1743_v22  ;;  %v1941_v0 = vmul.f32 0.01, %v1800_v15 }
 0x2be   : > { %v1686_v27 = vpop.f32.mrf.mxu0  ;;  %2903 = vmatmul.bf16.gmra.mxu1 %v5499_v23 }
 0x2bf   : > { %v1629_v59 = vpop.f32.mrf.mxu3  ;;  %v1687_v57 = vadd.f32 %v1686_v27, %v1628_v29  ;;  %v1945_v36 = vmul.f32 0.01, %v1802_v19  ;;  %vm1865_vm5 = vcmp.gt.f32.partialorder %v1802_v19, 0.0  ;;  %v2021_v56 = vsel %vm1861_vm7, %v1800_v15, %v1941_v0 }
 0x2c0   : > { %v1630_v4 = vadd.f32 %v1629_v59, %v5427_v20  ;;  %v1746_v15 = vadd.f32 %v5474_v38, %v5445_v1 }
 0x2c1   : > { %2839 = vmatmul.bf16.gmra.mxu0 %v5303_v10  ;;  %2957 = vmatmul.bf16.gmra.mxu2 %v5502_v2  ;;  %v1948_v60 = vmul.f32 0.01, %v1687_v57  ;;  %vm1868_vm4 = vcmp.gt.f32.partialorder %v1687_v57, 0.0  ;;  %v2025_v29 = vsel %vm1865_vm5, %v1802_v19, %v1945_v36 }
 0x2c2   : > { %v5520_v8 = vpack.c.bf16 %v2025_v29, %v2021_v56 }
 0x2c3   : > { %v2028_v27 = vsel %vm1868_vm4, %v1687_v57, %v1948_v60  ;;  %v1748_v57 = vadd.f32 %v5478_v32, %v5445_v1 }
 0x2c4   : > { %v5511_v12 = vpop.f32.mrf.mxu1  ;;  %v1804_v13 = vpop.f32.mrf.mxu2  ;;  %2785 = vmatmul.bf16.gmra.mxu3 %v5316_v41 }
 0x2c5   : > { %v1805_v32 = vadd.f32 %v1804_v13, %v1746_v15  ;;  %v1753_v15 = vadd.f32 %v5497_v42, %v5445_v1 }
 0x2c6   : > { %v1688_v35 = vpop.f32.mrf.mxu0 }
 0x2c7   : > { %v1689_v40 = vadd.f32 %v1688_v35, %v1630_v4  ;;  %v1632_v25 = vpop.f32.mrf.mxu3  ;;  %v4341_v4 = vor.u32 %v4568_v3, %v4338_v51  ;;  %v4149_v35 = vor.u32 %v4520_v28, %v4146_v26  ;;  %v1949_v29 = vmul.f32 0.01, %v1805_v32 }
 0x2c8   : > { %v1633_v31 = vadd.f32 %v1632_v25, %v5427_v20  ;;  %vm1869_vm11 = vcmp.gt.f32.partialorder %v1805_v32, 0.0 }
 0x2c9   : > { %vm1872_vm6 = vcmp.gt.f32.partialorder %v1689_v40, 0.0  ;;  %v1952_v49 = vmul.f32 0.01, %v1689_v40  ;;  %3179 = vmatpush.bf16.msra.mxu2 %v4341_v4  ;;  %3061 = vmatpush.bf16.msra.mxu0 %v4149_v35  ;;  %v2029_v51 = vsel %vm1869_vm11, %v1805_v32, %v1949_v29  ;;  %v1751_v4 = vadd.f32 %v5493_v47, %v5445_v1  ;;  %v4493_v35 = vld [vmem:[#allocation5 + $0x34] sm:$0xf] }
 0x2ca   : > { %v4565_v29 = vld [vmem:[#allocation5 + $0x274] sm:$0xf] }
 0x2cb   : > { %v2032_v44 = vsel %vm1872_vm6, %v1689_v40, %v1952_v49 }
 0x2cc   : > { %v5515_v59 = vpop.f32.mrf.mxu1  ;;  %v1806_v52 = vpop.f32.mrf.mxu2  ;;  %v5517_v6 = vpack.c.bf16 %v2032_v44, %v2028_v27  ;;  %v4544_v27 = vld [vmem:[#allocation5 + $0x1cc] sm:$0xf] }
 0x2cd   : > { %v1807_v60 = vadd.f32 %v1806_v52, %v1748_v57  ;;  %v4245_v52 = vor.u32 %v4544_v27, %v4242_v54 }
 0x2ce   : > { %v1691_v11 = vpop.f32.mrf.mxu0  ;;  %2908 = vmatmul.bf16.gmra.mxu1 %v5517_v6 }
 0x2cf   : > { %v1634_v22 = vpop.f32.mrf.mxu3  ;;  %v1692_v19 = vadd.f32 %v1691_v11, %v1633_v31  ;;  %v1953_v44 = vmul.f32 0.01, %v1807_v60  ;;  %vm1873_vm9 = vcmp.gt.f32.partialorder %v1807_v60, 0.0  ;;  %3120 = vmatpush.bf16.msrb.mxu1 %v4245_v52 }
 0x2d0   : > { %v1635_v36 = vadd.f32 %v1634_v22, %v5427_v20 }
 0x2d1   : > { %2844 = vmatmul.bf16.gmra.mxu0 %v5321_v14  ;;  %2962 = vmatmul.bf16.gmra.mxu2 %v5520_v8  ;;  %v1956_v5 = vmul.f32 0.01, %v1692_v19  ;;  %vm1876_vm8 = vcmp.gt.f32.partialorder %v1692_v19, 0.0  ;;  %v2033_v3 = vsel %vm1873_vm9, %v1807_v60, %v1953_v44  ;;  %v4038_v60 = vld [vmem:[#allocation5 + $0x3c] sm:$0xf0] }
 0x2d2   : > { %v5538_v26 = vpack.c.bf16 %v2033_v3, %v2029_v51  ;;  %v4041_v32 = vor.u32 %v4493_v35, %v4038_v60  ;;  %v4134_v3 = vld [vmem:[#allocation5 + $0xfc] sm:$0xf0] }
 0x2d3   : > { %v2036_v11 = vsel %vm1876_vm8, %v1692_v19, %v1956_v5  ;;  %v4230_v51 = vld [vmem:[#allocation5 + $0x1bc] sm:$0xf0] }
 0x2d4   : > { %v5529_v40 = vpop.f32.mrf.mxu1  ;;  %v1809_v25 = vpop.f32.mrf.mxu2  ;;  %2790 = vmatmul.bf16.gmra.mxu3 %v5334_v33 }
 0x2d5   : > { %3003 = vmatpush.bf16.msra.mxu3 %v4041_v32 }
 0x2d6   : > { %v1693_v49 = vpop.f32.mrf.mxu0 }
 0x2d7   : > { %v1694_v0 = vadd.f32 %v1693_v49, %v1635_v36  ;;  %v1637_v46 = vpop.f32.mrf.mxu3  ;;  %v1810_v36 = vadd.f32 %v1809_v25, %v1751_v4  ;;  %v4326_v25 = vld [vmem:[#allocation5 + $0x27c] sm:$0xf0] }
 0x2d8   : > { %v1638_v19 = vadd.f32 %v1637_v46, %v5427_v20 }
 0x2d9   : > { %vm1880_vm10 = vcmp.gt.f32.partialorder %v1694_v0, 0.0  ;;  %v1960_v38 = vmul.f32 0.01, %v1694_v0  ;;  %v1957_v44 = vmul.f32 0.01, %v1810_v36  ;;  %vm1877_vm12 = vcmp.gt.f32.partialorder %v1810_v36, 0.0 }
 0x2db   : > { %v2040_v56 = vsel %vm1880_vm10, %v1694_v0, %v1960_v38 }
 0x2dc   : > { %v5533_v22 = vpop.f32.mrf.mxu1  ;;  %v1811_v13 = vpop.f32.mrf.mxu2  ;;  %v5535_v31 = vpack.c.bf16 %v2040_v56, %v2036_v11  ;;  %v4329_v56 = vor.u32 %v4565_v29, %v4326_v25 }
 0x2dd   : > { %v1812_v5 = vadd.f32 %v1811_v13, %v1753_v15  ;;  %v4517_v13 = vld [vmem:[#allocation5 + $0xf4] sm:$0xf] }
 0x2de   : > { %v1696_v57 = vpop.f32.mrf.mxu0  ;;  %2913 = vmatmul.bf16.gmra.mxu1 %v5535_v31  ;;  %3180 = vmatpush.bf16.msra.mxu2 %v4329_v56 }
 0x2df   : > { %v1639_v28 = vpop.f32.mrf.mxu3  ;;  %v1697_v49 = vadd.f32 %v1696_v57, %v1638_v19  ;;  %v1961_v42 = vmul.f32 0.01, %v1812_v5  ;;  %vm1881_vm14 = vcmp.gt.f32.partialorder %v1812_v5, 0.0  ;;  %v4541_v57 = vld [vmem:[#allocation5 + $0x1b4] sm:$0xf]  ;;  %v4137_v19 = vor.u32 %v4517_v13, %v4134_v3 }
 0x2e0   : > { %v1640_v47 = vadd.f32 %v1639_v28, %v5427_v20  ;;  %v4233_v35 = vor.u32 %v4541_v57, %v4230_v51 }
 0x2e1   : > { %2849 = vmatmul.bf16.gmra.mxu0 %v5339_v55  ;;  %2967 = vmatmul.bf16.gmra.mxu2 %v5538_v26  ;;  %v1964_v54 = vmul.f32 0.01, %v1697_v49  ;;  %vm1884_vm13 = vcmp.gt.f32.partialorder %v1697_v49, 0.0  ;;  %v2041_v32 = vsel %vm1881_vm14, %v1812_v5, %v1961_v42  ;;  %v1758_v5 = vadd.f32 %v5515_v59, %v5445_v1  ;;  %v4026_v42 = vld [vmem:[#allocation5 + $0x24] sm:$0xf0] }
 0x2e2   : > { %3062 = vmatpush.bf16.msra.mxu0 %v4137_v19  ;;  %3121 = vmatpush.bf16.msrb.mxu1 %v4233_v35  ;;  %v4562_v19 = vld [vmem:[#allocation5 + $0x25c] sm:$0xf] }
 0x2e3   : > { %v2044_v28 = vsel %vm1884_vm13, %v1697_v49, %v1964_v54 }
 0x2e4   : > { %v1814_v0 = vpop.f32.mrf.mxu2  ;;  %2795 = vmatmul.bf16.gmra.mxu3 %v5352_v30  ;;  %v5549_v27 = vpop.f32.mrf.mxu1 }
 0x2e6   : > { %v1698_v46 = vpop.f32.mrf.mxu0 }
 0x2e7   : > { %v1699_v38 = vadd.f32 %v1698_v46, %v1640_v47  ;;  %v1642_v52 = vpop.f32.mrf.mxu3  ;;  %v2037_v46 = vsel %vm1877_vm12, %v1810_v36, %v1957_v44  ;;  %v1756_v36 = vadd.f32 %v5511_v12, %v5445_v1 }
 0x2e8   : > { %v5557_v30 = vpack.c.bf16 %v2041_v32, %v2037_v46  ;;  %v1643_v49 = vadd.f32 %v1642_v52, %v5427_v20 }
 0x2e9   : > { %vm1888_vm15 = vcmp.gt.f32.partialorder %v1699_v38, 0.0  ;;  %v1968_v11 = vmul.f32 0.01, %v1699_v38  ;;  %v1815_v13 = vadd.f32 %v1814_v0, %v1756_v36  ;;  %v4514_v0 = vld [vmem:[#allocation5 + $0xdc] sm:$0xf] }
 0x2eb   : > { %v2048_v4 = vsel %vm1888_vm15, %v1699_v38, %v1968_v11  ;;  %v4490_v38 = vld [vmem:[#allocation5 + $0x1c] sm:$0xf]  ;;  %v1965_v35 = vmul.f32 0.01, %v1815_v13  ;;  %vm1885_vm3 = vcmp.gt.f32.partialorder %v1815_v13, 0.0 }
 0x2ec   : > { %v1816_v15 = vpop.f32.mrf.mxu2  ;;  %v5551_v60 = vpack.c.bf16 %v2048_v4, %v2044_v28  ;;  %v5555_v29 = vpop.f32.mrf.mxu1  ;;  %v4029_v56 = vor.u32 %v4490_v38, %v4026_v42 }
 0x2ed   : > { %v1817_v44 = vadd.f32 %v1816_v15, %v1758_v5  ;;  %v4314_v15 = vld [vmem:[#allocation5 + $0x264] sm:$0xf0] }
 0x2ee   : > { %v1701_v47 = vpop.f32.mrf.mxu0  ;;  %2918 = vmatmul.bf16.gmra.mxu1 %v5551_v60  ;;  %3004 = vmatpush.bf16.msra.mxu3 %v4029_v56  ;;  %v4317_v46 = vor.u32 %v4562_v19, %v4314_v15  ;;  %v2045_v56 = vsel %vm1885_vm3, %v1815_v13, %v1965_v35  ;;  %v1761_v19 = vadd.f32 %v5529_v40, %v5445_v1 }
 0x2ef   : > { %v1644_v25 = vpop.f32.mrf.mxu3  ;;  %v1702_v54 = vadd.f32 %v1701_v47, %v1643_v49  ;;  %v1969_v59 = vmul.f32 0.01, %v1817_v44  ;;  %vm1889_vm1 = vcmp.gt.f32.partialorder %v1817_v44, 0.0 }
 0x2f0   : > { %v1645_v52 = vadd.f32 %v1644_v25, %v5427_v20  ;;  %v4122_v25 = vld [vmem:[#allocation5 + $0xe4] sm:$0xf0]  ;;  %3181 = vmatpush.bf16.msra.mxu2 %v4317_v46 }
 0x2f1   : > { %2854 = vmatmul.bf16.gmra.mxu0 %v5357_v43  ;;  %2972 = vmatmul.bf16.gmra.mxu2 %v5557_v30  ;;  %v1972_v57 = vmul.f32 0.01, %v1702_v54  ;;  %vm1892_vm0 = vcmp.gt.f32.partialorder %v1702_v54, 0.0  ;;  %v2049_v38 = vsel %vm1889_vm1, %v1817_v44, %v1969_v59  ;;  %v4125_v42 = vor.u32 %v4514_v0, %v4122_v25  ;;  %v4014_v25 = vld [vmem:[#allocation5 + $0xc] sm:$0xf0] }
 0x2f3   : > { %v2052_v32 = vsel %vm1892_vm0, %v1702_v54, %v1972_v57  ;;  %3063 = vmatpush.bf16.msra.mxu0 %v4125_v42  ;;  %v4218_v54 = vld [vmem:[#allocation5 + $0x1a4] sm:$0xf0]  ;;  %v1763_v57 = vadd.f32 %v5533_v22, %v5445_v1  ;;  %v4535_v42 = vld [vmem:[#allocation5 + $0x184] sm:$0xf] }
 0x2f4   : > { %v1819_v11 = vpop.f32.mrf.mxu2  ;;  %2800 = vmatmul.bf16.gmra.mxu3 %v5370_v21  ;;  %v5568_v4 = vpop.f32.mrf.mxu1  ;;  %v4538_v21 = vld [vmem:[#allocation5 + $0x19c] sm:$0xf] }
 0x2f5   : > { %v4221_v44 = vor.u32 %v4538_v21, %v4218_v54  ;;  %v1820_v15 = vadd.f32 %v1819_v11, %v1761_v19  ;;  %v4487_v21 = vld [vmem:[#allocation5 + $0x4] sm:$0xf] }
 0x2f6   : > { %v1703_v3 = vpop.f32.mrf.mxu0 }
 0x2f7   : > { %v1704_v51 = vadd.f32 %v1703_v3, %v1645_v52  ;;  %v1647_v28 = vpop.f32.mrf.mxu3  ;;  %v5573_v3 = vpack.c.bf16 %v2049_v38, %v2045_v56  ;;  %3122 = vmatpush.bf16.msrb.mxu1 %v4221_v44  ;;  %v4017_v38 = vor.u32 %v4487_v21, %v4014_v25  ;;  %v1973_v40 = vmul.f32 0.01, %v1820_v15  ;;  %v4559_v25 = vld [vmem:[#allocation5 + $0x244] sm:$0xf] }
 0x2f8   : > { %vm1893_vm7 = vcmp.gt.f32.partialorder %v1820_v15, 0.0 }
 0x2f9   : > { %vm1896_vm2 = vcmp.gt.f32.partialorder %v1704_v51, 0.0  ;;  %v1976_v12 = vmul.f32 0.01, %v1704_v51  ;;  %5912 = vst [vmem:[#allocation15_spill] sm:$0xff] %v5573_v3  ;;  %3005 = vmatpush.bf16.msra.mxu3 %v4017_v38 }
 0x2fb   : > { %v2056_v47 = vsel %vm1896_vm2, %v1704_v51, %v1976_v12  ;;  %v1648_v51 = vadd.f32 %v1647_v28, %v5427_v20 }
 0x2fc   : > { %v1821_v49 = vpop.f32.mrf.mxu2  ;;  %v5570_v5 = vpack.c.bf16 %v2056_v47, %v2052_v32  ;;  %v5580_v59 = vpop.f32.mrf.mxu1 }
 0x2fd   : > { %v1822_v12 = vadd.f32 %v1821_v49, %v1763_v57 }
 0x2fe   : > { %v1706_v36 = vpop.f32.mrf.mxu0  ;;  %2923 = vmatmul.bf16.gmra.mxu1 %v5570_v5 }
 0x2ff   : > { %v1649_v52 = vpop.f32.mrf.mxu3  ;;  %v1707_v13 = vadd.f32 %v1706_v36, %v1648_v51  ;;  %v1977_v32 = vmul.f32 0.01, %v1822_v12  ;;  %vm1897_vm5 = vcmp.gt.f32.partialorder %v1822_v12, 0.0  ;;  %v4206_v36 = vld [vmem:[#allocation5 + $0x18c] sm:$0xf0] }
 0x300   : > { %v1650_v22 = vadd.f32 %v1649_v52, %v5427_v20  ;;  %v4209_v54 = vor.u32 %v4535_v42, %v4206_v36 }
 0x301   : > { %2859 = vmatmul.bf16.gmra.mxu0 %v5375_v50  ;;  %2977 = vmatmul.bf16.gmra.mxu2 %v5573_v3  ;;  %v1980_v47 = vmul.f32 0.01, %v1707_v13  ;;  %vm1900_vm4 = vcmp.gt.f32.partialorder %v1707_v13, 0.0  ;;  %v2057_v44 = vsel %vm1897_vm5, %v1822_v12, %v1977_v32  ;;  %v4511_v3 = vld [vmem:[#allocation5 + $0xc4] sm:$0xf]  ;;  %v1768_v12 = vadd.f32 %v5555_v29, %v5445_v1 }
 0x302   : > { %3123 = vmatpush.bf16.msrb.mxu1 %v4209_v54  ;;  %v4110_v50 = vld [vmem:[#allocation5 + $0xcc] sm:$0xf0] }
 0x303   : > { %v2060_v52 = vsel %vm1900_vm4, %v1707_v13, %v1980_v47  ;;  %v4113_v32 = vor.u32 %v4511_v3, %v4110_v50  ;;  %v5607_v50 = vld [vmem:[%s5891_s8] sm:$0x7] }
 0x304   : > { %v1824_v35 = vpop.f32.mrf.mxu2  ;;  %2805 = vmatmul.bf16.gmra.mxu3 %v5388_v17  ;;  %v4302_v17 = vld [vmem:[#allocation5 + $0x24c] sm:$0xf0] }
 0x305   : > { %v4305_v47 = vor.u32 %v4559_v25, %v4302_v17  ;;  %3064 = vmatpush.bf16.msra.mxu0 %v4113_v32 }
 0x306   : > { %v1708_v28 = vpop.f32.mrf.mxu0 }
 0x307   : > { %v1709_v46 = vadd.f32 %v1708_v28, %v1650_v22  ;;  %v1652_v0 = vpop.f32.mrf.mxu3  ;;  %v2053_v22 = vsel %vm1893_vm7, %v1820_v15, %v1973_v40  ;;  %3182 = vmatpush.bf16.msra.mxu2 %v4305_v47 }
 0x308   : > { %v5591_v21 = vpack.c.bf16 %v2057_v44, %v2053_v22  ;;  %v1653_v13 = vadd.f32 %v1652_v0, %v5427_v20  ;;  %v4104_v44 = vld [vmem:[#allocation5 + $0xb0] sm:$0xf] }
 0x309   : > { %vm1904_vm6 = vcmp.gt.f32.partialorder %v1709_v46, 0.0  ;;  %v1984_v49 = vmul.f32 0.01, %v1709_v46 }
 0x30b   : > { %v5586_v56 = vpop.f32.mrf.mxu1  ;;  %v2064_v11 = vsel %vm1904_vm6, %v1709_v46, %v1984_v49  ;;  %v1766_v49 = vadd.f32 %v5549_v27, %v5445_v1 }
 0x30c   : > { %v1826_v57 = vpop.f32.mrf.mxu2  ;;  %v5588_v51 = vpack.c.bf16 %v2064_v11, %v2060_v52  ;;  %v5610_v11 = vperm.slane %v5607_v50, 0 }
 0x30d   : > { %v1827_v38 = vadd.f32 %v1826_v57, %v1768_v12  ;;  %v1825_v40 = vadd.f32 %v1824_v35, %v1766_v49 }
 0x30e   : > { %v1711_v19 = vpop.f32.mrf.mxu0  ;;  %2928 = vmatmul.bf16.gmra.mxu1 %v5588_v51 }
 0x30f   : > { %v1654_v28 = vpop.f32.mrf.mxu3  ;;  %v1712_v46 = vadd.f32 %v1711_v19, %v1653_v13  ;;  %v1985_v52 = vmul.f32 0.01, %v1827_v38  ;;  %vm1905_vm9 = vcmp.gt.f32.partialorder %v1827_v38, 0.0  ;;  %vm1901_vm11 = vcmp.gt.f32.partialorder %v1825_v40, 0.0  ;;  %v4510_v19 = vld [vmem:[#allocation5 + $0xb8] sm:$0xf0] }
 0x310   : > { %v1655_v0 = vadd.f32 %v1654_v28, %v5427_v20  ;;  %v1981_v20 = vmul.f32 0.01, %v1825_v40  ;;  %v4105_v13 = vor.u32 %v4510_v19, %v4104_v44 }
 0x311   : > { %2864 = vmatmul.bf16.gmra.mxu0 %v5393_v58  ;;  %2982 = vmatmul.bf16.gmra.mxu2 %v5591_v21  ;;  %v1988_v29 = vmul.f32 0.01, %v1712_v46  ;;  %vm1908_vm8 = vcmp.gt.f32.partialorder %v1712_v46, 0.0  ;;  %v2065_v25 = vsel %vm1905_vm9, %v1827_v38, %v1985_v52  ;;  %v4392_v38 = vld [vmem:[#allocation5 + $0x2f0] sm:$0xf] }
 0x312   : > { %v2061_v32 = vsel %vm1901_vm11, %v1825_v40, %v1981_v20  ;;  %3234 = vmatpush.bf16.msrb.mxu3 %v4105_v13  ;;  %v4200_v52 = vld [vmem:[#allocation5 + $0x170] sm:$0xf]  ;;  %v1771_v20 = vadd.f32 %v5568_v4, %v5445_v1 }
 0x313   : > { %v5598_v15 = vpop.f32.mrf.mxu1  ;;  %v2068_v54 = vsel %vm1908_vm8, %v1712_v46, %v1988_v29  ;;  %v5619_v46 = vpack.c.bf16 %v2065_v25, %v2061_v32  ;;  %v1773_v29 = vadd.f32 %v5580_v59, %v5445_v1  ;;  %v4558_v1 = vld [vmem:[#allocation5 + $0x238] sm:$0xf0] }
 0x314   : > { %v1829_v42 = vpop.f32.mrf.mxu2  ;;  %2810 = vmatmul.bf16.gmra.mxu3 %v5406_v45 }
 0x315   : > { %v1830_v59 = vadd.f32 %v1829_v42, %v1771_v20 }
 0x316   : > { %v1713_v17 = vpop.f32.mrf.mxu0 }
 0x317   : > { %v1714_v3 = vadd.f32 %v1713_v17, %v1655_v0  ;;  %v2771_v36 = vpop.f32.mrf.mxu3  ;;  %v4582_v17 = vld [vmem:[#allocation5 + $0x2f8] sm:$0xf0]  ;;  %v1989_v32 = vmul.f32 0.01, %v1830_v59  ;;  %vm1909_vm13 = vcmp.gt.f32.partialorder %v1830_v59, 0.0 }
 0x318   : > { %v2772_v47 = vadd.f32 %v2771_v36, %v5610_v11 }
 0x319   : > { %vm1912_vm10 = vcmp.gt.f32.partialorder %v1714_v3, 0.0  ;;  %v1992_v27 = vmul.f32 0.01, %v1714_v3 }
 0x31b   : > { %v5612_v35 = vpop.f32.mrf.mxu1  ;;  %v2072_v57 = vsel %vm1912_vm10, %v1714_v3, %v1992_v27  ;;  %v4393_v3 = vor.u32 %v4582_v17, %v4392_v38  ;;  %v4534_v27 = vld [vmem:[#allocation5 + $0x178] sm:$0xf0] }
 0x31c   : > { %v1831_v22 = vpop.f32.mrf.mxu2  ;;  %v5614_v28 = vpack.c.bf16 %v2072_v57, %v2068_v54  ;;  %v4201_v44 = vor.u32 %v4534_v27, %v4200_v52 }
 0x31d   : > { %v1832_v54 = vadd.f32 %v1831_v22, %v1773_v29  ;;  %3411 = vmatpush.bf16.msrb.mxu2 %v4393_v3 }
 0x31e   : > { %v2830_v12 = vpop.f32.mrf.mxu0  ;;  %2933 = vmatmul.bf16.gmra.mxu1 %v5614_v28  ;;  %3293 = vmatpush.bf16.msrb.mxu0 %v4201_v44  ;;  %v4507_v44 = vld [vmem:[#allocation5 + $0xa0] sm:$0xf0] }
 0x31f   : > { %v2831_v49 = vadd.f32 %v2830_v12, %v2772_v47  ;;  %v2773_v0 = vpop.f32.mrf.mxu3  ;;  %v4296_v12 = vld [vmem:[#allocation5 + $0x230] sm:$0xf]  ;;  %v1993_v4 = vmul.f32 0.01, %v1832_v54  ;;  %vm1913_vm12 = vcmp.gt.f32.partialorder %v1832_v54, 0.0 }
 0x320   : > { %v2774_v19 = vadd.f32 %v2773_v0, %v5610_v11  ;;  %v4297_v22 = vor.u32 %v4558_v1, %v4296_v12  ;;  %v4380_v1 = vld [vmem:[#allocation5 + $0x2d8] sm:$0xf] }
 0x321   : > { %2869 = vmatmul.bf16.gmra.mxu0 %v5411_v24  ;;  %2987 = vmatmul.bf16.gmra.mxu2 %v5619_v46  ;;  %v2890_v40 = vadd.f32 %v5586_v56, %v2831_v49  ;;  %v2073_v38 = vsel %vm1913_vm12, %v1832_v54, %v1993_v4  ;;  %v4579_v4 = vld [vmem:[#allocation5 + $0x2e0] sm:$0xf0] }
 0x322   : > { %3352 = vmatpush.bf16.msra.mxu1 %v4297_v22  ;;  %v4381_v22 = vor.u32 %v4579_v4, %v4380_v1 }
 0x323   : > { %v5627_v36 = vpop.f32.mrf.mxu1 }
 0x324   : > { %2815 = vmatmul.bf16.gmra.mxu3 %v5424_v9  ;;  %v2948_v57 = vpop.f32.mrf.mxu2  ;;  %3412 = vmatpush.bf16.msrb.mxu2 %v4381_v22 }
 0x325   : > { %v2949_v25 = vadd.f32 %v2948_v57, %v2890_v40  ;;  %v2069_v40 = vsel %vm1909_vm13, %v1830_v59, %v1989_v32  ;;  %v4092_v57 = vld [vmem:[#allocation5 + $0x98] sm:$0xf] }
 0x326   : > { %v2832_v13 = vpop.f32.mrf.mxu0  ;;  %v5641_v20 = vpack.c.bf16 %v2073_v38, %v2069_v40  ;;  %v4188_v32 = vld [vmem:[#allocation5 + $0x158] sm:$0xf] }
 0x327   : > { %3470 = vst [vmem:[%s5634_s17] sm:$0xff] %v2949_v25  ;;  %v2833_v56 = vadd.f32 %v2832_v13, %v2774_v19  ;;  %v2776_v47 = vpop.f32.mrf.mxu3 }
 0x328   : > { %v2777_v17 = vadd.f32 %v2776_v47, %v5610_v11 }
 0x329   : > { %v2892_v42 = vadd.f32 %v5598_v15, %v2833_v56  ;;  %v4093_v15 = vor.u32 %v4507_v44, %v4092_v57 }
 0x32b   : > { %v2899_v49 = vpop.f32.mrf.mxu1  ;;  %3235 = vmatpush.bf16.msrb.mxu3 %v4093_v15 }
 0x32c   : > { %v2950_v0 = vpop.f32.mrf.mxu2 }
 0x32d   : > { %v2951_v29 = vadd.f32 %v2950_v0, %v2892_v42  ;;  %v4531_v42 = vld [vmem:[#allocation5 + $0x160] sm:$0xf0]  ;;  %v4284_v0 = vld [vmem:[#allocation5 + $0x218] sm:$0xf] }
 0x32e   : > { %v2835_v3 = vpop.f32.mrf.mxu0  ;;  %3124 = vmatmul.bf16.vlgmr.msrb.gmra.mxu1 %v5438_v34  ;;  %v4189_v38 = vor.u32 %v4531_v42, %v4188_v32  ;;  %v4368_v32 = vld [vmem:[#allocation5 + $0x2c0] sm:$0xf]  ;;  %v4576_v42 = vld [vmem:[#allocation5 + $0x2c8] sm:$0xf0] }
 0x32f   : > { %3473 = vst [vmem:[%s5634_s17 + $0x18] sm:$0xff] %v2951_v29  ;;  %v2836_v52 = vadd.f32 %v2835_v3, %v2777_v17  ;;  %v2778_v27 = vpop.f32.mrf.mxu3 }
 0x330   : > { %v2779_v59 = vadd.f32 %v2778_v27, %v5610_v11  ;;  %3294 = vmatpush.bf16.msrb.mxu0 %v4189_v38 }
 0x331   : > { %2874 = vmatmul.bf16.gmra.mxu0 %v5432_v37  ;;  %2992 = vmatmul.bf16.gmra.mxu2 %v5641_v20  ;;  %v2895_v19 = vadd.f32 %v5612_v35, %v2836_v52  ;;  %v4555_v35 = vld [vmem:[#allocation5 + $0x220] sm:$0xf0] }
 0x332   : > { %v4285_v17 = vor.u32 %v4555_v35, %v4284_v0  ;;  %v4369_v0 = vor.u32 %v4576_v42, %v4368_v32  ;;  %v4176_v35 = vld [vmem:[#allocation5 + $0x140] sm:$0xf]  ;;  %v4068_v32 = vld [vmem:[#allocation5 + $0x68] sm:$0xf]  ;;  %v4501_v42 = vld [vmem:[#allocation5 + $0x70] sm:$0xf0] }
 0x333   : > { %v2901_v54 = vpop.f32.mrf.mxu1 }
 0x334   : > { %v2953_v25 = vpop.f32.mrf.mxu2  ;;  %3006 = vmatmul.bf16.vlgmr.msra.gmra.mxu3 %v5258_v39  ;;  %3353 = vmatpush.bf16.msra.mxu1 %v4285_v17  ;;  %v4528_v17 = vld [vmem:[#allocation5 + $0x148] sm:$0xf0] }
 0x335   : > { %v2954_v13 = vadd.f32 %v2953_v25, %v2895_v19  ;;  %3413 = vmatpush.bf16.msrb.mxu2 %v4369_v0  ;;  %v4069_v0 = vor.u32 %v4501_v42, %v4068_v32 }
 0x336   : > { %v2837_v56 = vpop.f32.mrf.mxu0 }
 0x337   : > { %3476 = vst [vmem:[%s5634_s17 + $0x30] sm:$0xff] %v2954_v13  ;;  %v2838_v47 = vadd.f32 %v2837_v56, %v2779_v59  ;;  %v2781_v12 = vpop.f32.mrf.mxu3  ;;  %v4504_v59 = vld [vmem:[#allocation5 + $0x88] sm:$0xf0] }
 0x338   : > { %v2782_v52 = vadd.f32 %v2781_v12, %v5610_v11 }
 0x339   : > { %v2897_v3 = vadd.f32 %v5627_v36, %v2838_v47  ;;  %v4080_v36 = vld [vmem:[#allocation5 + $0x80] sm:$0xf] }
 0x33a   : > { %v4081_v56 = vor.u32 %v4504_v59, %v4080_v36  ;;  %v4552_v36 = vld [vmem:[#allocation5 + $0x208] sm:$0xf0] }
 0x33b   : > { %v2904_v29 = vpop.f32.mrf.mxu1 }
 0x33c   : > { %v2955_v40 = vpop.f32.mrf.mxu2  ;;  %3236 = vmatpush.bf16.msrb.mxu3 %v4081_v56 }
 0x33d   : > { %v2956_v27 = vadd.f32 %v2955_v40, %v2897_v3  ;;  %v4177_v40 = vor.u32 %v4528_v17, %v4176_v35 }
 0x33e   : > { %v2840_v57 = vpop.f32.mrf.mxu0  ;;  %3129 = vmatmul.bf16.gmra.mxu1 %v5461_v53 }
 0x33f   : > { %3479 = vst [vmem:[%s5634_s17 + $0x48] sm:$0xff] %v2956_v27  ;;  %v2841_v44 = vadd.f32 %v2840_v57, %v2782_v52  ;;  %v2783_v15 = vpop.f32.mrf.mxu3  ;;  %3295 = vmatpush.bf16.msrb.mxu0 %v4177_v40 }
 0x340   : > { %v2784_v47 = vadd.f32 %v2783_v15, %v5610_v11  ;;  %3237 = vmatpush.bf16.msrb.mxu3 %v4069_v0 }
 0x341   : > { %3065 = vmatmul.bf16.vlgmr.msra.gmra.mxu0 %v5267_v16  ;;  %3183 = vmatmul.bf16.vlgmr.msra.gmra.mxu2 %v5465_v61  ;;  %v2900_v25 = vadd.f32 %v2899_v49, %v2841_v44 }
 0x343   : > { %v2906_v19 = vpop.f32.mrf.mxu1 }
 0x344   : > { %v2958_v13 = vpop.f32.mrf.mxu2  ;;  %3011 = vmatmul.bf16.gmra.mxu3 %v5280_v62 }
 0x345   : > { %v2959_v12 = vadd.f32 %v2958_v13, %v2900_v25  ;;  %v4272_v25 = vld [vmem:[#allocation5 + $0x200] sm:$0xf] }
 0x346   : > { %v2842_v1 = vpop.f32.mrf.mxu0  ;;  %v4273_v59 = vor.u32 %v4552_v36, %v4272_v25  ;;  %v4164_v25 = vld [vmem:[#allocation5 + $0x128] sm:$0xf]  ;;  %v4525_v36 = vld [vmem:[#allocation5 + $0x130] sm:$0xf0] }
 0x347   : > { %3482 = vst [vmem:[%s5634_s17 + $0x60] sm:$0xff] %v2959_v12  ;;  %v2843_v4 = vadd.f32 %v2842_v1, %v2784_v47  ;;  %v2786_v22 = vpop.f32.mrf.mxu3 }
 0x348   : > { %v2787_v52 = vadd.f32 %v2786_v22, %v5610_v11  ;;  %3354 = vmatpush.bf16.msra.mxu1 %v4273_v59  ;;  %v4260_v59 = vld [vmem:[#allocation5 + $0x1e8] sm:$0xf] }
 0x349   : > { %v2902_v49 = vadd.f32 %v2901_v54, %v2843_v4 }
 0x34b   : > { %v2909_v38 = vpop.f32.mrf.mxu1 }
 0x34c   : > { %v2960_v3 = vpop.f32.mrf.mxu2 }
 0x34d   : > { %v2961_v27 = vadd.f32 %v2960_v3, %v2902_v49 }
 0x34e   : > { %v2845_v57 = vpop.f32.mrf.mxu0  ;;  %3134 = vmatmul.bf16.gmra.mxu1 %v5480_v63 }
 0x34f   : > { %3485 = vst [vmem:[%s5634_s17 + $0x78] sm:$0xff] %v2961_v27  ;;  %v2846_v44 = vadd.f32 %v2845_v57, %v2787_v52  ;;  %v2788_v15 = vpop.f32.mrf.mxu3  ;;  %v4356_v57 = vld [vmem:[#allocation5 + $0x2a8] sm:$0xf] }
 0x350   : > { %v2789_v47 = vadd.f32 %v2788_v15, %v5610_v11 }
 0x351   : > { %3070 = vmatmul.bf16.gmra.mxu0 %v5285_v18  ;;  %3188 = vmatmul.bf16.gmra.mxu2 %v5484_v7  ;;  %v2905_v13 = vadd.f32 %v2904_v29, %v2846_v44  ;;  %v4573_v44 = vld [vmem:[#allocation5 + $0x2b0] sm:$0xf0] }
 0x352   : > { %v4357_v15 = vor.u32 %v4573_v44, %v4356_v57 }
 0x353   : > { %v2911_v54 = vpop.f32.mrf.mxu1 }
 0x354   : > { %v2963_v56 = vpop.f32.mrf.mxu2  ;;  %3016 = vmatmul.bf16.gmra.mxu3 %v5298_v48  ;;  %3414 = vmatpush.bf16.msrb.mxu2 %v4357_v15 }
 0x355   : > { %v2964_v12 = vadd.f32 %v2963_v56, %v2905_v13  ;;  %v4549_v13 = vld [vmem:[#allocation5 + $0x1f0] sm:$0xf0] }
 0x356   : > { %v2847_v1 = vpop.f32.mrf.mxu0  ;;  %v4261_v56 = vor.u32 %v4549_v13, %v4260_v59  ;;  %v4152_v13 = vld [vmem:[#allocation5 + $0x110] sm:$0xf] }
 0x357   : > { %3488 = vst [vmem:[%s5634_s17 + $0x90] sm:$0xff] %v2964_v12  ;;  %v2848_v4 = vadd.f32 %v2847_v1, %v2789_v47  ;;  %v2791_v22 = vpop.f32.mrf.mxu3 }
 0x358   : > { %v2792_v29 = vadd.f32 %v2791_v22, %v5610_v11  ;;  %3355 = vmatpush.bf16.msra.mxu1 %v4261_v56  ;;  %v4522_v56 = vld [vmem:[#allocation5 + $0x118] sm:$0xf0] }
 0x359   : > { %v2907_v35 = vadd.f32 %v2906_v19, %v2848_v4  ;;  %v4165_v19 = vor.u32 %v4525_v36, %v4164_v25  ;;  %v4570_v25 = vld [vmem:[#allocation5 + $0x298] sm:$0xf0] }
 0x35b   : > { %v2914_v49 = vpop.f32.mrf.mxu1  ;;  %3296 = vmatpush.bf16.msrb.mxu0 %v4165_v19 }
 0x35c   : > { %v2965_v17 = vpop.f32.mrf.mxu2 }
 0x35d   : > { %v2966_v3 = vadd.f32 %v2965_v17, %v2907_v35 }
 0x35e   : > { %v2850_v40 = vpop.f32.mrf.mxu0  ;;  %3139 = vmatmul.bf16.gmra.mxu1 %v5499_v23 }
 0x35f   : > { %3491 = vst [vmem:[%s5634_s17 + $0xa8] sm:$0xff] %v2966_v3  ;;  %v2851_v52 = vadd.f32 %v2850_v40, %v2792_v29  ;;  %v2793_v27 = vpop.f32.mrf.mxu3  ;;  %v4056_v29 = vld [vmem:[#allocation5 + $0x50] sm:$0xf]  ;;  %v4498_v3 = vld [vmem:[#allocation5 + $0x58] sm:$0xf0] }
 0x360   : > { %v2794_v4 = vadd.f32 %v2793_v27, %v5610_v11  ;;  %v4057_v57 = vor.u32 %v4498_v3, %v4056_v29  ;;  %v4546_v29 = vld [vmem:[#allocation5 + $0x1d8] sm:$0xf0] }
 0x361   : > { %3075 = vmatmul.bf16.gmra.mxu0 %v5303_v10  ;;  %3193 = vmatmul.bf16.gmra.mxu2 %v5502_v2  ;;  %v2910_v12 = vadd.f32 %v2909_v38, %v2851_v52 }
 0x362   : > { %3238 = vmatpush.bf16.msrb.mxu3 %v4057_v57 }
 0x363   : > { %v2916_v47 = vpop.f32.mrf.mxu1 }
 0x364   : > { %v2968_v1 = vpop.f32.mrf.mxu2  ;;  %3021 = vmatmul.bf16.gmra.mxu3 %v5316_v41 }
 0x365   : > { %v2969_v22 = vadd.f32 %v2968_v1, %v2910_v12  ;;  %v4153_v1 = vor.u32 %v4522_v56, %v4152_v13  ;;  %v5913_v56 = vld [vmem:[#allocation11_spill] sm:$0xff] }
 0x366   : > { %v2852_v32 = vpop.f32.mrf.mxu0 }
 0x367   : > { %3494 = vst [vmem:[%s5634_s17 + $0xc0] sm:$0xff] %v2969_v22  ;;  %v2853_v42 = vadd.f32 %v2852_v32, %v2794_v4  ;;  %v2796_v0 = vpop.f32.mrf.mxu3  ;;  %3297 = vmatpush.bf16.msrb.mxu0 %v4153_v1 }
 0x368   : > { %v2797_v38 = vadd.f32 %v2796_v0, %v5610_v11 }
 0x369   : > { %v2912_v17 = vadd.f32 %v2911_v54, %v2853_v42  ;;  %v4344_v54 = vld [vmem:[#allocation5 + $0x290] sm:$0xf] }
 0x36a   : > { %v4345_v36 = vor.u32 %v4570_v25, %v4344_v54  ;;  %v4044_v54 = vld [vmem:[#allocation5 + $0x38] sm:$0xf]  ;;  %v4495_v25 = vld [vmem:[#allocation5 + $0x40] sm:$0xf0] }
 0x36b   : > { %v2919_v35 = vpop.f32.mrf.mxu1 }
 0x36c   : > { %v2970_v40 = vpop.f32.mrf.mxu2  ;;  %3415 = vmatpush.bf16.msrb.mxu2 %v4345_v36  ;;  %v4045_v36 = vor.u32 %v4495_v25, %v4044_v54 }
 0x36d   : > { %v2971_v52 = vadd.f32 %v2970_v40, %v2912_v17  ;;  %v4248_v17 = vld [vmem:[#allocation5 + $0x1d0] sm:$0xf] }
 0x36e   : > { %v2855_v44 = vpop.f32.mrf.mxu0  ;;  %3144 = vmatmul.bf16.gmra.mxu1 %v5517_v6  ;;  %v4249_v3 = vor.u32 %v4546_v29, %v4248_v17  ;;  %3239 = vmatpush.bf16.msrb.mxu3 %v4045_v36  ;;  %v4140_v29 = vld [vmem:[#allocation5 + $0xf8] sm:$0xf] }
 0x36f   : > { %3497 = vst [vmem:[%s5634_s17 + $0xd8] sm:$0xff] %v2971_v52  ;;  %v2856_v27 = vadd.f32 %v2855_v44, %v2797_v38  ;;  %v2798_v15 = vpop.f32.mrf.mxu3 }
 0x370   : > { %v2799_v4 = vadd.f32 %v2798_v15, %v5610_v11  ;;  %3356 = vmatpush.bf16.msra.mxu1 %v4249_v3  ;;  %v4519_v3 = vld [vmem:[#allocation5 + $0x100] sm:$0xf0] }
 0x371   : > { %3080 = vmatmul.bf16.gmra.mxu0 %v5321_v14  ;;  %3198 = vmatmul.bf16.gmra.mxu2 %v5520_v8  ;;  %v2915_v59 = vadd.f32 %v2914_v49, %v2856_v27 }
 0x373   : > { %v2921_v19 = vpop.f32.mrf.mxu1 }
 0x374   : > { %v2973_v12 = vpop.f32.mrf.mxu2  ;;  %3026 = vmatmul.bf16.gmra.mxu3 %v5334_v33 }
 0x375   : > { %v2974_v22 = vadd.f32 %v2973_v12, %v2915_v59 }
 0x376   : > { %v2857_v32 = vpop.f32.mrf.mxu0 }
 0x377   : > { %3500 = vst [vmem:[%s5634_s17 + $0xf0] sm:$0xff] %v2974_v22  ;;  %v2858_v42 = vadd.f32 %v2857_v32, %v2799_v4  ;;  %v2801_v0 = vpop.f32.mrf.mxu3 }
 0x378   : > { %v2802_v38 = vadd.f32 %v2801_v0, %v5610_v11  ;;  %v4567_v0 = vld [vmem:[#allocation5 + $0x280] sm:$0xf0] }
 0x379   : > { %v2917_v40 = vadd.f32 %v2916_v47, %v2858_v42  ;;  %v4332_v42 = vld [vmem:[#allocation5 + $0x278] sm:$0xf] }
 0x37a   : > { %v4333_v17 = vor.u32 %v4567_v0, %v4332_v42 }
 0x37b   : > { %v2924_v49 = vpop.f32.mrf.mxu1 }
 0x37c   : > { %v2975_v57 = vpop.f32.mrf.mxu2  ;;  %3416 = vmatpush.bf16.msrb.mxu2 %v4333_v17 }
 0x37d   : > { %v2976_v52 = vadd.f32 %v2975_v57, %v2917_v40  ;;  %v4236_v40 = vld [vmem:[#allocation5 + $0x1b8] sm:$0xf]  ;;  %v4141_v57 = vor.u32 %v4519_v3, %v4140_v29 }
 0x37e   : > { %v2860_v44 = vpop.f32.mrf.mxu0  ;;  %3149 = vmatmul.bf16.gmra.mxu1 %v5535_v31 }
 0x37f   : > { %3503 = vst [vmem:[%s5634_s17 + $0x108] sm:$0xff] %v2976_v52  ;;  %v2861_v27 = vadd.f32 %v2860_v44, %v2802_v38  ;;  %v2803_v15 = vpop.f32.mrf.mxu3  ;;  %3298 = vmatpush.bf16.msrb.mxu0 %v4141_v57  ;;  %v4564_v57 = vld [vmem:[#allocation5 + $0x268] sm:$0xf0] }
 0x380   : > { %v2804_v12 = vadd.f32 %v2803_v15, %v5610_v11 }
 0x381   : > { %3085 = vmatmul.bf16.gmra.mxu0 %v5339_v55  ;;  %3203 = vmatmul.bf16.gmra.mxu2 %v5538_v26  ;;  %v2920_v47 = vadd.f32 %v2919_v35, %v2861_v27  ;;  %v4543_v35 = vld [vmem:[#allocation5 + $0x1c0] sm:$0xf0] }
 0x382   : > { %v4237_v38 = vor.u32 %v4543_v35, %v4236_v40  ;;  %v4320_v40 = vld [vmem:[#allocation5 + $0x260] sm:$0xf] }
 0x383   : > { %v2926_v59 = vpop.f32.mrf.mxu1  ;;  %v4321_v35 = vor.u32 %v4564_v57, %v4320_v40 }
 0x384   : > { %v2978_v13 = vpop.f32.mrf.mxu2  ;;  %3031 = vmatmul.bf16.gmra.mxu3 %v5913_v56  ;;  %3357 = vmatpush.bf16.msra.mxu1 %v4237_v38 }
 0x385   : > { %v2979_v1 = vadd.f32 %v2978_v13, %v2920_v47  ;;  %3417 = vmatpush.bf16.msrb.mxu2 %v4321_v35 }
 0x386   : > { %v2862_v4 = vpop.f32.mrf.mxu0 }
 0x387   : > { %3506 = vst [vmem:[%s5634_s17 + $0x120] sm:$0xff] %v2979_v1  ;;  %v2863_v22 = vadd.f32 %v2862_v4, %v2804_v12  ;;  %v2806_v32 = vpop.f32.mrf.mxu3  ;;  %v4492_v1 = vld [vmem:[#allocation5 + $0x28] sm:$0xf0] }
 0x388   : > { %v2807_v15 = vadd.f32 %v2806_v32, %v5610_v11 }
 0x389   : > { %v2922_v44 = vadd.f32 %v2921_v19, %v2863_v22  ;;  %v4032_v19 = vld [vmem:[#allocation5 + $0x20] sm:$0xf]  ;;  %v5914_v22 = vld [vmem:[#allocation12_spill] sm:$0xff] }
 0x38a   : > { %v4033_v32 = vor.u32 %v4492_v1, %v4032_v19  ;;  %v4224_v1 = vld [vmem:[#allocation5 + $0x1a0] sm:$0xf] }
 0x38b   : > { %v2929_v52 = vpop.f32.mrf.mxu1 }
 0x38c   : > { %v2980_v27 = vpop.f32.mrf.mxu2  ;;  %3240 = vmatpush.bf16.msrb.mxu3 %v4033_v32 }
 0x38d   : > { %v2981_v54 = vadd.f32 %v2980_v27, %v2922_v44  ;;  %v4128_v44 = vld [vmem:[#allocation5 + $0xe0] sm:$0xf]  ;;  %v4516_v27 = vld [vmem:[#allocation5 + $0xe8] sm:$0xf0] }
 0x38e   : > { %v2865_v25 = vpop.f32.mrf.mxu0  ;;  %3154 = vmatmul.bf16.gmra.mxu1 %v5551_v60 }
 0x38f   : > { %3509 = vst [vmem:[%s5634_s17 + $0x138] sm:$0xff] %v2981_v54  ;;  %v2866_v36 = vadd.f32 %v2865_v25, %v2807_v15  ;;  %v2808_v47 = vpop.f32.mrf.mxu3  ;;  %v4129_v54 = vor.u32 %v4516_v27, %v4128_v44  ;;  %v4020_v27 = vld [vmem:[#allocation5 + $0x8] sm:$0xf] }
 0x390   : > { %v2809_v42 = vadd.f32 %v2808_v47, %v5610_v11 }
 0x391   : > { %3090 = vmatmul.bf16.gmra.mxu0 %v5357_v43  ;;  %3208 = vmatmul.bf16.gmra.mxu2 %v5557_v30  ;;  %v2925_v12 = vadd.f32 %v2924_v49, %v2866_v36 }
 0x392   : > { %3299 = vmatpush.bf16.msrb.mxu0 %v4129_v54 }
 0x393   : > { %v2931_v13 = vpop.f32.mrf.mxu1 }
 0x394   : > { %v2983_v4 = vpop.f32.mrf.mxu2  ;;  %3036 = vmatmul.bf16.gmra.mxu3 %v5914_v22 }
 0x395   : > { %v2984_v0 = vadd.f32 %v2983_v4, %v2925_v12  ;;  %v4540_v4 = vld [vmem:[#allocation5 + $0x1a8] sm:$0xf0] }
 0x396   : > { %v2867_v17 = vpop.f32.mrf.mxu0  ;;  %v4225_v32 = vor.u32 %v4540_v4, %v4224_v1 }
 0x397   : > { %3512 = vst [vmem:[%s5634_s17 + $0x150] sm:$0xff] %v2984_v0  ;;  %v2868_v29 = vadd.f32 %v2867_v17, %v2809_v42  ;;  %v2811_v3 = vpop.f32.mrf.mxu3  ;;  %v5916_v42 = vld [vmem:[#allocation15_spill] sm:$0xff] }
 0x398   : > { %v2812_v25 = vadd.f32 %v2811_v3, %v5610_v11  ;;  %3358 = vmatpush.bf16.msra.mxu1 %v4225_v32  ;;  %v5917_v3 = vld [vmem:[#allocation14_spill] sm:$0xff] }
 0x399   : > { %v2927_v49 = vadd.f32 %v2926_v59, %v2868_v29  ;;  %v5915_v59 = vld [vmem:[#allocation13_spill] sm:$0xff] }
 0x39b   : > { %v2934_v38 = vpop.f32.mrf.mxu1 }
 0x39c   : > { %v2985_v15 = vpop.f32.mrf.mxu2 }
 0x39d   : > { %v2986_v36 = vadd.f32 %v2985_v15, %v2927_v49  ;;  %v4489_v15 = vld [vmem:[#allocation5 + $0x10] sm:$0xf0] }
 0x39e   : > { %v2870_v47 = vpop.f32.mrf.mxu0  ;;  %3159 = vmatmul.bf16.gmra.mxu1 %v5570_v5  ;;  %v4021_v54 = vor.u32 %v4489_v15, %v4020_v27  ;;  %v4116_v27 = vld [vmem:[#allocation5 + $0xc8] sm:$0xf]  ;;  %v4513_v15 = vld [vmem:[#allocation5 + $0xd0] sm:$0xf0] }
 0x39f   : > { %3515 = vst [vmem:[%s5634_s17 + $0x168] sm:$0xff] %v2986_v36  ;;  %v2871_v12 = vadd.f32 %v2870_v47, %v2812_v25  ;;  %v2813_v19 = vpop.f32.mrf.mxu3  ;;  %v4212_v25 = vld [vmem:[#allocation5 + $0x188] sm:$0xf]  ;;  %v4537_v36 = vld [vmem:[#allocation5 + $0x190] sm:$0xf0] }
 0x3a0   : > { %v2814_v40 = vadd.f32 %v2813_v19, %v5610_v11  ;;  %v4213_v47 = vor.u32 %v4537_v36, %v4212_v25  ;;  %3241 = vmatpush.bf16.msrb.mxu3 %v4021_v54 }
 0x3a1   : > { %3095 = vmatmul.bf16.gmra.mxu0 %v5915_v59  ;;  %3213 = vmatmul.bf16.gmra.mxu2 %v5916_v42  ;;  %v2930_v17 = vadd.f32 %v2929_v52, %v2871_v12 }
 0x3a2   : > { %3359 = vmatpush.bf16.msra.mxu1 %v4213_v47 }
 0x3a3   : > { %v2936_v0 = vpop.f32.mrf.mxu1 }
 0x3a4   : > { %v2988_v29 = vpop.f32.mrf.mxu2  ;;  %3041 = vmatmul.bf16.gmra.mxu3 %v5917_v3 }
 0x3a5   : > { %v2989_v57 = vadd.f32 %v2988_v29, %v2930_v17 }
 0x3a6   : > { %v2872_v35 = vpop.f32.mrf.mxu0 }
 0x3a7   : > { %3518 = vst [vmem:[%s5634_s17 + $0x180] sm:$0xff] %v2989_v57  ;;  %v2873_v49 = vadd.f32 %v2872_v35, %v2814_v40  ;;  %v2816_v44 = vpop.f32.mrf.mxu3  ;;  %v4308_v40 = vld [vmem:[#allocation5 + $0x248] sm:$0xf]  ;;  %v4561_v57 = vld [vmem:[#allocation5 + $0x250] sm:$0xf0] }
 0x3a8   : > { %v2817_v12 = vadd.f32 %v2816_v44, %v5610_v11  ;;  %v4309_v35 = vor.u32 %v4561_v57, %v4308_v40 }
 0x3a9   : > { %v2932_v4 = vadd.f32 %v2931_v13, %v2873_v49  ;;  %v4117_v13 = vor.u32 %v4513_v15, %v4116_v27 }
 0x3aa   : > { %3418 = vmatpush.bf16.msrb.mxu2 %v4309_v35 }
 0x3ab   : > { %v3125_v1 = vpop.f32.mrf.mxu1  ;;  %3300 = vmatpush.bf16.msrb.mxu0 %v4117_v13 }
 0x3ac   : > { %v2990_v52 = vpop.f32.mrf.mxu2 }
 0x3ad   : > { %v2991_v19 = vadd.f32 %v2990_v52, %v2932_v4 }
 0x3ae   : > { %v2875_v32 = vpop.f32.mrf.mxu0  ;;  %3164 = vmatmul.bf16.gmra.mxu1 %v5588_v51 }
 0x3af   : > { %3521 = vst [vmem:[%s5634_s17 + $0x198] sm:$0xff] %v2991_v19  ;;  %v2876_v17 = vadd.f32 %v2875_v32, %v2817_v12  ;;  %v2818_v29 = vpop.f32.mrf.mxu3  ;;  %v5715_v12 = vperm.slane %v5607_v50, 1 }
 0x3b0   : > { %v2819_v25 = vadd.f32 %v2818_v29, %v5610_v11 }
 0x3b1   : > { %3100 = vmatmul.bf16.gmra.mxu0 %v5393_v58  ;;  %3218 = vmatmul.bf16.gmra.mxu2 %v5591_v21  ;;  %v2935_v44 = vadd.f32 %v2934_v38, %v2876_v17 }
 0x3b3   : > { %v3127_v49 = vpop.f32.mrf.mxu1 }
 0x3b4   : > { %v2993_v54 = vpop.f32.mrf.mxu2  ;;  %3046 = vmatmul.bf16.gmra.mxu3 %v5406_v45 }
 0x3b5   : > { %v2994_v36 = vadd.f32 %v2993_v54, %v2935_v44 }
 0x3b6   : > { %v2877_v47 = vpop.f32.mrf.mxu0 }
 0x3b7   : > { %3524 = vst [vmem:[%s5634_s17 + $0x1b0] sm:$0xff] %v2994_v36  ;;  %v2878_v4 = vadd.f32 %v2877_v47, %v2819_v25  ;;  %v3007_v52 = vpop.f32.mrf.mxu3 }
 0x3b8   : > { %v3008_v38 = vadd.f32 %v3007_v52, %v5715_v12 }
 0x3b9   : > { %v2937_v32 = vadd.f32 %v2936_v0, %v2878_v4 }
 0x3bb   : > { %v3130_v19 = vpop.f32.mrf.mxu1 }
 0x3bc   : > { %v2995_v40 = vpop.f32.mrf.mxu2 }
 0x3bd   : > { %v2996_v17 = vadd.f32 %v2995_v40, %v2937_v32 }
 0x3be   : > { %v3066_v57 = vpop.f32.mrf.mxu0  ;;  %3169 = vmatmul.bf16.gmra.mxu1 %v5614_v28 }
 0x3bf   : > { %3527 = vst [vmem:[%s5634_s17 + $0x1c8] sm:$0xff] %v2996_v17  ;;  %v3067_v11 = vadd.f32 %v3066_v57, %v3008_v38  ;;  %v3009_v29 = vpop.f32.mrf.mxu3 }
 0x3c0   : > { %v3010_v27 = vadd.f32 %v3009_v29, %v5715_v12 }
 0x3c1   : > { %3105 = vmatmul.bf16.gmra.mxu0 %v5411_v24  ;;  %3223 = vmatmul.bf16.gmra.mxu2 %v5619_v46  ;;  %v3126_v50 = vadd.f32 %v3125_v1, %v3067_v11 }
 0x3c3   : > { %v3132_v35 = vpop.f32.mrf.mxu1 }
 0x3c4   : > { %3051 = vmatmul.bf16.gmra.mxu3 %v5424_v9  ;;  %v3184_v0 = vpop.f32.mrf.mxu2 }
 0x3c5   : > { %v3185_v15 = vadd.f32 %v3184_v0, %v3126_v50 }
 0x3c6   : > { %v3068_v13 = vpop.f32.mrf.mxu0 }
 0x3c7   : > { %3471 = vst [vmem:[%s5634_s17 + $0x8] sm:$0xff] %v3185_v15  ;;  %v3069_v44 = vadd.f32 %v3068_v13, %v3010_v27  ;;  %v3012_v54 = vpop.f32.mrf.mxu3 }
 0x3c8   : > { %v3013_v4 = vadd.f32 %v3012_v54, %v5715_v12 }
 0x3c9   : > { %v3128_v36 = vadd.f32 %v3127_v49, %v3069_v44 }
 0x3cb   : > { %v3135_v25 = vpop.f32.mrf.mxu1 }
 0x3cc   : > { %v3186_v47 = vpop.f32.mrf.mxu2 }
 0x3cd   : > { %v3187_v52 = vadd.f32 %v3186_v47, %v3128_v36 }
 0x3ce   : > { %v3071_v32 = vpop.f32.mrf.mxu0  ;;  %3360 = vmatmul.bf16.vlgmr.msra.gmra.mxu1 %v5438_v34 }
 0x3cf   : > { %3474 = vst [vmem:[%s5634_s17 + $0x20] sm:$0xff] %v3187_v52  ;;  %v3072_v1 = vadd.f32 %v3071_v32, %v3013_v4  ;;  %v3014_v40 = vpop.f32.mrf.mxu3 }
 0x3d0   : > { %v3015_v49 = vadd.f32 %v3014_v40, %v5715_v12 }
 0x3d1   : > { %3110 = vmatmul.bf16.gmra.mxu0 %v5432_v37  ;;  %3228 = vmatmul.bf16.gmra.mxu2 %v5641_v20  ;;  %v3131_v17 = vadd.f32 %v3130_v19, %v3072_v1 }
 0x3d3   : > { %v3137_v38 = vpop.f32.mrf.mxu1 }
 0x3d4   : > { %v3189_v57 = vpop.f32.mrf.mxu2  ;;  %3242 = vmatmul.bf16.vlgmr.msrb.gmra.mxu3 %v5258_v39 }
 0x3d5   : > { %v3190_v11 = vadd.f32 %v3189_v57, %v3131_v17 }
 0x3d6   : > { %v3073_v29 = vpop.f32.mrf.mxu0 }
 0x3d7   : > { %3477 = vst [vmem:[%s5634_s17 + $0x38] sm:$0xff] %v3190_v11  ;;  %v3074_v50 = vadd.f32 %v3073_v29, %v3015_v49  ;;  %v3017_v34 = vpop.f32.mrf.mxu3 }
 0x3d8   : > { %v3018_v13 = vadd.f32 %v3017_v34, %v5715_v12 }
 0x3d9   : > { %v3133_v27 = vadd.f32 %v3132_v35, %v3074_v50 }
 0x3db   : > { %v3140_v0 = vpop.f32.mrf.mxu1 }
 0x3dc   : > { %v3191_v15 = vpop.f32.mrf.mxu2 }
 0x3dd   : > { %v3192_v44 = vadd.f32 %v3191_v15, %v3133_v27 }
 0x3de   : > { %v3076_v54 = vpop.f32.mrf.mxu0  ;;  %3365 = vmatmul.bf16.gmra.mxu1 %v5461_v53 }
 0x3df   : > { %3480 = vst [vmem:[%s5634_s17 + $0x50] sm:$0xff] %v3192_v44  ;;  %v3077_v19 = vadd.f32 %v3076_v54, %v3018_v13  ;;  %v3019_v39 = vpop.f32.mrf.mxu3 }
 0x3e0   : > { %v3020_v35 = vadd.f32 %v3019_v39, %v5715_v12 }
 0x3e1   : > { %3301 = vmatmul.bf16.vlgmr.msrb.gmra.mxu0 %v5267_v16  ;;  %3419 = vmatmul.bf16.vlgmr.msrb.gmra.mxu2 %v5465_v61  ;;  %v3136_v47 = vadd.f32 %v3135_v25, %v3077_v19 }
 0x3e3   : > { %v3142_v36 = vpop.f32.mrf.mxu1 }
 0x3e4   : > { %v3194_v4 = vpop.f32.mrf.mxu2  ;;  %3247 = vmatmul.bf16.gmra.mxu3 %v5280_v62 }
 0x3e5   : > { %v3195_v52 = vadd.f32 %v3194_v4, %v3136_v47 }
 0x3e6   : > { %v3078_v32 = vpop.f32.mrf.mxu0 }
 0x3e7   : > { %3483 = vst [vmem:[%s5634_s17 + $0x68] sm:$0xff] %v3195_v52  ;;  %v3079_v1 = vadd.f32 %v3078_v32, %v3020_v35  ;;  %v3022_v53 = vpop.f32.mrf.mxu3 }
 0x3e8   : > { %v3023_v16 = vadd.f32 %v3022_v53, %v5715_v12 }
 0x3e9   : > { %v3138_v17 = vadd.f32 %v3137_v38, %v3079_v1 }
 0x3eb   : > { %v3145_v40 = vpop.f32.mrf.mxu1 }
 0x3ec   : > { %v3196_v57 = vpop.f32.mrf.mxu2 }
 0x3ed   : > { %v3197_v61 = vadd.f32 %v3196_v57, %v3138_v17 }
 0x3ee   : > { %v3081_v49 = vpop.f32.mrf.mxu0  ;;  %3370 = vmatmul.bf16.gmra.mxu1 %v5480_v63 }
 0x3ef   : > { %3486 = vst [vmem:[%s5634_s17 + $0x80] sm:$0xff] %v3197_v61  ;;  %v3082_v25 = vadd.f32 %v3081_v49, %v3023_v16  ;;  %v3024_v62 = vpop.f32.mrf.mxu3 }
 0x3f0   : > { %v3025_v38 = vadd.f32 %v3024_v62, %v5715_v12 }
 0x3f1   : > { %3306 = vmatmul.bf16.gmra.mxu0 %v5285_v18  ;;  %3424 = vmatmul.bf16.gmra.mxu2 %v5484_v7  ;;  %v3141_v29 = vadd.f32 %v3140_v0, %v3082_v25 }
 0x3f3   : > { %v3147_v11 = vpop.f32.mrf.mxu1 }
 0x3f4   : > { %v3199_v50 = vpop.f32.mrf.mxu2  ;;  %3252 = vmatmul.bf16.gmra.mxu3 %v5298_v48 }
 0x3f5   : > { %v3200_v34 = vadd.f32 %v3199_v50, %v3141_v29 }
 0x3f6   : > { %v3083_v27 = vpop.f32.mrf.mxu0 }
 0x3f7   : > { %3489 = vst [vmem:[%s5634_s17 + $0x98] sm:$0xff] %v3200_v34  ;;  %v3084_v15 = vadd.f32 %v3083_v27, %v3025_v38  ;;  %v3027_v63 = vpop.f32.mrf.mxu3 }
 0x3f8   : > { %v3028_v18 = vadd.f32 %v3027_v63, %v5715_v12 }
 0x3f9   : > { %v3143_v44 = vadd.f32 %v3142_v36, %v3084_v15 }
 0x3fb   : > { %v3150_v13 = vpop.f32.mrf.mxu1 }
 0x3fc   : > { %v3201_v54 = vpop.f32.mrf.mxu2 }
 0x3fd   : > { %v3202_v7 = vadd.f32 %v3201_v54, %v3143_v44 }
 0x3fe   : > { %v3086_v19 = vpop.f32.mrf.mxu0  ;;  %3375 = vmatmul.bf16.gmra.mxu1 %v5499_v23 }
 0x3ff   : > { %3492 = vst [vmem:[%s5634_s17 + $0xb0] sm:$0xff] %v3202_v7  ;;  %v3087_v0 = vadd.f32 %v3086_v19, %v3028_v18  ;;  %v3029_v48 = vpop.f32.mrf.mxu3 }
 0x400   : > { %v3030_v36 = vadd.f32 %v3029_v48, %v5715_v12 }
 0x401   : > { %3311 = vmatmul.bf16.gmra.mxu0 %v5303_v10  ;;  %3429 = vmatmul.bf16.gmra.mxu2 %v5502_v2  ;;  %v3146_v47 = vadd.f32 %v3145_v40, %v3087_v0 }
 0x403   : > { %v3152_v39 = vpop.f32.mrf.mxu1 }
 0x404   : > { %v3204_v4 = vpop.f32.mrf.mxu2  ;;  %3257 = vmatmul.bf16.gmra.mxu3 %v5316_v41 }
 0x405   : > { %v3205_v35 = vadd.f32 %v3204_v4, %v3146_v47 }
 0x406   : > { %v3088_v52 = vpop.f32.mrf.mxu0 }
 0x407   : > { %3495 = vst [vmem:[%s5634_s17 + $0xc8] sm:$0xff] %v3205_v35  ;;  %v3089_v32 = vadd.f32 %v3088_v52, %v3030_v36  ;;  %v3032_v23 = vpop.f32.mrf.mxu3 }
 0x408   : > { %v3033_v10 = vadd.f32 %v3032_v23, %v5715_v12 }
 0x409   : > { %v3148_v53 = vadd.f32 %v3147_v11, %v3089_v32 }
 0x40b   : > { %v3155_v1 = vpop.f32.mrf.mxu1 }
 0x40c   : > { %v3206_v17 = vpop.f32.mrf.mxu2 }
 0x40d   : > { %v3207_v2 = vadd.f32 %v3206_v17, %v3148_v53 }
 0x40e   : > { %v3091_v57 = vpop.f32.mrf.mxu0  ;;  %3380 = vmatmul.bf16.gmra.mxu1 %v5517_v6 }
 0x40f   : > { %3498 = vst [vmem:[%s5634_s17 + $0xe0] sm:$0xff] %v3207_v2  ;;  %v3092_v40 = vadd.f32 %v3091_v57, %v3033_v10  ;;  %v3034_v41 = vpop.f32.mrf.mxu3 }
 0x410   : > { %v3035_v25 = vadd.f32 %v3034_v41, %v5715_v12 }
 0x411   : > { %3316 = vmatmul.bf16.gmra.mxu0 %v5321_v14  ;;  %3434 = vmatmul.bf16.gmra.mxu2 %v5520_v8  ;;  %v3151_v61 = vadd.f32 %v3150_v13, %v3092_v40 }
 0x413   : > { %v3157_v16 = vpop.f32.mrf.mxu1 }
 0x414   : > { %v3209_v49 = vpop.f32.mrf.mxu2  ;;  %3262 = vmatmul.bf16.gmra.mxu3 %v5334_v33 }
 0x415   : > { %v3210_v62 = vadd.f32 %v3209_v49, %v3151_v61 }
 0x416   : > { %v3093_v11 = vpop.f32.mrf.mxu0 }
 0x417   : > { %3501 = vst [vmem:[%s5634_s17 + $0xf8] sm:$0xff] %v3210_v62  ;;  %v3094_v29 = vadd.f32 %v3093_v11, %v3035_v25  ;;  %v3037_v6 = vpop.f32.mrf.mxu3 }
 0x418   : > { %v3038_v14 = vadd.f32 %v3037_v6, %v5715_v12 }
 0x419   : > { %v3153_v38 = vadd.f32 %v3152_v39, %v3094_v29 }
 0x41b   : > { %v3160_v50 = vpop.f32.mrf.mxu1 }
 0x41c   : > { %v3211_v34 = vpop.f32.mrf.mxu2 }
 0x41d   : > { %v3212_v8 = vadd.f32 %v3211_v34, %v3153_v38 }
 0x41e   : > { %v3096_v27 = vpop.f32.mrf.mxu0  ;;  %3385 = vmatmul.bf16.gmra.mxu1 %v5535_v31 }
 0x41f   : > { %3504 = vst [vmem:[%s5634_s17 + $0x110] sm:$0xff] %v3212_v8  ;;  %v3097_v15 = vadd.f32 %v3096_v27, %v3038_v14  ;;  %v3039_v33 = vpop.f32.mrf.mxu3 }
 0x420   : > { %v3040_v54 = vadd.f32 %v3039_v33, %v5715_v12 }
 0x421   : > { %3321 = vmatmul.bf16.gmra.mxu0 %v5339_v55  ;;  %3439 = vmatmul.bf16.gmra.mxu2 %v5538_v26  ;;  %v3156_v13 = vadd.f32 %v3155_v1, %v3097_v15 }
 0x423   : > { %v3162_v63 = vpop.f32.mrf.mxu1 }
 0x424   : > { %v3214_v44 = vpop.f32.mrf.mxu2  ;;  %3267 = vmatmul.bf16.gmra.mxu3 %v5913_v56 }
 0x425   : > { %v3215_v18 = vadd.f32 %v3214_v44, %v3156_v13  ;;  %v4670_v44 = vld [vmem:[%s5891_s8] sm:$0x7] }
 0x426   : > { %v3098_v7 = vpop.f32.mrf.mxu0 }
 0x427   : > { %3507 = vst [vmem:[%s5634_s17 + $0x128] sm:$0xff] %v3215_v18  ;;  %v3099_v19 = vadd.f32 %v3098_v7, %v3040_v54  ;;  %v3042_v31 = vpop.f32.mrf.mxu3 }
 0x428   : > { %v3043_v55 = vadd.f32 %v3042_v31, %v5715_v12 }
 0x429   : > { %v3158_v48 = vadd.f32 %v3157_v16, %v3099_v19 }
 0x42b   : > { %v3165_v0 = vpop.f32.mrf.mxu1 }
 0x42c   : > { %v3216_v39 = vpop.f32.mrf.mxu2 }
 0x42d   : > { %v3217_v26 = vadd.f32 %v3216_v39, %v3158_v48 }
 0x42e   : > { %v3101_v47 = vpop.f32.mrf.mxu0  ;;  %3390 = vmatmul.bf16.gmra.mxu1 %v5551_v60 }
 0x42f   : > { %3510 = vst [vmem:[%s5634_s17 + $0x140] sm:$0xff] %v3217_v26  ;;  %v3102_v4 = vadd.f32 %v3101_v47, %v3043_v55  ;;  %v3044_v56 = vpop.f32.mrf.mxu3 }
 0x430   : > { %v3045_v32 = vadd.f32 %v3044_v56, %v5715_v12 }
 0x431   : > { %3326 = vmatmul.bf16.gmra.mxu0 %v5357_v43  ;;  %3444 = vmatmul.bf16.gmra.mxu2 %v5557_v30  ;;  %v3161_v35 = vadd.f32 %v3160_v50, %v3102_v4 }
 0x433   : > { %v3167_v36 = vpop.f32.mrf.mxu1 }
 0x434   : > { %v3219_v52 = vpop.f32.mrf.mxu2  ;;  %3272 = vmatmul.bf16.gmra.mxu3 %v5914_v22 }
 0x435   : > { %v3220_v23 = vadd.f32 %v3219_v52, %v3161_v35 }
 0x436   : > { %v3103_v1 = vpop.f32.mrf.mxu0 }
 0x437   : > { %3513 = vst [vmem:[%s5634_s17 + $0x158] sm:$0xff] %v3220_v23  ;;  %v3104_v53 = vadd.f32 %v3103_v1, %v3045_v32  ;;  %v3047_v60 = vpop.f32.mrf.mxu3 }
 0x438   : > { %v3048_v43 = vadd.f32 %v3047_v60, %v5715_v12 }
 0x439   : > { %v3163_v10 = vadd.f32 %v3162_v63, %v3104_v53 }
 0x43b   : > { %v3170_v17 = vpop.f32.mrf.mxu1 }
 0x43c   : > { %v3221_v2 = vpop.f32.mrf.mxu2 }
 0x43d   : > { %v3222_v30 = vadd.f32 %v3221_v2, %v3163_v10 }
 0x43e   : > { %v3106_v57 = vpop.f32.mrf.mxu0  ;;  %3395 = vmatmul.bf16.gmra.mxu1 %v5570_v5 }
 0x43f   : > { %3516 = vst [vmem:[%s5634_s17 + $0x170] sm:$0xff] %v3222_v30  ;;  %v3107_v40 = vadd.f32 %v3106_v57, %v3048_v43  ;;  %v3049_v22 = vpop.f32.mrf.mxu3 }
 0x440   : > { %v3050_v49 = vadd.f32 %v3049_v22, %v5715_v12 }
 0x441   : > { %3331 = vmatmul.bf16.gmra.mxu0 %v5915_v59  ;;  %3449 = vmatmul.bf16.gmra.mxu2 %v5916_v42  ;;  %v3166_v16 = vadd.f32 %v3165_v0, %v3107_v40 }
 0x443   : > { %v3172_v41 = vpop.f32.mrf.mxu1 }
 0x444   : > { %v3224_v61 = vpop.f32.mrf.mxu2  ;;  %3277 = vmatmul.bf16.gmra.mxu3 %v5917_v3 }
 0x445   : > { %v3225_v25 = vadd.f32 %v3224_v61, %v3166_v16 }
 0x446   : > { %v3108_v62 = vpop.f32.mrf.mxu0 }
 0x447   : > { %3519 = vst [vmem:[%s5634_s17 + $0x188] sm:$0xff] %v3225_v25  ;;  %v3109_v11 = vadd.f32 %v3108_v62, %v3050_v49  ;;  %v3052_v5 = vpop.f32.mrf.mxu3 }
 0x448   : > { %v3053_v59 = vadd.f32 %v3052_v5, %v5715_v12 }
 0x449   : > { %v3168_v6 = vadd.f32 %v3167_v36, %v3109_v11 }
 0x44b   : > { %v3361_v29 = vpop.f32.mrf.mxu1 }
 0x44c   : > { %v3226_v50 = vpop.f32.mrf.mxu2 }
 0x44d   : > { %v3227_v42 = vadd.f32 %v3226_v50, %v3168_v6 }
 0x44e   : > { %v3111_v38 = vpop.f32.mrf.mxu0  ;;  %3400 = vmatmul.bf16.gmra.mxu1 %v5588_v51 }
 0x44f   : > { %3522 = vst [vmem:[%s5634_s17 + $0x1a0] sm:$0xff] %v3227_v42  ;;  %v3112_v34 = vadd.f32 %v3111_v38, %v3053_v59  ;;  %v3054_v3 = vpop.f32.mrf.mxu3 }
 0x450   : > { %v3055_v15 = vadd.f32 %v3054_v3, %v5715_v12 }
 0x451   : > { %3336 = vmatmul.bf16.gmra.mxu0 %v5393_v58  ;;  %3454 = vmatmul.bf16.gmra.mxu2 %v5591_v21  ;;  %v3171_v8 = vadd.f32 %v3170_v17, %v3112_v34  ;;  %v5800_v58 = vperm.slane %v4670_v44, 2 }
 0x453   : > { %v3363_v14 = vpop.f32.mrf.mxu1 }
 0x454   : > { %v3229_v27 = vpop.f32.mrf.mxu2  ;;  %3282 = vmatmul.bf16.gmra.mxu3 %v5406_v45 }
 0x455   : > { %v3230_v33 = vadd.f32 %v3229_v27, %v3171_v8 }
 0x456   : > { %v3113_v63 = vpop.f32.mrf.mxu0 }
 0x457   : > { %3525 = vst [vmem:[%s5634_s17 + $0x1b8] sm:$0xff] %v3230_v33  ;;  %v3114_v13 = vadd.f32 %v3113_v63, %v3055_v15  ;;  %v3243_v51 = vpop.f32.mrf.mxu3 }
 0x458   : > { %v3244_v7 = vadd.f32 %v3243_v51, %v5800_v58 }
 0x459   : > { %v3173_v54 = vadd.f32 %v3172_v41, %v3114_v13 }
 0x45b   : > { %v3366_v21 = vpop.f32.mrf.mxu1 }
 0x45c   : > { %v3231_v18 = vpop.f32.mrf.mxu2 }
 0x45d   : > { %v3232_v45 = vadd.f32 %v3231_v18, %v3173_v54 }
 0x45e   : > { %v3302_v19 = vpop.f32.mrf.mxu0  ;;  %3405 = vmatmul.bf16.gmra.mxu1 %v5614_v28 }
 0x45f   : > { %3528 = vst [vmem:[%s5634_s17 + $0x1d0] sm:$0xff] %v3232_v45  ;;  %v3303_v12 = vadd.f32 %v3302_v19, %v3244_v7  ;;  %v3245_v31 = vpop.f32.mrf.mxu3 }
 0x460   : > { %v3246_v55 = vadd.f32 %v3245_v31, %v5800_v58 }
 0x461   : > { %3341 = vmatmul.bf16.gmra.mxu0 %v5411_v24  ;;  %3459 = vmatmul.bf16.gmra.mxu2 %v5619_v46  ;;  %v3362_v48 = vadd.f32 %v3361_v29, %v3303_v12 }
 0x463   : > { %v3368_v0 = vpop.f32.mrf.mxu1 }
 0x464   : > { %3287 = vmatmul.bf16.gmra.mxu3 %v5424_v9  ;;  %v3420_v39 = vpop.f32.mrf.mxu2 }
 0x465   : > { %v3421_v26 = vadd.f32 %v3420_v39, %v3362_v48 }
 0x466   : > { %v3304_v47 = vpop.f32.mrf.mxu0 }
 0x467   : > { %3472 = vst [vmem:[%s5634_s17 + $0x10] sm:$0xff] %v3421_v26  ;;  %v3305_v4 = vadd.f32 %v3304_v47, %v3246_v55  ;;  %v3248_v28 = vpop.f32.mrf.mxu3 }
 0x468   : > { %v3249_v24 = vadd.f32 %v3248_v28, %v5800_v58 }
 0x469   : > { %v3364_v36 = vadd.f32 %v3363_v14, %v3305_v4 }
 0x46b   : > { %v3371_v56 = vpop.f32.mrf.mxu1 }
 0x46c   : > { %v3422_v35 = vpop.f32.mrf.mxu2 }
 0x46d   : > { %v3423_v46 = vadd.f32 %v3422_v35, %v3364_v36 }
 0x46e   : > { %v3307_v52 = vpop.f32.mrf.mxu0 }
 0x46f   : > { %3475 = vst [vmem:[%s5634_s17 + $0x28] sm:$0xff] %v3423_v46  ;;  %v3308_v32 = vadd.f32 %v3307_v52, %v3249_v24  ;;  %v3250_v23 = vpop.f32.mrf.mxu3 }
 0x470   : > { %v3251_v60 = vadd.f32 %v3250_v23, %v5800_v58 }
 0x471   : > { %3346 = vmatmul.bf16.gmra.mxu0 %v5432_v37  ;;  %3464 = vmatmul.bf16.gmra.mxu2 %v5641_v20  ;;  %v3367_v1 = vadd.f32 %v3366_v21, %v3308_v32 }
 0x473   : > { %v3373_v9 = vpop.f32.mrf.mxu1 }
 0x474   : > { %v3425_v53 = vpop.f32.mrf.mxu2 }
 0x475   : > { %v3426_v17 = vadd.f32 %v3425_v53, %v3367_v1 }
 0x476   : > { %v3309_v10 = vpop.f32.mrf.mxu0 }
 0x477   : > { %3478 = vst [vmem:[%s5634_s17 + $0x40] sm:$0xff] %v3426_v17  ;;  %v3310_v2 = vadd.f32 %v3309_v10, %v3251_v60  ;;  %v3253_v43 = vpop.f32.mrf.mxu3 }
 0x478   : > { %v3254_v22 = vadd.f32 %v3253_v43, %v5800_v58 }
 0x479   : > { %v3369_v57 = vadd.f32 %v3368_v0, %v3310_v2 }
 0x47b   : > { %v3376_v30 = vpop.f32.mrf.mxu1 }
 0x47c   : > { %v3427_v40 = vpop.f32.mrf.mxu2 }
 0x47d   : > { %v3428_v37 = vadd.f32 %v3427_v40, %v3369_v57 }
 0x47e   : > { %v3312_v41 = vpop.f32.mrf.mxu0 }
 0x47f   : > { %3481 = vst [vmem:[%s5634_s17 + $0x58] sm:$0xff] %v3428_v37  ;;  %v3313_v20 = vadd.f32 %v3312_v41, %v3254_v22  ;;  %v3255_v16 = vpop.f32.mrf.mxu3 }
 0x480   : > { %v3256_v62 = vadd.f32 %v3255_v16, %v5800_v58 }
 0x481   : > { %v3372_v49 = vadd.f32 %v3371_v56, %v3313_v20 }
 0x483   : > { %v3378_v61 = vpop.f32.mrf.mxu1 }
 0x484   : > { %v3430_v25 = vpop.f32.mrf.mxu2 }
 0x485   : > { %v3431_v11 = vadd.f32 %v3430_v25, %v3372_v49 }
 0x486   : > { %v3314_v5 = vpop.f32.mrf.mxu0 }
 0x487   : > { %3484 = vst [vmem:[%s5634_s17 + $0x70] sm:$0xff] %v3431_v11  ;;  %v3315_v29 = vadd.f32 %v3314_v5, %v3256_v62  ;;  %v3258_v6 = vpop.f32.mrf.mxu3 }
 0x488   : > { %v3259_v38 = vadd.f32 %v3258_v6, %v5800_v58 }
 0x489   : > { %v3374_v50 = vadd.f32 %v3373_v9, %v3315_v29 }
 0x48b   : > { %v3381_v59 = vpop.f32.mrf.mxu1 }
 0x48c   : > { %v3432_v42 = vpop.f32.mrf.mxu2 }
 0x48d   : > { %v3433_v34 = vadd.f32 %v3432_v42, %v3374_v50 }
 0x48e   : > { %v3317_v3 = vpop.f32.mrf.mxu0 }
 0x48f   : > { %3487 = vst [vmem:[%s5634_s17 + $0x88] sm:$0xff] %v3433_v34  ;;  %v3318_v14 = vadd.f32 %v3317_v3, %v3259_v38  ;;  %v3260_v8 = vpop.f32.mrf.mxu3 }
 0x490   : > { %v3261_v33 = vadd.f32 %v3260_v8, %v5800_v58 }
 0x491   : > { %v3377_v27 = vadd.f32 %v3376_v30, %v3318_v14 }
 0x493   : > { %v3383_v13 = vpop.f32.mrf.mxu1 }
 0x494   : > { %v3435_v15 = vpop.f32.mrf.mxu2 }
 0x495   : > { %v3436_v63 = vadd.f32 %v3435_v15, %v3377_v27 }
 0x496   : > { %v3319_v51 = vpop.f32.mrf.mxu0 }
 0x497   : > { %3490 = vst [vmem:[%s5634_s17 + $0xa0] sm:$0xff] %v3436_v63  ;;  %v3320_v44 = vadd.f32 %v3319_v51, %v3261_v33  ;;  %v3263_v21 = vpop.f32.mrf.mxu3 }
 0x498   : > { %v3264_v7 = vadd.f32 %v3263_v21, %v5800_v58 }
 0x499   : > { %v3379_v54 = vadd.f32 %v3378_v61, %v3320_v44 }
 0x49b   : > { %v3386_v0 = vpop.f32.mrf.mxu1 }
 0x49c   : > { %v3437_v18 = vpop.f32.mrf.mxu2 }
 0x49d   : > { %v3438_v45 = vadd.f32 %v3437_v18, %v3379_v54 }
 0x49e   : > { %v3322_v19 = vpop.f32.mrf.mxu0 }
 0x49f   : > { %3493 = vst [vmem:[%s5634_s17 + $0xb8] sm:$0xff] %v3438_v45  ;;  %v3323_v12 = vadd.f32 %v3322_v19, %v3264_v7  ;;  %v3265_v31 = vpop.f32.mrf.mxu3 }
 0x4a0   : > { %v3266_v55 = vadd.f32 %v3265_v31, %v5800_v58 }
 0x4a1   : > { %v3382_v48 = vadd.f32 %v3381_v59, %v3323_v12 }
 0x4a3   : > { %v3388_v56 = vpop.f32.mrf.mxu1 }
 0x4a4   : > { %v3440_v39 = vpop.f32.mrf.mxu2 }
 0x4a5   : > { %v3441_v26 = vadd.f32 %v3440_v39, %v3382_v48 }
 0x4a6   : > { %v3324_v47 = vpop.f32.mrf.mxu0 }
 0x4a7   : > { %3496 = vst [vmem:[%s5634_s17 + $0xd0] sm:$0xff] %v3441_v26  ;;  %v3325_v4 = vadd.f32 %v3324_v47, %v3266_v55  ;;  %v3268_v28 = vpop.f32.mrf.mxu3 }
 0x4a8   : > { %v3269_v24 = vadd.f32 %v3268_v28, %v5800_v58 }
 0x4a9   : > { %v3384_v36 = vadd.f32 %v3383_v13, %v3325_v4 }
 0x4ab   : > { %v3391_v1 = vpop.f32.mrf.mxu1 }
 0x4ac   : > { %v3442_v35 = vpop.f32.mrf.mxu2 }
 0x4ad   : > { %v3443_v46 = vadd.f32 %v3442_v35, %v3384_v36 }
 0x4ae   : > { %v3327_v52 = vpop.f32.mrf.mxu0 }
 0x4af   : > { %3499 = vst [vmem:[%s5634_s17 + $0xe8] sm:$0xff] %v3443_v46  ;;  %v3328_v32 = vadd.f32 %v3327_v52, %v3269_v24  ;;  %v3270_v23 = vpop.f32.mrf.mxu3 }
 0x4b0   : > { %v3271_v60 = vadd.f32 %v3270_v23, %v5800_v58 }
 0x4b1   : > { %v3387_v9 = vadd.f32 %v3386_v0, %v3328_v32 }
 0x4b3   : > { %v3393_v37 = vpop.f32.mrf.mxu1 }
 0x4b4   : > { %v3445_v53 = vpop.f32.mrf.mxu2 }
 0x4b5   : > { %v3446_v17 = vadd.f32 %v3445_v53, %v3387_v9 }
 0x4b6   : > { %v3329_v10 = vpop.f32.mrf.mxu0 }
 0x4b7   : > { %3502 = vst [vmem:[%s5634_s17 + $0x100] sm:$0xff] %v3446_v17  ;;  %v3330_v2 = vadd.f32 %v3329_v10, %v3271_v60  ;;  %v3273_v43 = vpop.f32.mrf.mxu3 }
 0x4b8   : > { %v3274_v40 = vadd.f32 %v3273_v43, %v5800_v58 }
 0x4b9   : > { %v3389_v30 = vadd.f32 %v3388_v56, %v3330_v2 }
 0x4bb   : > { %v3396_v6 = vpop.f32.mrf.mxu1 }
 0x4bc   : > { %v3447_v57 = vpop.f32.mrf.mxu2 }
 0x4bd   : > { %v3448_v22 = vadd.f32 %v3447_v57, %v3389_v30 }
 0x4be   : > { %v3332_v41 = vpop.f32.mrf.mxu0 }
 0x4bf   : > { %3505 = vst [vmem:[%s5634_s17 + $0x118] sm:$0xff] %v3448_v22  ;;  %v3333_v20 = vadd.f32 %v3332_v41, %v3274_v40  ;;  %v3275_v16 = vpop.f32.mrf.mxu3 }
 0x4c0   : > { %v3276_v25 = vadd.f32 %v3275_v16, %v5800_v58 }
 0x4c1   : > { %v3392_v61 = vadd.f32 %v3391_v1, %v3333_v20 }
 0x4c3   : > { %v3398_v8 = vpop.f32.mrf.mxu1 }
 0x4c4   : > { %v3450_v49 = vpop.f32.mrf.mxu2 }
 0x4c5   : > { %v3451_v62 = vadd.f32 %v3450_v49, %v3392_v61 }
 0x4c6   : > { %v3334_v11 = vpop.f32.mrf.mxu0 }
 0x4c7   : > { %3508 = vst [vmem:[%s5634_s17 + $0x130] sm:$0xff] %v3451_v62  ;;  %v3335_v5 = vadd.f32 %v3334_v11, %v3276_v25  ;;  %v3278_v29 = vpop.f32.mrf.mxu3 }
 0x4c8   : > { %v3279_v42 = vadd.f32 %v3278_v29, %v5800_v58 }
 0x4c9   : > { %v3394_v50 = vadd.f32 %v3393_v37, %v3335_v5 }
 0x4cb   : > { %v3401_v54 = vpop.f32.mrf.mxu1 }
 0x4cc   : > { %v3452_v59 = vpop.f32.mrf.mxu2 }
 0x4cd   : > { %v3453_v38 = vadd.f32 %v3452_v59, %v3394_v50 }
 0x4ce   : > { %v3337_v34 = vpop.f32.mrf.mxu0 }
 0x4cf   : > { %3511 = vst [vmem:[%s5634_s17 + $0x148] sm:$0xff] %v3453_v38  ;;  %v3338_v3 = vadd.f32 %v3337_v34, %v3279_v42  ;;  %v3280_v14 = vpop.f32.mrf.mxu3 }
 0x4d0   : > { %v3281_v33 = vadd.f32 %v3280_v14, %v5800_v58 }
 0x4d1   : > { %v3397_v27 = vadd.f32 %v3396_v6, %v3338_v3 }
 0x4d3   : > { %v3403_v26 = vpop.f32.mrf.mxu1 }
 0x4d4   : > { %v3455_v15 = vpop.f32.mrf.mxu2 }
 0x4d5   : > { %v3456_v63 = vadd.f32 %v3455_v15, %v3397_v27 }
 0x4d6   : > { %v3339_v13 = vpop.f32.mrf.mxu0 }
 0x4d7   : > { %3514 = vst [vmem:[%s5634_s17 + $0x160] sm:$0xff] %v3456_v63  ;;  %v3340_v51 = vadd.f32 %v3339_v13, %v3281_v33  ;;  %v3283_v44 = vpop.f32.mrf.mxu3 }
 0x4d8   : > { %v3284_v7 = vadd.f32 %v3283_v44, %v5800_v58 }
 0x4d9   : > { %v3399_v21 = vadd.f32 %v3398_v8, %v3340_v51 }
 0x4db   : > { %v3406_v32 = vpop.f32.mrf.mxu1 }
 0x4dc   : > { %v3457_v18 = vpop.f32.mrf.mxu2 }
 0x4dd   : > { %v3458_v45 = vadd.f32 %v3457_v18, %v3399_v21 }
 0x4de   : > { %v3342_v19 = vpop.f32.mrf.mxu0 }
 0x4df   : > { %3517 = vst [vmem:[%s5634_s17 + $0x178] sm:$0xff] %v3458_v45  ;;  %v3343_v12 = vadd.f32 %v3342_v19, %v3284_v7  ;;  %v3285_v31 = vpop.f32.mrf.mxu3 }
 0x4e0   : > { %v3286_v39 = vadd.f32 %v3285_v31, %v5800_v58 }
 0x4e1   : > { %v3402_v0 = vadd.f32 %v3401_v54, %v3343_v12 }
 0x4e3   : > { %v3408_v2 = vpop.f32.mrf.mxu1 }
 0x4e4   : > { %v3460_v48 = vpop.f32.mrf.mxu2 }
 0x4e5   : > { %v3461_v55 = vadd.f32 %v3460_v48, %v3402_v0 }
 0x4e6   : > { %v3344_v47 = vpop.f32.mrf.mxu0 }
 0x4e7   : > { %3520 = vst [vmem:[%s5634_s17 + $0x190] sm:$0xff] %v3461_v55  ;;  %v3345_v4 = vadd.f32 %v3344_v47, %v3286_v39  ;;  %v3288_v28 = vpop.f32.mrf.mxu3 }
 0x4e8   : > { %v3289_v35 = vadd.f32 %v3288_v28, %v5800_v58 }
 0x4e9   : > { %v3404_v56 = vadd.f32 %v3403_v26, %v3345_v4 }
 0x4ec   : > { %v3462_v36 = vpop.f32.mrf.mxu2 }
 0x4ed   : > { %v3463_v24 = vadd.f32 %v3462_v36, %v3404_v56 }
 0x4ee   : > { %v3347_v46 = vpop.f32.mrf.mxu0 }
 0x4ef   : > { %3523 = vst [vmem:[%s5634_s17 + $0x1a8] sm:$0xff] %v3463_v24  ;;  %v3348_v52 = vadd.f32 %v3347_v46, %v3289_v35  ;;  %v3290_v23 = vpop.f32.mrf.mxu3 }
 0x4f0   : > { %v3291_v53 = vadd.f32 %v3290_v23, %v5800_v58 }
 0x4f1   : > { %v3407_v9 = vadd.f32 %v3406_v32, %v3348_v52 }
 0x4f4   : > { %v3465_v1 = vpop.f32.mrf.mxu2 }
 0x4f5   : > { %v3466_v60 = vadd.f32 %v3465_v1, %v3407_v9 }
 0x4f6   : > { %v3349_v17 = vpop.f32.mrf.mxu0 }
 0x4f7   : > { %3526 = vst [vmem:[%s5634_s17 + $0x1c0] sm:$0xff] %v3466_v60  ;;  %v3350_v10 = vadd.f32 %v3349_v17, %v3291_v53 }
 0x4f9   : > { %v3409_v43 = vadd.f32 %v3408_v2, %v3350_v10 }
 0x4fc   : > { %v3467_v30 = vpop.f32.mrf.mxu2 }
 0x4fd   : > { %v3468_v57 = vadd.f32 %v3467_v30, %v3409_v43 }
 0x4ff   : > { %3529 = vst [vmem:[%s5634_s17 + $0x1d8] sm:$0xff] %v3468_v57 }
 0x500   : > { %4758 = shalt.err (!%p4755_p8)
}
 0x501   : > { %s4809_s14 = smov 384   ;;  %s4810_s17 = smov 24  }
 0x502   : > { %4609 = dma.vmem_to_hbm [thread:$0]  (%p4899_p5), %s3545_s25, 7680, %s3547_s26, %s3531_s13, %s4809_s14, %s4809_s14, %s4810_s17  }
 0x503 PF: > { %p4627_p9 = scmp.ge.s32.totalorder %s4801_s12, 2  ;;  %s3561_s5 = sand.u32 1, %s4789_s30  }
 0x504   : > { %s3562_s21 = scalar_lea.sflag [#allocation4], %s3561_s5 }
 0x505   : > { %p4619_p10 = pnand %p4627_p9, %p4903_p6 }
 0x507   : > { %p4620_p11 = pneg %p4619_p10 }
 0x509   : > { %4784 = dma.done.wait (%p4620_p11), %s3562_s21, 7680  }
 0x50a   : > { %4786 = vsyncadd (%p4620_p11), %s3562_s21, 4294959616  ;;  %p21_p12 = scmp.ge.s32.totalorder %s4886_s15, 4   ;;  %s5918_s30 = smov %s4793_s10 }
 0x50b   : > { %s5919_s10 = smov %s4797_s11  ;;  %s5920_s11 = smov %s4897_s18 }
 0x50c   : > { %s5921_s12 = smov %s4886_s15  ;;  %23 = sbr.rel (!%p21_p12) target bundleno = 7 (0x7), region = 100 }
 0x511   :  { %3568 = vsyncpa [#allocation3], 1 }
 0x512   :  { %3570 = vsyncpa [#allocation3 + $0x1], 1 }
 0x513   :  { %3571 = vsyncpa [#allocation6], 1 }
 0x514   :  { %3572 = vsyncpa [#allocation4], 1 }
 0x515   :  { %3574 = vsyncpa [#allocation4 + $0x1], 1 }

</bundles_post_ra>
